<compile_context>
chip_gen: v6e
topology: v6e:2x2x1
jax: 0.10.0
libtpu: 0.0.40
codegen_flags: <defaults>
</compile_context>

<pallas_src>
import functools

import jax
import jax.numpy as jnp
from jax.experimental import pallas as pl
from jax.experimental.pallas import tpu as pltpu

_TB = 8          # batch sublane tile
_BIG_NEG = -1e9  # sentinel prediction for padded / masked documents


def _lambdarank_pairwise_kernel(i_idx_ref, j_idx_ref, si_ref, sj_ref, out_ref, *, tile):
    """Pairwise lambda accumulation for one (batch_block, tile_pair) grid step.

    i_idx_ref / j_idx_ref: SMEM (n_pairs,) int32 upper-triangular tile indices.
    si_ref / sj_ref:       (3, TB, tile) stacked [sigma*preds, gain/ideal_dcg, discount]
                           (padded/masked docs: preds = -1e9, gain = discount = 0).
    out_ref:               (TB, Lp) per-document lambda sums (resident accumulator).
    """
    p = pl.program_id(1)

    @pl.when(p == 0)
    def _init():
        out_ref[...] = jnp.zeros_like(out_ref)

    ib = i_idx_ref[p]
    jb = j_idx_ref[p]

    preds_i = si_ref[0]          # (TB, tile)  sigma already folded in
    gs_i = si_ref[1]             # gain / (ideal_dcg + eps)
    disc_i = si_ref[2]           # 1 / log2(rank + 2)
    preds_j = sj_ref[0]
    gs_j = sj_ref[1]
    disc_j = sj_ref[2]

    pd = preds_i[:, :, None] - preds_j[:, None, :]     # (TB, tile, tile)
    gd = gs_i[:, :, None] - gs_j[:, None, :]
    dd = disc_i[:, :, None] - disc_j[:, None, :]

    # |gain_diff * disc_diff| / ideal_dcg  (reciprocal folded in, single fused abs).
    delta_ndcg = jnp.abs(gd * dd)

    # Stable softplus(-z) with z = sign(gd) * pd, without ever building sign(gd):
    #   |z| == |pd|, and max(-z, 0) == |pd| iff gd and pd have opposite (nonzero)
    #   signs.  Where gd == 0 the value is irrelevant because delta_ndcg == 0 there
    #   (do not "fix" that case without re-adding the sign() chain).
    a = jnp.abs(pd)
    neg_part = jnp.where(gd * pd < 0.0, a, 0.0)
    sp = neg_part + jnp.log1p(jnp.exp(-a))             # EUP exp/log1p, free slot

    # No pairwise/diagonal mask needed: diagonal and padded/masked pairs are
    # exactly 0 by construction (delta_ndcg == 0 or sp == 0).
    lam = sp * delta_ndcg

    i_off = pl.multiple_of(ib * tile, 128)
    out_ref[:, pl.ds(i_off, tile)] += jnp.sum(lam, axis=2)      # row sums -> i rows

    @pl.when(jb > ib)
    def _col():                                                  # symmetry: lam_ji == lam_ij
        j_off = pl.multiple_of(jb * tile, 128)
        out_ref[:, pl.ds(j_off, tile)] += jnp.sum(lam, axis=1)   # col sums -> j rows


def _pad2(x, rows, cols):
    r, c = x.shape
    return jnp.pad(x, ((0, rows - r), (0, cols - c)))


@functools.partial(jax.jit, static_argnames=("sigma", "eps"))
def lambdarank_loss(preds, labels, mask=None, sigma=1.0, eps=1e-12):
    """preds, labels: (B, L, 1) or (B, L). Returns scalar float32 loss."""
    if preds.ndim == 3 and preds.shape[-1] == 1:
        preds = jnp.squeeze(preds, -1)
    if labels.ndim == 3 and labels.shape[-1] == 1:
        labels = jnp.squeeze(labels, -1)
    preds = preds.astype(jnp.float32)
    labels = labels.astype(jnp.float32)
    if mask is None:
        mask = jnp.ones_like(preds)
    mask = mask.astype(jnp.float32)

    B, L = preds.shape

    # --- hoisted O(B*L*logL) work --------------------------------------------
    ranks = jnp.argsort(jnp.argsort(-preds, axis=1), axis=1).astype(jnp.float32)
    discount = 1.0 / jnp.log2(ranks + 2.0)
    gain = jnp.exp2(labels) - 1.0
    ideal_disc = 1.0 / jnp.log2(jnp.arange(L, dtype=jnp.float32) + 2.0)
    ideal_gain = -jnp.sort(-gain, axis=1)          # == gain gathered by descending labels
    ideal_dcg = jnp.sum(ideal_gain * ideal_disc[None, :], axis=1, keepdims=True) + eps
    gain_scaled = gain / ideal_dcg                 # fold 1/ideal_dcg into gain once

    # exact denominator: sum_{i != j} m_i m_j  (no LxL mask tensor needed)
    den = jnp.sum(jnp.sum(mask, axis=1) ** 2 - jnp.sum(mask * mask, axis=1))

    # fold sigma into preds once (kernel never multiplies by sigma)
    preds_scaled = preds * float(sigma)

    # --- pad to sublane/lane-dense tiles --------------------------------------
    Bp = ((B + _TB - 1) // _TB) * _TB
    Lp = ((L + 127) // 128) * 128
    T = 256 if Lp % 256 == 0 else 128              # i/j tile (equal, for symmetry)
    try:
        # v7x has only 64 MiB physical VMEM per TC: use smaller pairwise tiles there.
        if pltpu.get_tpu_info().vmem_capacity_bytes < 96 * 1024 * 1024:
            T = 128
    except Exception:
        pass

    # Padded / masked documents: preds -> -1e9, gain/discount -> 0.  Every pair
    # touching them then contributes exactly 0 in-kernel, so no mask plane and no
    # pairwise-mask multiply are needed (3 input planes instead of 4).
    valid = _pad2(mask, Bp, Lp)
    preds_p = jnp.where(valid > 0.0, _pad2(preds_scaled, Bp, Lp), _BIG_NEG)
    gain_p = _pad2(gain_scaled, Bp, Lp) * valid
    disc_p = _pad2(discount, Bp, Lp) * valid
    stacked = jnp.stack([preds_p, gain_p, disc_p], axis=0)      # (3, Bp, Lp)

    # --- compact upper-triangular tile-pair grid -------------------------------
    nt = Lp // T
    pair_i, pair_j = [], []
    for i in range(nt):
        for j in range(i, nt):
            pair_i.append(i)
            pair_j.append(j)
    i_idx = jnp.asarray(pair_i, dtype=jnp.int32)
    j_idx = jnp.asarray(pair_j, dtype=jnp.int32)
    n_pairs = len(pair_i)

    kernel = functools.partial(_lambdarank_pairwise_kernel, tile=T)

    lambda_per_doc = pl.pallas_call(
        kernel,
        out_shape=jax.ShapeDtypeStruct((Bp, Lp), jnp.float32),
        grid_spec=pltpu.PrefetchScalarGridSpec(
            num_scalar_prefetch=2,
            grid=(Bp // _TB, n_pairs),
            in_specs=[
                pl.BlockSpec((3, _TB, T), lambda b, p, ii, jj: (0, b, ii[p])),  # i view
                pl.BlockSpec((3, _TB, T), lambda b, p, ii, jj: (0, b, jj[p])),  # j view
            ],
            out_specs=pl.BlockSpec((_TB, Lp), lambda b, p, ii, jj: (b, 0)),
        ),
        compiler_params=pltpu.CompilerParams(
            dimension_semantics=("parallel", "arbitrary"),
            vmem_limit_bytes=32 * 1024 * 1024,   # load-bearing on v5e (16 MiB default)
        ),
    )(i_idx, j_idx, stacked, stacked)

    # padded / masked output rows are exactly 0, so just sum the squares
    num = jnp.sum(lambda_per_doc * lambda_per_doc)
    return num / (den + eps)


def _reference_loss(preds, labels, sigma=1.0, eps=1e-12):
    """Pure-JAX reference mirroring the PyTorch forward (indexes=None)."""
    preds = jnp.squeeze(preds, -1).astype(jnp.float32)
    labels = jnp.squeeze(labels, -1).astype(jnp.float32)
    B, L = preds.shape
    mask = jnp.ones_like(preds)
    true_ranks = jnp.argsort(-labels, axis=1)
    ranks = jnp.argsort(jnp.argsort(-preds, axis=1), axis=1).astype(jnp.float32)
    gain = 2.0 ** labels - 1.0
    discount = 1.0 / jnp.log2(ranks + 2.0)
    ideal_discount = 1.0 / jnp.log2(jnp.arange(L, dtype=jnp.float32) + 2.0)
    pred_diff = preds[:, :, None] - preds[:, None, :]
    S_ij = jnp.sign(labels[:, :, None] - labels[:, None, :])
    gain_diff = gain[:, :, None] - gain[:, None, :]
    disc_diff = discount[:, :, None] - discount[:, None, :]
    delta_dcg = jnp.abs(gain_diff * disc_diff)
    ideal_gain = jnp.take_along_axis(gain, true_ranks, axis=1)
    ideal_dcg = jnp.sum(ideal_gain * ideal_discount[None, :], axis=1, keepdims=True) + eps
    delta_ndcg = delta_dcg / ideal_dcg[:, :, None]
    lambda_ij = jnp.log1p(jnp.exp(-sigma * S_ij * pred_diff)) * delta_ndcg
    final_mask = (mask[:, :, None] * mask[:, None, :]) * (1.0 - jnp.eye(L))[None]
    lambda_ij = lambda_ij * final_mask
    lambda_per_doc = jnp.sum(lambda_ij, axis=-1)
    return jnp.sum(lambda_per_doc ** 2) / (jnp.sum(final_mask) + eps)


if __name__ == "__main__":
    B, L = 2, 8
    key = jax.random.PRNGKey(0)
    kp, kl = jax.random.split(key)
    preds = jax.random.normal(kp, (B, L, 1), dtype=jnp.float32)
    labels = jax.random.randint(kl, (B, L, 1), 0, 5).astype(jnp.float32)

    loss = jax.block_until_ready(lambdarank_loss(preds, labels))
    ref = jax.block_until_ready(_reference_loss(preds, labels))
    assert jnp.allclose(loss, ref, rtol=1e-4, atol=1e-6), (loss, ref)
    print("KERNEL_OK")
</pallas_src>

<mosaic_0001>
module attributes {stable_mosaic.version = 11 : i64} {
  func.func @_lambdarank_pairwise_kernel(%arg0: i32, %arg1: i32, %arg2: memref<1xi32, #tpu.memory_space<smem>>, %arg3: memref<1xi32, #tpu.memory_space<smem>>, %arg4: memref<3x8x128xf32, #tpu.memory_space<vmem>>, %arg5: memref<3x8x128xf32, #tpu.memory_space<vmem>>, %arg6: memref<8x128xf32, #tpu.memory_space<vmem>>) attributes {dimension_semantics = [#tpu.dimension_semantics<parallel>, #tpu.dimension_semantics<arbitrary>], iteration_bounds = array<i64: 1, 1>, scalar_prefetch = 2 : i64, scratch_operands = 0 : i64, tpu.core_type = #tpu.core_type<tc>, window_params = [{transform_indices = @transform_0, window_bounds = array<i64: 3, 8, 128>}, {transform_indices = @transform_1, window_bounds = array<i64: 3, 8, 128>}, {transform_indices = @transform_2, window_bounds = array<i64: 8, 128>}]} {
    %c0_i32 = arith.constant 0 : i32
    %0 = arith.cmpi eq, %arg1, %c0_i32 : i32
    %1 = arith.extui %0 : i1 to i32
    %c0_i32_0 = arith.constant 0 : i32
    %2 = arith.cmpi ne, %1, %c0_i32_0 : i32
    scf.if %2 {
      %cst_22 = arith.constant 0.000000e+00 : f32
      %59 = vector.broadcast %cst_22 : f32 to vector<8x128xf32>
      %c0_23 = arith.constant 0 : index
      %c0_24 = arith.constant 0 : index
      %60 = vector.load %arg6[%c0_23, %c0_24] : memref<8x128xf32, #tpu.memory_space<vmem>>, vector<8x128xf32>
      tpu.vector_store %arg6[%c0_23, %c0_24], %59 {strides = array<i32>} : memref<8x128xf32, #tpu.memory_space<vmem>>, vector<8x128xf32>,
    } else {
    }
    %3 = arith.index_cast %arg1 : i32 to index
    %4 = memref.load %arg2[%3] : memref<1xi32, #tpu.memory_space<smem>>
    %5 = arith.index_cast %arg1 : i32 to index
    %6 = memref.load %arg3[%5] : memref<1xi32, #tpu.memory_space<smem>>
    %c0 = arith.constant 0 : index
    %c0_1 = arith.constant 0 : index
    %c0_2 = arith.constant 0 : index
    %7 = vector.load %arg4[%c0, %c0_1, %c0_2] : memref<3x8x128xf32, #tpu.memory_space<vmem>>, vector<1x8x128xf32>
    %8 = vector.shape_cast %7 : vector<1x8x128xf32> to vector<8x128xf32>
    %c1 = arith.constant 1 : index
    %c0_3 = arith.constant 0 : index
    %c0_4 = arith.constant 0 : index
    %9 = vector.load %arg4[%c1, %c0_3, %c0_4] : memref<3x8x128xf32, #tpu.memory_space<vmem>>, vector<1x8x128xf32>
    %10 = vector.shape_cast %9 : vector<1x8x128xf32> to vector<8x128xf32>
    %c2 = arith.constant 2 : index
    %c0_5 = arith.constant 0 : index
    %c0_6 = arith.constant 0 : index
    %11 = vector.load %arg4[%c2, %c0_5, %c0_6] : memref<3x8x128xf32, #tpu.memory_space<vmem>>, vector<1x8x128xf32>
    %12 = vector.shape_cast %11 : vector<1x8x128xf32> to vector<8x128xf32>
    %c0_7 = arith.constant 0 : index
    %c0_8 = arith.constant 0 : index
    %c0_9 = arith.constant 0 : index
    %13 = vector.load %arg5[%c0_7, %c0_8, %c0_9] : memref<3x8x128xf32, #tpu.memory_space<vmem>>, vector<1x8x128xf32>
    %14 = vector.shape_cast %13 : vector<1x8x128xf32> to vector<8x128xf32>
    %c1_10 = arith.constant 1 : index
    %c0_11 = arith.constant 0 : index
    %c0_12 = arith.constant 0 : index
    %15 = vector.load %arg5[%c1_10, %c0_11, %c0_12] : memref<3x8x128xf32, #tpu.memory_space<vmem>>, vector<1x8x128xf32>
    %16 = vector.shape_cast %15 : vector<1x8x128xf32> to vector<8x128xf32>
    %c2_13 = arith.constant 2 : index
    %c0_14 = arith.constant 0 : index
    %c0_15 = arith.constant 0 : index
    %17 = vector.load %arg5[%c2_13, %c0_14, %c0_15] : memref<3x8x128xf32, #tpu.memory_space<vmem>>, vector<1x8x128xf32>
    %18 = vector.shape_cast %17 : vector<1x8x128xf32> to vector<8x128xf32>
    %19 = vector.shape_cast %8 : vector<8x128xf32> to vector<8x128x1xf32>
    %20 = vector.shape_cast %14 : vector<8x128xf32> to vector<8x1x128xf32>
    %21 = vector.broadcast %19 : vector<8x128x1xf32> to vector<8x128x128xf32>
    %22 = vector.broadcast %20 : vector<8x1x128xf32> to vector<8x128x128xf32>
    %23 = arith.subf %21, %22 : vector<8x128x128xf32>
    %24 = vector.shape_cast %10 : vector<8x128xf32> to vector<8x128x1xf32>
    %25 = vector.shape_cast %16 : vector<8x128xf32> to vector<8x1x128xf32>
    %26 = vector.broadcast %24 : vector<8x128x1xf32> to vector<8x128x128xf32>
    %27 = vector.broadcast %25 : vector<8x1x128xf32> to vector<8x128x128xf32>
    %28 = arith.subf %26, %27 : vector<8x128x128xf32>
    %29 = vector.shape_cast %12 : vector<8x128xf32> to vector<8x128x1xf32>
    %30 = vector.shape_cast %18 : vector<8x128xf32> to vector<8x1x128xf32>
    %31 = vector.broadcast %29 : vector<8x128x1xf32> to vector<8x128x128xf32>
    %32 = vector.broadcast %30 : vector<8x1x128xf32> to vector<8x128x128xf32>
    %33 = arith.subf %31, %32 : vector<8x128x128xf32>
    %34 = arith.mulf %28, %33 : vector<8x128x128xf32>
    %35 = math.absf %34 : vector<8x128x128xf32>
    %36 = math.absf %23 : vector<8x128x128xf32>
    %37 = arith.mulf %28, %23 : vector<8x128x128xf32>
    %cst = arith.constant 0.000000e+00 : f32
    %38 = vector.broadcast %cst : f32 to vector<8x128x128xf32>
    %39 = arith.cmpf olt, %37, %38 : vector<8x128x128xf32>
    %cst_16 = arith.constant 0.000000e+00 : f32
    %40 = vector.broadcast %cst_16 : f32 to vector<8x128x128xf32>
    %41 = arith.select %39, %36, %40 : vector<8x128x128xi1>, vector<8x128x128xf32>
    %cst_17 = arith.constant 0.000000e+00 : f32
    %42 = vector.broadcast %cst_17 : f32 to vector<8x128x128xf32>
    %43 = arith.subf %42, %36 : vector<8x128x128xf32>
    %44 = math.exp %43 : vector<8x128x128xf32>
    %45 = math.log1p %44 : vector<8x128x128xf32>
    %46 = arith.addf %41, %45 : vector<8x128x128xf32>
    %47 = arith.mulf %46, %35 : vector<8x128x128xf32>
    %c128_i32 = arith.constant 128 : i32
    %48 = arith.muli %4, %c128_i32 : i32
    %49 = tpu.assume_multiple %48, 128 : i32
    %c0_18 = arith.constant 0 : index
    %50 = arith.index_cast %49 : i32 to index
    %51 = vector.load %arg6[%c0_18, %50] : memref<8x128xf32, #tpu.memory_space<vmem>>, vector<8x128xf32>
    %cst_19 = arith.constant dense<0.000000e+00> : vector<8x128xf32>
    %52 = vector.multi_reduction <add>, %47, %cst_19 [2] : vector<8x128x128xf32> to vector<8x128xf32>
    %53 = arith.addf %51, %52 : vector<8x128xf32>
    %c0_20 = arith.constant 0 : index
    %54 = arith.index_cast %49 : i32 to index
    %55 = vector.load %arg6[%c0_20, %54] : memref<8x128xf32, #tpu.memory_space<vmem>>, vector<8x128xf32>
    tpu.vector_store %arg6[%c0_20, %54], %53 {strides = array<i32>} : memref<8x128xf32, #tpu.memory_space<vmem>>, vector<8x128xf32>,
    %56 = arith.cmpi sgt, %6, %4 : i32
    %57 = arith.extui %56 : i1 to i32
    %c0_i32_21 = arith.constant 0 : i32
    %58 = arith.cmpi ne, %57, %c0_i32_21 : i32
    scf.if %58 {
      %c128_i32_22 = arith.constant 128 : i32
      %59 = arith.muli %6, %c128_i32_22 : i32
      %60 = tpu.assume_multiple %59, 128 : i32
      %c0_23 = arith.constant 0 : index
      %61 = arith.index_cast %60 : i32 to index
      %62 = vector.load %arg6[%c0_23, %61] : memref<8x128xf32, #tpu.memory_space<vmem>>, vector<8x128xf32>
      %cst_24 = arith.constant dense<0.000000e+00> : vector<8x128xf32>
      %63 = vector.multi_reduction <add>, %47, %cst_24 [1] : vector<8x128x128xf32> to vector<8x128xf32>
      %64 = arith.addf %62, %63 : vector<8x128xf32>
      %c0_25 = arith.constant 0 : index
      %65 = arith.index_cast %60 : i32 to index
      %66 = vector.load %arg6[%c0_25, %65] : memref<8x128xf32, #tpu.memory_space<vmem>>, vector<8x128xf32>
      tpu.vector_store %arg6[%c0_25, %65], %64 {strides = array<i32>} : memref<8x128xf32, #tpu.memory_space<vmem>>, vector<8x128xf32>,
    } else {
    }
    return
  }
  func.func @transform_0(%arg0: i32, %arg1: i32, %arg2: memref<1xi32, #tpu.memory_space<smem>>, %arg3: memref<1xi32, #tpu.memory_space<smem>>) -> (i32, i32, i32) {
    %0 = arith.index_cast %arg1 : i32 to index
    %1 = memref.load %arg2[%0] : memref<1xi32, #tpu.memory_space<smem>>
    %c0_i32 = arith.constant 0 : i32
    %c0_i32_0 = arith.constant 0 : i32
    return %c0_i32, %arg0, %1 : i32, i32, i32
  }
  func.func @transform_1(%arg0: i32, %arg1: i32, %arg2: memref<1xi32, #tpu.memory_space<smem>>, %arg3: memref<1xi32, #tpu.memory_space<smem>>) -> (i32, i32, i32) {
    %0 = arith.index_cast %arg1 : i32 to index
    %1 = memref.load %arg3[%0] : memref<1xi32, #tpu.memory_space<smem>>
    %c0_i32 = arith.constant 0 : i32
    %c0_i32_0 = arith.constant 0 : i32
    return %c0_i32, %arg0, %1 : i32, i32, i32
  }
  func.func @transform_2(%arg0: i32, %arg1: i32, %arg2: memref<1xi32, #tpu.memory_space<smem>>, %arg3: memref<1xi32, #tpu.memory_space<smem>>) -> (i32, i32) {
    %c0_i32 = arith.constant 0 : i32
    %c0_i32_0 = arith.constant 0 : i32
    return %arg0, %c0_i32 : i32, i32
  }
}

</mosaic_0001>

<bundles_post_ra>
// kernel: neg.4
= control target key start
LH: loop header
LB: loop body
LE: loop exit
PB: predicated region body
PF: predicated region fallthrough
CT: control target
= control target key end

     0   :  { %s24_s0 = inlined_call_operand.vmem [shape: f32[2,8], index: 0, kind: input, shape index: {}]   ;;  %s25_s1 = inlined_call_operand.vmem [shape: f32[2,8], index: 1, kind: output, shape index: {}]  }
   0x1   :  { %v2_v0 = vld [vmem:[%s24_s0] sm:$0xff] }
   0x2   :  { %v5_v1 = vxor.u32 2147483648, %v2_v0 }
   0x4   :  { %7 = vst [vmem:[%s25_s1] sm:$0xff] %v5_v1 }

// kernel: lambdarank_loss.1
= control target key start
LH: loop header
LB: loop body
LE: loop exit
PB: predicated region body
PF: predicated region fallthrough
CT: control target
= control target key end

     0   :  { %v14617_v0 = vlaneseq  ;;  %s14612_s0 = inlined_call_operand.<no memory space> [shape: s32[1], index: 0, kind: input, shape index: {}, may-alias: {0,1}]   ;;  %s14613_s2 = inlined_call_operand.vmem [shape: f32[3,8,128], index: 2, kind: input, shape index: {}, may-alias: {2,3}]   ;;  %s14614_s1 = inlined_call_operand.<no memory space> [shape: s32[1], index: 1, kind: input, shape index: {}, may-alias: {0,1}]   ;;  %s14615_s3 = inlined_call_operand.vmem [shape: f32[3,8,128], index: 3, kind: input, shape index: {}, may-alias: {2,3}]   ;;  %s14616_s4 = inlined_call_operand.vmem [shape: f32[8,128], index: 4, kind: output, shape index: {}]  }
   0x1   :  { %p38_p0 = scmp.lt.s32.totalorder %s14612_s0, 0  ;;  %p44_p1 = scmp.lt.s32.totalorder %s14614_s1, 0 }
   0x2   :  { %v6736_v1 = vshrl.u32 %v14617_v0, 7  ;;  %s6177_s9 = sshll.u32 %s14612_s0, 7  ;;  %p6178_p2 = scmp.le.s32.totalorder %s14614_s1, %s14612_s0 }
   0x3   :  { %s39_s19 = scalar_select %p38_p0, %s14612_s0, 0 }
   0x4   :  { %15535 = vst [vmem:[#allocation5_spill] sm:$0xff] %v6736_v1  ;;  %v6742_v2 = vsub.s32 0, %v6736_v1  ;;  %v6755_v5 = vsub.s32 1, %v6736_v1  ;;  %v6760_v7 = vsub.s32 2, %v6736_v1  ;;  %v6765_v9 = vsub.s32 3, %v6736_v1  ;;  %s45_s27 = scalar_select %p44_p1, %s14614_s1, 0 }
   0x5   :  { %s6171_s20 = sshll.u32 %s39_s19, 3  ;;  %v6778_v15 = vsub.s32 4, %v6736_v1  ;;  %v6815_v33 = vsub.s32 5, %v6736_v1  ;;  %v6852_v51 = vsub.s32 6, %v6736_v1  ;;  %s4889_s10 = sshra.s32 %s6177_s9, 7 }
   0x6   :  { %s6747_s23 = scalar_lea.vmem %s14613_s2, %s6171_s20  ;;  %15536 = vst [vmem:[#allocation6_spill] sm:$0xff] %v6755_v5  ;;  %15537 = vst [vmem:[#allocation7_spill] sm:$0xff] %v6760_v7  ;;  %s6172_s28 = sshll.u32 %s45_s27, 3 }
   0x7   :  { %v6750_v3 = vld [vmem:[%s6747_s23] sm:$0xff]  ;;  %15538 = vst [vmem:[#allocation8_spill] sm:$0xff] %v6765_v9  ;;  %15539 = vst [vmem:[#allocation9_spill] sm:$0xff] %v6778_v15  ;;  %s6904_s5 = scalar_lea.vmem %s14615_s3, %s6172_s28  ;;  %s4891_s13 = scalar_lea.vmem %s14616_s4, %s4889_s10 }
   0x8   :  { %v69_v4 = vrot.slane %v6750_v3, %v6742_v2  ;;  %v136_v6 = vrot.slane %v6750_v3, %v6755_v5  ;;  %v203_v8 = vrot.slane %v6750_v3, %v6760_v7  ;;  %v270_v10 = vrot.slane %v6750_v3, %v6765_v9  ;;  %15540 = vst [vmem:[#allocation10_spill] sm:$0xff] %v6815_v33  ;;  %s6179_s19 = sshll.u32 (!%p6178_p2), %s14614_s1, 7 }
   0x9   :  { %v337_v18 = vrot.slane %v6750_v3, %v6778_v15  ;;  %v404_v36 = vrot.slane %v6750_v3, %v6815_v33  ;;  %15541 = vst [vmem:[#allocation11_spill] sm:$0xff] %v6852_v51  ;;  %v471_v54 = vrot.slane %v6750_v3, %v6852_v51  ;;  %v6895_v51 = vsub.s32 7, %v6736_v1  ;;  %s5963_s20 = sshra.s32 (!%p6178_p2), %s6179_s19, 7 }
   0xa   :  { %79 = vbcast.lane.b32.xlu1 %v69_v4, 272  ;;  %71 = vbcast.lane.b32.xlu0 %v69_v4, 256  ;;  %s5965_s22 = scalar_lea.vmem (!%p6178_p2), %s14616_s4, %s5963_s20 }
   0xb   :  { %15549 = vst [vmem:[#allocation19_spill] sm:$0xff] %v6895_v51 }
   0xe   :  { %83 = vbcast.lane.b32.xlu1 %v69_v4, 280  ;;  %75 = vbcast.lane.b32.xlu0 %v69_v4, 264 }
  0x12   :  { %91 = vbcast.lane.b32.xlu1 %v69_v4, 296  ;;  %87 = vbcast.lane.b32.xlu0 %v69_v4, 288 }
  0x16   :  { %99 = vbcast.lane.b32.xlu1 %v69_v4, 312  ;;  %95 = vbcast.lane.b32.xlu0 %v69_v4, 304 }
  0x1a   :  { %107 = vbcast.lane.b32.xlu1 %v69_v4, 328  ;;  %103 = vbcast.lane.b32.xlu0 %v69_v4, 320 }
  0x1e   :  { %115 = vbcast.lane.b32.xlu1 %v69_v4, 344  ;;  %111 = vbcast.lane.b32.xlu0 %v69_v4, 336 }
  0x22   :  { %123 = vbcast.lane.b32.xlu1 %v69_v4, 360  ;;  %119 = vbcast.lane.b32.xlu0 %v69_v4, 352 }
  0x26   :  { %131 = vbcast.lane.b32.xlu1 %v69_v4, 376  ;;  %127 = vbcast.lane.b32.xlu0 %v69_v4, 368 }
  0x2a   :  { %142 = vbcast.lane.b32.xlu1 %v136_v6, 264  ;;  %138 = vbcast.lane.b32.xlu0 %v136_v6, 256 }
  0x2e   :  { %150 = vbcast.lane.b32.xlu1 %v136_v6, 280  ;;  %146 = vbcast.lane.b32.xlu0 %v136_v6, 272 }
  0x32   :  { %158 = vbcast.lane.b32.xlu1 %v136_v6, 296  ;;  %154 = vbcast.lane.b32.xlu0 %v136_v6, 288 }
  0x36   :  { %166 = vbcast.lane.b32.xlu1 %v136_v6, 312  ;;  %162 = vbcast.lane.b32.xlu0 %v136_v6, 304 }
  0x3a   :  { %174 = vbcast.lane.b32.xlu1 %v136_v6, 328  ;;  %170 = vbcast.lane.b32.xlu0 %v136_v6, 320 }
  0x3e   :  { %182 = vbcast.lane.b32.xlu1 %v136_v6, 344  ;;  %178 = vbcast.lane.b32.xlu0 %v136_v6, 336 }
  0x42   :  { %190 = vbcast.lane.b32.xlu1 %v136_v6, 360  ;;  %186 = vbcast.lane.b32.xlu0 %v136_v6, 352 }
  0x46   :  { %198 = vbcast.lane.b32.xlu1 %v136_v6, 376  ;;  %194 = vbcast.lane.b32.xlu0 %v136_v6, 368 }
  0x4a   :  { %209 = vbcast.lane.b32.xlu1 %v203_v8, 264  ;;  %205 = vbcast.lane.b32.xlu0 %v203_v8, 256 }
  0x4e   :  { %217 = vbcast.lane.b32.xlu1 %v203_v8, 280  ;;  %213 = vbcast.lane.b32.xlu0 %v203_v8, 272 }
  0x52   :  { %225 = vbcast.lane.b32.xlu1 %v203_v8, 296  ;;  %221 = vbcast.lane.b32.xlu0 %v203_v8, 288 }
  0x56   :  { %233 = vbcast.lane.b32.xlu1 %v203_v8, 312  ;;  %229 = vbcast.lane.b32.xlu0 %v203_v8, 304 }
  0x5a   :  { %241 = vbcast.lane.b32.xlu1 %v203_v8, 328  ;;  %237 = vbcast.lane.b32.xlu0 %v203_v8, 320 }
  0x5e   :  { %249 = vbcast.lane.b32.xlu1 %v203_v8, 344  ;;  %245 = vbcast.lane.b32.xlu0 %v203_v8, 336 }
  0x62   :  { %257 = vbcast.lane.b32.xlu1 %v203_v8, 360  ;;  %253 = vbcast.lane.b32.xlu0 %v203_v8, 352 }
  0x66   :  { %265 = vbcast.lane.b32.xlu1 %v203_v8, 376  ;;  %261 = vbcast.lane.b32.xlu0 %v203_v8, 368 }
  0x6a   :  { %276 = vbcast.lane.b32.xlu1 %v270_v10, 264  ;;  %272 = vbcast.lane.b32.xlu0 %v270_v10, 256 }
  0x6e   :  { %284 = vbcast.lane.b32.xlu1 %v270_v10, 280  ;;  %280 = vbcast.lane.b32.xlu0 %v270_v10, 272 }
  0x72   :  { %292 = vbcast.lane.b32.xlu1 %v270_v10, 296  ;;  %288 = vbcast.lane.b32.xlu0 %v270_v10, 288 }
  0x76   :  { %300 = vbcast.lane.b32.xlu1 %v270_v10, 312  ;;  %296 = vbcast.lane.b32.xlu0 %v270_v10, 304 }
  0x7a   :  { %308 = vbcast.lane.b32.xlu1 %v270_v10, 328  ;;  %304 = vbcast.lane.b32.xlu0 %v270_v10, 320 }
  0x7c   :  { %v6769_v11 = vpop.permute.xlu1 %79  ;;  %v6771_v12 = vpop.permute.xlu0 %71 }
  0x7e   :  { %316 = vbcast.lane.b32.xlu1 %v270_v10, 344  ;;  %312 = vbcast.lane.b32.xlu0 %v270_v10, 336 }
  0x80   :  { %v6773_v13 = vpop.permute.xlu1 %83  ;;  %v6775_v14 = vpop.permute.xlu0 %75 }
  0x82   :  { %324 = vbcast.lane.b32.xlu1 %v270_v10, 360  ;;  %320 = vbcast.lane.b32.xlu0 %v270_v10, 352 }
  0x84   :  { %v6780_v16 = vpop.permute.xlu1 %91  ;;  %v6782_v17 = vpop.permute.xlu0 %87 }
  0x86   :  { %332 = vbcast.lane.b32.xlu1 %v270_v10, 376  ;;  %328 = vbcast.lane.b32.xlu0 %v270_v10, 368  ;;  %v6705_v10 = vmov 1966171168  }
  0x88   :  { %v6786_v19 = vpop.permute.xlu1 %99  ;;  %v6788_v20 = vpop.permute.xlu0 %95 }
  0x8a   :  { %343 = vbcast.lane.b32.xlu1 %v337_v18, 264  ;;  %339 = vbcast.lane.b32.xlu0 %v337_v18, 256 }
  0x8c   :  { %v6790_v21 = vpop.permute.xlu1 %107  ;;  %v6792_v22 = vpop.permute.xlu0 %103 }
  0x8e   :  { %351 = vbcast.lane.b32.xlu1 %v337_v18, 280  ;;  %347 = vbcast.lane.b32.xlu0 %v337_v18, 272 }
  0x90   :  { %v6794_v23 = vpop.permute.xlu1 %115  ;;  %v6796_v24 = vpop.permute.xlu0 %111 }
  0x92   :  { %359 = vbcast.lane.b32.xlu1 %v337_v18, 296  ;;  %355 = vbcast.lane.b32.xlu0 %v337_v18, 288 }
  0x94   :  { %v6798_v25 = vpop.permute.xlu1 %123  ;;  %v6800_v26 = vpop.permute.xlu0 %119 }
  0x96   :  { %367 = vbcast.lane.b32.xlu1 %v337_v18, 312  ;;  %363 = vbcast.lane.b32.xlu0 %v337_v18, 304 }
  0x98   :  { %v6802_v27 = vpop.permute.xlu1 %131  ;;  %v6804_v28 = vpop.permute.xlu0 %127 }
  0x9a   :  { %375 = vbcast.lane.b32.xlu1 %v337_v18, 328  ;;  %371 = vbcast.lane.b32.xlu0 %v337_v18, 320 }
  0x9c   :  { %v6806_v29 = vpop.permute.xlu1 %142  ;;  %v6808_v30 = vpop.permute.xlu0 %138 }
  0x9e   :  { %383 = vbcast.lane.b32.xlu1 %v337_v18, 344  ;;  %379 = vbcast.lane.b32.xlu0 %v337_v18, 336 }
  0xa0   :  { %v6810_v31 = vpop.permute.xlu1 %150  ;;  %v6812_v32 = vpop.permute.xlu0 %146 }
  0xa2   :  { %391 = vbcast.lane.b32.xlu1 %v337_v18, 360  ;;  %387 = vbcast.lane.b32.xlu0 %v337_v18, 352 }
  0xa4   :  { %v6817_v34 = vpop.permute.xlu1 %158  ;;  %v6819_v35 = vpop.permute.xlu0 %154 }
  0xa6   :  { %399 = vbcast.lane.b32.xlu1 %v337_v18, 376  ;;  %395 = vbcast.lane.b32.xlu0 %v337_v18, 368  ;;  %v605_v18 = vunpack.c.l.s4 %v6705_v10  ;;  %v538_v10 = vrot.slane %v6750_v3, %v6895_v51 }
  0xa8   :  { %v6823_v37 = vpop.permute.xlu1 %166  ;;  %v6825_v38 = vpop.permute.xlu0 %162  ;;  %v606_v33 = vunpack.c.0.s8 %v605_v18 }
  0xaa   :  { %410 = vbcast.lane.b32.xlu1 %v404_v36, 264  ;;  %406 = vbcast.lane.b32.xlu0 %v404_v36, 256 }
  0xac   :  { %v6827_v39 = vpop.permute.xlu1 %174  ;;  %v6829_v40 = vpop.permute.xlu0 %170 }
  0xae   :  { %418 = vbcast.lane.b32.xlu1 %v404_v36, 280  ;;  %414 = vbcast.lane.b32.xlu0 %v404_v36, 272 }
  0xb0   :  { %v6831_v41 = vpop.permute.xlu1 %182  ;;  %v6833_v42 = vpop.permute.xlu0 %178 }
  0xb2   :  { %426 = vbcast.lane.b32.xlu1 %v404_v36, 296  ;;  %422 = vbcast.lane.b32.xlu0 %v404_v36, 288 }
  0xb4   :  { %v6835_v43 = vpop.permute.xlu1 %190  ;;  %v6837_v44 = vpop.permute.xlu0 %186 }
  0xb6   :  { %434 = vbcast.lane.b32.xlu1 %v404_v36, 312  ;;  %430 = vbcast.lane.b32.xlu0 %v404_v36, 304 }
  0xb8   :  { %v6839_v45 = vpop.permute.xlu1 %198  ;;  %v6841_v46 = vpop.permute.xlu0 %194 }
  0xba   :  { %442 = vbcast.lane.b32.xlu1 %v404_v36, 328  ;;  %438 = vbcast.lane.b32.xlu0 %v404_v36, 320 }
  0xbc   :  { %v6843_v47 = vpop.permute.xlu1 %209  ;;  %v6845_v48 = vpop.permute.xlu0 %205 }
  0xbe   :  { %450 = vbcast.lane.b32.xlu1 %v404_v36, 344  ;;  %446 = vbcast.lane.b32.xlu0 %v404_v36, 336 }
  0xc0   :  { %v6847_v49 = vpop.permute.xlu1 %217  ;;  %v6849_v50 = vpop.permute.xlu0 %213 }
  0xc2   :  { %458 = vbcast.lane.b32.xlu1 %v404_v36, 360  ;;  %454 = vbcast.lane.b32.xlu0 %v404_v36, 352 }
  0xc4   :  { %v6854_v52 = vpop.permute.xlu1 %225  ;;  %v6856_v53 = vpop.permute.xlu0 %221 }
  0xc6   :  { %466 = vbcast.lane.b32.xlu1 %v404_v36, 376  ;;  %462 = vbcast.lane.b32.xlu0 %v404_v36, 368 }
  0xc8   :  { %v6860_v55 = vpop.permute.xlu1 %233  ;;  %v6862_v56 = vpop.permute.xlu0 %229 }
  0xca   :  { %477 = vbcast.lane.b32.xlu1 %v471_v54, 264  ;;  %473 = vbcast.lane.b32.xlu0 %v471_v54, 256 }
  0xcc   :  { %v6864_v57 = vpop.permute.xlu1 %241  ;;  %v6866_v58 = vpop.permute.xlu0 %237 }
  0xce   :  { %485 = vbcast.lane.b32.xlu1 %v471_v54, 280  ;;  %481 = vbcast.lane.b32.xlu0 %v471_v54, 272 }
  0xd0   :  { %v6868_v59 = vpop.permute.xlu1 %249  ;;  %v6870_v60 = vpop.permute.xlu0 %245 }
  0xd2   :  { %493 = vbcast.lane.b32.xlu1 %v471_v54, 296  ;;  %489 = vbcast.lane.b32.xlu0 %v471_v54, 288 }
  0xd4   :  { %v6872_v61 = vpop.permute.xlu1 %257  ;;  %v6874_v62 = vpop.permute.xlu0 %253 }
  0xd5   :  { %15542 = vst [vmem:[#allocation12_spill] sm:$0xff] %v6874_v62 }
  0xd6   :  { %501 = vbcast.lane.b32.xlu1 %v471_v54, 312  ;;  %497 = vbcast.lane.b32.xlu0 %v471_v54, 304 }
  0xd8   :  { %v6876_v63 = vpop.permute.xlu1 %265  ;;  %v6878_v4 = vpop.permute.xlu0 %261 }
  0xd9   :  { %15543 = vst [vmem:[#allocation13_spill] sm:$0xff] %v6876_v63  ;;  %15544 = vst [vmem:[#allocation14_spill] sm:$0xff] %v6878_v4 }
  0xda   :  { %509 = vbcast.lane.b32.xlu1 %v471_v54, 328  ;;  %505 = vbcast.lane.b32.xlu0 %v471_v54, 320 }
  0xdc   :  { %v6883_v6 = vpop.permute.xlu1 %276  ;;  %v6885_v8 = vpop.permute.xlu0 %272 }
  0xdd   :  { %15545 = vst [vmem:[#allocation15_spill] sm:$0xff] %v6883_v6  ;;  %15546 = vst [vmem:[#allocation16_spill] sm:$0xff] %v6885_v8 }
  0xde   :  { %517 = vbcast.lane.b32.xlu1 %v471_v54, 344  ;;  %513 = vbcast.lane.b32.xlu0 %v471_v54, 336 }
  0xe0   :  { %v6890_v36 = vpop.permute.xlu1 %284  ;;  %v6892_v0 = vpop.permute.xlu0 %280 }
  0xe1   :  { %15547 = vst [vmem:[#allocation17_spill] sm:$0xff] %v6890_v36  ;;  %15548 = vst [vmem:[#allocation18_spill] sm:$0xff] %v6892_v0  ;;  %v6909_v0 = vsub.s32 %v606_v33, %v6736_v1  ;;  %v6912_v36 = vld [vmem:[%s6904_s5] sm:$0xff] }
  0xe2   :  { %525 = vbcast.lane.b32.xlu1 %v471_v54, 360  ;;  %521 = vbcast.lane.b32.xlu0 %v471_v54, 352 }
  0xe3   :  { %15552 = vst [vmem:[#allocation22_spill] sm:$0xff] %v6909_v0 }
  0xe4   :  { %v6897_v15 = vpop.permute.xlu1 %292  ;;  %v6899_v9 = vpop.permute.xlu0 %288 }
  0xe5   :  { %15550 = vst [vmem:[#allocation20_spill] sm:$0xff] %v6897_v15  ;;  %15551 = vst [vmem:[#allocation21_spill] sm:$0xff] %v6899_v9  ;;  %v6920_v9 = vrot.slane %v6912_v36, %v6909_v0 }
  0xe6   :  { %533 = vbcast.lane.b32.xlu1 %v471_v54, 376  ;;  %529 = vbcast.lane.b32.xlu0 %v471_v54, 368 }
  0xe7   :  { %v6928_v3 = vrot.slane %v6920_v9, %v6909_v0 }
  0xe8   :  { %v6914_v18 = vpop.permute.xlu1 %300  ;;  %v6916_v15 = vpop.permute.xlu0 %296 }
  0xe9   :  { %15553 = vst [vmem:[#allocation23_spill] sm:$0xff] %v6914_v18  ;;  %15554 = vst [vmem:[#allocation24_spill] sm:$0xff] %v6916_v15  ;;  %v6936_v51 = vrot.slane %v6928_v3, %v6742_v2 }
  0xea   :  { %544 = vbcast.lane.b32.xlu1 %v538_v10, 264  ;;  %540 = vbcast.lane.b32.xlu0 %v538_v10, 256 }
  0xec   :  { %v6922_v8 = vpop.permute.xlu1 %308  ;;  %v6924_v54 = vpop.permute.xlu0 %304 }
  0xed   :  { %15555 = vst [vmem:[#allocation25_spill] sm:$0xff] %v6922_v8  ;;  %15556 = vst [vmem:[#allocation26_spill] sm:$0xff] %v6924_v54  ;;  %v6944_v54 = vsub.f32 %v6771_v12, %v6936_v51 }
  0xee   :  { %552 = vbcast.lane.b32.xlu1 %v538_v10, 280  ;;  %548 = vbcast.lane.b32.xlu0 %v538_v10, 272 }
  0xef   :  { %15561 = vst [vmem:[#allocation31_spill] sm:$0xff] %v6944_v54 }
  0xf0   :  { %v6930_v33 = vpop.permute.xlu1 %316  ;;  %v6932_v1 = vpop.permute.xlu0 %312 }
  0xf1   :  { %15557 = vst [vmem:[#allocation27_spill] sm:$0xff] %v6930_v33  ;;  %15558 = vst [vmem:[#allocation28_spill] sm:$0xff] %v6932_v1  ;;  %v6952_v1 = vsub.f32 %v6769_v11, %v6936_v51 }
  0xf2   :  { %560 = vbcast.lane.b32.xlu1 %v538_v10, 296  ;;  %556 = vbcast.lane.b32.xlu0 %v538_v10, 288 }
  0xf3   :  { %15564 = vst [vmem:[#allocation34_spill] sm:$0xff] %v6952_v1  ;;  %v14633_v12 = vand.u32 2147483647, %v6952_v1  ;;  %v6990_v1 = vsub.f32 %v6780_v16, %v6936_v51 }
  0xf4   :  { %v6938_v15 = vpop.permute.xlu1 %324  ;;  %v6940_v8 = vpop.permute.xlu0 %320 }
  0xf5   :  { %15559 = vst [vmem:[#allocation29_spill] sm:$0xff] %v6938_v15  ;;  %15560 = vst [vmem:[#allocation30_spill] sm:$0xff] %v6940_v8  ;;  %v14632_v15 = vand.u32 2147483647, %v6944_v54  ;;  %v3098_v11 = vsub.f32 0.0, %v14633_v12 }
  0xf6   :  { %568 = vbcast.lane.b32.xlu1 %v538_v10, 312  ;;  %564 = vbcast.lane.b32.xlu0 %v538_v10, 304  ;;  %15573 = vst [vmem:[#allocation43_spill] sm:$0xff] %v6990_v1 }
  0xf8   :  { %v6946_v18 = vpop.permute.xlu1 %332  ;;  %v6948_v33 = vpop.permute.xlu0 %328 }
  0xf9   :  { %15562 = vst [vmem:[#allocation32_spill] sm:$0xff] %v6946_v18  ;;  %15563 = vst [vmem:[#allocation33_spill] sm:$0xff] %v6948_v33  ;;  %v3096_v33 = vsub.f32 0.0, %v14632_v15  ;;  %v6981_v15 = vsub.f32 %v6773_v13, %v6936_v51  ;;  %v7012_v13 = vsub.f32 %v6788_v20, %v6936_v51  ;;  %v15583_v20 = vand.u32 2147483647, %v6990_v1 }
  0xfa   :  { %576 = vbcast.lane.b32.xlu1 %v538_v10, 328  ;;  %572 = vbcast.lane.b32.xlu0 %v538_v10, 320  ;;  %v603_v1 = vcombine.high %v6912_v36, %v6912_v36  ;;  %v7068_v36 = vsub.f32 %v6798_v25, %v6936_v51  ;;  %v7083_v25 = vsub.f32 %v6800_v26, %v6936_v51 }
  0xfb   :  { %v3224_v63 = vmul.f32 1.442695, %v3096_v33  ;;  %15572 = vst [vmem:[#allocation42_spill] sm:$0xff] %v6981_v15  ;;  %v3228_v33 = vmul.f32 1.442695, %v3098_v11  ;;  %v7003_v11 = vsub.f32 %v6786_v19, %v6936_v51  ;;  %15578 = vst [vmem:[#allocation48_spill] sm:$0xff] %v7012_v13 }
  0xfc   :  { %v6955_v8 = vpop.permute.xlu1 %343  ;;  %v6957_v6 = vpop.permute.xlu0 %339  ;;  %15592 = vst [vmem:[#allocation57_spill] sm:$0xff] %v7068_v36  ;;  %15596 = vst [vmem:[#allocation60_spill] sm:$0xff] %v7083_v25 }
  0xfd   :  { %15565 = vst [vmem:[#allocation35_spill] sm:$0xff] %v6955_v8  ;;  %15566 = vst [vmem:[#allocation36_spill] sm:$0xff] %v6957_v6  ;;  %v6970_v6 = vsub.f32 %v6775_v14, %v6936_v51  ;;  %v6973_v8 = vld [vmem:[%s6747_s23 + $0x8] sm:$0xff]  ;;  %6185 = vpow2.f32 %v3224_v63 }
  0xfe   :  { %584 = vbcast.lane.b32.xlu1 %v538_v10, 344  ;;  %580 = vbcast.lane.b32.xlu0 %v538_v10, 336  ;;  %v6985_v12 = vrot.slane %v6973_v8, %v6742_v2  ;;  %15577 = vst [vmem:[#allocation47_spill] sm:$0xff] %v7003_v11  ;;  %6187 = vpow2.f32 %v3228_v33 }
  0xff   :  { %15569 = vst [vmem:[#allocation39_spill] sm:$0xff] %v6970_v6  ;;  %v14636_v14 = vand.u32 2147483647, %v6970_v6  ;;  %v3101_v6 = vsub.f32 0.0, %v15583_v20  ;;  %v7047_v20 = vsub.f32 %v6794_v23, %v6936_v51  ;;  %v648_v23 = vcombine.high %v6928_v3, %v6928_v3 }
 0x100   :  { %v6962_v18 = vpop.permute.xlu1 %351  ;;  %v6964_v4 = vpop.permute.xlu0 %347 }
 0x101   :  { %15567 = vst [vmem:[#allocation37_spill] sm:$0xff] %v6962_v18  ;;  %15568 = vst [vmem:[#allocation38_spill] sm:$0xff] %v6964_v4  ;;  %v3097_v16 = vsub.f32 0.0, %v14636_v14  ;;  %v7025_v14 = vsub.f32 %v6790_v21, %v6936_v51 }
 0x102   :  { %592 = vbcast.lane.b32.xlu1 %v538_v10, 360  ;;  %588 = vbcast.lane.b32.xlu0 %v538_v10, 352  ;;  %15588 = vst [vmem:[#allocation55_spill] sm:$0xff] %v7047_v20 }
 0x103   :  { %15582 = vst [vmem:[#allocation51_spill] sm:$0xff] %v7025_v14 }
 0x104   :  { %v6975_v62 = vpop.permute.xlu1 %359  ;;  %v6977_v54 = vpop.permute.xlu0 %355 }
 0x105   :  { %15570 = vst [vmem:[#allocation40_spill] sm:$0xff] %v6975_v62  ;;  %15571 = vst [vmem:[#allocation41_spill] sm:$0xff] %v6977_v54 }
 0x106   :  { %600 = vbcast.lane.b32.xlu1 %v538_v10, 376  ;;  %596 = vbcast.lane.b32.xlu0 %v538_v10, 368  ;;  %v6999_v10 = vsub.f32 %v6782_v17, %v6936_v51  ;;  %v618_v17 = vcombine.high %v6920_v9, %v6920_v9  ;;  %v3226_v9 = vmul.f32 1.442695, %v3097_v16 }
 0x108   :  { %v6992_v62 = vpop.permute.xlu1 %367  ;;  %v6994_v54 = vpop.permute.xlu0 %363  ;;  %15576 = vst [vmem:[#allocation46_spill] sm:$0xff] %v6999_v10  ;;  %v640_v33 = vrot.slane %v618_v17, %v6909_v0  ;;  %v7053_v17 = vsub.f32 %v6796_v24, %v6936_v51  ;;  %6189 = vpow2.f32 %v3226_v9 }
 0x109   :  { %15574 = vst [vmem:[#allocation44_spill] sm:$0xff] %v6992_v62  ;;  %15575 = vst [vmem:[#allocation45_spill] sm:$0xff] %v6994_v54  ;;  %v15581_v62 = vand.u32 2147483647, %v6981_v15 }
 0x10a   :  { %829 = vbcast.lane.b32.xlu1 %v6985_v12, 264  ;;  %825 = vbcast.lane.b32.xlu0 %v6985_v12, 256  ;;  %15590 = vst [vmem:[#allocation56_spill] sm:$0xff] %v7053_v17  ;;  %v7061_v16 = vpop.eup %6185 }
 0x10b   :  { %v3099_v4 = vsub.f32 0.0, %v15581_v62  ;;  %v7035_v62 = vsub.f32 %v6792_v22, %v6936_v51 }
 0x10c   :  { %v7016_v54 = vpop.permute.xlu1 %375  ;;  %v7018_v19 = vpop.permute.xlu0 %371 }
 0x10d   :  { %15579 = vst [vmem:[#allocation49_spill] sm:$0xff] %v7016_v54  ;;  %15580 = vst [vmem:[#allocation50_spill] sm:$0xff] %v7018_v19  ;;  %v3230_v63 = vmul.f32 1.442695, %v3099_v4  ;;  %v15587_v54 = vand.u32 2147483647, %v6999_v10  ;;  %v7071_v10 = vrot.slane %v640_v33, %v6742_v2 }
 0x10e   :  { %837 = vbcast.lane.b32.xlu1 %v6985_v12, 280  ;;  %833 = vbcast.lane.b32.xlu0 %v6985_v12, 272  ;;  %15584 = vst [vmem:[#allocation52_spill] sm:$0xff] %v7035_v62  ;;  %v15589_v19 = vand.u32 2147483647, %v7003_v11 }
 0x10f   :  { %v3100_v18 = vsub.f32 0.0, %v15587_v54  ;;  %v3234_v4 = vmul.f32 1.442695, %v3101_v6  ;;  %v650_v54 = vcombine.high %v640_v33, %v640_v33  ;;  %6191 = vpow2.f32 %v3230_v63 }
 0x110   :  { %v7038_v21 = vpop.permute.xlu1 %383  ;;  %v7040_v15 = vpop.permute.xlu0 %379  ;;  %v3103_v22 = vsub.f32 0.0, %v15589_v19  ;;  %v15591_v19 = vand.u32 2147483647, %v7012_v13  ;;  %v617_v33 = vrot.slane %v603_v1, %v6909_v0  ;;  %v3480_v63 = vadd.f32 1.0, %v7061_v16 }
 0x111   :  { %15585 = vst [vmem:[#allocation53_spill] sm:$0xff] %v7038_v21  ;;  %15586 = vst [vmem:[#allocation54_spill] sm:$0xff] %v7040_v15  ;;  %v3232_v3 = vmul.f32 1.442695, %v3100_v18  ;;  %v15595_v15 = vand.u32 2147483647, %v7025_v14  ;;  %6193 = vpow2.f32 %v3234_v4  ;;  %v7089_v18 = vrot.slane %v648_v23, %v6742_v2 }
 0x112   :  { %845 = vbcast.lane.b32.xlu1 %v6985_v12, 296  ;;  %841 = vbcast.lane.b32.xlu0 %v6985_v12, 288  ;;  %v3102_v11 = vsub.f32 0.0, %v15591_v19  ;;  %v3238_v13 = vmul.f32 1.442695, %v3103_v22  ;;  %v7095_v22 = vpop.eup %6187  ;;  %v7102_v14 = vsub.f32 %v6802_v27, %v6936_v51  ;;  %v7115_v27 = vrot.slane %v617_v33, %v6909_v0 }
 0x113   :  { %v3105_v21 = vsub.f32 0.0, %v15595_v15  ;;  %v7092_v15 = vrot.slane %v650_v54, %v6742_v2  ;;  %v15597_v26 = vand.u32 2147483647, %v7035_v62  ;;  %6195 = vpow2.f32 %v3232_v3 }
 0x114   :  { %v7073_v9 = vpop.permute.xlu1 %391  ;;  %v7075_v6 = vpop.permute.xlu0 %387  ;;  %v3236_v24 = vmul.f32 1.442695, %v3102_v11  ;;  %15598 = vst [vmem:[#allocation61_spill] sm:$0xff] %v7102_v14  ;;  %v3483_v11 = vmul.f32 -0.5, %v7061_v16  ;;  %6197 = vpow2.f32 %v3238_v13  ;;  %v3498_v13 = vadd.f32 1.0, %v7095_v22 }
 0x115   :  { %15593 = vst [vmem:[#allocation58_spill] sm:$0xff] %v7073_v9  ;;  %15594 = vst [vmem:[#allocation59_spill] sm:$0xff] %v7075_v6  ;;  %v3104_v19 = vsub.f32 0.0, %v15597_v26  ;;  %v3242_v54 = vmul.f32 1.442695, %v3105_v21  ;;  %v7121_v21 = vsub.f32 %v6804_v28, %v6936_v51  ;;  %6199 = vlog2.f32 %v3480_v63 }
 0x116   :  { %853 = vbcast.lane.b32.xlu1 %v6985_v12, 312  ;;  %849 = vbcast.lane.b32.xlu0 %v6985_v12, 304  ;;  %v15601_v6 = vand.u32 2147483647, %v7047_v20  ;;  %v15602_v26 = vand.u32 2147483647, %v7053_v17  ;;  %6201 = vpow2.f32 %v3236_v24  ;;  %v7133_v28 = vsub.f32 %v6806_v29, %v7071_v10 }
 0x117   :  { %15603 = vst [vmem:[#allocation64_spill] sm:$0xff] %v7121_v21  ;;  %v3240_v3 = vmul.f32 1.442695, %v3104_v19  ;;  %v14661_v17 = vand.u32 2147483647, %v7102_v14  ;;  %v7137_v51 = vsub.f32 %v6808_v30, %v7071_v10  ;;  %v3484_v24 = vadd.f32 1.0, %v3483_v11 }
 0x118   :  { %v7104_v4 = vpop.permute.xlu1 %399  ;;  %v7106_v23 = vpop.permute.xlu0 %395  ;;  %v3107_v9 = vsub.f32 0.0, %v15601_v6  ;;  %v3106_v62 = vsub.f32 0.0, %v15602_v26  ;;  %v619_v6 = vcombine.high %v617_v33, %v617_v33  ;;  %v15604_v26 = vand.u32 2147483647, %v7068_v36  ;;  %15607 = vst [vmem:[#allocation67_spill] sm:$0xff] %v7133_v28 }
 0x119   :  { %15599 = vst [vmem:[#allocation62_spill] sm:$0xff] %v7104_v4  ;;  %15600 = vst [vmem:[#allocation63_spill] sm:$0xff] %v7106_v23  ;;  %6203 = vpow2.f32 %v3242_v54  ;;  %v15609_v33 = vand.u32 2147483647, %v7083_v25  ;;  %v3486_v30 = vand.u32 2147483647, %v7061_v16  ;;  %v7193_v29 = vsub.f32 %v6819_v35, %v7071_v10 }
 0x11a   :  { %861 = vbcast.lane.b32.xlu1 %v6985_v12, 328  ;;  %857 = vbcast.lane.b32.xlu0 %v6985_v12, 320  ;;  %v3109_v1 = vsub.f32 0.0, %v15604_v26  ;;  %v3246_v4 = vmul.f32 1.442695, %v3107_v9  ;;  %15608 = vst [vmem:[#allocation68_spill] sm:$0xff] %v7137_v51  ;;  %v7143_v26 = vrot.slane %v7115_v27, %v6742_v2  ;;  %v7149_v9 = vrot.slane %v619_v6, %v6909_v0 }
 0x11b   :  { %v3244_v19 = vmul.f32 1.442695, %v3106_v62  ;;  %v3108_v63 = vsub.f32 0.0, %v15609_v33  ;;  %6205 = vlog2.f32 %v3498_v13  ;;  %v7152_v62 = vpop.eup %6189  ;;  %v3111_v11 = vsub.f32 0.0, %v14661_v17  ;;  %15620 = vst [vmem:[#allocation78_spill] sm:$0xff] %v7193_v29 }
 0x11c   :  { %v7127_v20 = vpop.permute.xlu1 %410  ;;  %v7129_v23 = vpop.permute.xlu0 %406  ;;  %15610 = vst [vmem:[#allocation69_spill] sm:$0xff] %v7143_v26  ;;  %15611 = vst [vmem:[#allocation70_spill] sm:$0xff] %v7149_v9  ;;  %6207 = vpow2.f32 %v3240_v3  ;;  %v3250_v54 = vmul.f32 1.442695, %v3109_v1  ;;  %v3501_v25 = vmul.f32 -0.5, %v7095_v22  ;;  %v7164_v13 = vmul.f32 %v7061_v16, %v3484_v24 }
 0x11d   :  { %15605 = vst [vmem:[#allocation65_spill] sm:$0xff] %v7127_v20  ;;  %15606 = vst [vmem:[#allocation66_spill] sm:$0xff] %v7129_v23  ;;  %6209 = vpow2.f32 %v3246_v4  ;;  %v7166_v23 = vpop.eup %6191  ;;  %v3248_v1 = vmul.f32 1.442695, %v3108_v63  ;;  %v7170_v3 = vsub.f32 %v6810_v31, %v7071_v10  ;;  %v7174_v17 = vsub.f32 %v6812_v32, %v7071_v10 }
 0x11e   :  { %869 = vbcast.lane.b32.xlu1 %v6985_v12, 344  ;;  %865 = vbcast.lane.b32.xlu0 %v6985_v12, 336  ;;  %15614 = vst [vmem:[#allocation73_spill] sm:$0xff] %v7164_v13  ;;  %6211 = vpow2.f32 %v3244_v19  ;;  %v15617_v4 = vand.u32 2147483647, %v7121_v21  ;;  %v7182_v24 = vsub.f32 %v6817_v34, %v7071_v10  ;;  %v7186_v19 = vrot.slane %v7149_v9, %v6742_v2  ;;  %v7189_v63 = vpop.eup %6193 }
 0x11f   :  { %15615 = vst [vmem:[#allocation74_spill] sm:$0xff] %v7170_v3  ;;  %15616 = vst [vmem:[#allocation75_spill] sm:$0xff] %v7174_v17  ;;  %v3489_v31 = vadd.f32 1.0, %v7152_v62  ;;  %6213 = vpow2.f32 %v3250_v54  ;;  %v3254_v32 = vmul.f32 1.442695, %v3111_v11  ;;  %v3502_v34 = vadd.f32 1.0, %v3501_v25 }
 0x120   :  { %v7156_v33 = vpop.permute.xlu1 %418  ;;  %v7158_v36 = vpop.permute.xlu0 %414  ;;  %v3110_v16 = vsub.f32 0.0, %v15617_v4  ;;  %15618 = vst [vmem:[#allocation76_spill] sm:$0xff] %v7182_v24  ;;  %15619 = vst [vmem:[#allocation77_spill] sm:$0xff] %v7186_v19  ;;  %v15623_v21 = vand.u32 2147483647, %v7133_v28  ;;  %v3492_v20 = vmul.f32 -0.5, %v7152_v62  ;;  %6215 = vpow2.f32 %v3248_v1 }
 0x121   :  { %15612 = vst [vmem:[#allocation71_spill] sm:$0xff] %v7156_v33  ;;  %15613 = vst [vmem:[#allocation72_spill] sm:$0xff] %v7158_v36  ;;  %v15624_v36 = vand.u32 2147483647, %v7137_v51  ;;  %v3507_v54 = vadd.f32 1.0, %v7166_v23  ;;  %v7205_v11 = vpop.eup %6195  ;;  %v7213_v25 = vrot.slane %v6973_v8, %v6755_v5  ;;  %6217 = vlog2.f32 %v3489_v31 }
 0x122   :  { %877 = vbcast.lane.b32.xlu1 %v6985_v12, 360  ;;  %873 = vbcast.lane.b32.xlu0 %v6985_v12, 352  ;;  %v3113_v14 = vsub.f32 0.0, %v15623_v21  ;;  %vm7215_vm0 = vcmp.lt.f32.partialorder %v3486_v30, 0.0004427343  ;;  %v7219_v21 = vpop.eup %6197  ;;  %v7240_v31 = vsub.f32 %v6825_v38, %v7071_v10  ;;  %v3493_v28 = vadd.f32 1.0, %v3492_v20 }
 0x123   :  { %v3112_v33 = vsub.f32 0.0, %v15624_v36  ;;  %v15625_v36 = vmov 0  ;;  %v3252_v51 = vmul.f32 1.442695, %v3110_v16  ;;  %v3504_v35 = vand.u32 2147483647, %v7095_v22 }
 0x124   :  { %v7195_v6 = vpop.permute.xlu1 %426  ;;  %v7197_v4 = vpop.permute.xlu0 %422  ;;  %v15626_v36 = vsel %vm7215_vm0, 4294967295, %v15625_v36  ;;  %v3510_v16 = vmul.f32 -0.5, %v7166_v23  ;;  %v3258_v19 = vmul.f32 1.442695, %v3113_v14  ;;  %15632 = vst [vmem:[#allocation86_spill] sm:$0xff] %v7240_v31  ;;  %6219 = vlog2.f32 %v3507_v54 }
 0x125   :  { %15621 = vst [vmem:[#allocation79_spill] sm:$0xff] %v7195_v6  ;;  %15622 = vst [vmem:[#allocation80_spill] sm:$0xff] %v7197_v4  ;;  %v6200_v6 = vpop.eup %6199  ;;  %v7233_v4 = vmul.f32 %v7095_v22, %v3502_v34  ;;  %6221 = vpow2.f32 %v3254_v32  ;;  %v15635_v38 = vand.u32 2147483647, %v7182_v24  ;;  %vm7254_vm1 = vcmp.lt.f32.partialorder %v3504_v35, 0.0004427343 }
 0x126   :  { %885 = vbcast.lane.b32.xlu1 %v6985_v12, 376  ;;  %881 = vbcast.lane.b32.xlu0 %v6985_v12, 368  ;;  %15627 = vst [vmem:[#allocation81_spill] sm:$0xff] %v15626_v36  ;;  %v7226_v12 = vsub.f32 %v6823_v37, %v7071_v10  ;;  %v7236_v1 = vpop.eup %6201  ;;  %v3256_v37 = vmul.f32 1.442695, %v3112_v33  ;;  %6223 = vpow2.f32 %v3252_v51  ;;  %v15637_v33 = vmov 0 }
 0x127   :  { %15631 = vst [vmem:[#allocation85_spill] sm:$0xff] %v7233_v4  ;;  %v7248_v34 = vpop.eup %6203  ;;  %v3117_v14 = vsub.f32 0.0, %v15635_v38  ;;  %v7252_v20 = vmul.f32 0.6931472, %v6200_v6  ;;  %v15638_v33 = vsel %vm7254_vm1, 4294967295, %v15637_v33  ;;  %v7264_v51 = vsub.f32 %v6827_v39, %v7071_v10 }
 0x128   :  { %15628 = vst [vmem:[#allocation82_spill] sm:$0xff] %v7226_v12  ;;  %v7228_v5 = vpop.permute.xlu1 %434  ;;  %v7230_v30 = vpop.permute.xlu0 %430  ;;  %15639 = vst [vmem:[#allocation88_spill] sm:$0xff] %v15638_v33  ;;  %v15640_v54 = vand.u32 2147483647, %v7193_v29  ;;  %v3511_v35 = vadd.f32 1.0, %v3510_v16  ;;  %6225 = vpow2.f32 %v3258_v19  ;;  %v7275_v29 = vsub.f32 %v6829_v40, %v7071_v10 }
 0x129   :  { %15629 = vst [vmem:[#allocation83_spill] sm:$0xff] %v7228_v5  ;;  %15630 = vst [vmem:[#allocation84_spill] sm:$0xff] %v7230_v30  ;;  %v15633_v5 = vand.u32 2147483647, %v7170_v3  ;;  %v15634_v30 = vand.u32 2147483647, %v7174_v17  ;;  %v6206_v32 = vpop.eup %6205  ;;  %6227 = vpow2.f32 %v3256_v37  ;;  %v7283_v16 = vmul.f32 %v7152_v62, %v3493_v28 }
 0x12a   :  { %896 = vbcast.lane.b32.xlu1 %v7213_v25, 264  ;;  %892 = vbcast.lane.b32.xlu0 %v7213_v25, 256  ;;  %15636 = vst [vmem:[#allocation87_spill] sm:$0xff] %v7252_v20  ;;  %15641 = vst [vmem:[#allocation89_spill] sm:$0xff] %v7264_v51  ;;  %v7270_v38 = vpop.eup %6207  ;;  %v3266_v3 = vmul.f32 1.442695, %v3117_v14  ;;  %v7289_v40 = vsub.f32 %v6831_v41, %v7071_v10  ;;  %v7305_v41 = vmul.f32 %v7166_v23, %v3511_v35 }
 0x12b   :  { %v3115_v0 = vsub.f32 0.0, %v15633_v5  ;;  %v3114_v22 = vsub.f32 0.0, %v15634_v30  ;;  %v3495_v5 = vand.u32 2147483647, %v7152_v62  ;;  %v3116_v30 = vsub.f32 0.0, %v15640_v54  ;;  %15644 = vst [vmem:[#allocation92_spill] sm:$0xff] %v7275_v29  ;;  %v7278_v17 = vpop.eup %6209 }
 0x12c   :  { %v7266_v24 = vpop.permute.xlu1 %442  ;;  %v7268_v6 = vpop.permute.xlu0 %438  ;;  %v3516_v54 = vadd.f32 1.0, %v7205_v11  ;;  %15645 = vst [vmem:[#allocation93_spill] sm:$0xff] %v7283_v16  ;;  %15646 = vst [vmem:[#allocation94_spill] sm:$0xff] %v7289_v40  ;;  %v7295_v37 = vmul.f32 0.6931472, %v6206_v32  ;;  %v15653_v35 = vmov 0 }
 0x12d   :  { %15642 = vst [vmem:[#allocation90_spill] sm:$0xff] %v7266_v24  ;;  %15643 = vst [vmem:[#allocation91_spill] sm:$0xff] %v7268_v6  ;;  %v3262_v39 = vmul.f32 1.442695, %v3115_v0  ;;  %v3260_v26 = vmul.f32 1.442695, %v3114_v22  ;;  %v7285_v19 = vpop.eup %6211 }
 0x12e   :  { %904 = vbcast.lane.b32.xlu1 %v7213_v25, 280  ;;  %900 = vbcast.lane.b32.xlu0 %v7213_v25, 272  ;;  %15647 = vst [vmem:[#allocation95_spill] sm:$0xff] %v7295_v37  ;;  %v3264_v22 = vmul.f32 1.442695, %v3116_v30  ;;  %15649 = vst [vmem:[#allocation96_spill] sm:$0xff] %v7305_v41  ;;  %v7307_v9 = vpop.eup %6213  ;;  %v7314_v30 = vsub.f32 %v6833_v42, %v7071_v10  ;;  %6229 = vlog2.f32 %v3516_v54 }
 0x12f   :  { %v15648_v6 = vand.u32 2147483647, %v7226_v12  ;;  %v15650_v36 = vand.u32 2147483647, %v7240_v31  ;;  %6231 = vpow2.f32 %v3262_v39  ;;  %vm7322_vm2 = vcmp.lt.f32.partialorder %v3495_v5, 0.0004427343  ;;  %v7328_v42 = vpop.eup %6215 }
 0x130   :  { %v7300_v62 = vpop.permute.xlu1 %450  ;;  %v7302_v14 = vpop.permute.xlu0 %446  ;;  %15651 = vst [vmem:[#allocation97_spill] sm:$0xff] %v7314_v30  ;;  %v15654_v35 = vsel %vm7322_vm2, 4294967295, %v15653_v35  ;;  %v3519_v32 = vmul.f32 -0.5, %v7205_v11  ;;  %6233 = vpow2.f32 %v3260_v26  ;;  %v3525_v39 = vadd.f32 1.0, %v7189_v63 }
 0x131   :  { %v3119_v24 = vsub.f32 0.0, %v15648_v6  ;;  %v3118_v0 = vsub.f32 0.0, %v15650_v36  ;;  %v7318_v6 = vsub.f32 %v6835_v43, %v7071_v10  ;;  %15655 = vst [vmem:[#allocation99_spill] sm:$0xff] %v15654_v35  ;;  %v3513_v36 = vand.u32 2147483647, %v7166_v23  ;;  %v6218_v28 = vpop.eup %6217 }
 0x132   :  { %912 = vbcast.lane.b32.xlu1 %v7213_v25, 296  ;;  %908 = vbcast.lane.b32.xlu0 %v7213_v25, 288  ;;  %v7333_v43 = vsub.f32 %v6837_v44, %v7071_v10  ;;  %6235 = vpow2.f32 %v3266_v3  ;;  %v15657_v31 = vand.u32 2147483647, %v7264_v51  ;;  %v15658_v54 = vand.u32 2147483647, %v7275_v29 }
 0x133   :  { %15652 = vst [vmem:[#allocation98_spill] sm:$0xff] %v7318_v6  ;;  %v3270_v5 = vmul.f32 1.442695, %v3119_v24  ;;  %6237 = vpow2.f32 %v3264_v22  ;;  %v3268_v44 = vmul.f32 1.442695, %v3118_v0  ;;  %v6220_v24 = vpop.eup %6219  ;;  %v3520_v33 = vadd.f32 1.0, %v3519_v32 }
 0x134   :  { %15656 = vst [vmem:[#allocation100_spill] sm:$0xff] %v7333_v43  ;;  %v3121_v12 = vsub.f32 0.0, %v15657_v31  ;;  %v7338_v23 = vpop.permute.xlu1 %458  ;;  %v7340_v20 = vpop.permute.xlu0 %454  ;;  %v3120_v13 = vsub.f32 0.0, %v15658_v54  ;;  %v7352_v31 = vsub.f32 %v6839_v45, %v7071_v10  ;;  %v3528_v22 = vmul.f32 -0.5, %v7189_v63 }
 0x135   :  { %v7357_v0 = vpop.eup %6221  ;;  %v15660_v54 = vand.u32 2147483647, %v7289_v40  ;;  %v7362_v29 = vmul.f32 0.6931472, %v6218_v28  ;;  %6239 = vlog2.f32 %v3525_v39  ;;  %vm7370_vm3 = vcmp.lt.f32.partialorder %v3513_v36, 0.0004427343 }
 0x136   :  { %15659 = vst [vmem:[#allocation101_spill] sm:$0xff] %v7352_v31  ;;  %920 = vbcast.lane.b32.xlu1 %v7213_v25, 312  ;;  %916 = vbcast.lane.b32.xlu0 %v7213_v25, 304  ;;  %v7364_v51 = vpop.eup %6223  ;;  %6241 = vpow2.f32 %v3270_v5  ;;  %v3274_v45 = vmul.f32 1.442695, %v3121_v12  ;;  %v15664_v32 = vmov 0  ;;  %v7379_v39 = vsub.f32 %v6841_v46, %v7071_v10 }
 0x137   :  { %v3123_v26 = vsub.f32 0.0, %v15660_v54  ;;  %15661 = vst [vmem:[#allocation102_spill] sm:$0xff] %v7362_v29  ;;  %v15665_v32 = vsel %vm7370_vm3, 4294967295, %v15664_v32  ;;  %v3522_v40 = vand.u32 2147483647, %v7205_v11  ;;  %v7383_v12 = vpop.eup %6225  ;;  %6243 = vpow2.f32 %v3268_v44 }
 0x138   :  { %v7366_v37 = vpop.permute.xlu1 %466  ;;  %v7368_v4 = vpop.permute.xlu0 %462  ;;  %15666 = vst [vmem:[#allocation105_spill] sm:$0xff] %v15665_v32  ;;  %v3272_v54 = vmul.f32 1.442695, %v3120_v13  ;;  %v15667_v3 = vand.u32 2147483647, %v7314_v30  ;;  %15668 = vst [vmem:[#allocation106_spill] sm:$0xff] %v7379_v39  ;;  %6245 = vpow2.f32 %v3274_v45  ;;  %v7462_v32 = vsub.f32 %v6854_v52, %v7089_v18 }
 0x139   :  { %15662 = vst [vmem:[#allocation103_spill] sm:$0xff] %v7366_v37  ;;  %15663 = vst [vmem:[#allocation104_spill] sm:$0xff] %v7368_v4  ;;  %v7381_v5 = vmul.f32 0.6931472, %v6220_v24  ;;  %v15670_v36 = vand.u32 2147483647, %v7318_v6  ;;  %v7399_v24 = vmul.f32 %v7205_v11, %v3520_v33 }
 0x13a   :  { %v3122_v28 = vsub.f32 0.0, %v15667_v3  ;;  %928 = vbcast.lane.b32.xlu1 %v7213_v25, 328  ;;  %924 = vbcast.lane.b32.xlu0 %v7213_v25, 320  ;;  %v3529_v13 = vadd.f32 1.0, %v3528_v22  ;;  %v7390_v3 = vpop.eup %6227  ;;  %v3278_v30 = vmul.f32 1.442695, %v3123_v26  ;;  %6247 = vpow2.f32 %v3272_v54 }
 0x13b   :  { %15669 = vst [vmem:[#allocation107_spill] sm:$0xff] %v7381_v5  ;;  %v3125_v4 = vsub.f32 0.0, %v15670_v36  ;;  %v15671_v46 = vand.u32 2147483647, %v7333_v43  ;;  %15672 = vst [vmem:[#allocation108_spill] sm:$0xff] %v7399_v24  ;;  %v7403_v36 = vsub.f32 %v6843_v47, %v7089_v18  ;;  %v15673_v26 = vmov 0  ;;  %v6230_v45 = vpop.eup %6229 }
 0x13c   :  { %v7405_v22 = vpop.permute.xlu1 %477  ;;  %v7407_v37 = vpop.permute.xlu0 %473  ;;  %vm7409_vm4 = vcmp.lt.f32.partialorder %v3522_v40, 0.0004427343  ;;  %v3534_v44 = vadd.f32 1.0, %v7236_v1  ;;  %v3276_v11 = vmul.f32 1.442695, %v3122_v28  ;;  %v7418_v47 = vsub.f32 %v6845_v48, %v7089_v18  ;;  %15682 = vst [vmem:[#allocation114_spill] sm:$0xff] %v7462_v32 }
 0x13d   :  { %v3124_v10 = vsub.f32 0.0, %v15671_v46  ;;  %v15674_v26 = vsel %vm7409_vm4, 4294967295, %v15673_v26  ;;  %v3531_v46 = vand.u32 2147483647, %v7189_v63  ;;  %v3282_v43 = vmul.f32 1.442695, %v3125_v4  ;;  %v7431_v33 = vpop.eup %6231 }
 0x13e   :  { %15675 = vst [vmem:[#allocation109_spill] sm:$0xff] %v15674_v26  ;;  %v15676_v6 = vand.u32 2147483647, %v7352_v31  ;;  %936 = vbcast.lane.b32.xlu1 %v7213_v25, 344  ;;  %932 = vbcast.lane.b32.xlu0 %v7213_v25, 336  ;;  %v7429_v28 = vmul.f32 %v7189_v63, %v3529_v13  ;;  %6249 = vpow2.f32 %v3278_v30  ;;  %v7435_v4 = vsub.f32 %v6847_v49, %v7089_v18  ;;  %v7439_v31 = vpop.eup %6233 }
 0x13f   :  { %v3280_v48 = vmul.f32 1.442695, %v3124_v10  ;;  %v7444_v54 = vsub.f32 %v6849_v50, %v7089_v18  ;;  %6251 = vlog2.f32 %v3534_v44  ;;  %v3537_v30 = vmul.f32 -0.5, %v7236_v1  ;;  %v7451_v49 = vpop.eup %6235 }
 0x140   :  { %v3127_v40 = vsub.f32 0.0, %v15676_v6  ;;  %15677 = vst [vmem:[#allocation110_spill] sm:$0xff] %v7429_v28  ;;  %15678 = vst [vmem:[#allocation111_spill] sm:$0xff] %v7435_v4  ;;  %v649_v6 = vcombine.high %v7115_v27, %v7115_v27  ;;  %v7446_v63 = vpop.permute.xlu1 %485  ;;  %v7448_v13 = vpop.permute.xlu0 %481  ;;  %6253 = vpow2.f32 %v3276_v11  ;;  %v15680_v27 = vand.u32 2147483647, %v7379_v39 }
 0x141   :  { %15679 = vst [vmem:[#allocation112_spill] sm:$0xff] %v7444_v54  ;;  %v7456_v29 = vmul.f32 0.6931472, %v6230_v45  ;;  %v7458_v41 = vpop.eup %6237  ;;  %6255 = vpow2.f32 %v3282_v43  ;;  %vm7466_vm5 = vcmp.lt.f32.partialorder %v3531_v46, 0.0004427343  ;;  %v15683_v44 = vmov 0 }
 0x142   :  { %v3126_v10 = vsub.f32 0.0, %v15680_v27  ;;  %v3286_v50 = vmul.f32 1.442695, %v3127_v40  ;;  %944 = vbcast.lane.b32.xlu1 %v7213_v25, 360  ;;  %940 = vbcast.lane.b32.xlu0 %v7213_v25, 352  ;;  %v15684_v44 = vsel %vm7466_vm5, 4294967295, %v15683_v44  ;;  %6257 = vpow2.f32 %v3280_v48  ;;  %v6240_v52 = vpop.eup %6239 }
 0x143   :  { %15681 = vst [vmem:[#allocation113_spill] sm:$0xff] %v7456_v29  ;;  %15685 = vst [vmem:[#allocation115_spill] sm:$0xff] %v15684_v44  ;;  %v7473_v45 = vsub.f32 %v6856_v53, %v7089_v18  ;;  %v7476_v43 = vrot.slane %v649_v6, %v6742_v2  ;;  %v15687_v40 = vand.u32 2147483647, %v7403_v36  ;;  %v3538_v48 = vadd.f32 1.0, %v3537_v30  ;;  %v7486_v16 = vpop.eup %6241 }
 0x144   :  { %v7481_v46 = vpop.permute.xlu1 %493  ;;  %v7483_v39 = vpop.permute.xlu0 %489  ;;  %v3543_v11 = vadd.f32 1.0, %v7219_v21  ;;  %v3284_v53 = vmul.f32 1.442695, %v3126_v10  ;;  %v15690_v35 = vand.u32 2147483647, %v7418_v47  ;;  %6259 = vpow2.f32 %v3286_v50 }
 0x145   :  { %15686 = vst [vmem:[#allocation116_spill] sm:$0xff] %v7473_v45  ;;  %v3129_v27 = vsub.f32 0.0, %v15687_v40  ;;  %15688 = vst [vmem:[#allocation117_spill] sm:$0xff] %v7481_v46  ;;  %v3540_v5 = vand.u32 2147483647, %v7236_v1  ;;  %v7498_v30 = vsub.f32 %v6860_v55, %v7089_v18  ;;  %v7506_v10 = vpop.eup %6243  ;;  %v3546_v55 = vmul.f32 -0.5, %v7219_v21 }
 0x146   :  { %15689 = vst [vmem:[#allocation118_spill] sm:$0xff] %v7483_v39  ;;  %v3128_v6 = vsub.f32 0.0, %v15690_v35  ;;  %952 = vbcast.lane.b32.xlu1 %v7213_v25, 376  ;;  %948 = vbcast.lane.b32.xlu0 %v7213_v25, 368  ;;  %v7504_v35 = vrot.slane %v6973_v8, %v6760_v7  ;;  %v15691_v40 = vand.u32 2147483647, %v7435_v4  ;;  %v7518_v25 = vsub.f32 %v6862_v56, %v7089_v18 }
 0x147   :  { %v7511_v46 = vmul.f32 0.6931472, %v6240_v52  ;;  %v3290_v24 = vmul.f32 1.442695, %v3129_v27  ;;  %v15693_v26 = vand.u32 2147483647, %v7444_v54  ;;  %6261 = vlog2.f32 %v3543_v11 }
 0x148   :  { %v3131_v29 = vsub.f32 0.0, %v15691_v40  ;;  %v7520_v8 = vpop.permute.xlu1 %501  ;;  %v7522_v7 = vpop.permute.xlu0 %497  ;;  %v3288_v50 = vmul.f32 1.442695, %v3128_v6  ;;  %v7528_v52 = vsub.f32 %v6864_v57, %v7089_v18  ;;  %v7532_v27 = vsub.f32 %v6866_v58, %v7089_v18 }
 0x149   :  { %15692 = vst [vmem:[#allocation119_spill] sm:$0xff] %v7511_v46  ;;  %v3130_v39 = vsub.f32 0.0, %v15693_v26  ;;  %15694 = vst [vmem:[#allocation120_spill] sm:$0xff] %v7520_v8  ;;  %v7524_v40 = vpop.eup %6245  ;;  %v3552_v26 = vadd.f32 1.0, %v7270_v38  ;;  %6263 = vpow2.f32 %v3284_v53  ;;  %v15698_v8 = vand.u32 2147483647, %v7462_v32 }
 0x14a   :  { %15695 = vst [vmem:[#allocation121_spill] sm:$0xff] %v7522_v7  ;;  %15696 = vst [vmem:[#allocation122_spill] sm:$0xff] %v7528_v52  ;;  %v7535_v56 = vpop.eup %6247  ;;  %963 = vbcast.lane.b32.xlu1 %v7504_v35, 264  ;;  %959 = vbcast.lane.b32.xlu0 %v7504_v35, 256  ;;  %v7543_v57 = vmul.f32 %v7236_v1, %v3538_v48  ;;  %v3294_v6 = vmul.f32 1.442695, %v3131_v29  ;;  %6265 = vpow2.f32 %v3290_v24 }
 0x14b   :  { %15697 = vst [vmem:[#allocation123_spill] sm:$0xff] %v7532_v27  ;;  %v3133_v7 = vsub.f32 0.0, %v15698_v8  ;;  %v15700_v58 = vand.u32 2147483647, %v7473_v45  ;;  %vm7551_vm6 = vcmp.lt.f32.partialorder %v3540_v5, 0.0004427343  ;;  %v7555_v32 = vpop.eup %6249  ;;  %6267 = vlog2.f32 %v3552_v26 }
 0x14c   :  { %15699 = vst [vmem:[#allocation124_spill] sm:$0xff] %v7543_v57  ;;  %v15701_v8 = vmov 0  ;;  %v3547_v11 = vadd.f32 1.0, %v3546_v55  ;;  %15704 = vst [vmem:[#allocation126_spill] sm:$0xff] %v7555_v32  ;;  %v3292_v4 = vmul.f32 1.442695, %v3130_v39  ;;  %v7558_v29 = vpop.permute.xlu1 %509  ;;  %v7560_v48 = vpop.permute.xlu0 %505  ;;  %6269 = vpow2.f32 %v3288_v50 }
 0x14d   :  { %v3132_v54 = vsub.f32 0.0, %v15700_v58  ;;  %v15702_v8 = vsel %vm7551_vm6, 4294967295, %v15701_v8  ;;  %15705 = vst [vmem:[#allocation127_spill] sm:$0xff] %v7558_v29  ;;  %15706 = vst [vmem:[#allocation128_spill] sm:$0xff] %v7560_v48  ;;  %v3549_v58 = vand.u32 2147483647, %v7219_v21  ;;  %v6252_v45 = vpop.eup %6251  ;;  %v7572_v28 = vsub.f32 %v6868_v59, %v7089_v18 }
 0x14e   :  { %15703 = vst [vmem:[#allocation125_spill] sm:$0xff] %v15702_v8  ;;  %v3555_v55 = vmul.f32 -0.5, %v7270_v38  ;;  %v7566_v46 = vpop.eup %6253  ;;  %v3298_v39 = vmul.f32 1.442695, %v3133_v7  ;;  %v15707_v24 = vand.u32 2147483647, %v7498_v30  ;;  %6271 = vpow2.f32 %v3294_v6 }
 0x14f   :  { %15708 = vst [vmem:[#allocation129_spill] sm:$0xff] %v7572_v28  ;;  %971 = vbcast.lane.b32.xlu1 %v7504_v35, 280  ;;  %967 = vbcast.lane.b32.xlu0 %v7504_v35, 272  ;;  %v7576_v53 = vpop.eup %6255  ;;  %v3296_v26 = vmul.f32 1.442695, %v3132_v54  ;;  %v7580_v5 = vsub.f32 %v6870_v60, %v7089_v18  ;;  %v7583_v7 = vmul.f32 %v7219_v21, %v3547_v11  ;;  %6273 = vpow2.f32 %v3292_v4  ;;  %v15728_v29 = vld [vmem:[#allocation13_spill] sm:$0xff] }
 0x150   :  { %v3135_v1 = vsub.f32 0.0, %v15707_v24  ;;  %15709 = vst [vmem:[#allocation130_spill] sm:$0xff] %v7576_v53  ;;  %v7585_v50 = vpop.eup %6257  ;;  %v15713_v59 = vand.u32 2147483647, %v7518_v25  ;;  %v7589_v44 = vpop.permute.xlu1 %517  ;;  %v7593_v53 = vmul.f32 0.6931472, %v6252_v45  ;;  %6275 = vpow2.f32 %v3298_v39 }
 0x151   :  { %15710 = vst [vmem:[#allocation131_spill] sm:$0xff] %v7580_v5  ;;  %15711 = vst [vmem:[#allocation132_spill] sm:$0xff] %v7583_v7  ;;  %v7591_v32 = vpop.permute.xlu0 %513  ;;  %v3561_v54 = vadd.f32 1.0, %v7248_v34  ;;  %v15717_v60 = vand.u32 2147483647, %v7528_v52  ;;  %v3556_v48 = vadd.f32 1.0, %v3555_v55  ;;  %v7608_v45 = vpop.eup %6259  ;;  %6277 = vpow2.f32 %v3296_v26 }
 0x152   :  { %15712 = vst [vmem:[#allocation133_spill] sm:$0xff] %v7585_v50  ;;  %v3134_v24 = vsub.f32 0.0, %v15713_v59  ;;  %15714 = vst [vmem:[#allocation134_spill] sm:$0xff] %v7589_v44  ;;  %v15718_v21 = vand.u32 2147483647, %v7532_v27  ;;  %v3564_v4 = vmul.f32 -0.5, %v7248_v34  ;;  %v7631_v27 = vsub.f32 %v15728_v29, %v7089_v18 }
 0x153   :  { %15715 = vst [vmem:[#allocation135_spill] sm:$0xff] %v7591_v32  ;;  %15716 = vst [vmem:[#allocation136_spill] sm:$0xff] %v7593_v53  ;;  %v3137_v6 = vsub.f32 0.0, %v15717_v60  ;;  %v3302_v50 = vmul.f32 1.442695, %v3135_v1  ;;  %v7604_v32 = vsub.f32 %v6872_v61, %v7089_v18  ;;  %979 = vbcast.lane.b32.xlu1 %v7504_v35, 296  ;;  %6279 = vlog2.f32 %v3561_v54 }
 0x154   :  { %v3136_v11 = vsub.f32 0.0, %v15718_v21  ;;  %975 = vbcast.lane.b32.xlu0 %v7504_v35, 288  ;;  %15720 = vst [vmem:[#allocation138_spill] sm:$0xff] %v7608_v45  ;;  %v15721_v55 = vld [vmem:[#allocation12_spill] sm:$0xff]  ;;  %vm7615_vm7 = vcmp.lt.f32.partialorder %v3549_v58, 0.0004427343  ;;  %v7620_v59 = vpop.permute.xlu1 %525  ;;  %v7639_v54 = vmul.f32 %v7270_v38, %v3556_v48 }
 0x155   :  { %15719 = vst [vmem:[#allocation137_spill] sm:$0xff] %v7604_v32  ;;  %v7613_v21 = vsub.f32 %v15721_v55, %v7089_v18  ;;  %v15723_v1 = vmov 0  ;;  %v3570_v61 = vadd.f32 1.0, %v7285_v19  ;;  %v3300_v39 = vmul.f32 1.442695, %v3134_v24  ;;  %15726 = vst [vmem:[#allocation140_spill] sm:$0xff] %v7620_v59  ;;  %v7622_v44 = vpop.permute.xlu0 %521  ;;  %v6262_v55 = vpop.eup %6261 }
 0x156   :  { %v15724_v1 = vsel %vm7615_vm7, 4294967295, %v15723_v1  ;;  %15727 = vst [vmem:[#allocation141_spill] sm:$0xff] %v7622_v44  ;;  %v3558_v60 = vand.u32 2147483647, %v7270_v38  ;;  %v3306_v58 = vmul.f32 1.442695, %v3137_v6  ;;  %6281 = vpow2.f32 %v3302_v50  ;;  %v7641_v6 = vpop.eup %6263 }
 0x157   :  { %15722 = vst [vmem:[#allocation12_spill] sm:$0xff] %v7613_v21  ;;  %15725 = vst [vmem:[#allocation139_spill] sm:$0xff] %v15724_v1  ;;  %v3304_v45 = vmul.f32 1.442695, %v3136_v11  ;;  %v3565_v24 = vadd.f32 1.0, %v3564_v4  ;;  %987 = vbcast.lane.b32.xlu1 %v7504_v35, 312  ;;  %6283 = vlog2.f32 %v3570_v61  ;;  %v7662_v4 = vpop.eup %6265 }
 0x158   :  { %v15729_v59 = vand.u32 2147483647, %v7572_v28  ;;  %983 = vbcast.lane.b32.xlu0 %v7504_v35, 304  ;;  %15730 = vst [vmem:[#allocation13_spill] sm:$0xff] %v7639_v54  ;;  %15731 = vst [vmem:[#allocation142_spill] sm:$0xff] %v7641_v6  ;;  %v15733_v50 = vld [vmem:[#allocation14_spill] sm:$0xff]  ;;  %6285 = vpow2.f32 %v3300_v39 }
 0x159   :  { %v15732_v11 = vand.u32 2147483647, %v7580_v5  ;;  %v7648_v26 = vsub.f32 %v15733_v50, %v7089_v18  ;;  %v7652_v52 = vpop.permute.xlu0 %529  ;;  %v7654_v53 = vmul.f32 0.6931472, %v6262_v55  ;;  %vm7656_vm8 = vcmp.lt.f32.partialorder %v3558_v60, 0.0004427343  ;;  %v6268_v60 = vpop.eup %6267 }
 0x15a   :  { %v3139_v44 = vsub.f32 0.0, %v15729_v59  ;;  %v7650_v59 = vpop.permute.xlu1 %533  ;;  %15736 = vst [vmem:[#allocation144_spill] sm:$0xff] %v7652_v52  ;;  %v15738_v38 = vmov 0  ;;  %v3567_v48 = vand.u32 2147483647, %v7248_v34  ;;  %15741 = vst [vmem:[#allocation147_spill] sm:$0xff] %v7662_v4  ;;  %6287 = vpow2.f32 %v3306_v58  ;;  %v7680_v58 = vpop.eup %6269 }
 0x15b   :  { %v3138_v29 = vsub.f32 0.0, %v15732_v11  ;;  %15734 = vst [vmem:[#allocation14_spill] sm:$0xff] %v7648_v26  ;;  %15735 = vst [vmem:[#allocation143_spill] sm:$0xff] %v7650_v59  ;;  %v15739_v38 = vsel %vm7656_vm8, 4294967295, %v15738_v38  ;;  %v3573_v11 = vmul.f32 -0.5, %v7285_v19  ;;  %v15742_v61 = vld [vmem:[#allocation15_spill] sm:$0xff]  ;;  %v7670_v55 = vmul.f32 %v7248_v34, %v3565_v24  ;;  %v7686_v18 = vpop.eup %6271 }
 0x15c   :  { %15737 = vst [vmem:[#allocation145_spill] sm:$0xff] %v7654_v53  ;;  %15740 = vst [vmem:[#allocation146_spill] sm:$0xff] %v15739_v38  ;;  %v7667_v39 = vsub.f32 %v15742_v61, %v7092_v15  ;;  %6289 = vpow2.f32 %v3304_v45  ;;  %v3310_v50 = vmul.f32 1.442695, %v3139_v44  ;;  %v15745_v57 = vand.u32 2147483647, %v7604_v32 }
 0x15d   :  { %15744 = vst [vmem:[#allocation148_spill] sm:$0xff] %v7670_v55  ;;  %v15746_v6 = vld [vmem:[#allocation16_spill] sm:$0xff]  ;;  %995 = vbcast.lane.b32.xlu1 %v7504_v35, 328  ;;  %991 = vbcast.lane.b32.xlu0 %v7504_v35, 320  ;;  %v3308_v61 = vmul.f32 1.442695, %v3138_v29  ;;  %v7694_v4 = vpop.permute.xlu0 %540 }
 0x15e   :  { %15743 = vst [vmem:[#allocation15_spill] sm:$0xff] %v7667_v39  ;;  %v3141_v8 = vsub.f32 0.0, %v15745_v57  ;;  %v7676_v52 = vsub.f32 %v15746_v6, %v7092_v15  ;;  %v15748_v34 = vand.u32 2147483647, %v7613_v21  ;;  %v3579_v44 = vadd.f32 1.0, %v7278_v17  ;;  %15749 = vst [vmem:[#allocation149_spill] sm:$0xff] %v7686_v18  ;;  %v7692_v59 = vpop.permute.xlu1 %544  ;;  %v7701_v21 = vpop.eup %6273 }
 0x15f   :  { %v15750_v57 = vld [vmem:[#allocation17_spill] sm:$0xff]  ;;  %15752 = vst [vmem:[#allocation150_spill] sm:$0xff] %v7692_v59  ;;  %15753 = vst [vmem:[#allocation151_spill] sm:$0xff] %v7694_v4  ;;  %v3576_v45 = vand.u32 2147483647, %v7285_v19  ;;  %v15756_v5 = vld [vmem:[#allocation70_spill] sm:$0xff]  ;;  %6291 = vpow2.f32 %v3310_v50 }
 0x160   :  { %15747 = vst [vmem:[#allocation16_spill] sm:$0xff] %v7676_v52  ;;  %v3140_v24 = vsub.f32 0.0, %v15748_v34  ;;  %v7690_v6 = vsub.f32 %v15750_v57, %v7092_v15  ;;  %v3574_v34 = vadd.f32 1.0, %v3573_v11  ;;  %15754 = vst [vmem:[#allocation152_spill] sm:$0xff] %v7701_v21  ;;  %v15755_v18 = vand.u32 2147483647, %v7631_v27 }
 0x161   :  { %v651_v59 = vcombine.high %v15756_v5, %v15756_v5  ;;  %v7708_v28 = vmul.f32 0.6931472, %v6268_v60  ;;  %v3314_v4 = vmul.f32 1.442695, %v3141_v8  ;;  %v15758_v11 = vld [vmem:[#allocation18_spill] sm:$0xff]  ;;  %1003 = vbcast.lane.b32.xlu1 %v7504_v35, 344  ;;  %6293 = vlog2.f32 %v3579_v44 }
 0x162   :  { %15751 = vst [vmem:[#allocation17_spill] sm:$0xff] %v7690_v6  ;;  %v3143_v32 = vsub.f32 0.0, %v15755_v18  ;;  %v7713_v29 = vsub.f32 %v15758_v11, %v7092_v15  ;;  %999 = vbcast.lane.b32.xlu0 %v7504_v35, 336  ;;  %v7717_v18 = vpop.eup %6275  ;;  %v3312_v57 = vmul.f32 1.442695, %v3140_v24  ;;  %v15762_v60 = vmov 0  ;;  %v7733_v24 = vpop.permute.xlu1 %552 }
 0x163   :  { %15757 = vst [vmem:[#allocation70_spill] sm:$0xff] %v7708_v28  ;;  %15760 = vst [vmem:[#allocation153_spill] sm:$0xff] %v7717_v18  ;;  %v15761_v53 = vand.u32 2147483647, %v7648_v26  ;;  %vm7721_vm9 = vcmp.lt.f32.partialorder %v3567_v48, 0.0004427343  ;;  %v7726_v50 = vpop.eup %6277  ;;  %6295 = vpow2.f32 %v3308_v61  ;;  %v7735_v18 = vpop.permute.xlu0 %548  ;;  %v7743_v61 = vrot.slane %v651_v59, %v6742_v2 }
 0x164   :  { %15759 = vst [vmem:[#allocation18_spill] sm:$0xff] %v7713_v29  ;;  %v15763_v60 = vsel %vm7721_vm9, 4294967295, %v15762_v60  ;;  %v3582_v8 = vmul.f32 -0.5, %v7278_v17  ;;  %15765 = vst [vmem:[#allocation155_spill] sm:$0xff] %v7726_v50  ;;  %v15766_v1 = vld [vmem:[#allocation20_spill] sm:$0xff]  ;;  %v6280_v48 = vpop.eup %6279  ;;  %6297 = vpow2.f32 %v3314_v4  ;;  %v15777_v4 = vld [vmem:[#allocation21_spill] sm:$0xff] }
 0x165   :  { %v3142_v5 = vsub.f32 0.0, %v15761_v53  ;;  %15764 = vst [vmem:[#allocation154_spill] sm:$0xff] %v15763_v60  ;;  %v7731_v7 = vsub.f32 %v15766_v1, %v7092_v15  ;;  %15768 = vst [vmem:[#allocation156_spill] sm:$0xff] %v7733_v24  ;;  %v7738_v53 = vmul.f32 %v7285_v19, %v3574_v34  ;;  %v3318_v44 = vmul.f32 1.442695, %v3143_v32  ;;  %1011 = vbcast.lane.b32.xlu1 %v7504_v35, 360  ;;  %v7759_v59 = vpop.eup %6281 }
 0x166   :  { %15769 = vst [vmem:[#allocation157_spill] sm:$0xff] %v7735_v18  ;;  %v15771_v21 = vand.u32 2147483647, %v7667_v39  ;;  %v15772_v11 = vand.u32 2147483647, %v7676_v52  ;;  %1007 = vbcast.lane.b32.xlu0 %v7504_v35, 352  ;;  %6299 = vpow2.f32 %v3312_v57  ;;  %v7763_v1 = vsub.f32 %v15777_v4, %v7092_v15  ;;  %v6284_v19 = vpop.eup %6283  ;;  %v7772_v38 = vpop.permute.xlu1 %560 }
 0x167   :  { %15767 = vst [vmem:[#allocation20_spill] sm:$0xff] %v7731_v7  ;;  %15770 = vst [vmem:[#allocation158_spill] sm:$0xff] %v7738_v53  ;;  %vm7754_vm10 = vcmp.lt.f32.partialorder %v3576_v45, 0.0004427343  ;;  %v15773_v32 = vmov 0  ;;  %v15780_v28 = vld [vmem:[#allocation23_spill] sm:$0xff]  ;;  %v7774_v57 = vpop.permute.xlu0 %556  ;;  %v7778_v4 = vpop.eup %6285  ;;  %6301 = vpow2.f32 %v3318_v44 }
 0x168   :  { %v3145_v26 = vsub.f32 0.0, %v15771_v21  ;;  %v3144_v18 = vsub.f32 0.0, %v15772_v11  ;;  %v15774_v32 = vsel %vm7754_vm10, 4294967295, %v15773_v32  ;;  %v3588_v21 = vadd.f32 1.0, %v7328_v42  ;;  %15776 = vst [vmem:[#allocation160_spill] sm:$0xff] %v7759_v59  ;;  %15778 = vst [vmem:[#allocation21_spill] sm:$0xff] %v7763_v1  ;;  %v7785_v59 = vpop.eup %6287 }
 0x169   :  { %15775 = vst [vmem:[#allocation159_spill] sm:$0xff] %v15774_v32  ;;  %v3316_v34 = vmul.f32 1.442695, %v3142_v5  ;;  %v3583_v11 = vadd.f32 1.0, %v3582_v8  ;;  %v15779_v52 = vand.u32 2147483647, %v7690_v6  ;;  %v7770_v54 = vsub.f32 %v15780_v28, %v7092_v15 }
 0x16a   :  { %15782 = vst [vmem:[#allocation161_spill] sm:$0xff] %v7772_v38  ;;  %15783 = vst [vmem:[#allocation162_spill] sm:$0xff] %v7774_v57  ;;  %v7776_v5 = vmul.f32 0.6931472, %v6280_v48  ;;  %v3322_v8 = vmul.f32 1.442695, %v3145_v26  ;;  %6303 = vlog2.f32 %v3588_v21  ;;  %v7809_v50 = vpop.permute.xlu1 %568 }
 0x16b   :  { %v3147_v39 = vsub.f32 0.0, %v15779_v52  ;;  %15781 = vst [vmem:[#allocation23_spill] sm:$0xff] %v7770_v54  ;;  %15785 = vst [vmem:[#allocation164_spill] sm:$0xff] %v7778_v4  ;;  %v15786_v6 = vld [vmem:[#allocation24_spill] sm:$0xff]  ;;  %v3585_v45 = vand.u32 2147483647, %v7278_v17  ;;  %6305 = vpow2.f32 %v3316_v34 }
 0x16c   :  { %15784 = vst [vmem:[#allocation163_spill] sm:$0xff] %v7776_v5  ;;  %v7782_v52 = vsub.f32 %v15786_v6, %v7092_v15  ;;  %15788 = vst [vmem:[#allocation165_spill] sm:$0xff] %v7785_v59  ;;  %v3320_v28 = vmul.f32 1.442695, %v3144_v18  ;;  %v15789_v24 = vand.u32 2147483647, %v7713_v29  ;;  %v7798_v6 = vpop.eup %6289  ;;  %6307 = vpow2.f32 %v3322_v8 }
 0x16d   :  { %1019 = vbcast.lane.b32.xlu1 %v7504_v35, 376  ;;  %1015 = vbcast.lane.b32.xlu0 %v7504_v35, 368  ;;  %v7792_v48 = vld [vmem:[%s6747_s23 + $0x8] sm:$0xff]  ;;  %v15790_v44 = vld [vmem:[#allocation8_spill] sm:$0xff]  ;;  %15791 = vst [vmem:[#allocation166_spill] sm:$0xff] %v7798_v6  ;;  %15795 = vst [vmem:[#allocation169_spill] sm:$0xff] %v7809_v50 }
 0x16e   :  { %15787 = vst [vmem:[#allocation24_spill] sm:$0xff] %v7782_v52  ;;  %v3146_v38 = vsub.f32 0.0, %v15789_v24  ;;  %v7796_v26 = vrot.slane %v7792_v48, %v15790_v44  ;;  %v14781_v59 = vand.u32 2147483647, %v7763_v1  ;;  %v7801_v18 = vmul.f32 0.6931472, %v6284_v19  ;;  %v7811_v44 = vpop.permute.xlu0 %564 }
 0x16f   :  { %v7804_v24 = vmul.f32 %v7278_v17, %v3583_v11  ;;  %v3326_v29 = vmul.f32 1.442695, %v3147_v39  ;;  %v15794_v35 = vand.u32 2147483647, %v7731_v7  ;;  %15796 = vst [vmem:[#allocation170_spill] sm:$0xff] %v7811_v44  ;;  %v15797_v17 = vld [vmem:[#allocation25_spill] sm:$0xff]  ;;  %6309 = vpow2.f32 %v3320_v28 }
 0x170   :  { %15792 = vst [vmem:[#allocation167_spill] sm:$0xff] %v7801_v18  ;;  %v7820_v39 = vsub.f32 %v15797_v17, %v7092_v15  ;;  %v15799_v34 = vld [vmem:[#allocation26_spill] sm:$0xff]  ;;  %vm7828_vm11 = vcmp.lt.f32.partialorder %v3585_v45, 0.0004427343  ;;  %v15801_v57 = vmov 0  ;;  %v3591_v8 = vmul.f32 -0.5, %v7328_v42  ;;  %v7834_v17 = vpop.eup %6291 }
 0x171   :  { %15793 = vst [vmem:[#allocation168_spill] sm:$0xff] %v7804_v24  ;;  %v3149_v4 = vsub.f32 0.0, %v15794_v35  ;;  %v7824_v11 = vsub.f32 %v15799_v34, %v7092_v15  ;;  %v3324_v35 = vmul.f32 1.442695, %v3146_v38  ;;  %1030 = vbcast.lane.b32.xlu1 %v7796_v26, 264  ;;  %1026 = vbcast.lane.b32.xlu0 %v7796_v26, 256  ;;  %v6294_v7 = vpop.eup %6293  ;;  %6311 = vpow2.f32 %v3326_v29 }
 0x172   :  { %15798 = vst [vmem:[#allocation25_spill] sm:$0xff] %v7820_v39  ;;  %v15802_v57 = vsel %vm7828_vm11, 4294967295, %v15801_v57  ;;  %v3597_v21 = vadd.f32 1.0, %v7307_v9  ;;  %15804 = vst [vmem:[#allocation172_spill] sm:$0xff] %v7834_v17  ;;  %v3148_v34 = vsub.f32 0.0, %v14781_v59  ;;  %v15805_v28 = vld [vmem:[#allocation27_spill] sm:$0xff]  ;;  %v7849_v17 = vpop.permute.xlu1 %576  ;;  %v7851_v59 = vpop.permute.xlu0 %572 }
 0x173   :  { %15800 = vst [vmem:[#allocation26_spill] sm:$0xff] %v7824_v11  ;;  %15803 = vst [vmem:[#allocation171_spill] sm:$0xff] %v15802_v57  ;;  %v7840_v38 = vsub.f32 %v15805_v28, %v7092_v15  ;;  %v3594_v19 = vand.u32 2147483647, %v7328_v42  ;;  %v3330_v5 = vmul.f32 1.442695, %v3149_v4  ;;  %v7854_v1 = vpop.eup %6295 }
 0x174   :  { %v15807_v55 = vand.u32 2147483647, %v7770_v54  ;;  %15808 = vst [vmem:[#allocation173_spill] sm:$0xff] %v7849_v17  ;;  %15809 = vst [vmem:[#allocation174_spill] sm:$0xff] %v7851_v59  ;;  %v3600_v28 = vmul.f32 -0.5, %v7307_v9  ;;  %v15812_v29 = vld [vmem:[#allocation28_spill] sm:$0xff]  ;;  %6313 = vlog2.f32 %v3597_v21 }
 0x175   :  { %15806 = vst [vmem:[#allocation27_spill] sm:$0xff] %v7840_v38  ;;  %15810 = vst [vmem:[#allocation175_spill] sm:$0xff] %v7854_v1  ;;  %v15811_v6 = vand.u32 2147483647, %v7782_v52  ;;  %v7862_v4 = vsub.f32 %v15812_v29, %v7092_v15  ;;  %1038 = vbcast.lane.b32.xlu1 %v7796_v26, 280  ;;  %1034 = vbcast.lane.b32.xlu0 %v7796_v26, 272  ;;  %v7871_v52 = vpop.eup %6297  ;;  %6315 = vpow2.f32 %v3324_v35 }
 0x176   :  { %v3151_v60 = vsub.f32 0.0, %v15807_v55  ;;  %v15814_v55 = vld [vmem:[#allocation29_spill] sm:$0xff]  ;;  %v3592_v53 = vadd.f32 1.0, %v3591_v8  ;;  %15816 = vst [vmem:[#allocation176_spill] sm:$0xff] %v7871_v52  ;;  %v3328_v18 = vmul.f32 1.442695, %v3148_v34  ;;  %v7876_v1 = vpop.eup %6299  ;;  %6317 = vpow2.f32 %v3330_v5  ;;  %v7882_v8 = vpop.permute.xlu1 %584 }
 0x177   :  { %v3150_v32 = vsub.f32 0.0, %v15811_v6  ;;  %15813 = vst [vmem:[#allocation28_spill] sm:$0xff] %v7862_v4  ;;  %v7866_v54 = vsub.f32 %v15814_v55, %v7092_v15  ;;  %v3606_v6 = vadd.f32 1.0, %v7364_v51  ;;  %v7874_v29 = vmul.f32 0.6931472, %v6294_v7  ;;  %15818 = vst [vmem:[#allocation178_spill] sm:$0xff] %v7876_v1  ;;  %v7884_v21 = vpop.permute.xlu0 %580 }
 0x178   :  { %v3334_v55 = vmul.f32 1.442695, %v3151_v60  ;;  %v15819_v59 = vld [vmem:[#allocation30_spill] sm:$0xff]  ;;  %15821 = vst [vmem:[#allocation179_spill] sm:$0xff] %v7882_v8  ;;  %15822 = vst [vmem:[#allocation180_spill] sm:$0xff] %v7884_v21  ;;  %v3601_v44 = vadd.f32 1.0, %v3600_v28 }
 0x179   :  { %15815 = vst [vmem:[#allocation29_spill] sm:$0xff] %v7866_v54  ;;  %15817 = vst [vmem:[#allocation177_spill] sm:$0xff] %v7874_v29  ;;  %v7880_v17 = vsub.f32 %v15819_v59, %v7092_v15  ;;  %v3332_v52 = vmul.f32 1.442695, %v3150_v32  ;;  %v15823_v35 = vand.u32 2147483647, %v7820_v39  ;;  %v7895_v59 = vpop.eup %6301  ;;  %v7901_v32 = vmul.f32 %v7328_v42, %v3592_v53 }
 0x17a   :  { %v15824_v7 = vand.u32 2147483647, %v7824_v11  ;;  %vm7891_vm12 = vcmp.lt.f32.partialorder %v3594_v19, 0.0004427343  ;;  %v15825_v60 = vmov 0  ;;  %15828 = vst [vmem:[#allocation182_spill] sm:$0xff] %v7895_v59  ;;  %6319 = vlog2.f32 %v3606_v6 }
 0x17b   :  { %15820 = vst [vmem:[#allocation30_spill] sm:$0xff] %v7880_v17  ;;  %v3153_v34 = vsub.f32 0.0, %v15823_v35  ;;  %v15826_v60 = vsel %vm7891_vm12, 4294967295, %v15825_v60  ;;  %1046 = vbcast.lane.b32.xlu1 %v7796_v26, 296  ;;  %1042 = vbcast.lane.b32.xlu0 %v7796_v26, 288  ;;  %15829 = vst [vmem:[#allocation183_spill] sm:$0xff] %v7901_v32  ;;  %v6304_v35 = vpop.eup %6303  ;;  %6321 = vpow2.f32 %v3328_v18  ;;  %v7921_v18 = vpop.permute.xlu1 %592 }
 0x17c   :  { %v3152_v45 = vsub.f32 0.0, %v15824_v7  ;;  %15827 = vst [vmem:[#allocation181_spill] sm:$0xff] %v15826_v60  ;;  %v3609_v28 = vmul.f32 -0.5, %v7364_v51  ;;  %v15830_v19 = vand.u32 2147483647, %v7840_v38  ;;  %v15831_v1 = vld [vmem:[#allocation32_spill] sm:$0xff]  ;;  %v7914_v42 = vpop.eup %6305  ;;  %6323 = vpow2.f32 %v3334_v55 }
 0x17d   :  { %v7908_v11 = vsub.f32 %v15831_v1, %v7092_v15  ;;  %15833 = vst [vmem:[#allocation184_spill] sm:$0xff] %v7914_v42  ;;  %v15834_v6 = vld [vmem:[#allocation33_spill] sm:$0xff]  ;;  %15836 = vst [vmem:[#allocation185_spill] sm:$0xff] %v7921_v18  ;;  %v7926_v1 = vmul.f32 %v7307_v9, %v3601_v44  ;;  %v3603_v38 = vand.u32 2147483647, %v7307_v9  ;;  %v7934_v59 = vpop.eup %6307  ;;  %6325 = vpow2.f32 %v3332_v52 }
 0x17e   :  { %v3155_v7 = vsub.f32 0.0, %v15830_v19  ;;  %v7919_v39 = vsub.f32 %v15834_v6, %v7092_v15  ;;  %v7923_v19 = vpop.permute.xlu0 %588  ;;  %v3338_v57 = vmul.f32 1.442695, %v3153_v34  ;;  %v3336_v5 = vmul.f32 1.442695, %v3152_v45  ;;  %15840 = vst [vmem:[#allocation188_spill] sm:$0xff] %v7934_v59  ;;  %v7942_v55 = vpop.eup %6309 }
 0x17f   :  { %15832 = vst [vmem:[#allocation32_spill] sm:$0xff] %v7908_v11  ;;  %15837 = vst [vmem:[#allocation186_spill] sm:$0xff] %v7923_v19  ;;  %v15839_v29 = vand.u32 2147483647, %v7862_v4  ;;  %v15841_v15 = vand.u32 2147483647, %v7866_v54  ;;  %v7953_v19 = vpop.permute.xlu1 %600 }
 0x180   :  { %15835 = vst [vmem:[#allocation33_spill] sm:$0xff] %v7919_v39  ;;  %15838 = vst [vmem:[#allocation187_spill] sm:$0xff] %v7926_v1  ;;  %v7932_v53 = vld.sshfl [vmem:[%s6904_s5 + $0x8] sm:$0xff pattern:$0x75316420]  ;;  %1054 = vbcast.lane.b32.xlu1 %v7796_v26, 312  ;;  %6327 = vpow2.f32 %v3338_v57 }
 0x181   :  { %v3154_v24 = vsub.f32 0.0, %v15839_v29  ;;  %v3157_v6 = vsub.f32 0.0, %v15841_v15  ;;  %1050 = vbcast.lane.b32.xlu0 %v7796_v26, 304  ;;  %v7940_v44 = vmul.f32 0.6931472, %v6304_v35  ;;  %v3610_v9 = vadd.f32 1.0, %v3609_v28 }
 0x182   :  { %15843 = vst [vmem:[#allocation190_spill] sm:$0xff] %v7942_v55  ;;  %v3342_v45 = vmul.f32 1.442695, %v3155_v7  ;;  %v15844_v34 = vld [vmem:[#allocation69_spill] sm:$0xff]  ;;  %v15845_v4 = vld [vmem:[#allocation35_spill] sm:$0xff]  ;;  %v7955_v35 = vpop.permute.xlu0 %596  ;;  %v3615_v28 = vadd.f32 1.0, %v7357_v0  ;;  %v7958_v7 = vpop.eup %6311  ;;  %6329 = vpow2.f32 %v3336_v5 }
 0x183   :  { %15842 = vst [vmem:[#allocation189_spill] sm:$0xff] %v7940_v44  ;;  %v7947_v42 = vsub.f32 %v15845_v4, %v15844_v34  ;;  %v3612_v52 = vand.u32 2147483647, %v7364_v51  ;;  %v15847_v15 = vand.u32 2147483647, %v7880_v17  ;;  %15848 = vst [vmem:[#allocation35_spill] sm:$0xff] %v7953_v19 }
 0x184   :  { %15849 = vst [vmem:[#allocation191_spill] sm:$0xff] %v7955_v35  ;;  %15850 = vst [vmem:[#allocation192_spill] sm:$0xff] %v7958_v7  ;;  %v3340_v29 = vmul.f32 1.442695, %v3154_v24  ;;  %v15851_v4 = vld [vmem:[#allocation36_spill] sm:$0xff]  ;;  %v15853_v18 = vld [vmem:[#allocation37_spill] sm:$0xff]  ;;  %v7979_v24 = vmul.f32 %v7364_v51, %v3610_v9  ;;  %6331 = vpow2.f32 %v3342_v45  ;;  %v7996_v9 = vpop.permute.xlu1 %829 }
 0x185   :  { %15846 = vst [vmem:[#allocation69_spill] sm:$0xff] %v7947_v42  ;;  %v3156_v54 = vsub.f32 0.0, %v15847_v15  ;;  %v7962_v55 = vsub.f32 %v15851_v4, %v15844_v34  ;;  %v7966_v17 = vsub.f32 %v15853_v18, %v15844_v34  ;;  %vm7968_vm13 = vcmp.lt.f32.partialorder %v3603_v38, 0.0004427343  ;;  %1062 = vbcast.lane.b32.xlu1 %v7796_v26, 328  ;;  %1058 = vbcast.lane.b32.xlu0 %v7796_v26, 320  ;;  %v6314_v18 = vpop.eup %6313 }
 0x186   :  { %v15855_v15 = vmov 0  ;;  %v3346_v59 = vmul.f32 1.442695, %v3157_v6  ;;  %15858 = vst [vmem:[#allocation194_spill] sm:$0xff] %v7979_v24  ;;  %v15859_v38 = vand.u32 2147483647, %v7908_v11  ;;  %v7988_v35 = vpop.eup %6315  ;;  %v7998_v45 = vpop.permute.xlu0 %825  ;;  %6333 = vlog2.f32 %v3615_v28 }
 0x187   :  { %15852 = vst [vmem:[#allocation36_spill] sm:$0xff] %v7962_v55  ;;  %15854 = vst [vmem:[#allocation37_spill] sm:$0xff] %v7966_v17  ;;  %v15856_v15 = vsel %vm7968_vm13, 4294967295, %v15855_v15  ;;  %v15860_v6 = vld [vmem:[#allocation38_spill] sm:$0xff]  ;;  %v3344_v19 = vmul.f32 1.442695, %v3156_v54  ;;  %6335 = vpow2.f32 %v3340_v29 }
 0x188   :  { %15857 = vst [vmem:[#allocation193_spill] sm:$0xff] %v15856_v15  ;;  %v3159_v4 = vsub.f32 0.0, %v15859_v38  ;;  %v7986_v7 = vsub.f32 %v15860_v6, %v15844_v34  ;;  %15862 = vst [vmem:[#allocation195_spill] sm:$0xff] %v7988_v35  ;;  %v15863_v60 = vand.u32 2147483647, %v7919_v39  ;;  %v15864_v44 = vld [vmem:[#allocation22_spill] sm:$0xff]  ;;  %v8000_v38 = vpop.eup %6317  ;;  %6337 = vpow2.f32 %v3346_v59 }
 0x189   :  { %v7994_v51 = vrot.slane %v7932_v53, %v15864_v44  ;;  %15865 = vst [vmem:[#allocation196_spill] sm:$0xff] %v7996_v9  ;;  %15866 = vst [vmem:[#allocation197_spill] sm:$0xff] %v7998_v45  ;;  %v3618_v54 = vmul.f32 -0.5, %v7357_v0  ;;  %1070 = vbcast.lane.b32.xlu1 %v7796_v26, 344  ;;  %1066 = vbcast.lane.b32.xlu0 %v7796_v26, 336  ;;  %v15871_v28 = vmov 0  ;;  %v6320_v29 = vpop.eup %6319  ;;  %6339 = vpow2.f32 %v3344_v19  ;;  %v8030_v45 = vpop.permute.xlu1 %837 }
 0x18a   :  { %15861 = vst [vmem:[#allocation38_spill] sm:$0xff] %v7986_v7  ;;  %v3158_v57 = vsub.f32 0.0, %v15863_v60  ;;  %15867 = vst [vmem:[#allocation198_spill] sm:$0xff] %v8000_v38  ;;  %v15868_v60 = vld [vmem:[#allocation40_spill] sm:$0xff]  ;;  %v8011_v11 = vmul.f32 0.6931472, %v6314_v18  ;;  %v8024_v32 = vpop.eup %6321 }
 0x18b   :  { %v8007_v39 = vsub.f32 %v15868_v60, %v15844_v34  ;;  %vm8013_vm14 = vcmp.lt.f32.partialorder %v3612_v52, 0.0004427343  ;;  %v3350_v6 = vmul.f32 1.442695, %v3159_v4  ;;  %v15874_v5 = vand.u32 2147483647, %v7947_v42  ;;  %v8032_v4 = vpop.permute.xlu0 %833 }
 0x18c   :  { %15870 = vst [vmem:[#allocation199_spill] sm:$0xff] %v8011_v11  ;;  %v15872_v28 = vsel %vm8013_vm14, 4294967295, %v15871_v28  ;;  %v15875_v60 = vld [vmem:[#allocation41_spill] sm:$0xff]  ;;  %15877 = vst [vmem:[#allocation201_spill] sm:$0xff] %v8024_v32  ;;  %v3348_v18 = vmul.f32 1.442695, %v3158_v57  ;;  %v8028_v52 = vrot.slane %v7994_v51, %v6742_v2  ;;  %v8040_v57 = vpop.eup %6323 }
 0x18d   :  { %15869 = vst [vmem:[#allocation40_spill] sm:$0xff] %v8007_v39  ;;  %15873 = vst [vmem:[#allocation200_spill] sm:$0xff] %v15872_v28  ;;  %v3161_v38 = vsub.f32 0.0, %v15874_v5  ;;  %v8022_v35 = vsub.f32 %v15875_v60, %v15844_v34  ;;  %v3624_v5 = vadd.f32 1.0, %v7390_v3  ;;  %v15881_v59 = vand.u32 2147483647, %v7962_v55 }
 0x18e   :  { %15878 = vst [vmem:[#allocation202_spill] sm:$0xff] %v8028_v52  ;;  %15879 = vst [vmem:[#allocation203_spill] sm:$0xff] %v8030_v45  ;;  %v15882_v60 = vand.u32 2147483647, %v7966_v17  ;;  %v3619_v21 = vadd.f32 1.0, %v3618_v54  ;;  %v15884_v52 = vld [vmem:[#allocation44_spill] sm:$0xff]  ;;  %6341 = vpow2.f32 %v3350_v6 }
 0x18f   :  { %15876 = vst [vmem:[#allocation41_spill] sm:$0xff] %v8022_v35  ;;  %15880 = vst [vmem:[#allocation204_spill] sm:$0xff] %v8032_v4  ;;  %v3160_v42 = vsub.f32 0.0, %v15881_v59  ;;  %v3621_v19 = vand.u32 2147483647, %v7357_v0  ;;  %v8045_v45 = vsub.f32 %v15884_v52, %v15844_v34  ;;  %1078 = vbcast.lane.b32.xlu1 %v7796_v26, 360  ;;  %v8068_v59 = vpop.permute.xlu1 %845  ;;  %6343 = vlog2.f32 %v3624_v5 }
 0x190   :  { %v3163_v9 = vsub.f32 0.0, %v15882_v60  ;;  %15883 = vst [vmem:[#allocation205_spill] sm:$0xff] %v8040_v57  ;;  %1074 = vbcast.lane.b32.xlu0 %v7796_v26, 352  ;;  %v8053_v54 = vmul.f32 0.6931472, %v6320_v29  ;;  %v8055_v60 = vpop.eup %6325  ;;  %v15889_v57 = vld [vmem:[#allocation45_spill] sm:$0xff]  ;;  %v8070_v29 = vpop.permute.xlu0 %841  ;;  %6345 = vpow2.f32 %v3348_v18 }
 0x191   :  { %15885 = vst [vmem:[#allocation44_spill] sm:$0xff] %v8045_v45  ;;  %15887 = vst [vmem:[#allocation207_spill] sm:$0xff] %v8055_v60  ;;  %v3354_v17 = vmul.f32 1.442695, %v3161_v38  ;;  %v15888_v32 = vand.u32 2147483647, %v7986_v7  ;;  %v8062_v4 = vsub.f32 %v15889_v57, %v15844_v34  ;;  %v8078_v60 = vpop.eup %6327 }
 0x192   :  { %15886 = vst [vmem:[#allocation206_spill] sm:$0xff] %v8053_v54  ;;  %v15891_v8 = vld [vmem:[#allocation49_spill] sm:$0xff]  ;;  %v3633_v38 = vadd.f32 1.0, %v7383_v12  ;;  %v3352_v6 = vmul.f32 1.442695, %v3160_v42  ;;  %v3627_v57 = vmul.f32 -0.5, %v7390_v3  ;;  %v8089_v5 = vpop.eup %6329 }
 0x193   :  { %v3162_v55 = vsub.f32 0.0, %v15888_v32  ;;  %15890 = vst [vmem:[#allocation45_spill] sm:$0xff] %v8062_v4  ;;  %v8066_v50 = vsub.f32 %v15891_v8, %v15844_v34  ;;  %v3358_v7 = vmul.f32 1.442695, %v3163_v9  ;;  %v15893_v32 = vld [vmem:[#allocation50_spill] sm:$0xff]  ;;  %15895 = vst [vmem:[#allocation208_spill] sm:$0xff] %v8078_v60  ;;  %6347 = vpow2.f32 %v3354_v17  ;;  %v8098_v1 = vpop.eup %6331 }
 0x194   :  { %v8075_v52 = vsub.f32 %v15893_v32, %v15844_v34  ;;  %v15896_v8 = vand.u32 2147483647, %v8007_v39  ;;  %1086 = vbcast.lane.b32.xlu1 %v7796_v26, 376  ;;  %1082 = vbcast.lane.b32.xlu0 %v7796_v26, 368  ;;  %v15897_v42 = vld [vmem:[#allocation9_spill] sm:$0xff]  ;;  %15898 = vst [vmem:[#allocation209_spill] sm:$0xff] %v8089_v5  ;;  %v8104_v5 = vpop.permute.xlu1 %853  ;;  %v8106_v17 = vpop.permute.xlu0 %849  ;;  %6349 = vlog2.f32 %v3633_v38 }
 0x195   :  { %15892 = vst [vmem:[#allocation49_spill] sm:$0xff] %v8066_v50  ;;  %v8087_v9 = vrot.slane %v7792_v48, %v15897_v42  ;;  %v3356_v32 = vmul.f32 1.442695, %v3162_v55  ;;  %15900 = vst [vmem:[#allocation211_spill] sm:$0xff] %v8098_v1  ;;  %v15901_v26 = vand.u32 2147483647, %v8022_v35  ;;  %v6334_v55 = vpop.eup %6333  ;;  %6351 = vpow2.f32 %v3352_v6 }
 0x196   :  { %15894 = vst [vmem:[#allocation50_spill] sm:$0xff] %v8075_v52  ;;  %v3165_v11 = vsub.f32 0.0, %v15896_v8  ;;  %v8096_v8 = vmul.f32 %v7357_v0, %v3619_v21  ;;  %15902 = vst [vmem:[#allocation212_spill] sm:$0xff] %v8104_v5  ;;  %vm8109_vm15 = vcmp.lt.f32.partialorder %v3621_v19, 0.0004427343  ;;  %v15904_v0 = vmov 0  ;;  %v8114_v1 = vpop.eup %6335 }
 0x197   :  { %v3164_v39 = vsub.f32 0.0, %v15901_v26  ;;  %15903 = vst [vmem:[#allocation213_spill] sm:$0xff] %v8106_v17  ;;  %v15905_v0 = vsel %vm8109_vm15, 4294967295, %v15904_v0  ;;  %v3628_v21 = vadd.f32 1.0, %v3627_v57  ;;  %v3636_v26 = vmul.f32 -0.5, %v7383_v12  ;;  %15907 = vst [vmem:[#allocation215_spill] sm:$0xff] %v8114_v1  ;;  %v8124_v19 = vpop.eup %6337 }
 0x198   :  { %15899 = vst [vmem:[#allocation210_spill] sm:$0xff] %v8096_v8  ;;  %15906 = vst [vmem:[#allocation214_spill] sm:$0xff] %v15905_v0  ;;  %6353 = vpow2.f32 %v3358_v7  ;;  %v3362_v42 = vmul.f32 1.442695, %v3165_v11  ;;  %v15908_v60 = vand.u32 2147483647, %v8045_v45  ;;  %v8136_v24 = vpop.permute.xlu1 %861  ;;  %v8138_v28 = vpop.permute.xlu0 %857 }
 0x199   :  { %v15909_v38 = vld [vmem:[#allocation53_spill] sm:$0xff]  ;;  %1097 = vbcast.lane.b32.xlu1 %v8087_v9, 264  ;;  %1093 = vbcast.lane.b32.xlu0 %v8087_v9, 256  ;;  %15911 = vst [vmem:[#allocation216_spill] sm:$0xff] %v8124_v19  ;;  %6355 = vpow2.f32 %v3356_v32  ;;  %v15912_v6 = vld [vmem:[#allocation54_spill] sm:$0xff]  ;;  %v3642_v7 = vadd.f32 1.0, %v7439_v31  ;;  %v8142_v19 = vpop.eup %6339 }
 0x19a   :  { %v3167_v35 = vsub.f32 0.0, %v15908_v60  ;;  %v8120_v54 = vsub.f32 %v15909_v38, %v15844_v34  ;;  %v8128_v57 = vsub.f32 %v15912_v6, %v15844_v34  ;;  %v3630_v11 = vand.u32 2147483647, %v7390_v3  ;;  %15916 = vst [vmem:[#allocation217_spill] sm:$0xff] %v8136_v24  ;;  %15917 = vst [vmem:[#allocation218_spill] sm:$0xff] %v8138_v28  ;;  %v15921_v5 = vld [vmem:[#allocation58_spill] sm:$0xff] }
 0x19b   :  { %v3360_v60 = vmul.f32 1.442695, %v3164_v39  ;;  %v15914_v18 = vand.u32 2147483647, %v8062_v4  ;;  %v15915_v45 = vand.u32 2147483647, %v8066_v50  ;;  %v8148_v39 = vsub.f32 %v15921_v5, %v15844_v34 }
 0x19c   :  { %15910 = vst [vmem:[#allocation53_spill] sm:$0xff] %v8120_v54  ;;  %15913 = vst [vmem:[#allocation54_spill] sm:$0xff] %v8128_v57  ;;  %v8140_v32 = vmul.f32 0.6931472, %v6334_v55  ;;  %v15920_v6 = vand.u32 2147483647, %v8075_v52  ;;  %6357 = vpow2.f32 %v3362_v42  ;;  %v8167_v42 = vpop.eup %6341  ;;  %v8171_v4 = vpop.permute.xlu0 %865 }
 0x19d   :  { %v3166_v38 = vsub.f32 0.0, %v15914_v18  ;;  %v3169_v1 = vsub.f32 0.0, %v15915_v45  ;;  %15919 = vst [vmem:[#allocation220_spill] sm:$0xff] %v8142_v19  ;;  %15922 = vst [vmem:[#allocation58_spill] sm:$0xff] %v8148_v39  ;;  %v8151_v18 = vmul.f32 %v7390_v3, %v3628_v21  ;;  %v3637_v50 = vadd.f32 1.0, %v3636_v26  ;;  %v15924_v55 = vld [vmem:[#allocation59_spill] sm:$0xff] }
 0x19e   :  { %15918 = vst [vmem:[#allocation219_spill] sm:$0xff] %v8140_v32  ;;  %v3168_v15 = vsub.f32 0.0, %v15920_v6  ;;  %v3366_v45 = vmul.f32 1.442695, %v3167_v35  ;;  %v8156_v28 = vsub.f32 %v15924_v55, %v15844_v34  ;;  %1105 = vbcast.lane.b32.xlu1 %v8087_v9, 280  ;;  %1101 = vbcast.lane.b32.xlu0 %v8087_v9, 272  ;;  %6359 = vlog2.f32 %v3642_v7  ;;  %v8169_v55 = vpop.permute.xlu1 %869 }
 0x19f   :  { %15923 = vst [vmem:[#allocation221_spill] sm:$0xff] %v8151_v18  ;;  %vm8161_vm14 = vcmp.lt.f32.partialorder %v3630_v11, 0.0004427343  ;;  %v15926_v5 = vmov 0  ;;  %v3645_v3 = vmul.f32 -0.5, %v7439_v31  ;;  %v3651_v35 = vadd.f32 1.0, %v7431_v33  ;;  %v6344_v11 = vpop.eup %6343 }
 0x1a0   :  { %15925 = vst [vmem:[#allocation59_spill] sm:$0xff] %v8156_v28  ;;  %v15927_v5 = vsel %vm8161_vm14, 4294967295, %v15926_v5  ;;  %15929 = vst [vmem:[#allocation223_spill] sm:$0xff] %v8167_v42  ;;  %6361 = vpow2.f32 %v3360_v60  ;;  %v3364_v21 = vmul.f32 1.442695, %v3166_v38  ;;  %v15931_v7 = vld [vmem:[#allocation62_spill] sm:$0xff] }
 0x1a1   :  { %15928 = vst [vmem:[#allocation222_spill] sm:$0xff] %v15927_v5  ;;  %v3370_v26 = vmul.f32 1.442695, %v3169_v1  ;;  %15930 = vst [vmem:[#allocation224_spill] sm:$0xff] %v8171_v4  ;;  %v3639_v6 = vand.u32 2147483647, %v7383_v12  ;;  %v8177_v24 = vsub.f32 %v15931_v7, %v15844_v34  ;;  %6363 = vpow2.f32 %v3366_v45  ;;  %v8192_v7 = vpop.eup %6345 }
 0x1a2   :  { %v3368_v19 = vmul.f32 1.442695, %v3168_v15  ;;  %v15933_v17 = vld [vmem:[#allocation63_spill] sm:$0xff]  ;;  %v15935_v1 = vand.u32 2147483647, %v8120_v54  ;;  %1113 = vbcast.lane.b32.xlu1 %v8087_v9, 296  ;;  %v1372_v45 = vcombine.high %v7932_v53, %v7932_v53  ;;  %6365 = vlog2.f32 %v3651_v35  ;;  %v8198_v38 = vpop.eup %6347  ;;  %v8200_v52 = vpop.permute.xlu1 %877 }
 0x1a3   :  { %15932 = vst [vmem:[#allocation62_spill] sm:$0xff] %v8177_v24  ;;  %v8181_v42 = vsub.f32 %v15933_v17, %v15844_v34  ;;  %1109 = vbcast.lane.b32.xlu0 %v8087_v9, 288  ;;  %15936 = vst [vmem:[#allocation225_spill] sm:$0xff] %v8192_v7  ;;  %v15937_v34 = vand.u32 2147483647, %v8128_v57  ;;  %6367 = vpow2.f32 %v3364_v21  ;;  %v8202_v54 = vpop.permute.xlu0 %873  ;;  %v8207_v15 = vmul.f32 %v7383_v12, %v3637_v50  ;;  %v15944_v21 = vld [vmem:[#allocation77_spill] sm:$0xff] }
 0x1a4   :  { %v3171_v60 = vsub.f32 0.0, %v15935_v1  ;;  %v3646_v1 = vadd.f32 1.0, %v3645_v3  ;;  %15938 = vst [vmem:[#allocation226_spill] sm:$0xff] %v8198_v38  ;;  %15939 = vst [vmem:[#allocation227_spill] sm:$0xff] %v8200_v52  ;;  %v8204_v4 = vmul.f32 0.6931472, %v6344_v11  ;;  %6369 = vpow2.f32 %v3370_v26 }
 0x1a5   :  { %15934 = vst [vmem:[#allocation63_spill] sm:$0xff] %v8181_v42  ;;  %v3170_v17 = vsub.f32 0.0, %v15937_v34  ;;  %15940 = vst [vmem:[#allocation228_spill] sm:$0xff] %v8202_v54  ;;  %v3648_v7 = vand.u32 2147483647, %v7439_v31  ;;  %v6350_v34 = vpop.eup %6349  ;;  %v15945_v38 = vld [vmem:[#allocation65_spill] sm:$0xff]  ;;  %6371 = vpow2.f32 %v3368_v19  ;;  %v8235_v35 = vrot.slane %v1372_v45, %v15864_v44 }
 0x1a6   :  { %15941 = vst [vmem:[#allocation229_spill] sm:$0xff] %v8204_v4  ;;  %15942 = vst [vmem:[#allocation230_spill] sm:$0xff] %v8207_v15  ;;  %v15943_v57 = vand.u32 2147483647, %v8148_v39  ;;  %v8216_v32 = vsub.f32 %v15945_v38, %v15944_v21  ;;  %vm8218_vm15 = vcmp.lt.f32.partialorder %v3639_v6, 0.0004427343  ;;  %v8222_v12 = vpop.eup %6351  ;;  %v8238_v26 = vmul.f32 %v7439_v31, %v3646_v1 }
 0x1a7   :  { %v15947_v11 = vmov 0  ;;  %15950 = vst [vmem:[#allocation231_spill] sm:$0xff] %v8222_v12  ;;  %v3374_v50 = vmul.f32 1.442695, %v3171_v60  ;;  %v15951_v8 = vand.u32 2147483647, %v8156_v28  ;;  %v8232_v38 = vpop.eup %6353  ;;  %v8246_v12 = vpop.permute.xlu1 %885 }
 0x1a8   :  { %v3173_v53 = vsub.f32 0.0, %v15943_v57  ;;  %15946 = vst [vmem:[#allocation77_spill] sm:$0xff] %v8216_v32  ;;  %v15948_v11 = vsel %vm8218_vm15, 4294967295, %v15947_v11  ;;  %v15952_v57 = vld [vmem:[#allocation66_spill] sm:$0xff]  ;;  %1121 = vbcast.lane.b32.xlu1 %v8087_v9, 312  ;;  %1117 = vbcast.lane.b32.xlu0 %v8087_v9, 304  ;;  %v8240_v60 = vpop.eup %6355  ;;  %v8248_v28 = vpop.permute.xlu0 %881 }
 0x1a9   :  { %15949 = vst [vmem:[#allocation65_spill] sm:$0xff] %v15948_v11  ;;  %v3172_v39 = vsub.f32 0.0, %v15951_v8  ;;  %v8228_v3 = vsub.f32 %v15952_v57, %v15944_v21  ;;  %15954 = vst [vmem:[#allocation232_spill] sm:$0xff] %v8232_v38  ;;  %v3372_v6 = vmul.f32 1.442695, %v3170_v17  ;;  %v15957_v8 = vld [vmem:[#allocation71_spill] sm:$0xff]  ;;  %6373 = vpow2.f32 %v3374_v50 }
 0x1aa   :  { %15955 = vst [vmem:[#allocation233_spill] sm:$0xff] %v8238_v26  ;;  %15956 = vst [vmem:[#allocation234_spill] sm:$0xff] %v8240_v60  ;;  %v8244_v57 = vsub.f32 %v15957_v8, %v15944_v21  ;;  %v8254_v17 = vmul.f32 0.6931472, %v6350_v34  ;;  %v3654_v31 = vmul.f32 -0.5, %v7431_v33  ;;  %v15964_v5 = vld [vmem:[#allocation72_spill] sm:$0xff] }
 0x1ab   :  { %15953 = vst [vmem:[#allocation66_spill] sm:$0xff] %v8228_v3  ;;  %15959 = vst [vmem:[#allocation235_spill] sm:$0xff] %v8246_v12  ;;  %v3378_v45 = vmul.f32 1.442695, %v3173_v53  ;;  %v15962_v1 = vand.u32 2147483647, %v8177_v24  ;;  %v8265_v19 = vsub.f32 %v15964_v5, %v15944_v21  ;;  %v8273_v53 = vpop.eup %6357  ;;  %6375 = vpow2.f32 %v3372_v6  ;;  %v8286_v0 = vpop.permute.xlu1 %896 }
 0x1ac   :  { %15958 = vst [vmem:[#allocation71_spill] sm:$0xff] %v8244_v57  ;;  %15960 = vst [vmem:[#allocation236_spill] sm:$0xff] %v8248_v28  ;;  %v15963_v8 = vand.u32 2147483647, %v8181_v42  ;;  %v3376_v28 = vmul.f32 1.442695, %v3172_v39  ;;  %v8277_v39 = vrot.slane %v8235_v35, %v6742_v2  ;;  %v8288_v42 = vpop.permute.xlu0 %892 }
 0x1ad   :  { %15961 = vst [vmem:[#allocation237_spill] sm:$0xff] %v8254_v17  ;;  %v3175_v38 = vsub.f32 0.0, %v15962_v1  ;;  %15965 = vst [vmem:[#allocation72_spill] sm:$0xff] %v8265_v19  ;;  %1129 = vbcast.lane.b32.xlu1 %v8087_v9, 328  ;;  %1125 = vbcast.lane.b32.xlu0 %v8087_v9, 320  ;;  %v15966_v34 = vmov 0  ;;  %v6360_v1 = vpop.eup %6359  ;;  %6377 = vpow2.f32 %v3378_v45 }
 0x1ae   :  { %v3174_v60 = vsub.f32 0.0, %v15963_v8  ;;  %vm8269_vm14 = vcmp.lt.f32.partialorder %v3648_v7, 0.0004427343  ;;  %15969 = vst [vmem:[#allocation239_spill] sm:$0xff] %v8273_v53  ;;  %15970 = vst [vmem:[#allocation240_spill] sm:$0xff] %v8277_v39  ;;  %v3660_v50 = vadd.f32 1.0, %v7458_v41  ;;  %v8291_v24 = vpop.eup %6361  ;;  %6379 = vpow2.f32 %v3376_v28 }
 0x1af   :  { %v15967_v34 = vsel %vm8269_vm14, 4294967295, %v15966_v34  ;;  %v3663_v5 = vmul.f32 -0.5, %v7458_v41  ;;  %v15971_v12 = vld [vmem:[#allocation79_spill] sm:$0xff]  ;;  %v3655_v6 = vadd.f32 1.0, %v3654_v31  ;;  %v3657_v53 = vand.u32 2147483647, %v7431_v33 }
 0x1b0   :  { %15968 = vst [vmem:[#allocation238_spill] sm:$0xff] %v15967_v34  ;;  %v8284_v7 = vsub.f32 %v15971_v12, %v15944_v21  ;;  %15973 = vst [vmem:[#allocation241_spill] sm:$0xff] %v8291_v24  ;;  %v3382_v4 = vmul.f32 1.442695, %v3175_v38  ;;  %v3380_v18 = vmul.f32 1.442695, %v3174_v60  ;;  %v8304_v38 = vpop.eup %6363  ;;  %6381 = vlog2.f32 %v3660_v50  ;;  %v8317_v11 = vpop.permute.xlu0 %900 }
 0x1b1   :  { %v15974_v39 = vand.u32 2147483647, %v8216_v32  ;;  %v15975_v8 = vand.u32 2147483647, %v8228_v3  ;;  %1137 = vbcast.lane.b32.xlu1 %v8087_v9, 344  ;;  %1133 = vbcast.lane.b32.xlu0 %v8087_v9, 336  ;;  %v8315_v32 = vpop.permute.xlu1 %904  ;;  %v8320_v31 = vmul.f32 %v7431_v33, %v3655_v6 }
 0x1b2   :  { %15972 = vst [vmem:[#allocation79_spill] sm:$0xff] %v8284_v7  ;;  %15976 = vst [vmem:[#allocation242_spill] sm:$0xff] %v8304_v38  ;;  %v15977_v60 = vld [vmem:[#allocation80_spill] sm:$0xff]  ;;  %v8310_v28 = vmul.f32 0.6931472, %v6360_v1  ;;  %6383 = vpow2.f32 %v3382_v4  ;;  %v3669_v3 = vadd.f32 1.0, %v7451_v49 }
 0x1b3   :  { %v3177_v54 = vsub.f32 0.0, %v15974_v39  ;;  %v3176_v12 = vsub.f32 0.0, %v15975_v8  ;;  %v8308_v45 = vsub.f32 %v15977_v60, %v15944_v21  ;;  %v3664_v39 = vadd.f32 1.0, %v3663_v5  ;;  %v6366_v8 = vpop.eup %6365  ;;  %15981 = vst [vmem:[#allocation244_spill] sm:$0xff] %v8315_v32  ;;  %15982 = vst [vmem:[#allocation245_spill] sm:$0xff] %v8317_v11  ;;  %v15988_v5 = vld [vmem:[#allocation83_spill] sm:$0xff] }
 0x1b4   :  { %15979 = vst [vmem:[#allocation243_spill] sm:$0xff] %v8310_v28  ;;  %v15980_v52 = vand.u32 2147483647, %v8244_v57  ;;  %15983 = vst [vmem:[#allocation246_spill] sm:$0xff] %v8320_v31  ;;  %vm8322_vm15 = vcmp.lt.f32.partialorder %v3657_v53, 0.0004427343  ;;  %v8326_v1 = vpop.eup %6367  ;;  %6385 = vpow2.f32 %v3380_v18  ;;  %v8363_v15 = vpop.permute.xlu0 %908 }
 0x1b5   :  { %15978 = vst [vmem:[#allocation80_spill] sm:$0xff] %v8308_v45  ;;  %v15984_v60 = vmov 0  ;;  %15987 = vst [vmem:[#allocation248_spill] sm:$0xff] %v8326_v1  ;;  %v3386_v50 = vmul.f32 1.442695, %v3177_v54  ;;  %v15991_v53 = vld [vmem:[#allocation84_spill] sm:$0xff]  ;;  %v8341_v4 = vpop.eup %6369  ;;  %v8361_v54 = vpop.permute.xlu1 %912  ;;  %6387 = vlog2.f32 %v3669_v3 }
 0x1b6   :  { %v3179_v24 = vsub.f32 0.0, %v15980_v52  ;;  %v15985_v60 = vsel %vm8322_vm15, 4294967295, %v15984_v60  ;;  %v8330_v52 = vsub.f32 %v15988_v5, %v15944_v21  ;;  %v3384_v38 = vmul.f32 1.442695, %v3176_v12  ;;  %1145 = vbcast.lane.b32.xlu1 %v8087_v9, 360  ;;  %1141 = vbcast.lane.b32.xlu0 %v8087_v9, 352  ;;  %v8353_v5 = vpop.eup %6371 }
 0x1b7   :  { %15986 = vst [vmem:[#allocation247_spill] sm:$0xff] %v15985_v60  ;;  %v15990_v57 = vand.u32 2147483647, %v8265_v19  ;;  %v8337_v6 = vsub.f32 %v15991_v53, %v15944_v21  ;;  %15993 = vst [vmem:[#allocation249_spill] sm:$0xff] %v8341_v4  ;;  %v8348_v12 = vmul.f32 0.6931472, %v6366_v8  ;;  %6389 = vpow2.f32 %v3386_v50  ;;  %v8379_v18 = vpop.eup %6373 }
 0x1b8   :  { %15989 = vst [vmem:[#allocation83_spill] sm:$0xff] %v8330_v52  ;;  %15996 = vst [vmem:[#allocation252_spill] sm:$0xff] %v8353_v5  ;;  %v3390_v53 = vmul.f32 1.442695, %v3179_v24  ;;  %v15997_v1 = vand.u32 2147483647, %v8284_v7  ;;  %6391 = vpow2.f32 %v3384_v38 }
 0x1b9   :  { %v3178_v33 = vsub.f32 0.0, %v15990_v57  ;;  %15992 = vst [vmem:[#allocation84_spill] sm:$0xff] %v8337_v6  ;;  %15994 = vst [vmem:[#allocation250_spill] sm:$0xff] %v8348_v12  ;;  %v8351_v57 = vmul.f32 %v7458_v41, %v3664_v39  ;;  %v15998_v4 = vld [vmem:[#allocation90_spill] sm:$0xff]  ;;  %v3666_v8 = vand.u32 2147483647, %v7458_v41  ;;  %v8395_v38 = vpop.permute.xlu1 %920 }
 0x1ba   :  { %v3181_v19 = vsub.f32 0.0, %v15997_v1  ;;  %v8359_v17 = vsub.f32 %v15998_v4, %v15944_v21  ;;  %16000 = vst [vmem:[#allocation253_spill] sm:$0xff] %v8361_v54  ;;  %16001 = vst [vmem:[#allocation254_spill] sm:$0xff] %v8363_v15  ;;  %v16002_v39 = vld [vmem:[#allocation91_spill] sm:$0xff]  ;;  %v3678_v24 = vadd.f32 1.0, %v7506_v10  ;;  %1153 = vbcast.lane.b32.xlu1 %v8087_v9, 376  ;;  %v8388_v4 = vpop.eup %6375  ;;  %6393 = vpow2.f32 %v3390_v53 }
 0x1bb   :  { %15995 = vst [vmem:[#allocation251_spill] sm:$0xff] %v8351_v57  ;;  %v8369_v28 = vsub.f32 %v16002_v39, %v15944_v21  ;;  %v3388_v1 = vmul.f32 1.442695, %v3178_v33  ;;  %1149 = vbcast.lane.b32.xlu0 %v8087_v9, 368  ;;  %v16004_v5 = vld [vmem:[#allocation10_spill] sm:$0xff]  ;;  %16005 = vst [vmem:[#allocation255_spill] sm:$0xff] %v8379_v18  ;;  %v8393_v18 = vsub.f32 %v7300_v62, %v15944_v21 }
 0x1bc   :  { %15999 = vst [vmem:[#allocation90_spill] sm:$0xff] %v8359_v17  ;;  %v8377_v41 = vrot.slane %v7792_v48, %v16004_v5  ;;  %v16006_v39 = vand.u32 2147483647, %v8308_v45  ;;  %v3672_v33 = vmul.f32 -0.5, %v7451_v49  ;;  %16007 = vst [vmem:[#allocation256_spill] sm:$0xff] %v8388_v4  ;;  %v8404_v4 = vsub.f32 %v7302_v14, %v15944_v21  ;;  %v16020_v60 = vld [vmem:[#allocation103_spill] sm:$0xff] }
 0x1bd   :  { %16003 = vst [vmem:[#allocation91_spill] sm:$0xff] %v8369_v28  ;;  %v3394_v9 = vmul.f32 1.442695, %v3181_v19  ;;  %16008 = vst [vmem:[#allocation257_spill] sm:$0xff] %v8393_v18  ;;  %v16011_v45 = vand.u32 2147483647, %v8330_v52  ;;  %6395 = vlog2.f32 %v3678_v24  ;;  %v8406_v19 = vpop.eup %6377  ;;  %v8412_v48 = vsub.f32 %v7338_v23, %v15944_v21  ;;  %v8427_v5 = vpop.permute.xlu1 %928 }
 0x1be   :  { %v3180_v3 = vsub.f32 0.0, %v16006_v39  ;;  %16009 = vst [vmem:[#allocation258_spill] sm:$0xff] %v8395_v38  ;;  %v8397_v39 = vpop.permute.xlu0 %916  ;;  %16012 = vst [vmem:[#allocation260_spill] sm:$0xff] %v8404_v4  ;;  %6397 = vpow2.f32 %v3388_v1  ;;  %v16014_v62 = vand.u32 2147483647, %v8337_v6  ;;  %1164 = vbcast.lane.b32.xlu1 %v8377_v41, 264  ;;  %v8417_v50 = vpop.eup %6379  ;;  %v8421_v24 = vsub.f32 %v7340_v20, %v15944_v21 }
 0x1bf   :  { %16010 = vst [vmem:[#allocation259_spill] sm:$0xff] %v8397_v39  ;;  %v3183_v7 = vsub.f32 0.0, %v16011_v45  ;;  %16013 = vst [vmem:[#allocation261_spill] sm:$0xff] %v8406_v19  ;;  %1160 = vbcast.lane.b32.xlu0 %v8377_v41, 256  ;;  %v3687_v45 = vadd.f32 1.0, %v7486_v16  ;;  %v3673_v1 = vadd.f32 1.0, %v3672_v33  ;;  %v6382_v19 = vpop.eup %6381  ;;  %6399 = vpow2.f32 %v3394_v9 }
 0x1c0   :  { %v3182_v53 = vsub.f32 0.0, %v16014_v62  ;;  %16015 = vst [vmem:[#allocation262_spill] sm:$0xff] %v8417_v50  ;;  %v3392_v14 = vmul.f32 1.442695, %v3180_v3  ;;  %v3675_v62 = vand.u32 2147483647, %v7451_v49  ;;  %v8437_v9 = vsub.f32 %v16020_v60, %v15944_v21 }
 0x1c1   :  { %v16016_v23 = vand.u32 2147483647, %v8359_v17  ;;  %16017 = vst [vmem:[#allocation263_spill] sm:$0xff] %v8427_v5  ;;  %v3681_v3 = vmul.f32 -0.5, %v7506_v10  ;;  %v3398_v50 = vmul.f32 1.442695, %v3183_v7  ;;  %v8439_v17 = vpop.eup %6383  ;;  %6401 = vlog2.f32 %v3687_v45  ;;  %v8459_v33 = vpop.permute.xlu1 %936 }
 0x1c2   :  { %v8429_v12 = vpop.permute.xlu0 %924  ;;  %v16019_v20 = vand.u32 2147483647, %v8369_v28  ;;  %16021 = vst [vmem:[#allocation103_spill] sm:$0xff] %v8439_v17  ;;  %v16022_v26 = vld [vmem:[#allocation104_spill] sm:$0xff]  ;;  %1172 = vbcast.lane.b32.xlu1 %v8377_v41, 280  ;;  %v8448_v7 = vpop.eup %6385  ;;  %6403 = vpow2.f32 %v3392_v14  ;;  %16029 = vst [vmem:[#allocation267_spill] sm:$0xff] %v8459_v33 }
 0x1c3   :  { %v3185_v6 = vsub.f32 0.0, %v16016_v23  ;;  %16018 = vst [vmem:[#allocation264_spill] sm:$0xff] %v8429_v12  ;;  %v3396_v23 = vmul.f32 1.442695, %v3182_v53  ;;  %v8444_v34 = vsub.f32 %v16022_v26, %v15944_v21  ;;  %1168 = vbcast.lane.b32.xlu0 %v8377_v41, 272  ;;  %16023 = vst [vmem:[#allocation104_spill] sm:$0xff] %v8448_v7  ;;  %6405 = vpow2.f32 %v3398_v50 }
 0x1c4   :  { %v3184_v31 = vsub.f32 0.0, %v16019_v20  ;;  %v8451_v20 = vmul.f32 0.6931472, %v6382_v19  ;;  %vm8453_vm15 = vcmp.lt.f32.partialorder %v3666_v8, 0.0004427343  ;;  %v16025_v53 = vmov 0 }
 0x1c5   :  { %v16026_v53 = vsel %vm8453_vm15, 4294967295, %v16025_v53  ;;  %v3402_v52 = vmul.f32 1.442695, %v3185_v6  ;;  %v16028_v21 = vand.u32 2147483647, %v8393_v18  ;;  %v3682_v45 = vadd.f32 1.0, %v3681_v3  ;;  %v6388_v6 = vpop.eup %6387 }
 0x1c6   :  { %16024 = vst [vmem:[#allocation265_spill] sm:$0xff] %v8451_v20  ;;  %16027 = vst [vmem:[#allocation266_spill] sm:$0xff] %v16026_v53  ;;  %v8461_v17 = vpop.permute.xlu0 %932  ;;  %v3684_v7 = vand.u32 2147483647, %v7506_v10  ;;  %v3400_v14 = vmul.f32 1.442695, %v3184_v31  ;;  %6407 = vpow2.f32 %v3396_v23  ;;  %v8477_v31 = vmul.f32 %v7451_v49, %v3673_v1  ;;  %v8479_v50 = vpop.eup %6389 }
 0x1c7   :  { %v3187_v26 = vsub.f32 0.0, %v16028_v21  ;;  %16030 = vst [vmem:[#allocation268_spill] sm:$0xff] %v8461_v17  ;;  %v16031_v19 = vand.u32 2147483647, %v8404_v4  ;;  %vm8467_vm14 = vcmp.lt.f32.partialorder %v3675_v62, 0.0004427343  ;;  %v8485_v23 = vsub.f32 %v7405_v22, %v7476_v43  ;;  %v8492_v8 = vpop.eup %6391 }
 0x1c8   :  { %v16032_v28 = vmov 0  ;;  %v16035_v21 = vand.u32 2147483647, %v8412_v48  ;;  %1180 = vbcast.lane.b32.xlu1 %v8377_v41, 296  ;;  %1176 = vbcast.lane.b32.xlu0 %v8377_v41, 288  ;;  %16036 = vst [vmem:[#allocation270_spill] sm:$0xff] %v8477_v31  ;;  %v8496_v1 = vsub.f32 %v7407_v37, %v7476_v43  ;;  %v8503_v22 = vmul.f32 %v7506_v10, %v3682_v45 }
 0x1c9   :  { %v3186_v60 = vsub.f32 0.0, %v16031_v19  ;;  %v16033_v28 = vsel %vm8467_vm14, 4294967295, %v16032_v28  ;;  %16037 = vst [vmem:[#allocation271_spill] sm:$0xff] %v8479_v50  ;;  %v16038_v62 = vand.u32 2147483647, %v8421_v24  ;;  %16039 = vst [vmem:[#allocation272_spill] sm:$0xff] %v8485_v23  ;;  %v8498_v50 = vpop.permute.xlu1 %944  ;;  %v1402_v37 = vcombine.high %v7994_v51, %v7994_v51 }
 0x1ca   :  { %16034 = vst [vmem:[#allocation269_spill] sm:$0xff] %v16033_v28  ;;  %v3189_v18 = vsub.f32 0.0, %v16035_v21  ;;  %v3690_v3 = vmul.f32 -0.5, %v7486_v16  ;;  %16040 = vst [vmem:[#allocation273_spill] sm:$0xff] %v8492_v8  ;;  %v3406_v49 = vmul.f32 1.442695, %v3187_v26  ;;  %v8509_v21 = vpop.eup %6393  ;;  %6409 = vpow2.f32 %v3402_v52 }
 0x1cb   :  { %v3188_v19 = vsub.f32 0.0, %v16038_v62  ;;  %16041 = vst [vmem:[#allocation274_spill] sm:$0xff] %v8496_v1  ;;  %16042 = vst [vmem:[#allocation275_spill] sm:$0xff] %v8498_v50  ;;  %v8500_v62 = vpop.permute.xlu0 %940  ;;  %vm8505_vm13 = vcmp.lt.f32.partialorder %v3684_v7, 0.0004427343  ;;  %v16045_v4 = vmov 0  ;;  %v6396_v53 = vpop.eup %6395  ;;  %6411 = vpow2.f32 %v3400_v14 }
 0x1cc   :  { %16043 = vst [vmem:[#allocation276_spill] sm:$0xff] %v8500_v62  ;;  %16044 = vst [vmem:[#allocation277_spill] sm:$0xff] %v8503_v22  ;;  %v16046_v4 = vsel %vm8505_vm13, 4294967295, %v16045_v4  ;;  %v3404_v20 = vmul.f32 1.442695, %v3186_v60  ;;  %1188 = vbcast.lane.b32.xlu1 %v8377_v41, 312  ;;  %v8522_v45 = vpop.eup %6397  ;;  %6413 = vpow2.f32 %v3406_v49  ;;  %v8535_v14 = vrot.slane %v1402_v37, %v6742_v2 }
 0x1cd   :  { %16047 = vst [vmem:[#allocation278_spill] sm:$0xff] %v16046_v4  ;;  %16048 = vst [vmem:[#allocation279_spill] sm:$0xff] %v8509_v21  ;;  %v16049_v26 = vand.u32 2147483647, %v8437_v9  ;;  %v8515_v57 = vmul.f32 0.6931472, %v6388_v6  ;;  %v8532_v17 = vpop.eup %6399 }
 0x1ce   :  { %v3410_v62 = vmul.f32 1.442695, %v3189_v18  ;;  %v16051_v10 = vand.u32 2147483647, %v8444_v34  ;;  %1184 = vbcast.lane.b32.xlu0 %v8377_v41, 304  ;;  %v3699_v60 = vmul.f32 -0.5, %v7535_v56  ;;  %v8526_v18 = vpop.permute.xlu1 %952  ;;  %6415 = vpow2.f32 %v3404_v20  ;;  %v6402_v51 = vpop.eup %6401 }
 0x1cf   :  { %v3191_v8 = vsub.f32 0.0, %v16049_v26  ;;  %16050 = vst [vmem:[#allocation280_spill] sm:$0xff] %v8515_v57  ;;  %16052 = vst [vmem:[#allocation281_spill] sm:$0xff] %v8522_v45  ;;  %v3408_v26 = vmul.f32 1.442695, %v3188_v19  ;;  %v3691_v6 = vadd.f32 1.0, %v3690_v3  ;;  %v8528_v21 = vpop.permute.xlu0 %948  ;;  %v8554_v37 = vpop.eup %6403 }
 0x1d0   :  { %v3190_v7 = vsub.f32 0.0, %v16051_v10  ;;  %16053 = vst [vmem:[#allocation282_spill] sm:$0xff] %v8526_v18  ;;  %16054 = vst [vmem:[#allocation283_spill] sm:$0xff] %v8528_v21  ;;  %v3693_v10 = vand.u32 2147483647, %v7486_v16  ;;  %v3696_v50 = vadd.f32 1.0, %v7535_v56  ;;  %6417 = vpow2.f32 %v3410_v62 }
 0x1d1   :  { %16055 = vst [vmem:[#allocation284_spill] sm:$0xff] %v8532_v17  ;;  %v3414_v45 = vmul.f32 1.442695, %v3191_v8  ;;  %v8537_v19 = vmul.f32 0.6931472, %v6396_v53  ;;  %1196 = vbcast.lane.b32.xlu1 %v8377_v41, 328  ;;  %6419 = vpow2.f32 %v3408_v26  ;;  %v8549_v53 = vsub.f32 %v7446_v63, %v7476_v43 }
 0x1d2   :  { %v3412_v3 = vmul.f32 1.442695, %v3190_v7  ;;  %1192 = vbcast.lane.b32.xlu0 %v8377_v41, 320  ;;  %v3700_v52 = vadd.f32 1.0, %v3699_v60  ;;  %v16057_v20 = vand.u32 2147483647, %v8485_v23  ;;  %v8552_v62 = vmul.f32 %v7486_v16, %v3691_v6  ;;  %v964_v26 = vpop.permute.xlu1 %963  ;;  %v8576_v6 = vpop.eup %6405 }
 0x1d3   :  { %16056 = vst [vmem:[#allocation285_spill] sm:$0xff] %v8537_v19  ;;  %16058 = vst [vmem:[#allocation286_spill] sm:$0xff] %v8549_v53  ;;  %v16061_v7 = vand.u32 2147483647, %v8496_v1  ;;  %v8560_v60 = vsub.f32 %v7448_v13, %v7476_v43  ;;  %v960_v49 = vpop.permute.xlu0 %959  ;;  %vm8562_vm14 = vcmp.lt.f32.partialorder %v3693_v10, 0.0004427343  ;;  %6421 = vlog2.f32 %v3696_v50 }
 0x1d4   :  { %v3193_v8 = vsub.f32 0.0, %v16057_v20  ;;  %16059 = vst [vmem:[#allocation287_spill] sm:$0xff] %v8552_v62  ;;  %16060 = vst [vmem:[#allocation288_spill] sm:$0xff] %v8554_v37  ;;  %v16063_v20 = vmov 0  ;;  %6423 = vpow2.f32 %v3414_v45  ;;  %v8567_v16 = vsub.f32 %v964_v26, %v8535_v14  ;;  %v16072_v37 = vld [vmem:[#allocation117_spill] sm:$0xff]  ;;  %v16074_v10 = vld [vmem:[#allocation118_spill] sm:$0xff] }
 0x1d5   :  { %v3192_v17 = vsub.f32 0.0, %v16061_v7  ;;  %16062 = vst [vmem:[#allocation289_spill] sm:$0xff] %v8560_v60  ;;  %v16064_v20 = vsel %vm8562_vm14, 4294967295, %v16063_v20  ;;  %v8570_v63 = vsub.f32 %v960_v49, %v8535_v14  ;;  %16068 = vst [vmem:[#allocation293_spill] sm:$0xff] %v8576_v6  ;;  %6425 = vpow2.f32 %v3412_v3  ;;  %1204 = vbcast.lane.b32.xlu1 %v8377_v41, 344  ;;  %v8586_v49 = vpop.eup %6407  ;;  %v16128_v21 = vld [vmem:[#allocation129_spill] sm:$0xff] }
 0x1d6   :  { %16065 = vst [vmem:[#allocation290_spill] sm:$0xff] %v16064_v20  ;;  %16066 = vst [vmem:[#allocation291_spill] sm:$0xff] %v8567_v16  ;;  %1200 = vbcast.lane.b32.xlu0 %v8377_v41, 336  ;;  %v8580_v50 = vmul.f32 0.6931472, %v6402_v51  ;;  %v8583_v45 = vmul.f32 %v7535_v56, %v3700_v52  ;;  %v2745_v13 = vmul.f32 %v8567_v16, %v7403_v36 }
 0x1d7   :  { %16067 = vst [vmem:[#allocation292_spill] sm:$0xff] %v8570_v63  ;;  %16071 = vst [vmem:[#allocation296_spill] sm:$0xff] %v8586_v49  ;;  %v3418_v7 = vmul.f32 1.442695, %v3193_v8  ;;  %v2744_v3 = vmul.f32 %v8570_v63, %v7418_v47  ;;  %v3416_v6 = vmul.f32 1.442695, %v3192_v17  ;;  %v8596_v52 = vsub.f32 %v16072_v37, %v7476_v43  ;;  %v972_v8 = vpop.permute.xlu1 %971  ;;  %v968_v49 = vpop.permute.xlu0 %967 }
 0x1d8   :  { %16069 = vst [vmem:[#allocation294_spill] sm:$0xff] %v8580_v50  ;;  %16070 = vst [vmem:[#allocation295_spill] sm:$0xff] %v8583_v45  ;;  %v8600_v1 = vsub.f32 %v16074_v10, %v7476_v43  ;;  %vm2873_vm13 = vcmp.lt.f32.partialorder %v2745_v13, 0.0  ;;  %v8603_v26 = vsub.f32 %v972_v8, %v8535_v14  ;;  %v8606_v63 = vsub.f32 %v968_v49, %v8535_v14  ;;  %v8623_v49 = vpop.eup %6409 }
 0x1d9   :  { %16073 = vst [vmem:[#allocation117_spill] sm:$0xff] %v8596_v52  ;;  %vm2872_vm15 = vcmp.lt.f32.partialorder %v2744_v3, 0.0  ;;  %v16078_v17 = vand.u32 2147483647, %v7403_v36  ;;  %v16079_v37 = vand.u32 2147483647, %v7418_v47  ;;  %6427 = vpow2.f32 %v3418_v7  ;;  %v8631_v23 = vpop.eup %6411 }
 0x1da   :  { %16075 = vst [vmem:[#allocation118_spill] sm:$0xff] %v8600_v1  ;;  %16076 = vst [vmem:[#allocation297_spill] sm:$0xff] %v8603_v26  ;;  %1212 = vbcast.lane.b32.xlu1 %v8377_v41, 360  ;;  %1208 = vbcast.lane.b32.xlu0 %v8377_v41, 352  ;;  %v3705_v10 = vadd.f32 1.0, %v7524_v40  ;;  %v16082_v47 = vld [vmem:[#allocation111_spill] sm:$0xff]  ;;  %6429 = vpow2.f32 %v3416_v6 }
 0x1db   :  { %16077 = vst [vmem:[#allocation298_spill] sm:$0xff] %v8606_v63  ;;  %v8610_v51 = vsel %vm2873_vm13, %v16078_v17, 0.0  ;;  %v8614_v16 = vsel %vm2872_vm15, %v16079_v37, 0.0  ;;  %16080 = vst [vmem:[#allocation299_spill] sm:$0xff] %v8623_v49  ;;  %v16081_v36 = vand.u32 2147483647, %v8549_v53  ;;  %v2747_v8 = vmul.f32 %v8603_v26, %v16082_v47  ;;  %v980_v7 = vpop.permute.xlu1 %979  ;;  %v976_v50 = vpop.permute.xlu0 %975 }
 0x1dc   :  { %v16083_v17 = vld [vmem:[#allocation112_spill] sm:$0xff]  ;;  %16084 = vst [vmem:[#allocation111_spill] sm:$0xff] %v8631_v23  ;;  %v16085_v19 = vand.u32 2147483647, %v8560_v60  ;;  %v8638_v53 = vpop.eup %6413  ;;  %v8644_v23 = vsub.f32 %v976_v50, %v8535_v14  ;;  %v16090_v13 = vand.u32 2147483647, %v16082_v47  ;;  %6431 = vlog2.f32 %v3705_v10 }
 0x1dd   :  { %v3195_v3 = vsub.f32 0.0, %v16081_v36  ;;  %v2746_v37 = vmul.f32 %v8606_v63, %v16083_v17  ;;  %v3708_v36 = vmul.f32 -0.5, %v7524_v40  ;;  %16086 = vst [vmem:[#allocation112_spill] sm:$0xff] %v8638_v53  ;;  %vm2875_vm13 = vcmp.lt.f32.partialorder %v2747_v8, 0.0  ;;  %v8659_v8 = vld [vmem:[%s6747_s23 + $0x8] sm:$0xff]  ;;  %v16095_v53 = vld [vmem:[#allocation116_spill] sm:$0xff] }
 0x1de   :  { %v3194_v20 = vsub.f32 0.0, %v16085_v19  ;;  %v8641_v63 = vsub.f32 %v980_v7, %v8535_v14  ;;  %16088 = vst [vmem:[#allocation301_spill] sm:$0xff] %v8644_v23  ;;  %v8646_v19 = vpop.eup %6415  ;;  %v8650_v49 = vsel %vm2875_vm13, %v16090_v13, 0.0  ;;  %v16091_v26 = vand.u32 2147483647, %v16083_v17  ;;  %1220 = vbcast.lane.b32.xlu1 %v8377_v41, 376 }
 0x1df   :  { %vm2874_vm15 = vcmp.lt.f32.partialorder %v2746_v37, 0.0  ;;  %16089 = vst [vmem:[#allocation302_spill] sm:$0xff] %v8646_v19  ;;  %1216 = vbcast.lane.b32.xlu0 %v8377_v41, 368  ;;  %v16092_v37 = vld [vmem:[#allocation11_spill] sm:$0xff]  ;;  %v8665_v7 = vpop.eup %6417  ;;  %v3422_v6 = vmul.f32 1.442695, %v3195_v3  ;;  %v988_v4 = vpop.permute.xlu1 %987 }
 0x1e0   :  { %16087 = vst [vmem:[#allocation300_spill] sm:$0xff] %v8641_v63  ;;  %v8654_v60 = vsel %vm2874_vm15, %v16091_v26, 0.0  ;;  %v8663_v50 = vrot.slane %v8659_v8, %v16092_v37  ;;  %16093 = vst [vmem:[#allocation303_spill] sm:$0xff] %v8665_v7  ;;  %v16094_v47 = vld [vmem:[#allocation114_spill] sm:$0xff]  ;;  %v2748_v26 = vmul.f32 %v8644_v23, %v16095_v53  ;;  %v8671_v17 = vpop.eup %6419  ;;  %v3420_v19 = vmul.f32 1.442695, %v3194_v20  ;;  %v984_v57 = vpop.permute.xlu0 %983 }
 0x1e1   :  { %v2749_v13 = vmul.f32 %v8641_v63, %v16094_v47  ;;  %16096 = vst [vmem:[#allocation114_spill] sm:$0xff] %v8671_v17  ;;  %v16097_v41 = vand.u32 2147483647, %v8596_v52  ;;  %v16098_v22 = vand.u32 2147483647, %v8600_v1  ;;  %v3709_v7 = vadd.f32 1.0, %v3708_v36  ;;  %v8677_v3 = vpop.eup %6421 }
 0x1e2   :  { %vm2876_vm15 = vcmp.lt.f32.partialorder %v2748_v26, 0.0  ;;  %v8680_v63 = vsub.f32 %v988_v4, %v8535_v14  ;;  %v8683_v10 = vsub.f32 %v984_v57, %v8535_v14  ;;  %v8685_v20 = vpop.eup %6423  ;;  %v16105_v36 = vand.u32 2147483647, %v16095_v53  ;;  %1231 = vbcast.lane.b32.xlu1 %v8663_v50, 264  ;;  %v16107_v26 = vld [vmem:[#allocation121_spill] sm:$0xff]  ;;  %v16119_v52 = vld [vmem:[#allocation128_spill] sm:$0xff] }
 0x1e3   :  { %v3197_v62 = vsub.f32 0.0, %v16097_v41  ;;  %v3196_v37 = vsub.f32 0.0, %v16098_v22  ;;  %vm2877_vm13 = vcmp.lt.f32.partialorder %v2749_v13, 0.0  ;;  %16101 = vst [vmem:[#allocation305_spill] sm:$0xff] %v8685_v20  ;;  %v16102_v41 = vld [vmem:[#allocation120_spill] sm:$0xff]  ;;  %1227 = vbcast.lane.b32.xlu0 %v8663_v50, 256  ;;  %v8702_v4 = vpop.eup %6425  ;;  %6433 = vpow2.f32 %v3422_v6  ;;  %v996_v20 = vpop.permute.xlu1 %995 }
 0x1e4   :  { %16099 = vst [vmem:[#allocation116_spill] sm:$0xff] %v8680_v63  ;;  %16100 = vst [vmem:[#allocation304_spill] sm:$0xff] %v8683_v10  ;;  %v8689_v17 = vsub.f32 %v16102_v41, %v7476_v43  ;;  %v16104_v22 = vand.u32 2147483647, %v16094_v47  ;;  %v8697_v13 = vsel %vm2876_vm15, %v16105_v36, 0.0  ;;  %v3714_v57 = vadd.f32 1.0, %v7566_v46  ;;  %v992_v1 = vpop.permute.xlu0 %991 }
 0x1e5   :  { %16106 = vst [vmem:[#allocation306_spill] sm:$0xff] %v8702_v4  ;;  %v8706_v41 = vsub.f32 %v16107_v26, %v7476_v43  ;;  %v2751_v47 = vmul.f32 %v8680_v63, %v7498_v30  ;;  %v2750_v53 = vmul.f32 %v8683_v10, %v7518_v25  ;;  %6435 = vpow2.f32 %v3420_v19 }
 0x1e6   :  { %16103 = vst [vmem:[#allocation120_spill] sm:$0xff] %v8689_v17  ;;  %v8693_v23 = vsel %vm2877_vm13, %v16104_v22, 0.0  ;;  %v3426_v22 = vmul.f32 1.442695, %v3197_v62  ;;  %v3424_v36 = vmul.f32 1.442695, %v3196_v37  ;;  %v8714_v6 = vsub.f32 %v996_v20, %v8535_v14 }
 0x1e7   :  { %16108 = vst [vmem:[#allocation121_spill] sm:$0xff] %v8706_v41  ;;  %vm2879_vm13 = vcmp.lt.f32.partialorder %v2751_v47, 0.0  ;;  %vm2878_vm15 = vcmp.lt.f32.partialorder %v2750_v53, 0.0  ;;  %v8717_v26 = vsub.f32 %v992_v1, %v8535_v14  ;;  %v16111_v63 = vand.u32 2147483647, %v7498_v30  ;;  %1239 = vbcast.lane.b32.xlu1 %v8663_v50, 280 }
 0x1e8   :  { %16109 = vst [vmem:[#allocation307_spill] sm:$0xff] %v8714_v6  ;;  %v16112_v62 = vand.u32 2147483647, %v7518_v25  ;;  %1235 = vbcast.lane.b32.xlu0 %v8663_v50, 272  ;;  %v8731_v37 = vmul.f32 %v7524_v40, %v3709_v7  ;;  %v16114_v20 = vld [vmem:[#allocation122_spill] sm:$0xff]  ;;  %v16115_v53 = vld [vmem:[#allocation123_spill] sm:$0xff]  ;;  %6437 = vlog2.f32 %v3714_v57  ;;  %v8746_v4 = vsub.f32 %v16119_v52, %v7476_v43  ;;  %v1004_v7 = vpop.permute.xlu1 %1003  ;;  %v1000_v31 = vpop.permute.xlu0 %999 }
 0x1e9   :  { %16110 = vst [vmem:[#allocation308_spill] sm:$0xff] %v8717_v26  ;;  %v8722_v10 = vsel %vm2879_vm13, %v16111_v63, 0.0  ;;  %v2753_v47 = vmul.f32 %v8714_v6, %v16114_v20  ;;  %v2752_v30 = vmul.f32 %v8717_v26, %v16115_v53  ;;  %v8738_v63 = vpop.eup %6427  ;;  %v16117_v25 = vld [vmem:[#allocation127_spill] sm:$0xff]  ;;  %v8749_v1 = vmul.f32 -0.5, %v7566_v46 }
 0x1ea   :  { %v8726_v19 = vsel %vm2878_vm15, %v16112_v62, 0.0  ;;  %16113 = vst [vmem:[#allocation309_spill] sm:$0xff] %v8731_v37  ;;  %16116 = vst [vmem:[#allocation122_spill] sm:$0xff] %v8738_v63  ;;  %v8742_v62 = vsub.f32 %v16117_v25, %v7476_v43  ;;  %v3768_v6 = vadd.f32 1.0, %v7680_v58  ;;  %v8753_v57 = vsub.f32 %v1004_v7, %v8535_v14  ;;  %v8769_v7 = vpop.eup %6429 }
 0x1eb   :  { %16120 = vst [vmem:[#allocation127_spill] sm:$0xff] %v8746_v4  ;;  %vm2881_vm13 = vcmp.lt.f32.partialorder %v2753_v47, 0.0  ;;  %vm2880_vm15 = vcmp.lt.f32.partialorder %v2752_v30, 0.0  ;;  %v8756_v63 = vsub.f32 %v1000_v31, %v8535_v14  ;;  %6439 = vpow2.f32 %v3426_v22  ;;  %1247 = vbcast.lane.b32.xlu1 %v8663_v50, 296  ;;  %v16125_v47 = vld [vmem:[#allocation126_spill] sm:$0xff] }
 0x1ec   :  { %16118 = vst [vmem:[#allocation123_spill] sm:$0xff] %v8742_v62  ;;  %16121 = vst [vmem:[#allocation128_spill] sm:$0xff] %v8753_v57  ;;  %v16123_v25 = vand.u32 2147483647, %v16114_v20  ;;  %v16124_v26 = vand.u32 2147483647, %v16115_v53  ;;  %6441 = vpow2.f32 %v3424_v36  ;;  %v2755_v20 = vmul.f32 %v8753_v57, %v16128_v21  ;;  %v1008_v36 = vpop.permute.xlu0 %1007 }
 0x1ed   :  { %16122 = vst [vmem:[#allocation310_spill] sm:$0xff] %v8756_v63  ;;  %1243 = vbcast.lane.b32.xlu0 %v8663_v50, 288  ;;  %v3723_v30 = vadd.f32 1.0, %v16125_v47  ;;  %16126 = vst [vmem:[#allocation126_spill] sm:$0xff] %v8769_v7  ;;  %v16127_v31 = vand.u32 2147483647, %v8689_v17  ;;  %v1012_v7 = vpop.permute.xlu1 %1011  ;;  %6443 = vlog2.f32 %v3768_v6  ;;  %v8787_v57 = vsub.f32 %v1008_v36, %v8535_v14 }
 0x1ee   :  { %v8760_v52 = vsel %vm2881_vm13, %v16123_v25, 0.0  ;;  %v8764_v28 = vsel %vm2880_vm15, %v16124_v26, 0.0  ;;  %v16129_v25 = vld [vmem:[#allocation131_spill] sm:$0xff]  ;;  %v8777_v26 = vpop.eup %6431  ;;  %v16130_v18 = vand.u32 2147483647, %v8706_v41  ;;  %vm2883_vm13 = vcmp.lt.f32.partialorder %v2755_v20, 0.0 }
 0x1ef   :  { %v3199_v22 = vsub.f32 0.0, %v16127_v31  ;;  %v2754_v53 = vmul.f32 %v8756_v63, %v16129_v25  ;;  %v8784_v31 = vsub.f32 %v1012_v7, %v8535_v14  ;;  %16132 = vst [vmem:[#allocation131_spill] sm:$0xff] %v8787_v57  ;;  %v16133_v63 = vld [vmem:[#allocation134_spill] sm:$0xff]  ;;  %v16136_v12 = vand.u32 2147483647, %v16129_v25  ;;  %1255 = vbcast.lane.b32.xlu1 %v8663_v50, 312 }
 0x1f0   :  { %v3198_v33 = vsub.f32 0.0, %v16130_v18  ;;  %v8791_v17 = vsub.f32 %v16133_v63, %v7476_v43  ;;  %v16135_v18 = vand.u32 2147483647, %v16128_v21  ;;  %v8804_v6 = vmul.f32 0.6931472, %v8677_v3  ;;  %v16138_v7 = vld [vmem:[#allocation135_spill] sm:$0xff]  ;;  %v8821_v3 = vpop.eup %6433  ;;  %v1016_v32 = vpop.permute.xlu0 %1015 }
 0x1f1   :  { %vm2882_vm15 = vcmp.lt.f32.partialorder %v2754_v53, 0.0  ;;  %16131 = vst [vmem:[#allocation129_spill] sm:$0xff] %v8784_v31  ;;  %1251 = vbcast.lane.b32.xlu0 %v8663_v50, 304  ;;  %v8808_v20 = vsub.f32 %v16138_v7, %v7476_v43  ;;  %v16140_v63 = vld [vmem:[#allocation137_spill] sm:$0xff]  ;;  %v16141_v53 = vld [vmem:[#allocation12_spill] sm:$0xff]  ;;  %v16143_v25 = vmov 0  ;;  %v1020_v11 = vpop.permute.xlu1 %1019  ;;  %6445 = vlog2.f32 %v3723_v30 }
 0x1f2   :  { %16134 = vst [vmem:[#allocation134_spill] sm:$0xff] %v8791_v17  ;;  %v8795_v5 = vsel %vm2883_vm13, %v16135_v18, 0.0  ;;  %v8799_v41 = vsel %vm2882_vm15, %v16136_v12, 0.0  ;;  %16137 = vst [vmem:[#allocation311_spill] sm:$0xff] %v8804_v6  ;;  %v2757_v21 = vmul.f32 %v8784_v31, %v16140_v63  ;;  %v2756_v36 = vmul.f32 %v8787_v57, %v16141_v53  ;;  %v16146_v18 = vld [vmem:[#allocation147_spill] sm:$0xff] }
 0x1f3   :  { %16139 = vst [vmem:[#allocation135_spill] sm:$0xff] %v8808_v20  ;;  %v16142_v12 = vand.u32 2147483647, %v7535_v56  ;;  %v3777_v39 = vadd.f32 1.0, %v16146_v18  ;;  %16147 = vst [vmem:[#allocation12_spill] sm:$0xff] %v8821_v3  ;;  %v3726_v57 = vmul.f32 -0.5, %v16125_v47  ;;  %v8828_v56 = vpop.eup %6435  ;;  %v8834_v3 = vsub.f32 %v1016_v32, %v8535_v14 }
 0x1f4   :  { %v3430_v38 = vmul.f32 1.442695, %v3199_v22  ;;  %v16148_v7 = vand.u32 2147483647, %v8742_v62  ;;  %v16149_v15 = vand.u32 2147483647, %v8746_v4  ;;  %v1404_v37 = vcombine.high %v8235_v35, %v8235_v35 }
 0x1f5   :  { %vm8816_vm13 = vcmp.lt.f32.partialorder %v16142_v12, 0.0004427343  ;;  %16150 = vst [vmem:[#allocation147_spill] sm:$0xff] %v8828_v56  ;;  %vm2885_vm15 = vcmp.lt.f32.partialorder %v2757_v21, 0.0  ;;  %vm2884_vm14 = vcmp.lt.f32.partialorder %v2756_v36, 0.0  ;;  %v8831_v12 = vsub.f32 %v1020_v11, %v8535_v14  ;;  %16152 = vst [vmem:[#allocation313_spill] sm:$0xff] %v8834_v3  ;;  %v8862_v11 = vpop.permute.xlu0 %1026 }
 0x1f6   :  { %v16144_v25 = vsel %vm8816_vm13, 4294967295, %v16143_v25  ;;  %v3201_v54 = vsub.f32 0.0, %v16148_v7  ;;  %v3200_v31 = vsub.f32 0.0, %v16149_v15  ;;  %v16153_v7 = vand.u32 2147483647, %v16140_v63  ;;  %1263 = vbcast.lane.b32.xlu1 %v8663_v50, 328 }
 0x1f7   :  { %16145 = vst [vmem:[#allocation137_spill] sm:$0xff] %v16144_v25  ;;  %16151 = vst [vmem:[#allocation312_spill] sm:$0xff] %v8831_v12  ;;  %v16154_v15 = vand.u32 2147483647, %v16141_v53  ;;  %1259 = vbcast.lane.b32.xlu0 %v8663_v50, 320  ;;  %v2759_v32 = vmul.f32 %v8831_v12, %v7631_v27  ;;  %v16155_v14 = vld [vmem:[#allocation14_spill] sm:$0xff]  ;;  %6447 = vlog2.f32 %v3777_v39  ;;  %v8858_v53 = vpop.eup %6437 }
 0x1f8   :  { %v8839_v4 = vsel %vm2885_vm15, %v16153_v7, 0.0  ;;  %v2758_v21 = vmul.f32 %v8834_v3, %v16155_v14  ;;  %v16156_v63 = vand.u32 2147483647, %v7524_v40  ;;  %v16157_v36 = vmov 0  ;;  %16161 = vst [vmem:[#allocation315_spill] sm:$0xff] %v8862_v11  ;;  %v16163_v39 = vld [vmem:[#allocation140_spill] sm:$0xff] }
 0x1f9   :  { %v8843_v62 = vsel %vm2884_vm14, %v16154_v15, 0.0  ;;  %6449 = vpow2.f32 %v3430_v38  ;;  %v3428_v7 = vmul.f32 1.442695, %v3198_v33  ;;  %v3434_v30 = vmul.f32 1.442695, %v3201_v54  ;;  %v8860_v15 = vpop.permute.xlu1 %1030 }
 0x1fa   :  { %vm8854_vm15 = vcmp.lt.f32.partialorder %v16156_v63, 0.0004427343  ;;  %16160 = vst [vmem:[#allocation314_spill] sm:$0xff] %v8860_v15  ;;  %v3718_v22 = vadd.f32 1.0, %v8749_v1  ;;  %v3432_v56 = vmul.f32 1.442695, %v3200_v31  ;;  %v8869_v12 = vsub.f32 %v16163_v39, %v7476_v43  ;;  %v8881_v1 = vpop.eup %6439 }
 0x1fb   :  { %v16158_v36 = vsel %vm8854_vm15, 4294967295, %v16157_v36  ;;  %vm2887_vm14 = vcmp.lt.f32.partialorder %v2759_v32, 0.0  ;;  %vm2886_vm12 = vcmp.lt.f32.partialorder %v2758_v21, 0.0  ;;  %v3727_v40 = vadd.f32 1.0, %v3726_v57  ;;  %1271 = vbcast.lane.b32.xlu1 %v8663_v50, 344  ;;  %1267 = vbcast.lane.b32.xlu0 %v8663_v50, 336 }
 0x1fc   :  { %16159 = vst [vmem:[#allocation14_spill] sm:$0xff] %v16158_v36  ;;  %v16162_v63 = vand.u32 2147483647, %v8791_v17  ;;  %16164 = vst [vmem:[#allocation140_spill] sm:$0xff] %v8869_v12  ;;  %v16165_v38 = vand.u32 2147483647, %v7631_v27  ;;  %6451 = vpow2.f32 %v3428_v7  ;;  %v8906_v17 = vmul.f32 %v7566_v46, %v3718_v22 }
 0x1fd   :  { %v16166_v33 = vand.u32 2147483647, %v16155_v14  ;;  %16167 = vst [vmem:[#allocation316_spill] sm:$0xff] %v8881_v1  ;;  %v16168_v57 = vand.u32 2147483647, %v8808_v20  ;;  %v16169_v32 = vld [vmem:[#allocation141_spill] sm:$0xff]  ;;  %v8891_v14 = vpop.eup %6441  ;;  %6453 = vpow2.f32 %v3434_v30 }
 0x1fe   :  { %v3203_v3 = vsub.f32 0.0, %v16162_v63  ;;  %v8873_v54 = vsel %vm2887_vm14, %v16165_v38, 0.0  ;;  %v8887_v21 = vsub.f32 %v16169_v32, %v7476_v43  ;;  %v16170_v27 = vld [vmem:[#allocation133_spill] sm:$0xff]  ;;  %v3771_v39 = vmul.f32 -0.5, %v7680_v58  ;;  %16171 = vst [vmem:[#allocation141_spill] sm:$0xff] %v8891_v14  ;;  %v8893_v38 = vpop.permute.xlu1 %1038  ;;  %v6444_v20 = vpop.eup %6443  ;;  %16175 = vst [vmem:[#allocation319_spill] sm:$0xff] %v8906_v17 }
 0x1ff   :  { %v8877_v11 = vsel %vm2886_vm12, %v16166_v33, 0.0  ;;  %v3202_v31 = vsub.f32 0.0, %v16168_v57  ;;  %v3732_v63 = vadd.f32 1.0, %v16170_v27  ;;  %16172 = vst [vmem:[#allocation133_spill] sm:$0xff] %v8893_v38  ;;  %v8895_v33 = vpop.permute.xlu0 %1034  ;;  %v8902_v1 = vmul.f32 0.6931472, %v8777_v26 }
 0x200   :  { %16173 = vst [vmem:[#allocation317_spill] sm:$0xff] %v8895_v33  ;;  %v3720_v32 = vand.u32 2147483647, %v7566_v46  ;;  %v3729_v7 = vand.u32 2147483647, %v16125_v47  ;;  %v16176_v14 = vld [vmem:[#allocation152_spill] sm:$0xff]  ;;  %6455 = vpow2.f32 %v3432_v56  ;;  %v8914_v26 = vmul.f32 %v16125_v47, %v3727_v40 }
 0x201   :  { %16174 = vst [vmem:[#allocation318_spill] sm:$0xff] %v8902_v1  ;;  %v3786_v38 = vadd.f32 1.0, %v16176_v14  ;;  %v3438_v33 = vmul.f32 1.442695, %v3203_v3  ;;  %1279 = vbcast.lane.b32.xlu1 %v8663_v50, 360  ;;  %1275 = vbcast.lane.b32.xlu0 %v8663_v50, 352  ;;  %6457 = vlog2.f32 %v3732_v63 }
 0x202   :  { %16177 = vst [vmem:[#allocation152_spill] sm:$0xff] %v8914_v26  ;;  %v3436_v57 = vmul.f32 1.442695, %v3202_v31  ;;  %v3772_v46 = vadd.f32 1.0, %v3771_v39  ;;  %v16178_v22 = vld [vmem:[#allocation143_spill] sm:$0xff]  ;;  %v16179_v3 = vld [vmem:[#allocation144_spill] sm:$0xff]  ;;  %v8925_v15 = vpop.permute.xlu1 %1046 }
 0x203   :  { %v8919_v6 = vsub.f32 %v16178_v22, %v7476_v43  ;;  %v8923_v56 = vsub.f32 %v16179_v3, %v7476_v43  ;;  %16180 = vst [vmem:[#allocation143_spill] sm:$0xff] %v8925_v15  ;;  %v8927_v45 = vpop.permute.xlu0 %1042  ;;  %v3774_v40 = vand.u32 2147483647, %v7680_v58  ;;  %vm8934_vm12 = vcmp.lt.f32.partialorder %v3720_v32, 0.0004427343  ;;  %v16185_v43 = vld [vmem:[#allocation149_spill] sm:$0xff]  ;;  %v6446_v15 = vpop.eup %6445 }
 0x204   :  { %16181 = vst [vmem:[#allocation144_spill] sm:$0xff] %v8927_v45  ;;  %v16182_v31 = vmov 0  ;;  %v3770_v63 = vmul.f32 0.6931472, %v6444_v20  ;;  %v3780_v39 = vmul.f32 -0.5, %v16146_v18  ;;  %6459 = vlog2.f32 %v3786_v38  ;;  %v16187_v47 = vld [vmem:[#allocation19_spill] sm:$0xff]  ;;  %v6448_v36 = vpop.eup %6447 }
 0x205   :  { %v16183_v31 = vsel %vm8934_vm12, 4294967295, %v16182_v31  ;;  %v3795_v22 = vadd.f32 1.0, %v16185_v43  ;;  %v16186_v3 = vand.u32 2147483647, %v8869_v12  ;;  %1287 = vbcast.lane.b32.xlu1 %v8663_v50, 376  ;;  %1283 = vbcast.lane.b32.xlu0 %v8663_v50, 368  ;;  %v8946_v45 = vrot.slane %v8659_v8, %v16187_v47 }
 0x206   :  { %16184 = vst [vmem:[#allocation320_spill] sm:$0xff] %v16183_v31  ;;  %v3735_v32 = vmul.f32 -0.5, %v16170_v27  ;;  %v16188_v38 = vand.u32 2147483647, %v8887_v21  ;;  %v3773_v50 = vmul.f32 %v7680_v58, %v3772_v46  ;;  %v16190_v12 = vld [vmem:[#allocation150_spill] sm:$0xff]  ;;  %v8964_v25 = vpop.permute.xlu1 %1054  ;;  %v16194_v35 = vmov 0 }
 0x207   :  { %v3205_v30 = vsub.f32 0.0, %v16186_v3  ;;  %v8955_v3 = vmul.f32 0.6931472, %v8858_v53  ;;  %v8962_v20 = vsub.f32 %v16190_v12, %v7743_v61  ;;  %16192 = vst [vmem:[#allocation321_spill] sm:$0xff] %v8964_v25  ;;  %vm8968_vm14 = vcmp.lt.f32.partialorder %v3729_v7, 0.0004427343  ;;  %v8972_v53 = vpop.eup %6449 }
 0x208   :  { %v3204_v1 = vsub.f32 0.0, %v16188_v38  ;;  %v8966_v38 = vpop.permute.xlu0 %1050  ;;  %v16195_v35 = vsel %vm8968_vm14, 4294967295, %v16194_v35  ;;  %vm3775_vm15 = vcmp.lt.f32.partialorder %v3774_v40, 0.0004427343  ;;  %16197 = vst [vmem:[#allocation324_spill] sm:$0xff] %v8972_v53  ;;  %v16198_v58 = vld [vmem:[#allocation151_spill] sm:$0xff]  ;;  %6461 = vlog2.f32 %v3795_v22 }
 0x209   :  { %16189 = vst [vmem:[#allocation149_spill] sm:$0xff] %v8955_v3  ;;  %16191 = vst [vmem:[#allocation150_spill] sm:$0xff] %v8962_v20  ;;  %v8976_v46 = vsub.f32 %v16198_v58, %v7743_v61  ;;  %v3776_v47 = vsel %vm3775_vm15, %v3773_v50, %v3770_v63  ;;  %v3781_v8 = vadd.f32 1.0, %v3780_v39  ;;  %6463 = vpow2.f32 %v3438_v33  ;;  %1298 = vbcast.lane.b32.xlu1 %v8946_v45, 264  ;;  %v16238_v31 = vld [vmem:[#allocation142_spill] sm:$0xff] }
 0x20a   :  { %16193 = vst [vmem:[#allocation322_spill] sm:$0xff] %v8966_v38  ;;  %16196 = vst [vmem:[#allocation323_spill] sm:$0xff] %v16195_v35  ;;  %v3442_v12 = vmul.f32 1.442695, %v3205_v30  ;;  %1294 = vbcast.lane.b32.xlu0 %v8946_v45, 256  ;;  %v8981_v7 = vadd.f32 %v3776_v47, %v8614_v16  ;;  %6465 = vpow2.f32 %v3436_v57  ;;  %v3736_v38 = vadd.f32 1.0, %v3735_v32  ;;  %v8991_v22 = vpop.permute.xlu1 %1062  ;;  %v8997_v47 = vpop.eup %6451 }
 0x20b   :  { %16199 = vst [vmem:[#allocation151_spill] sm:$0xff] %v8976_v46  ;;  %v3783_v40 = vand.u32 2147483647, %v16146_v18  ;;  %v3440_v53 = vmul.f32 1.442695, %v3204_v1  ;;  %v8989_v30 = vrot.slane %v1404_v37, %v6742_v2  ;;  %16203 = vst [vmem:[#allocation326_spill] sm:$0xff] %v8991_v22  ;;  %v3782_v57 = vmul.f32 %v16146_v18, %v3781_v8 }
 0x20c   :  { %16200 = vst [vmem:[#allocation325_spill] sm:$0xff] %v8981_v7  ;;  %v3779_v25 = vmul.f32 0.6931472, %v6448_v36  ;;  %v16201_v58 = vand.u32 2147483647, %v8919_v6  ;;  %v8993_v50 = vpop.permute.xlu0 %1058  ;;  %16206 = vst [vmem:[#allocation329_spill] sm:$0xff] %v8997_v47  ;;  %6467 = vpow2.f32 %v3442_v12  ;;  %v9018_v8 = vmul.f32 %v16170_v27, %v3736_v38 }
 0x20d   :  { %v16202_v39 = vand.u32 2147483647, %v8923_v56  ;;  %16204 = vst [vmem:[#allocation327_spill] sm:$0xff] %v8993_v50  ;;  %v8995_v16 = vmul.f32 0.6931472, %v6446_v15  ;;  %v16207_v32 = vld [vmem:[#allocation155_spill] sm:$0xff]  ;;  %6469 = vpow2.f32 %v3440_v53 }
 0x20e   :  { %v3207_v63 = vsub.f32 0.0, %v16201_v58  ;;  %v3804_v58 = vadd.f32 1.0, %v16207_v32  ;;  %v16209_v37 = vld [vmem:[#allocation156_spill] sm:$0xff]  ;;  %1306 = vbcast.lane.b32.xlu1 %v8946_v45, 280  ;;  %1302 = vbcast.lane.b32.xlu0 %v8946_v45, 272  ;;  %16212 = vst [vmem:[#allocation331_spill] sm:$0xff] %v9018_v8  ;;  %v9025_v22 = vpop.permute.xlu1 %1070 }
 0x20f   :  { %v3206_v33 = vsub.f32 0.0, %v16202_v39  ;;  %16205 = vst [vmem:[#allocation328_spill] sm:$0xff] %v8995_v16  ;;  %v9003_v39 = vpop.eup %6453  ;;  %v9007_v7 = vsub.f32 %v16209_v37, %v7743_v61  ;;  %vm3784_vm15 = vcmp.lt.f32.partialorder %v3783_v40, 0.0004427343  ;;  %v3789_v37 = vmul.f32 -0.5, %v16176_v14  ;;  %v16213_v47 = vld [vmem:[#allocation157_spill] sm:$0xff] }
 0x210   :  { %16208 = vst [vmem:[#allocation155_spill] sm:$0xff] %v9003_v39  ;;  %v9015_v18 = vpop.eup %6455  ;;  %v3785_v12 = vsel %vm3784_vm15, %v3782_v57, %v3779_v25  ;;  %v3446_v1 = vmul.f32 1.442695, %v3207_v63  ;;  %v9023_v50 = vsub.f32 %v16213_v47, %v7743_v61  ;;  %16215 = vst [vmem:[#allocation332_spill] sm:$0xff] %v9025_v22  ;;  %v9027_v15 = vpop.permute.xlu0 %1066  ;;  %v16218_v38 = vand.u32 2147483647, %v8962_v20 }
 0x211   :  { %16210 = vst [vmem:[#allocation156_spill] sm:$0xff] %v9007_v7  ;;  %16211 = vst [vmem:[#allocation330_spill] sm:$0xff] %v9015_v18  ;;  %v6458_v36 = vpop.eup %6457  ;;  %v3444_v39 = vmul.f32 1.442695, %v3206_v33  ;;  %v9030_v40 = vadd.f32 %v3785_v12, %v8610_v51  ;;  %v16219_v25 = vand.u32 2147483647, %v8976_v46  ;;  %6471 = vlog2.f32 %v3804_v58 }
 0x212   :  { %16214 = vst [vmem:[#allocation157_spill] sm:$0xff] %v9023_v50  ;;  %16216 = vst [vmem:[#allocation333_spill] sm:$0xff] %v9027_v15  ;;  %v3209_v53 = vsub.f32 0.0, %v16218_v38  ;;  %v6460_v33 = vpop.eup %6459  ;;  %v16220_v18 = vld [vmem:[#allocation161_spill] sm:$0xff]  ;;  %1314 = vbcast.lane.b32.xlu1 %v8946_v45, 296  ;;  %1310 = vbcast.lane.b32.xlu0 %v8946_v45, 288  ;;  %6473 = vpow2.f32 %v3446_v1  ;;  %v9056_v20 = vpop.permute.xlu1 %1078 }
 0x213   :  { %16217 = vst [vmem:[#allocation334_spill] sm:$0xff] %v9030_v40  ;;  %v3208_v57 = vsub.f32 0.0, %v16219_v25  ;;  %v9043_v15 = vsub.f32 %v16220_v18, %v7743_v61  ;;  %v16222_v51 = vld [vmem:[#allocation130_spill] sm:$0xff]  ;;  %v3790_v58 = vadd.f32 1.0, %v3789_v37  ;;  %v3798_v63 = vmul.f32 -0.5, %v16185_v43  ;;  %v16225_v47 = vld [vmem:[#allocation153_spill] sm:$0xff] }
 0x214   :  { %v3741_v12 = vadd.f32 1.0, %v16222_v51  ;;  %v3744_v38 = vmul.f32 -0.5, %v16222_v51  ;;  %v16223_v25 = vld [vmem:[#allocation162_spill] sm:$0xff]  ;;  %v3813_v46 = vadd.f32 1.0, %v16225_v47  ;;  %v9058_v22 = vpop.permute.xlu0 %1074  ;;  %v3792_v26 = vand.u32 2147483647, %v16176_v14 }
 0x215   :  { %16221 = vst [vmem:[#allocation161_spill] sm:$0xff] %v9043_v15  ;;  %v9051_v40 = vsub.f32 %v16223_v25, %v7743_v61  ;;  %16226 = vst [vmem:[#allocation162_spill] sm:$0xff] %v9056_v20  ;;  %6475 = vpow2.f32 %v3444_v39  ;;  %v3450_v35 = vmul.f32 1.442695, %v3209_v53  ;;  %v3448_v25 = vmul.f32 1.442695, %v3208_v57  ;;  %v6462_v17 = vpop.eup %6461 }
 0x216   :  { %16227 = vst [vmem:[#allocation153_spill] sm:$0xff] %v9058_v22  ;;  %v16228_v37 = vand.u32 2147483647, %v16170_v27  ;;  %v16229_v3 = vmov 0  ;;  %v3788_v1 = vmul.f32 0.6931472, %v6460_v33  ;;  %6477 = vlog2.f32 %v3741_v12  ;;  %v9073_v53 = vpop.eup %6463  ;;  %v9081_v22 = vpop.permute.xlu1 %1086 }
 0x217   :  { %16224 = vst [vmem:[#allocation130_spill] sm:$0xff] %v9051_v40  ;;  %v16232_v18 = vand.u32 2147483647, %v9007_v7  ;;  %1322 = vbcast.lane.b32.xlu1 %v8946_v45, 312  ;;  %1318 = vbcast.lane.b32.xlu0 %v8946_v45, 304  ;;  %v3745_v39 = vadd.f32 1.0, %v3744_v38  ;;  %v3791_v57 = vmul.f32 %v16176_v14, %v3790_v58  ;;  %6479 = vlog2.f32 %v3813_v46  ;;  %v9077_v33 = vpop.eup %6465 }
 0x218   :  { %vm9064_vm15 = vcmp.lt.f32.partialorder %v16228_v37, 0.0004427343  ;;  %16233 = vst [vmem:[#allocation336_spill] sm:$0xff] %v9073_v53  ;;  %v3799_v37 = vadd.f32 1.0, %v3798_v63  ;;  %16234 = vst [vmem:[#allocation337_spill] sm:$0xff] %v9077_v33  ;;  %v9083_v7 = vpop.permute.xlu0 %1082  ;;  %v3750_v12 = vadd.f32 1.0, %v16238_v31  ;;  %6481 = vpow2.f32 %v3450_v35 }
 0x219   :  { %v16230_v3 = vsel %vm9064_vm15, 4294967295, %v16229_v3  ;;  %v3211_v20 = vsub.f32 0.0, %v16232_v18  ;;  %v16235_v18 = vand.u32 2147483647, %v9023_v50  ;;  %16236 = vst [vmem:[#allocation338_spill] sm:$0xff] %v9081_v22  ;;  %16237 = vst [vmem:[#allocation339_spill] sm:$0xff] %v9083_v7  ;;  %6483 = vpow2.f32 %v3448_v25 }
 0x21a   :  { %16231 = vst [vmem:[#allocation335_spill] sm:$0xff] %v16230_v3  ;;  %vm3793_vm14 = vcmp.lt.f32.partialorder %v3792_v26, 0.0004427343  ;;  %v3801_v38 = vand.u32 2147483647, %v16185_v43  ;;  %v9096_v26 = vpop.eup %6467  ;;  %v3807_v25 = vmul.f32 -0.5, %v16207_v32  ;;  %6485 = vlog2.f32 %v3750_v12 }
 0x21b   :  { %v3210_v16 = vsub.f32 0.0, %v16235_v18  ;;  %v9087_v27 = vmul.f32 0.6931472, %v6458_v36  ;;  %v3794_v14 = vsel %vm3793_vm14, %v3791_v57, %v3788_v1  ;;  %v3797_v63 = vmul.f32 0.6931472, %v6462_v17  ;;  %1330 = vbcast.lane.b32.xlu1 %v8946_v45, 328  ;;  %v9106_v57 = vpop.eup %6469 }
 0x21c   :  { %v3454_v46 = vmul.f32 1.442695, %v3211_v20  ;;  %v16240_v58 = vand.u32 2147483647, %v9043_v15  ;;  %1326 = vbcast.lane.b32.xlu0 %v8946_v45, 320  ;;  %v9094_v18 = vadd.f32 %v3794_v14, %v8654_v60  ;;  %16242 = vst [vmem:[#allocation341_spill] sm:$0xff] %v9096_v26  ;;  %v3800_v20 = vmul.f32 %v16185_v43, %v3799_v37  ;;  %v9112_v14 = vpop.permute.xlu1 %1097  ;;  %v9114_v26 = vpop.permute.xlu0 %1093 }
 0x21d   :  { %16239 = vst [vmem:[#allocation142_spill] sm:$0xff] %v9087_v27  ;;  %v16243_v35 = vand.u32 2147483647, %v9051_v40  ;;  %v16244_v1 = vld [vmem:[#allocation169_spill] sm:$0xff]  ;;  %16246 = vst [vmem:[#allocation342_spill] sm:$0xff] %v9106_v57  ;;  %v16247_v33 = vld [vmem:[#allocation170_spill] sm:$0xff] }
 0x21e   :  { %v3213_v53 = vsub.f32 0.0, %v16240_v58  ;;  %16241 = vst [vmem:[#allocation340_spill] sm:$0xff] %v9094_v18  ;;  %v9102_v17 = vsub.f32 %v16244_v1, %v7743_v61  ;;  %v3452_v58 = vmul.f32 1.442695, %v3210_v16  ;;  %v9110_v60 = vsub.f32 %v16247_v33, %v7743_v61  ;;  %16249 = vst [vmem:[#allocation343_spill] sm:$0xff] %v9112_v14  ;;  %v16252_v1 = vld [vmem:[#allocation173_spill] sm:$0xff]  ;;  %v6472_v18 = vpop.eup %6471 }
 0x21f   :  { %v3212_v36 = vsub.f32 0.0, %v16243_v35  ;;  %16250 = vst [vmem:[#allocation344_spill] sm:$0xff] %v9114_v26  ;;  %v9117_v35 = vmul.f32 %v16222_v51, %v3745_v39  ;;  %vm3802_vm14 = vcmp.lt.f32.partialorder %v3801_v38, 0.0004427343  ;;  %v9121_v43 = vsub.f32 %v16252_v1, %v7743_v61  ;;  %v16254_v57 = vld [vmem:[#allocation164_spill] sm:$0xff]  ;;  %1338 = vbcast.lane.b32.xlu1 %v8946_v45, 344 }
 0x220   :  { %16245 = vst [vmem:[#allocation169_spill] sm:$0xff] %v9102_v17  ;;  %16248 = vst [vmem:[#allocation170_spill] sm:$0xff] %v9110_v60  ;;  %v3803_v37 = vsel %vm3802_vm14, %v3800_v20, %v3797_v63  ;;  %v3822_v16 = vadd.f32 1.0, %v16254_v57  ;;  %v3458_v40 = vmul.f32 1.442695, %v3213_v53  ;;  %1334 = vbcast.lane.b32.xlu0 %v8946_v45, 336  ;;  %6487 = vpow2.f32 %v3454_v46  ;;  %v9140_v50 = vpop.permute.xlu1 %1105  ;;  %v9142_v39 = vpop.permute.xlu0 %1101 }
 0x221   :  { %16251 = vst [vmem:[#allocation345_spill] sm:$0xff] %v9117_v35  ;;  %16253 = vst [vmem:[#allocation173_spill] sm:$0xff] %v9121_v43  ;;  %v3753_v33 = vmul.f32 -0.5, %v16238_v31  ;;  %v9132_v38 = vadd.f32 %v3803_v37, %v8650_v49  ;;  %v3456_v12 = vmul.f32 1.442695, %v3212_v36  ;;  %v3808_v20 = vadd.f32 1.0, %v3807_v25  ;;  %v9145_v49 = vpop.eup %6473 }
 0x222   :  { %6489 = vpow2.f32 %v3452_v58  ;;  %v16256_v1 = vld [vmem:[#allocation174_spill] sm:$0xff]  ;;  %16258 = vst [vmem:[#allocation346_spill] sm:$0xff] %v9140_v50  ;;  %16259 = vst [vmem:[#allocation347_spill] sm:$0xff] %v9142_v39  ;;  %v3810_v26 = vand.u32 2147483647, %v16207_v32  ;;  %v3816_v25 = vmul.f32 -0.5, %v16225_v47  ;;  %v9149_v58 = vpop.eup %6475 }
 0x223   :  { %16255 = vst [vmem:[#allocation164_spill] sm:$0xff] %v9132_v38  ;;  %v9138_v15 = vsub.f32 %v16256_v1, %v7743_v61  ;;  %16260 = vst [vmem:[#allocation348_spill] sm:$0xff] %v9145_v49  ;;  %v3806_v36 = vmul.f32 0.6931472, %v6472_v18  ;;  %6491 = vlog2.f32 %v3822_v16  ;;  %v16262_v37 = vld [vmem:[#allocation179_spill] sm:$0xff]  ;;  %1346 = vbcast.lane.b32.xlu1 %v8946_v45, 360  ;;  %v6478_v46 = vpop.eup %6477 }
 0x224   :  { %16261 = vst [vmem:[#allocation349_spill] sm:$0xff] %v9149_v58  ;;  %6493 = vpow2.f32 %v3458_v40  ;;  %v9153_v1 = vsub.f32 %v16262_v37, %v7743_v61  ;;  %1342 = vbcast.lane.b32.xlu0 %v8946_v45, 352  ;;  %v16264_v63 = vld [vmem:[#allocation138_spill] sm:$0xff]  ;;  %v16265_v18 = vand.u32 2147483647, %v9102_v17  ;;  %v9162_v38 = vld [vmem:[%s6747_s23 + $0x10] sm:$0xff]  ;;  %v3809_v40 = vmul.f32 %v16207_v32, %v3808_v20  ;;  %v6480_v39 = vpop.eup %6479  ;;  %v9169_v53 = vpop.permute.xlu1 %1113 }
 0x225   :  { %16257 = vst [vmem:[#allocation174_spill] sm:$0xff] %v9138_v15  ;;  %v3759_v49 = vadd.f32 1.0, %v16264_v63  ;;  %6495 = vpow2.f32 %v3456_v12  ;;  %v16266_v58 = vld [vmem:[#allocation160_spill] sm:$0xff]  ;;  %v16267_v50 = vand.u32 2147483647, %v9110_v60  ;;  %16268 = vst [vmem:[#allocation138_spill] sm:$0xff] %v9169_v53  ;;  %v9171_v22 = vpop.permute.xlu0 %1109  ;;  %v9186_v53 = vpop.eup %6481 }
 0x226   :  { %16263 = vst [vmem:[#allocation179_spill] sm:$0xff] %v9153_v1  ;;  %v3215_v16 = vsub.f32 0.0, %v16265_v18  ;;  %v3831_v37 = vadd.f32 1.0, %v16266_v58  ;;  %16269 = vst [vmem:[#allocation160_spill] sm:$0xff] %v9171_v22  ;;  %v3762_v12 = vmul.f32 -0.5, %v16264_v63  ;;  %v16271_v32 = vld [vmem:[#allocation180_spill] sm:$0xff] }
 0x227   :  { %v3214_v14 = vsub.f32 0.0, %v16267_v50  ;;  %vm3811_vm14 = vcmp.lt.f32.partialorder %v3810_v26, 0.0004427343  ;;  %v16270_v18 = vand.u32 2147483647, %v9121_v43  ;;  %v9178_v20 = vsub.f32 %v16271_v32, %v7743_v61  ;;  %16277 = vst [vmem:[#allocation351_spill] sm:$0xff] %v9186_v53 }
 0x228   :  { %v16273_v27 = vand.u32 2147483647, %v16222_v51  ;;  %v16274_v50 = vmov 0  ;;  %v3812_v7 = vsel %vm3811_vm14, %v3809_v40, %v3806_v36  ;;  %v3817_v60 = vadd.f32 1.0, %v3816_v25  ;;  %1354 = vbcast.lane.b32.xlu1 %v8946_v45, 376  ;;  %1350 = vbcast.lane.b32.xlu0 %v8946_v45, 368  ;;  %v9204_v8 = vpop.permute.xlu1 %1121 }
 0x229   :  { %v3217_v17 = vsub.f32 0.0, %v16270_v18  ;;  %16272 = vst [vmem:[#allocation180_spill] sm:$0xff] %v9178_v20  ;;  %v9193_v26 = vrot.slane %v9162_v38, %v6742_v2  ;;  %v9196_v51 = vadd.f32 %v3812_v7, %v8697_v13  ;;  %v9199_v18 = vpop.eup %6483  ;;  %v3754_v36 = vadd.f32 1.0, %v3753_v33  ;;  %v16280_v40 = vld [vmem:[#allocation166_spill] sm:$0xff]  ;;  %v9206_v3 = vpop.permute.xlu0 %1117 }
 0x22a   :  { %vm9182_vm15 = vcmp.lt.f32.partialorder %v16273_v27, 0.0004427343  ;;  %v3819_v27 = vand.u32 2147483647, %v16225_v47  ;;  %16279 = vst [vmem:[#allocation353_spill] sm:$0xff] %v9199_v18  ;;  %6497 = vlog2.f32 %v3831_v37  ;;  %v3840_v32 = vadd.f32 1.0, %v16280_v40  ;;  %v6486_v33 = vpop.eup %6485 }
 0x22b   :  { %v16275_v50 = vsel %vm9182_vm15, 4294967295, %v16274_v50  ;;  %16278 = vst [vmem:[#allocation352_spill] sm:$0xff] %v9196_v51  ;;  %v3815_v25 = vmul.f32 0.6931472, %v6480_v39  ;;  %v3462_v22 = vmul.f32 1.442695, %v3215_v16  ;;  %6499 = vlog2.f32 %v3759_v49 }
 0x22c   :  { %16276 = vst [vmem:[#allocation350_spill] sm:$0xff] %v16275_v50  ;;  %v3460_v53 = vmul.f32 1.442695, %v3214_v14  ;;  %v16281_v45 = vand.u32 2147483647, %v9138_v15  ;;  %16282 = vst [vmem:[#allocation166_spill] sm:$0xff] %v9204_v8  ;;  %v3818_v39 = vmul.f32 %v16225_v47, %v3817_v60  ;;  %6501 = vlog2.f32 %v3840_v32 }
 0x22d   :  { %16283 = vst [vmem:[#allocation354_spill] sm:$0xff] %v9206_v3  ;;  %v3466_v13 = vmul.f32 1.442695, %v3217_v17  ;;  %v9209_v51 = vmul.f32 0.6931472, %v6478_v46  ;;  %v16286_v37 = vld [vmem:[#allocation185_spill] sm:$0xff]  ;;  %v9225_v60 = vpop.eup %6487  ;;  %6503 = vpow2.f32 %v3462_v22  ;;  %v9230_v15 = vpop.permute.xlu0 %1125 }
 0x22e   :  { %v3216_v43 = vsub.f32 0.0, %v16281_v45  ;;  %v16285_v16 = vand.u32 2147483647, %v9153_v1  ;;  %v9216_v45 = vsub.f32 %v16286_v37, %v7743_v61  ;;  %1583 = vbcast.lane.b32.xlu1 %v9193_v26, 264  ;;  %1579 = vbcast.lane.b32.xlu0 %v9193_v26, 256  ;;  %v3763_v17 = vadd.f32 1.0, %v3762_v12  ;;  %v9228_v1 = vpop.permute.xlu1 %1129 }
 0x22f   :  { %16284 = vst [vmem:[#allocation355_spill] sm:$0xff] %v9209_v51  ;;  %vm3820_vm14 = vcmp.lt.f32.partialorder %v3819_v27, 0.0004427343  ;;  %v16288_v49 = vld [vmem:[#allocation186_spill] sm:$0xff]  ;;  %v3825_v47 = vmul.f32 -0.5, %v16254_v57  ;;  %16290 = vst [vmem:[#allocation356_spill] sm:$0xff] %v9225_v60  ;;  %v9235_v27 = vpop.eup %6489  ;;  %6505 = vpow2.f32 %v3460_v53 }
 0x230   :  { %v3219_v14 = vsub.f32 0.0, %v16285_v16  ;;  %16287 = vst [vmem:[#allocation185_spill] sm:$0xff] %v9216_v45  ;;  %v9222_v46 = vsub.f32 %v16288_v49, %v7743_v61  ;;  %v3821_v7 = vsel %vm3820_vm14, %v3818_v39, %v3815_v25  ;;  %v3464_v16 = vmul.f32 1.442695, %v3216_v43  ;;  %v6699_v37 = vld [vmem:[%s6904_s5 + $0x8] sm:$0xff]  ;;  %16291 = vst [vmem:[#allocation357_spill] sm:$0xff] %v9228_v1  ;;  %v6492_v43 = vpop.eup %6491 }
 0x231   :  { %v1357_v18 = vcombine.high %v6699_v37, %v6699_v37  ;;  %16292 = vst [vmem:[#allocation358_spill] sm:$0xff] %v9230_v15  ;;  %v9233_v12 = vadd.f32 %v3821_v7, %v8693_v23  ;;  %16294 = vst [vmem:[#allocation360_spill] sm:$0xff] %v9235_v27  ;;  %v9238_v25 = vmul.f32 %v16238_v31, %v3754_v36  ;;  %v16295_v39 = vld [vmem:[#allocation165_spill] sm:$0xff]  ;;  %v16296_v37 = vand.u32 2147483647, %v9178_v20  ;;  %v9274_v20 = vpop.permute.xlu0 %1133  ;;  %v16315_v8 = vld [vmem:[#allocation191_spill] sm:$0xff] }
 0x232   :  { %16289 = vst [vmem:[#allocation186_spill] sm:$0xff] %v9222_v46  ;;  %v3849_v22 = vadd.f32 1.0, %v16295_v39  ;;  %v3470_v49 = vmul.f32 1.442695, %v3219_v14  ;;  %1591 = vbcast.lane.b32.xlu1 %v9193_v26, 280  ;;  %1587 = vbcast.lane.b32.xlu0 %v9193_v26, 272  ;;  %v9257_v7 = vmul.f32 %v16264_v63, %v3763_v17  ;;  %v9259_v14 = vpop.eup %6493  ;;  %6507 = vpow2.f32 %v3466_v13  ;;  %v9272_v17 = vpop.permute.xlu1 %1137 }
 0x233   :  { %16293 = vst [vmem:[#allocation359_spill] sm:$0xff] %v9233_v12  ;;  %v3218_v60 = vsub.f32 0.0, %v16296_v37  ;;  %v16297_v53 = vand.u32 2147483647, %v16238_v31  ;;  %v16298_v36 = vmov 0  ;;  %16300 = vst [vmem:[#allocation165_spill] sm:$0xff] %v9259_v14  ;;  %v9263_v12 = vpop.eup %6495  ;;  %6509 = vpow2.f32 %v3464_v16 }
 0x234   :  { %v3826_v27 = vadd.f32 1.0, %v3825_v47  ;;  %16301 = vst [vmem:[#allocation361_spill] sm:$0xff] %v9263_v12  ;;  %v16302_v31 = vld [vmem:[#allocation35_spill] sm:$0xff]  ;;  %v9270_v23 = vrot.slane %v1357_v18, %v15864_v44  ;;  %16304 = vst [vmem:[#allocation362_spill] sm:$0xff] %v9272_v17  ;;  %v3828_v13 = vand.u32 2147483647, %v16254_v57  ;;  %6511 = vlog2.f32 %v3849_v22 }
 0x235   :  { %vm9252_vm14 = vcmp.lt.f32.partialorder %v16297_v53, 0.0004427343  ;;  %v9267_v53 = vsub.f32 %v16302_v31, %v7743_v61  ;;  %16305 = vst [vmem:[#allocation363_spill] sm:$0xff] %v9274_v20  ;;  %v3824_v37 = vmul.f32 0.6931472, %v6492_v43  ;;  %v3834_v32 = vmul.f32 -0.5, %v16266_v58 }
 0x236   :  { %v16299_v36 = vsel %vm9252_vm14, 4294967295, %v16298_v36  ;;  %v16306_v47 = vld [vmem:[#allocation175_spill] sm:$0xff]  ;;  %6513 = vpow2.f32 %v3470_v49  ;;  %v3468_v16 = vmul.f32 1.442695, %v3218_v60  ;;  %v16307_v12 = vld [vmem:[#allocation202_spill] sm:$0xff]  ;;  %v16308_v31 = vld [vmem:[#allocation196_spill] sm:$0xff]  ;;  %v3827_v60 = vmul.f32 %v16254_v57, %v3826_v27 }
 0x237   :  { %16303 = vst [vmem:[#allocation35_spill] sm:$0xff] %v9267_v53  ;;  %v3858_v14 = vadd.f32 1.0, %v16306_v47  ;;  %v9281_v15 = vsub.f32 %v16308_v31, %v16307_v12  ;;  %1599 = vbcast.lane.b32.xlu1 %v9193_v26, 296  ;;  %1595 = vbcast.lane.b32.xlu0 %v9193_v26, 288  ;;  %v9285_v18 = vmul.f32 0.6931472, %v6486_v33  ;;  %v6498_v31 = vpop.eup %6497  ;;  %v9299_v51 = vsub.f32 %v16315_v8, %v7743_v61 }
 0x238   :  { %v16311_v20 = vand.u32 2147483647, %v9216_v45  ;;  %v16312_v17 = vand.u32 2147483647, %v9222_v46  ;;  %v16313_v1 = vld [vmem:[#allocation197_spill] sm:$0xff]  ;;  %v9303_v33 = vrot.slane %v9270_v23, %v15864_v44  ;;  %v3835_v45 = vadd.f32 1.0, %v3834_v32 }
 0x239   :  { %16309 = vst [vmem:[#allocation175_spill] sm:$0xff] %v9281_v15  ;;  %16310 = vst [vmem:[#allocation202_spill] sm:$0xff] %v9285_v18  ;;  %v9293_v49 = vsub.f32 %v16313_v1, %v16307_v12  ;;  %vm3829_vm15 = vcmp.lt.f32.partialorder %v3828_v13, 0.0004427343  ;;  %v6500_v1 = vpop.eup %6499  ;;  %v3843_v57 = vmul.f32 -0.5, %v16280_v40  ;;  %6515 = vlog2.f32 %v3858_v14  ;;  %v16319_v27 = vld [vmem:[#allocation39_spill] sm:$0xff] }
 0x23a   :  { %v3221_v43 = vsub.f32 0.0, %v16311_v20  ;;  %v3220_v22 = vsub.f32 0.0, %v16312_v17  ;;  %16316 = vst [vmem:[#allocation197_spill] sm:$0xff] %v9299_v51  ;;  %v9305_v20 = vpop.permute.xlu1 %1145  ;;  %v9307_v17 = vpop.permute.xlu0 %1141  ;;  %v3830_v46 = vsel %vm3829_vm15, %v3827_v60, %v3824_v37  ;;  %v2713_v3 = vmul.f32 %v9281_v15, %v16319_v27  ;;  %v16322_v37 = vld [vmem:[#allocation31_spill] sm:$0xff] }
 0x23b   :  { %16314 = vst [vmem:[#allocation196_spill] sm:$0xff] %v9293_v49  ;;  %16317 = vst [vmem:[#allocation191_spill] sm:$0xff] %v9305_v20  ;;  %1607 = vbcast.lane.b32.xlu1 %v9193_v26, 312  ;;  %1603 = vbcast.lane.b32.xlu0 %v9193_v26, 304  ;;  %v9315_v61 = vadd.f32 %v3830_v46, %v8726_v19  ;;  %v3837_v8 = vand.u32 2147483647, %v16266_v58  ;;  %6517 = vpow2.f32 %v3468_v16  ;;  %v6502_v15 = vpop.eup %6501 }
 0x23c   :  { %16318 = vst [vmem:[#allocation364_spill] sm:$0xff] %v9307_v17  ;;  %v16321_v17 = vld [vmem:[#allocation172_spill] sm:$0xff]  ;;  %v2712_v32 = vmul.f32 %v9293_v49, %v16322_v37  ;;  %v3833_v60 = vmul.f32 0.6931472, %v6498_v31  ;;  %v3474_v20 = vmul.f32 1.442695, %v3221_v43  ;;  %v9328_v46 = vrot.slane %v9303_v33, %v6742_v2  ;;  %v9340_v31 = vpop.eup %6503 }
 0x23d   :  { %16320 = vst [vmem:[#allocation39_spill] sm:$0xff] %v9315_v61  ;;  %v3867_v13 = vadd.f32 1.0, %v16321_v17  ;;  %v3472_v35 = vmul.f32 1.442695, %v3220_v22  ;;  %v16326_v49 = vand.u32 2147483647, %v16264_v63  ;;  %v3836_v14 = vmul.f32 %v16266_v58, %v3835_v45  ;;  %v9346_v18 = vpop.eup %6505 }
 0x23e   :  { %16323 = vst [vmem:[#allocation172_spill] sm:$0xff] %v9328_v46  ;;  %v9330_v61 = vpop.permute.xlu1 %1153  ;;  %v9332_v16 = vpop.permute.xlu0 %1149  ;;  %16329 = vst [vmem:[#allocation366_spill] sm:$0xff] %v9340_v31  ;;  %v16330_v43 = vand.u32 2147483647, %v9267_v53  ;;  %v3844_v19 = vadd.f32 1.0, %v3843_v57  ;;  %vm2841_vm14 = vcmp.lt.f32.partialorder %v2713_v3, 0.0 }
 0x23f   :  { %16324 = vst [vmem:[#allocation31_spill] sm:$0xff] %v9330_v61  ;;  %16325 = vst [vmem:[#allocation365_spill] sm:$0xff] %v9332_v16  ;;  %vm9336_vm15 = vcmp.lt.f32.partialorder %v16326_v49, 0.0004427343  ;;  %v3846_v46 = vand.u32 2147483647, %v16280_v40  ;;  %6519 = vlog2.f32 %v3867_v13  ;;  %v9352_v58 = vpop.eup %6507 }
 0x240   :  { %v3223_v22 = vsub.f32 0.0, %v16330_v43  ;;  %16331 = vst [vmem:[#allocation367_spill] sm:$0xff] %v9346_v18  ;;  %1615 = vbcast.lane.b32.xlu1 %v9193_v26, 328  ;;  %1611 = vbcast.lane.b32.xlu0 %v9193_v26, 320  ;;  %vm3838_vm12 = vcmp.lt.f32.partialorder %v3837_v8, 0.0004427343  ;;  %6521 = vpow2.f32 %v3474_v20  ;;  %v9365_v13 = vpop.eup %6509 }
 0x241   :  { %v16332_v63 = vld [vmem:[#allocation178_spill] sm:$0xff]  ;;  %vm2840_vm13 = vcmp.lt.f32.partialorder %v2712_v32, 0.0  ;;  %v3839_v31 = vsel %vm3838_vm12, %v3836_v14, %v3833_v60  ;;  %v3842_v16 = vmul.f32 0.6931472, %v6502_v15  ;;  %v3852_v43 = vmul.f32 -0.5, %v16295_v39  ;;  %16339 = vst [vmem:[#allocation372_spill] sm:$0xff] %v9365_v13 }
 0x242   :  { %v3876_v49 = vadd.f32 1.0, %v16332_v63  ;;  %16333 = vst [vmem:[#allocation178_spill] sm:$0xff] %v9352_v58  ;;  %v16334_v45 = vand.u32 2147483647, %v9299_v51  ;;  %v9356_v18 = vpop.permute.xlu1 %1164  ;;  %v9358_v61 = vpop.permute.xlu0 %1160  ;;  %v9360_v53 = vmul.f32 0.6931472, %v6500_v1  ;;  %v9363_v8 = vadd.f32 %v3839_v31, %v8722_v10 }
 0x243   :  { %16335 = vst [vmem:[#allocation368_spill] sm:$0xff] %v9356_v18  ;;  %16336 = vst [vmem:[#allocation369_spill] sm:$0xff] %v9358_v61  ;;  %v3478_v15 = vmul.f32 1.442695, %v3223_v22  ;;  %v16340_v14 = vld [vmem:[#allocation203_spill] sm:$0xff]  ;;  %v16342_v20 = vld [vmem:[#allocation204_spill] sm:$0xff]  ;;  %v6512_v18 = vpop.eup %6511 }
 0x244   :  { %v3222_v57 = vsub.f32 0.0, %v16334_v45  ;;  %16337 = vst [vmem:[#allocation370_spill] sm:$0xff] %v9360_v53  ;;  %16338 = vst [vmem:[#allocation371_spill] sm:$0xff] %v9363_v8  ;;  %v9369_v60 = vsub.f32 %v16340_v14, %v16307_v12  ;;  %v9373_v58 = vsub.f32 %v16342_v20, %v16307_v12  ;;  %v3845_v45 = vmul.f32 %v16280_v40, %v3844_v19  ;;  %v9384_v22 = vpop.eup %6513  ;;  %v16351_v20 = vld [vmem:[#allocation42_spill] sm:$0xff]  ;;  %v16367_v13 = vld [vmem:[#allocation213_spill] sm:$0xff] }
 0x245   :  { %v16344_v1 = vand.u32 2147483647, %v16319_v27  ;;  %v16345_v10 = vand.u32 2147483647, %v16322_v37  ;;  %1623 = vbcast.lane.b32.xlu1 %v9193_v26, 344  ;;  %1619 = vbcast.lane.b32.xlu0 %v9193_v26, 336  ;;  %6523 = vlog2.f32 %v3876_v49  ;;  %v9388_v40 = vsub.f32 %v8070_v29, %v16307_v12 }
 0x246   :  { %16341 = vst [vmem:[#allocation203_spill] sm:$0xff] %v9369_v60  ;;  %16343 = vst [vmem:[#allocation204_spill] sm:$0xff] %v9373_v58  ;;  %vm3847_vm12 = vcmp.lt.f32.partialorder %v3846_v46, 0.0004427343  ;;  %v3853_v27 = vadd.f32 1.0, %v3852_v43  ;;  %v3861_v3 = vmul.f32 -0.5, %v16306_v47  ;;  %6525 = vpow2.f32 %v3472_v35  ;;  %v9393_v32 = vpop.permute.xlu1 %1172  ;;  %v9395_v14 = vpop.permute.xlu0 %1168 }
 0x247   :  { %v2969_v61 = vsel %vm2841_vm14, %v16344_v1, 0.0  ;;  %v2968_v31 = vsel %vm2840_vm13, %v16345_v10, 0.0  ;;  %16346 = vst [vmem:[#allocation373_spill] sm:$0xff] %v9384_v22  ;;  %16347 = vst [vmem:[#allocation374_spill] sm:$0xff] %v9388_v40  ;;  %v3848_v19 = vsel %vm3847_vm12, %v3845_v45, %v3842_v16  ;;  %v9391_v37 = vmul.f32 1.442695, %v3222_v57  ;;  %v6516_v57 = vpop.eup %6515 }
 0x248   :  { %16348 = vst [vmem:[#allocation375_spill] sm:$0xff] %v9393_v32  ;;  %16349 = vst [vmem:[#allocation376_spill] sm:$0xff] %v9395_v14  ;;  %v9398_v46 = vadd.f32 %v3848_v19, %v8764_v28  ;;  %v3855_v49 = vand.u32 2147483647, %v16295_v39  ;;  %v2715_v29 = vmul.f32 %v9369_v60, %v16351_v20  ;;  %v16352_v1 = vld [vmem:[#allocation34_spill] sm:$0xff]  ;;  %6527 = vpow2.f32 %v3478_v15  ;;  %v16354_v45 = vld [vmem:[#allocation73_spill] sm:$0xff] }
 0x249   :  { %v2714_v16 = vmul.f32 %v9373_v58, %v16352_v1  ;;  %v3851_v43 = vmul.f32 0.6931472, %v6512_v18  ;;  %1631 = vbcast.lane.b32.xlu1 %v9193_v26, 360  ;;  %1627 = vbcast.lane.b32.xlu0 %v9193_v26, 352  ;;  %v16355_v10 = vld [vmem:[#allocation87_spill] sm:$0xff]  ;;  %v16359_v58 = vld [vmem:[#allocation93_spill] sm:$0xff]  ;;  %v9428_v8 = vsub.f32 %v8068_v59, %v16307_v12 }
 0x24a   :  { %16350 = vst [vmem:[#allocation377_spill] sm:$0xff] %v9398_v46  ;;  %v16356_v19 = vsel %vm7215_vm0, %v16354_v45, %v16355_v10  ;;  %v16360_v60 = vld [vmem:[#allocation102_spill] sm:$0xff]  ;;  %v16363_v18 = vld [vmem:[#allocation176_spill] sm:$0xff]  ;;  %v3854_v45 = vmul.f32 %v16295_v39, %v3853_v27  ;;  %v9433_v10 = vpop.eup %6517  ;;  %vm3856_vm0 = vcmp.lt.f32.partialorder %v3855_v49, 0.0004427343  ;;  %v10202_v50 = vld [vmem:[%s6747_s23 + $0x10] sm:$0xff] }
 0x24b   :  { %v9416_v22 = vadd.f32 %v16356_v19, %v2968_v31  ;;  %v16361_v46 = vsel %vm7322_vm2, %v16359_v58, %v16360_v60  ;;  %v3885_v15 = vadd.f32 1.0, %v16363_v18  ;;  %16364 = vst [vmem:[#allocation81_spill] sm:$0xff] %v9428_v8  ;;  %v16365_v14 = vld [vmem:[#allocation46_spill] sm:$0xff]  ;;  %v3862_v31 = vadd.f32 1.0, %v3861_v3  ;;  %16366 = vst [vmem:[#allocation73_spill] sm:$0xff] %v9433_v10  ;;  %v9441_v58 = vpop.permute.xlu0 %1176  ;;  %v16373_v49 = vld [vmem:[#allocation184_spill] sm:$0xff] }
 0x24c   :  { %v9423_v35 = vadd.f32 %v16361_v46, %v2969_v61  ;;  %v2716_v28 = vmul.f32 %v9388_v40, %v16365_v14  ;;  %v9437_v19 = vsub.f32 %v16367_v13, %v16307_v12  ;;  %v9439_v61 = vpop.permute.xlu1 %1180  ;;  %16370 = vst [vmem:[#allocation93_spill] sm:$0xff] %v9441_v58  ;;  %v3864_v59 = vand.u32 2147483647, %v16306_v47  ;;  %v16371_v27 = vld [vmem:[#allocation6_spill] sm:$0xff] }
 0x24d   :  { %16357 = vst [vmem:[#allocation42_spill] sm:$0xff] %v9416_v22  ;;  %16369 = vst [vmem:[#allocation99_spill] sm:$0xff] %v9439_v61  ;;  %v3870_v60 = vmul.f32 -0.5, %v16321_v17  ;;  %vm2843_vm2 = vcmp.lt.f32.partialorder %v2715_v29, 0.0  ;;  %vm2842_vm13 = vcmp.lt.f32.partialorder %v2714_v16, 0.0  ;;  %v3857_v46 = vsel %vm3856_vm0, %v3854_v45, %v3851_v43  ;;  %1639 = vbcast.lane.b32.xlu1 %v9193_v26, 376 }
 0x24e   :  { %16362 = vst [vmem:[#allocation34_spill] sm:$0xff] %v9423_v35  ;;  %16368 = vst [vmem:[#allocation87_spill] sm:$0xff] %v9437_v19  ;;  %v3860_v39 = vmul.f32 0.6931472, %v6516_v57  ;;  %1635 = vbcast.lane.b32.xlu0 %v9193_v26, 368  ;;  %v9449_v3 = vrot.slane %v9162_v38, %v16371_v27  ;;  %v9452_v13 = vadd.f32 %v3857_v46, %v8760_v52  ;;  %6529 = vlog2.f32 %v3885_v15  ;;  %v6520_v35 = vpop.eup %6519  ;;  %v16374_v22 = vld [vmem:[#allocation43_spill] sm:$0xff] }
 0x24f   :  { %v3894_v10 = vadd.f32 1.0, %v16373_v49  ;;  %v2717_v40 = vmul.f32 %v9428_v8, %v16374_v22  ;;  %vm2844_vm14 = vcmp.lt.f32.partialorder %v2716_v28, 0.0  ;;  %v16375_v43 = vld [vmem:[#allocation212_spill] sm:$0xff]  ;;  %v3863_v26 = vmul.f32 %v16306_v47, %v3862_v31  ;;  %v9466_v52 = vpop.permute.xlu0 %1184  ;;  %v16381_v8 = vld [vmem:[#allocation217_spill] sm:$0xff]  ;;  %v16383_v31 = vld [vmem:[#allocation182_spill] sm:$0xff] }
 0x250   :  { %16372 = vst [vmem:[#allocation102_spill] sm:$0xff] %v9452_v13  ;;  %v9459_v57 = vsub.f32 %v16375_v43, %v16307_v12  ;;  %v16377_v45 = vld [vmem:[#allocation48_spill] sm:$0xff]  ;;  %v9464_v58 = vpop.permute.xlu1 %1188  ;;  %16379 = vst [vmem:[#allocation213_spill] sm:$0xff] %v9466_v52  ;;  %vm3865_vm12 = vcmp.lt.f32.partialorder %v3864_v59, 0.0004427343  ;;  %v3871_v15 = vadd.f32 1.0, %v3870_v60  ;;  %v9469_v13 = vpop.eup %6521  ;;  %v9473_v61 = vsub.f32 %v16381_v8, %v16307_v12 }
 0x251   :  { %v2718_v27 = vmul.f32 %v9437_v19, %v16377_v45  ;;  %16378 = vst [vmem:[#allocation46_spill] sm:$0xff] %v9464_v58  ;;  %v3879_v46 = vmul.f32 -0.5, %v16332_v63  ;;  %16380 = vst [vmem:[#allocation6_spill] sm:$0xff] %v9469_v13  ;;  %v3866_v43 = vsel %vm3865_vm12, %v3863_v26, %v3860_v39  ;;  %v3873_v47 = vand.u32 2147483647, %v16321_v17  ;;  %v16384_v19 = vld [vmem:[#allocation218_spill] sm:$0xff] }
 0x252   :  { %16376 = vst [vmem:[#allocation176_spill] sm:$0xff] %v9459_v57  ;;  %16382 = vst [vmem:[#allocation184_spill] sm:$0xff] %v9473_v61  ;;  %v3903_v32 = vadd.f32 1.0, %v16383_v31  ;;  %v9479_v58 = vsub.f32 %v16384_v19, %v16307_v12  ;;  %1650 = vbcast.lane.b32.xlu1 %v9449_v3, 264  ;;  %1646 = vbcast.lane.b32.xlu0 %v9449_v3, 256  ;;  %v9484_v59 = vadd.f32 %v3866_v43, %v8799_v41  ;;  %v6524_v8 = vpop.eup %6523  ;;  %v16390_v43 = vld [vmem:[#allocation47_spill] sm:$0xff] }
 0x253   :  { %v3869_v60 = vmul.f32 0.6931472, %v6520_v35  ;;  %6531 = vlog2.f32 %v3894_v10  ;;  %v16387_v39 = vand.u32 2147483647, %v16351_v20  ;;  %v16388_v13 = vand.u32 2147483647, %v16352_v1  ;;  %v9501_v20 = vpop.permute.xlu0 %1192  ;;  %v9504_v16 = vpop.eup %6525 }
 0x254   :  { %16385 = vst [vmem:[#allocation43_spill] sm:$0xff] %v9479_v58  ;;  %16386 = vst [vmem:[#allocation212_spill] sm:$0xff] %v9484_v59  ;;  %vm2845_vm0 = vcmp.lt.f32.partialorder %v2717_v40, 0.0  ;;  %v1373_v19 = vcombine.high %v9270_v23, %v9270_v23  ;;  %v16389_v51 = vand.u32 2147483647, %v16365_v14  ;;  %v2719_v35 = vmul.f32 %v9459_v57, %v16390_v43  ;;  %v9499_v10 = vpop.permute.xlu1 %1196 }
 0x255   :  { %v2971_v26 = vsel %vm2843_vm2, %v16387_v39, 0.0  ;;  %v2970_v52 = vsel %vm2842_vm13, %v16388_v13, 0.0  ;;  %16391 = vst [vmem:[#allocation48_spill] sm:$0xff] %v9499_v10  ;;  %16392 = vst [vmem:[#allocation217_spill] sm:$0xff] %v9501_v20  ;;  %v3872_v29 = vmul.f32 %v16321_v17, %v3871_v15  ;;  %v3880_v1 = vadd.f32 1.0, %v3879_v46  ;;  %v16394_v13 = vld [vmem:[#allocation51_spill] sm:$0xff]  ;;  %v9513_v15 = vpop.eup %6527 }
 0x256   :  { %v2972_v41 = vsel %vm2844_vm14, %v16389_v51, 0.0  ;;  %16393 = vst [vmem:[#allocation182_spill] sm:$0xff] %v9504_v16  ;;  %v2721_v39 = vmul.f32 %v9473_v61, %v16394_v13  ;;  %vm3874_vm2 = vcmp.lt.f32.partialorder %v3873_v47, 0.0004427343  ;;  %v3882_v23 = vand.u32 2147483647, %v16332_v63 }
 0x257   :  { %6533 = vlog2.f32 %v3903_v32  ;;  %vm2846_vm13 = vcmp.lt.f32.partialorder %v2718_v27, 0.0  ;;  %v16395_v51 = vld [vmem:[#allocation52_spill] sm:$0xff]  ;;  %1658 = vbcast.lane.b32.xlu1 %v9449_v3, 280  ;;  %1654 = vbcast.lane.b32.xlu0 %v9449_v3, 272  ;;  %v3875_v28 = vsel %vm3874_vm2, %v3872_v29, %v3869_v60  ;;  %v3878_v17 = vmul.f32 0.6931472, %v6524_v8 }
 0x258   :  { %v2720_v14 = vmul.f32 %v9479_v58, %v16395_v51  ;;  %16396 = vst [vmem:[#allocation218_spill] sm:$0xff] %v9513_v15  ;;  %v9516_v46 = vrot.slane %v1373_v19, %v15864_v44  ;;  %v16398_v47 = vld [vmem:[#allocation85_spill] sm:$0xff]  ;;  %v16399_v61 = vld [vmem:[#allocation95_spill] sm:$0xff]  ;;  %v16403_v58 = vld [vmem:[#allocation96_spill] sm:$0xff]  ;;  %v9533_v60 = vadd.f32 %v3875_v28, %v8795_v5  ;;  %v16408_v8 = vand.u32 2147483647, %v16374_v22  ;;  %v9538_v29 = vpop.permute.xlu1 %1204 }
 0x259   :  { %v16400_v32 = vsel %vm7254_vm1, %v16398_v47, %v16399_v61  ;;  %v16404_v20 = vld [vmem:[#allocation107_spill] sm:$0xff]  ;;  %vm2847_vm14 = vcmp.lt.f32.partialorder %v2719_v35, 0.0  ;;  %v9540_v61 = vpop.permute.xlu0 %1200  ;;  %v3888_v59 = vmul.f32 -0.5, %v16363_v18  ;;  %vm2849_vm1 = vcmp.lt.f32.partialorder %v2721_v39, 0.0  ;;  %v16412_v22 = vld [vmem:[#allocation113_spill] sm:$0xff]  ;;  %v16420_v47 = vld [vmem:[#allocation110_spill] sm:$0xff] }
 0x25a   :  { %v9523_v57 = vadd.f32 %v16400_v32, %v2970_v52  ;;  %v16405_v10 = vsel %vm7370_vm3, %v16403_v58, %v16404_v20  ;;  %16407 = vst [vmem:[#allocation52_spill] sm:$0xff] %v9533_v60  ;;  %v2973_v19 = vsel %vm2845_vm0, %v16408_v8, 0.0  ;;  %v3881_v52 = vmul.f32 %v16332_v63, %v3880_v1  ;;  %v16416_v63 = vld [vmem:[#allocation224_spill] sm:$0xff]  ;;  %v16421_v32 = vld [vmem:[#allocation119_spill] sm:$0xff] }
 0x25b   :  { %v9530_v53 = vadd.f32 %v16405_v10, %v2971_v26  ;;  %v16409_v58 = vand.u32 2147483647, %v16377_v45  ;;  %v16411_v10 = vld [vmem:[#allocation108_spill] sm:$0xff]  ;;  %vm3883_vm3 = vcmp.lt.f32.partialorder %v3882_v23, 0.0004427343  ;;  %vm2848_vm12 = vcmp.lt.f32.partialorder %v2720_v14, 0.0  ;;  %v6530_v27 = vpop.eup %6529 }
 0x25c   :  { %16401 = vst [vmem:[#allocation47_spill] sm:$0xff] %v9523_v57  ;;  %v16413_v40 = vsel %vm7409_vm4, %v16411_v10, %v16412_v22  ;;  %v9556_v16 = vsub.f32 %v8169_v55, %v16307_v12  ;;  %v9560_v1 = vsub.f32 %v16416_v63, %v16307_v12  ;;  %1666 = vbcast.lane.b32.xlu1 %v9449_v3, 296  ;;  %v16418_v28 = vand.u32 2147483647, %v16390_v43  ;;  %v16426_v35 = vld [vmem:[#allocation124_spill] sm:$0xff]  ;;  %v16436_v39 = vld [vmem:[#allocation227_spill] sm:$0xff] }
 0x25d   :  { %16406 = vst [vmem:[#allocation51_spill] sm:$0xff] %v9530_v53  ;;  %v2974_v26 = vsel %vm2846_vm13, %v16409_v58, 0.0  ;;  %v9552_v20 = vadd.f32 %v16413_v40, %v2972_v41  ;;  %1662 = vbcast.lane.b32.xlu0 %v9449_v3, 288  ;;  %v3884_v45 = vsel %vm3883_vm3, %v3881_v52, %v3878_v17  ;;  %v9571_v23 = vrot.slane %v9516_v46, %v6742_v2  ;;  %v1213_v17 = vpop.permute.xlu1 %1212  ;;  %v1209_v52 = vpop.permute.xlu0 %1208  ;;  %v16427_v10 = vld [vmem:[#allocation136_spill] sm:$0xff]  ;;  %v16512_v53 = vld [vmem:[#allocation177_spill] sm:$0xff] }
 0x25e   :  { %16415 = vst [vmem:[#allocation85_spill] sm:$0xff] %v9556_v16  ;;  %16417 = vst [vmem:[#allocation95_spill] sm:$0xff] %v9560_v1  ;;  %v9567_v41 = vsel %vm2847_vm14, %v16418_v28, 0.0  ;;  %v16422_v8 = vsel %vm7466_vm5, %v16420_v47, %v16421_v32  ;;  %v9581_v5 = vadd.f32 %v3884_v45, %v8843_v62  ;;  %v16428_v22 = vsel %vm7551_vm6, %v16426_v35, %v16427_v10  ;;  %v16435_v43 = vld [vmem:[#allocation56_spill] sm:$0xff] }
 0x25f   :  { %16414 = vst [vmem:[#allocation88_spill] sm:$0xff] %v9552_v20  ;;  %v9578_v58 = vadd.f32 %v16422_v8, %v2973_v19  ;;  %v9588_v40 = vadd.f32 %v16428_v22, %v2974_v26  ;;  %v3889_v63 = vadd.f32 1.0, %v3888_v59  ;;  %v3891_v28 = vand.u32 2147483647, %v16363_v18  ;;  %v16434_v59 = vld [vmem:[#allocation55_spill] sm:$0xff] }
 0x260   :  { %16424 = vst [vmem:[#allocation96_spill] sm:$0xff] %v9581_v5  ;;  %v3897_v55 = vmul.f32 -0.5, %v16373_v49  ;;  %v16430_v19 = vand.u32 2147483647, %v16394_v13  ;;  %v16431_v62 = vand.u32 2147483647, %v16395_v51  ;;  %v9603_v32 = vsub.f32 %v1213_v17, %v9571_v23  ;;  %v6532_v17 = vpop.eup %6531 }
 0x261   :  { %16423 = vst [vmem:[#allocation105_spill] sm:$0xff] %v9578_v58  ;;  %16429 = vst [vmem:[#allocation107_spill] sm:$0xff] %v9588_v40  ;;  %v9606_v26 = vsub.f32 %v1209_v52, %v9571_v23  ;;  %v9610_v8 = vmul.f32 %v9556_v16, %v16434_v59  ;;  %v9614_v13 = vmul.f32 %v9560_v1, %v16435_v43  ;;  %1674 = vbcast.lane.b32.xlu1 %v9449_v3, 312  ;;  %v16438_v52 = vld [vmem:[#allocation228_spill] sm:$0xff] }
 0x262   :  { %v9595_v47 = vsel %vm2849_vm1, %v16430_v19, 0.0  ;;  %v9600_v45 = vsel %vm2848_vm12, %v16431_v62, 0.0  ;;  %16432 = vst [vmem:[#allocation109_spill] sm:$0xff] %v9603_v32  ;;  %v9618_v51 = vsub.f32 %v16436_v39, %v16307_v12  ;;  %1670 = vbcast.lane.b32.xlu0 %v9449_v3, 304  ;;  %v3887_v14 = vmul.f32 0.6931472, %v6530_v27  ;;  %v1221_v62 = vpop.permute.xlu1 %1220  ;;  %v1217_v39 = vpop.permute.xlu0 %1216 }
 0x263   :  { %16433 = vst [vmem:[#allocation108_spill] sm:$0xff] %v9606_v26  ;;  %v9624_v35 = vsub.f32 %v16438_v52, %v16307_v12  ;;  %v2805_v10 = vmul.f32 %v9603_v32, %v8412_v48  ;;  %v2804_v22 = vmul.f32 %v9606_v26, %v8421_v24  ;;  %v3906_v19 = vmul.f32 -0.5, %v16383_v31 }
 0x264   :  { %16437 = vst [vmem:[#allocation113_spill] sm:$0xff] %v9618_v51  ;;  %v3890_v15 = vmul.f32 %v16363_v18, %v3889_v63  ;;  %vm9632_vm4 = vcmp.lt.f32.partialorder %v3891_v28, 0.0004427343  ;;  %v3898_v27 = vadd.f32 1.0, %v3897_v55  ;;  %v3900_v52 = vand.u32 2147483647, %v16373_v49  ;;  %v6534_v40 = vpop.eup %6533 }
 0x265   :  { %16439 = vst [vmem:[#allocation224_spill] sm:$0xff] %v9624_v35  ;;  %vm2933_vm5 = vcmp.lt.f32.partialorder %v2805_v10, 0.0  ;;  %vm2932_vm6 = vcmp.lt.f32.partialorder %v2804_v22, 0.0  ;;  %v9638_v32 = vsub.f32 %v1221_v62, %v9571_v23  ;;  %v9641_v26 = vsub.f32 %v1217_v39, %v9571_v23  ;;  %1682 = vbcast.lane.b32.xlu1 %v9449_v3, 328  ;;  %v16449_v22 = vld [vmem:[#allocation60_spill] sm:$0xff]  ;;  %v16450_v39 = vld [vmem:[#allocation235_spill] sm:$0xff] }
 0x266   :  { %v16444_v1 = vand.u32 2147483647, %v8412_v48  ;;  %v16446_v18 = vand.u32 2147483647, %v8421_v24  ;;  %1678 = vbcast.lane.b32.xlu0 %v9449_v3, 320  ;;  %v3893_v28 = vsel %vm9632_vm4, %v3890_v15, %v3887_v14  ;;  %v3907_v24 = vadd.f32 1.0, %v3906_v19  ;;  %v9668_v16 = vpop.permute.xlu1 %1231  ;;  %v9670_v15 = vpop.permute.xlu0 %1227 }
 0x267   :  { %16442 = vst [vmem:[#allocation115_spill] sm:$0xff] %v9638_v32  ;;  %16443 = vst [vmem:[#allocation110_spill] sm:$0xff] %v9641_v26  ;;  %v3896_v55 = vmul.f32 0.6931472, %v6532_v17  ;;  %v2807_v10 = vmul.f32 %v9638_v32, %v8437_v9  ;;  %v2806_v48 = vmul.f32 %v9641_v26, %v8444_v34  ;;  %v2724_v62 = vmul.f32 %v9624_v35, %v16449_v22  ;;  %v16452_v19 = vld [vmem:[#allocation236_spill] sm:$0xff]  ;;  %v16478_v32 = vld [vmem:[#allocation13_spill] sm:$0xff] }
 0x268   :  { %v9645_v58 = vsel %vm2933_vm5, %v16444_v1, 0.0  ;;  %v9649_v63 = vsel %vm2932_vm6, %v16446_v18, 0.0  ;;  %v9660_v1 = vadd.f32 %v3893_v28, %v8839_v4  ;;  %v9666_v18 = vsub.f32 %v16450_v39, %v16307_v12 }
 0x269   :  { %16445 = vst [vmem:[#allocation119_spill] sm:$0xff] %v9645_v58  ;;  %16447 = vst [vmem:[#allocation125_spill] sm:$0xff] %v9649_v63  ;;  %v3899_v14 = vmul.f32 %v16373_v49, %v3898_v27  ;;  %v3909_v17 = vand.u32 2147483647, %v16383_v31  ;;  %vm2935_vm0 = vcmp.lt.f32.partialorder %v2807_v10, 0.0  ;;  %vm2934_vm2 = vcmp.lt.f32.partialorder %v2806_v48, 0.0 }
 0x26a   :  { %16448 = vst [vmem:[#allocation124_spill] sm:$0xff] %v9660_v1  ;;  %16451 = vst [vmem:[#allocation136_spill] sm:$0xff] %v9666_v18  ;;  %vm3901_vm13 = vcmp.lt.f32.partialorder %v3900_v52, 0.0004427343  ;;  %v3905_v4 = vmul.f32 0.6931472, %v6534_v40  ;;  %v9676_v28 = vsub.f32 %v16452_v19, %v16307_v12  ;;  %v9698_v52 = vpop.permute.xlu1 %1239  ;;  %6535 = vpow2.f32 %v9391_v37 }
 0x26b   :  { %v16454_v58 = vand.u32 2147483647, %v8437_v9  ;;  %v16456_v63 = vand.u32 2147483647, %v8444_v34  ;;  %1690 = vbcast.lane.b32.xlu1 %v9449_v3, 344  ;;  %1686 = vbcast.lane.b32.xlu0 %v9449_v3, 336  ;;  %v3902_v49 = vsel %vm3901_vm13, %v3899_v14, %v3896_v55  ;;  %v3908_v9 = vmul.f32 %v16383_v31, %v3907_v24 }
 0x26c   :  { %16453 = vst [vmem:[#allocation55_spill] sm:$0xff] %v9676_v28  ;;  %vm2851_vm14 = vcmp.lt.f32.partialorder %v9610_v8, 0.0  ;;  %vm2850_vm1 = vcmp.lt.f32.partialorder %v9614_v13, 0.0  ;;  %v9691_v12 = vadd.f32 %v3902_v49, %v8877_v11  ;;  %vm2852_vm3 = vcmp.lt.f32.partialorder %v2724_v62, 0.0  ;;  %v16460_v34 = vld [vmem:[#allocation61_spill] sm:$0xff]  ;;  %v16461_v55 = vld [vmem:[#allocation240_spill] sm:$0xff] }
 0x26d   :  { %v9680_v39 = vsel %vm2935_vm0, %v16454_v58, 0.0  ;;  %v9684_v26 = vsel %vm2934_vm2, %v16456_v63, 0.0  ;;  %v16459_v58 = vld [vmem:[#allocation57_spill] sm:$0xff]  ;;  %v2727_v27 = vmul.f32 %v9666_v18, %v16460_v34  ;;  %v9700_v63 = vpop.permute.xlu0 %1235  ;;  %vm3910_vm12 = vcmp.lt.f32.partialorder %v3909_v17, 0.0004427343  ;;  %v16464_v31 = vld [vmem:[#allocation244_spill] sm:$0xff] }
 0x26e   :  { %16455 = vst [vmem:[#allocation56_spill] sm:$0xff] %v9680_v39  ;;  %16457 = vst [vmem:[#allocation227_spill] sm:$0xff] %v9684_v26  ;;  %v2725_v40 = vmul.f32 %v9618_v51, %v16459_v58  ;;  %v9704_v10 = vsub.f32 %v8286_v0, %v16461_v55  ;;  %v9708_v11 = vsub.f32 %v8288_v42, %v16461_v55  ;;  %v16466_v14 = vld [vmem:[#allocation64_spill] sm:$0xff]  ;;  %v16467_v17 = vld [vmem:[#allocation245_spill] sm:$0xff] }
 0x26f   :  { %16458 = vst [vmem:[#allocation228_spill] sm:$0xff] %v9691_v12  ;;  %v9712_v48 = vsub.f32 %v16464_v31, %v16461_v55  ;;  %v3911_v24 = vsel %vm3910_vm12, %v3908_v9, %v3905_v4  ;;  %v2726_v19 = vmul.f32 %v9676_v28, %v16466_v14  ;;  %v9719_v49 = vsub.f32 %v16467_v17, %v16461_v55  ;;  %v16470_v42 = vld [vmem:[#allocation254_spill] sm:$0xff]  ;;  %v16473_v4 = vld [vmem:[#allocation132_spill] sm:$0xff]  ;;  %v16474_v9 = vld [vmem:[#allocation145_spill] sm:$0xff] }
 0x270   :  { %16462 = vst [vmem:[#allocation60_spill] sm:$0xff] %v9704_v10  ;;  %16463 = vst [vmem:[#allocation235_spill] sm:$0xff] %v9708_v11  ;;  %1698 = vbcast.lane.b32.xlu1 %v9449_v3, 360  ;;  %1694 = vbcast.lane.b32.xlu0 %v9449_v3, 352  ;;  %v9724_v0 = vadd.f32 %v3911_v24, %v8873_v54  ;;  %v9728_v31 = vsub.f32 %v16470_v42, %v16461_v55  ;;  %v16479_v28 = vld [vmem:[#allocation70_spill] sm:$0xff]  ;;  %v16483_v42 = vld [vmem:[#allocation148_spill] sm:$0xff] }
 0x271   :  { %16465 = vst [vmem:[#allocation236_spill] sm:$0xff] %v9712_v48  ;;  %16468 = vst [vmem:[#allocation57_spill] sm:$0xff] %v9719_v49  ;;  %v16475_v39 = vsel %vm7615_vm7, %v16473_v4, %v16474_v9  ;;  %v16480_v18 = vsel %vm7656_vm8, %v16478_v32, %v16479_v28  ;;  %v16484_v51 = vld [vmem:[#allocation163_spill] sm:$0xff]  ;;  %v16487_v4 = vand.u32 2147483647, %v16434_v59  ;;  %vm2853_vm7 = vcmp.lt.f32.partialorder %v2725_v40, 0.0  ;;  %v9765_v28 = vpop.permute.xlu1 %1247 }
 0x272   :  { %16469 = vst [vmem:[#allocation61_spill] sm:$0xff] %v9724_v0  ;;  %16471 = vst [vmem:[#allocation240_spill] sm:$0xff] %v9728_v31  ;;  %v9736_v26 = vadd.f32 %v16475_v39, %v9567_v41  ;;  %v9744_v54 = vadd.f32 %v16480_v18, %v9600_v45  ;;  %v16485_v35 = vsel %vm7721_vm9, %v16483_v42, %v16484_v51  ;;  %v16488_v39 = vand.u32 2147483647, %v16435_v43  ;;  %v9767_v51 = vpop.permute.xlu0 %1243  ;;  %v16491_v8 = vld [vmem:[#allocation68_spill] sm:$0xff]  ;;  %v16492_v43 = vld [vmem:[#allocation74_spill] sm:$0xff] }
 0x273   :  { %v9752_v37 = vadd.f32 %v16485_v35, %v9595_v47  ;;  %v2979_v41 = vsel %vm2851_vm14, %v16487_v4, 0.0  ;;  %v16489_v45 = vand.u32 2147483647, %v16449_v22  ;;  %vm2855_vm8 = vcmp.lt.f32.partialorder %v2727_v27, 0.0  ;;  %v16490_v47 = vld [vmem:[#allocation67_spill] sm:$0xff]  ;;  %v16494_v62 = vld [vmem:[#allocation253_spill] sm:$0xff] }
 0x274   :  { %16476 = vst [vmem:[#allocation244_spill] sm:$0xff] %v9736_v26  ;;  %16481 = vst [vmem:[#allocation64_spill] sm:$0xff] %v9744_v54  ;;  %v2978_v32 = vsel %vm2850_vm1, %v16488_v39, 0.0  ;;  %v2729_v59 = vmul.f32 %v9704_v10, %v16490_v47  ;;  %v2728_v35 = vmul.f32 %v9708_v11, %v16491_v8  ;;  %v2731_v13 = vmul.f32 %v9712_v48, %v16492_v43  ;;  %v16493_v9 = vld [vmem:[#allocation75_spill] sm:$0xff]  ;;  %v16497_v4 = vld [vmem:[#allocation78_spill] sm:$0xff] }
 0x275   :  { %16486 = vst [vmem:[#allocation245_spill] sm:$0xff] %v9752_v37  ;;  %v2980_v18 = vsel %vm2852_vm3, %v16489_v45, 0.0  ;;  %vm2854_vm9 = vcmp.lt.f32.partialorder %v2726_v19, 0.0  ;;  %v2730_v22 = vmul.f32 %v9719_v49, %v16493_v9  ;;  %v9779_v17 = vsub.f32 %v16494_v62, %v16461_v55  ;;  %1706 = vbcast.lane.b32.xlu1 %v9449_v3, 376  ;;  %1702 = vbcast.lane.b32.xlu0 %v9449_v3, 368  ;;  %v16496_v24 = vld [vmem:[#allocation7_spill] sm:$0xff] }
 0x276   :  { %v9785_v42 = vrot.slane %v9162_v38, %v16496_v24  ;;  %v2732_v39 = vmul.f32 %v9728_v31, %v16497_v4  ;;  %v16498_v45 = vld [vmem:[#allocation258_spill] sm:$0xff]  ;;  %v16500_v49 = vld [vmem:[#allocation259_spill] sm:$0xff]  ;;  %v16507_v38 = vand.u32 2147483647, %v16459_v58  ;;  %v16508_v31 = vld [vmem:[#allocation264_spill] sm:$0xff]  ;;  %v9813_v20 = vpop.permute.xlu0 %1251  ;;  %vm2857_vm4 = vcmp.lt.f32.partialorder %v2729_v59, 0.0 }
 0x277   :  { %16495 = vst [vmem:[#allocation254_spill] sm:$0xff] %v9779_v17  ;;  %v9791_v48 = vsub.f32 %v16498_v45, %v16461_v55  ;;  %v9795_v11 = vsub.f32 %v16500_v49, %v16461_v55  ;;  %v16503_v10 = vld [vmem:[#allocation158_spill] sm:$0xff]  ;;  %v16504_v37 = vld [vmem:[#allocation167_spill] sm:$0xff]  ;;  %v9809_v26 = vsub.f32 %v16508_v31, %v16461_v55  ;;  %v9811_v45 = vpop.permute.xlu1 %1255  ;;  %v16511_v62 = vld [vmem:[#allocation168_spill] sm:$0xff]  ;;  %v16521_v31 = vand.u32 2147483647, %v16460_v34 }
 0x278   :  { %v16505_v3 = vsel %vm7754_vm10, %v16503_v10, %v16504_v37  ;;  %v2981_v24 = vsel %vm2853_vm7, %v16507_v38, 0.0  ;;  %v16513_v57 = vsel %vm7828_vm11, %v16511_v62, %v16512_v53  ;;  %v16515_v37 = vld [vmem:[#allocation181_spill] sm:$0xff]  ;;  %v16517_v58 = vld [vmem:[#allocation183_spill] sm:$0xff]  ;;  %vm2856_vm5 = vcmp.lt.f32.partialorder %v2728_v35, 0.0  ;;  %v16523_v53 = vld [vmem:[#allocation76_spill] sm:$0xff]  ;;  %v9900_v35 = vpop.eup %6535 }
 0x279   :  { %16499 = vst [vmem:[#allocation139_spill] sm:$0xff] %v9791_v48  ;;  %16501 = vst [vmem:[#allocation132_spill] sm:$0xff] %v9795_v11  ;;  %v9802_v54 = vadd.f32 %v16505_v3, %v2978_v32  ;;  %v9820_v10 = vadd.f32 %v16513_v57, %v2979_v41  ;;  %vm16516_vm10 = vnez %v16515_v37  ;;  %v16518_v40 = vld [vmem:[#allocation189_spill] sm:$0xff]  ;;  %v2983_v38 = vsel %vm2855_vm8, %v16521_v31, 0.0  ;;  %v16524_v41 = vld [vmem:[#allocation263_spill] sm:$0xff]  ;;  %1717 = vbcast.lane.b32.xlu1 %v9785_v42, 264 }
 0x27a   :  { %16509 = vst [vmem:[#allocation146_spill] sm:$0xff] %v9809_v26  ;;  %v16519_v32 = vsel %vm16516_vm10, %v16517_v58, %v16518_v40  ;;  %vm2859_vm11 = vcmp.lt.f32.partialorder %v2731_v13, 0.0  ;;  %vm2858_vm6 = vcmp.lt.f32.partialorder %v2730_v22, 0.0  ;;  %v2733_v57 = vmul.f32 %v9779_v17, %v16523_v53  ;;  %1713 = vbcast.lane.b32.xlu0 %v9785_v42, 256  ;;  %v16526_v34 = vld [vmem:[#allocation82_spill] sm:$0xff]  ;;  %v16530_v37 = vld [vmem:[#allocation92_spill] sm:$0xff] }
 0x27b   :  { %16506 = vst [vmem:[#allocation145_spill] sm:$0xff] %v9802_v54  ;;  %16514 = vst [vmem:[#allocation13_spill] sm:$0xff] %v9820_v10  ;;  %v9827_v3 = vadd.f32 %v16519_v32, %v2980_v18  ;;  %v16522_v54 = vand.u32 2147483647, %v16466_v14  ;;  %v9839_v62 = vsub.f32 %v16524_v41, %v16461_v55  ;;  %vm2860_vm0 = vcmp.lt.f32.partialorder %v2732_v39, 0.0  ;;  %v16527_v14 = vld [vmem:[#allocation86_spill] sm:$0xff]  ;;  %v9853_v40 = vpop.permute.xlu1 %1263  ;;  %v9855_v32 = vpop.permute.xlu0 %1259 }
 0x27c   :  { %v2735_v27 = vmul.f32 %v9791_v48, %v16526_v34  ;;  %v2734_v19 = vmul.f32 %v9795_v11, %v16527_v14  ;;  %v2736_v58 = vmul.f32 %v9809_v26, %v16530_v37  ;;  %v16531_v31 = vld [vmem:[#allocation193_spill] sm:$0xff]  ;;  %v16533_v39 = vld [vmem:[#allocation187_spill] sm:$0xff]  ;;  %v16539_v11 = vld [vmem:[#allocation194_spill] sm:$0xff]  ;;  %vm2861_vm1 = vcmp.lt.f32.partialorder %v2733_v57, 0.0  ;;  %16557 = vst [vmem:[#allocation75_spill] sm:$0xff] %v9900_v35 }
 0x27d   :  { %16520 = vst [vmem:[#allocation70_spill] sm:$0xff] %v9827_v3  ;;  %v2982_v49 = vsel %vm2854_vm9, %v16522_v54, 0.0  ;;  %16525 = vst [vmem:[#allocation154_spill] sm:$0xff] %v9839_v62  ;;  %v16528_v54 = vld [vmem:[#allocation267_spill] sm:$0xff]  ;;  %vm16532_vm2 = vnez %v16531_v31  ;;  %v16537_v3 = vld [vmem:[#allocation200_spill] sm:$0xff]  ;;  %1725 = vbcast.lane.b32.xlu1 %v9785_v42, 280 }
 0x27e   :  { %v9849_v18 = vsub.f32 %v16528_v54, %v16461_v55  ;;  %v16534_v41 = vld [vmem:[#allocation199_spill] sm:$0xff]  ;;  %vm16538_vm13 = vnez %v16537_v3  ;;  %v16540_v10 = vld [vmem:[#allocation206_spill] sm:$0xff]  ;;  %v16549_v31 = vand.u32 2147483647, %v16490_v47  ;;  %v16551_v3 = vand.u32 2147483647, %v16492_v43 }
 0x27f   :  { %v16535_v17 = vsel %vm16532_vm2, %v16533_v39, %v16534_v41  ;;  %v16541_v54 = vsel %vm16538_vm13, %v16539_v11, %v16540_v10  ;;  %v16543_v12 = vld [vmem:[#allocation214_spill] sm:$0xff]  ;;  %v16546_v1 = vld [vmem:[#allocation219_spill] sm:$0xff]  ;;  %v16552_v10 = vand.u32 2147483647, %v16493_v9  ;;  %v16555_v59 = vld [vmem:[#allocation268_spill] sm:$0xff]  ;;  %1721 = vbcast.lane.b32.xlu0 %v9785_v42, 272  ;;  %v1403_v9 = vcombine.high %v9303_v33, %v9303_v33 }
 0x280   :  { %16529 = vst [vmem:[#allocation148_spill] sm:$0xff] %v9849_v18  ;;  %v9862_v48 = vadd.f32 %v16535_v17, %v2981_v24  ;;  %v9869_v0 = vadd.f32 %v16541_v54, %v2982_v49  ;;  %vm16544_vm14 = vnez %v16543_v12  ;;  %v16545_v26 = vld [vmem:[#allocation210_spill] sm:$0xff]  ;;  %v2985_v39 = vsel %vm2857_vm4, %v16549_v31, 0.0  ;;  %v16559_v22 = vld [vmem:[#allocation275_spill] sm:$0xff]  ;;  %v9912_v49 = vpop.permute.xlu0 %1267  ;;  %v16563_v54 = vld [vmem:[#allocation221_spill] sm:$0xff] }
 0x281   :  { %v16547_v5 = vsel %vm16544_vm14, %v16545_v26, %v16546_v1  ;;  %v16550_v17 = vand.u32 2147483647, %v16491_v8  ;;  %v2987_v11 = vsel %vm2859_vm11, %v16551_v3, 0.0  ;;  %v2986_v12 = vsel %vm2858_vm6, %v16552_v10, 0.0  ;;  %v16554_v1 = vld [vmem:[#allocation89_spill] sm:$0xff]  ;;  %v16558_v43 = vld [vmem:[#allocation94_spill] sm:$0xff] }
 0x282   :  { %16536 = vst [vmem:[#allocation163_spill] sm:$0xff] %v9862_v48  ;;  %16542 = vst [vmem:[#allocation67_spill] sm:$0xff] %v9869_v0  ;;  %v9876_v60 = vadd.f32 %v16547_v5, %v2983_v38  ;;  %v16553_v5 = vand.u32 2147483647, %v16497_v4  ;;  %v2737_v47 = vmul.f32 %v9839_v62, %v16554_v1  ;;  %v9896_v8 = vsub.f32 %v16555_v59, %v16461_v55  ;;  %v9910_v38 = vpop.permute.xlu1 %1271  ;;  %v16561_v41 = vld [vmem:[#allocation222_spill] sm:$0xff]  ;;  %v16570_v33 = vld [vmem:[#allocation237_spill] sm:$0xff] }
 0x283   :  { %v2984_v24 = vsel %vm2856_vm5, %v16550_v17, 0.0  ;;  %vm2863_vm3 = vcmp.lt.f32.partialorder %v2735_v27, 0.0  ;;  %vm2862_vm12 = vcmp.lt.f32.partialorder %v2734_v19, 0.0  ;;  %v2739_v13 = vmul.f32 %v9849_v18, %v16558_v43  ;;  %v16564_v27 = vld [vmem:[#allocation229_spill] sm:$0xff]  ;;  %v16569_v3 = vld [vmem:[#allocation230_spill] sm:$0xff]  ;;  %1733 = vbcast.lane.b32.xlu1 %v9785_v42, 296 }
 0x284   :  { %16548 = vst [vmem:[#allocation68_spill] sm:$0xff] %v9876_v60  ;;  %v2988_v26 = vsel %vm2860_vm0, %v16553_v5, 0.0  ;;  %16556 = vst [vmem:[#allocation74_spill] sm:$0xff] %v9896_v8  ;;  %vm2864_vm7 = vcmp.lt.f32.partialorder %v2736_v58, 0.0  ;;  %v9908_v4 = vsub.f32 %v16559_v22, %v16461_v55  ;;  %vm16562_vm8 = vnez %v16561_v41  ;;  %v16567_v17 = vld [vmem:[#allocation65_spill] sm:$0xff]  ;;  %v16574_v35 = vld [vmem:[#allocation238_spill] sm:$0xff] }
 0x285   :  { %v16565_v19 = vsel %vm16562_vm8, %v16563_v54, %v16564_v27  ;;  %vm16568_vm9 = vnez %v16567_v17  ;;  %v16573_v59 = vand.u32 2147483647, %v16523_v53  ;;  %vm16575_vm10 = vnez %v16574_v35  ;;  %v16576_v18 = vld [vmem:[#allocation233_spill] sm:$0xff]  ;;  %v16577_v41 = vld [vmem:[#allocation243_spill] sm:$0xff]  ;;  %v16582_v54 = vld [vmem:[#allocation246_spill] sm:$0xff]  ;;  %1729 = vbcast.lane.b32.xlu0 %v9785_v42, 288 }
 0x286   :  { %16560 = vst [vmem:[#allocation253_spill] sm:$0xff] %v9908_v4  ;;  %v9919_v31 = vadd.f32 %v16565_v19, %v2984_v24  ;;  %v16571_v10 = vsel %vm16568_vm9, %v16569_v3, %v16570_v33  ;;  %v16578_v62 = vsel %vm16575_vm10, %v16576_v18, %v16577_v41  ;;  %v16580_v24 = vld [vmem:[#allocation247_spill] sm:$0xff]  ;;  %v16583_v27 = vld [vmem:[#allocation250_spill] sm:$0xff]  ;;  %v16589_v53 = vld [vmem:[#allocation265_spill] sm:$0xff]  ;;  %v16592_v35 = vand.u32 2147483647, %v16526_v34  ;;  %v1280_v58 = vpop.permute.xlu1 %1279 }
 0x287   :  { %v9926_v5 = vadd.f32 %v16571_v10, %v2985_v39  ;;  %v2989_v22 = vsel %vm2861_vm1, %v16573_v59, 0.0  ;;  %v9936_v60 = vadd.f32 %v16578_v62, %v2986_v12  ;;  %vm16581_vm4 = vnez %v16580_v24  ;;  %v16586_v39 = vld [vmem:[#allocation266_spill] sm:$0xff]  ;;  %v16588_v3 = vld [vmem:[#allocation251_spill] sm:$0xff]  ;;  %v16594_v12 = vld [vmem:[#allocation97_spill] sm:$0xff]  ;;  %1741 = vbcast.lane.b32.xlu1 %v9785_v42, 312 }
 0x288   :  { %16566 = vst [vmem:[#allocation7_spill] sm:$0xff] %v9919_v31  ;;  %v16584_v19 = vsel %vm16581_vm4, %v16582_v54, %v16583_v27  ;;  %vm16587_vm5 = vnez %v16586_v39  ;;  %v2991_v10 = vsel %vm2863_vm3, %v16592_v35, 0.0  ;;  %v16593_v62 = vand.u32 2147483647, %v16527_v14  ;;  %v16598_v24 = vld [vmem:[#allocation98_spill] sm:$0xff]  ;;  %v16601_v39 = vld [vmem:[#allocation283_spill] sm:$0xff] }
 0x289   :  { %16572 = vst [vmem:[#allocation78_spill] sm:$0xff] %v9926_v5  ;;  %16579 = vst [vmem:[#allocation258_spill] sm:$0xff] %v9936_v60  ;;  %v9943_v17 = vadd.f32 %v16584_v19, %v2987_v11  ;;  %v16590_v57 = vsel %vm16587_vm5, %v16588_v3, %v16589_v53  ;;  %vm2865_vm11 = vcmp.lt.f32.partialorder %v2737_v47, 0.0  ;;  %v2738_v59 = vmul.f32 %v9896_v8, %v16594_v12  ;;  %v16599_v27 = vld [vmem:[#allocation282_spill] sm:$0xff]  ;;  %v1276_v3 = vpop.permute.xlu0 %1275  ;;  %v16682_v5 = vld [vmem:[#allocation16_spill] sm:$0xff] }
 0x28a   :  { %v9950_v33 = vadd.f32 %v16590_v57, %v2988_v26  ;;  %v2990_v18 = vsel %vm2862_vm12, %v16593_v62, 0.0  ;;  %v16595_v11 = vand.u32 2147483647, %v16530_v37  ;;  %vm2867_vm6 = vcmp.lt.f32.partialorder %v2739_v13, 0.0  ;;  %v16596_v26 = vld [vmem:[#allocation276_spill] sm:$0xff]  ;;  %v16603_v53 = vld [vmem:[#allocation190_spill] sm:$0xff] }
 0x28b   :  { %16585 = vst [vmem:[#allocation259_spill] sm:$0xff] %v9943_v17  ;;  %v9965_v34 = vsub.f32 %v16596_v26, %v16461_v55  ;;  %v9968_v14 = vrot.slane %v1403_v9, %v6742_v2  ;;  %v2741_v54 = vmul.f32 %v9908_v4, %v16598_v24  ;;  %v9974_v19 = vsub.f32 %v16599_v27, %v16461_v55  ;;  %v16606_v62 = vld [vmem:[#allocation269_spill] sm:$0xff]  ;;  %v16609_v26 = vld [vmem:[#allocation280_spill] sm:$0xff]  ;;  %v16612_v8 = vld [vmem:[#allocation278_spill] sm:$0xff] }
 0x28c   :  { %16591 = vst [vmem:[#allocation159_spill] sm:$0xff] %v9950_v33  ;;  %v2992_v41 = vsel %vm2864_vm7, %v16595_v11, 0.0  ;;  %v9978_v37 = vsub.f32 %v16601_v39, %v16461_v55  ;;  %v3912_v57 = vadd.f32 1.0, %v16603_v53  ;;  %vm16607_vm0 = vnez %v16606_v62  ;;  %v16608_v11 = vld [vmem:[#allocation270_spill] sm:$0xff]  ;;  %v16614_v55 = vld [vmem:[#allocation277_spill] sm:$0xff]  ;;  %1737 = vbcast.lane.b32.xlu0 %v9785_v42, 304 }
 0x28d   :  { %16597 = vst [vmem:[#allocation158_spill] sm:$0xff] %v9965_v34  ;;  %16600 = vst [vmem:[#allocation167_spill] sm:$0xff] %v9974_v19  ;;  %v9982_v35 = vsub.f32 %v1280_v58, %v9968_v14  ;;  %v9985_v9 = vsub.f32 %v1276_v3, %v9968_v14  ;;  %v16610_v27 = vsel %vm16607_vm0, %v16608_v11, %v16609_v26  ;;  %vm16613_vm2 = vnez %v16612_v8  ;;  %v16615_v39 = vld [vmem:[#allocation285_spill] sm:$0xff]  ;;  %v16619_v3 = vld [vmem:[#allocation290_spill] sm:$0xff] }
 0x28e   :  { %16602 = vst [vmem:[#allocation264_spill] sm:$0xff] %v9978_v37  ;;  %v9992_v4 = vadd.f32 %v16610_v27, %v2989_v22  ;;  %v16616_v33 = vsel %vm16613_vm2, %v16614_v55, %v16615_v39  ;;  %v16618_v58 = vand.u32 2147483647, %v16554_v1  ;;  %vm2866_vm13 = vcmp.lt.f32.partialorder %v2738_v59, 0.0  ;;  %v16621_v22 = vld [vmem:[#allocation287_spill] sm:$0xff]  ;;  %v16622_v62 = vld [vmem:[#allocation294_spill] sm:$0xff] }
 0x28f   :  { %16604 = vst [vmem:[#allocation171_spill] sm:$0xff] %v9982_v35  ;;  %16605 = vst [vmem:[#allocation168_spill] sm:$0xff] %v9985_v9  ;;  %v9999_v17 = vadd.f32 %v16616_v33, %v2990_v18  ;;  %vm16620_vm14 = vnez %v16619_v3  ;;  %v16625_v26 = vld [vmem:[#allocation137_spill] sm:$0xff]  ;;  %v16627_v33 = vld [vmem:[#allocation295_spill] sm:$0xff]  ;;  %v16631_v47 = vand.u32 2147483647, %v16558_v43  ;;  %v1284_v43 = vpop.permute.xlu0 %1283  ;;  %6537 = vlog2.f32 %v3912_v57 }
 0x290   :  { %16611 = vst [vmem:[#allocation177_spill] sm:$0xff] %v9992_v4  ;;  %v2993_v60 = vsel %vm2865_vm11, %v16618_v58, 0.0  ;;  %v16623_v11 = vsel %vm16620_vm14, %v16621_v22, %v16622_v62  ;;  %vm16626_vm1 = vnez %v16625_v26  ;;  %v16628_v18 = vld [vmem:[#allocation311_spill] sm:$0xff]  ;;  %v16632_v39 = vld [vmem:[#allocation100_spill] sm:$0xff]  ;;  %vm2869_vm3 = vcmp.lt.f32.partialorder %v2741_v54, 0.0  ;;  %v16634_v22 = vld [vmem:[#allocation101_spill] sm:$0xff]  ;;  %v1288_v26 = vpop.permute.xlu1 %1287 }
 0x291   :  { %16617 = vst [vmem:[#allocation181_spill] sm:$0xff] %v9999_v17  ;;  %v10011_v8 = vadd.f32 %v16623_v11, %v2991_v10  ;;  %v16629_v27 = vsel %vm16626_vm1, %v16627_v33, %v16628_v18  ;;  %v2995_v55 = vsel %vm2867_vm6, %v16631_v47, 0.0  ;;  %v2740_v58 = vmul.f32 %v9965_v34, %v16632_v39  ;;  %v16633_v3 = vld [vmem:[#allocation140_spill] sm:$0xff]  ;;  %v16635_v11 = vld [vmem:[#allocation106_spill] sm:$0xff]  ;;  %1749 = vbcast.lane.b32.xlu1 %v9785_v42, 328  ;;  %v16645_v57 = vld [vmem:[#allocation309_spill] sm:$0xff] }
 0x292   :  { %v10018_v1 = vadd.f32 %v16629_v27, %v2992_v41  ;;  %v2821_v17 = vmul.f32 %v9982_v35, %v16633_v3  ;;  %v2820_v10 = vmul.f32 %v9985_v9, %v8887_v21  ;;  %v2743_v62 = vmul.f32 %v9974_v19, %v16634_v22  ;;  %1745 = vbcast.lane.b32.xlu0 %v9785_v42, 320  ;;  %v16731_v0 = vld [vmem:[#allocation327_spill] sm:$0xff] }
 0x293   :  { %16624 = vst [vmem:[#allocation183_spill] sm:$0xff] %v10011_v8  ;;  %v2742_v41 = vmul.f32 %v9978_v37, %v16635_v11  ;;  %v10034_v13 = vsub.f32 %v1288_v26, %v9968_v14  ;;  %v10037_v33 = vsub.f32 %v1284_v43, %v9968_v14  ;;  %v16638_v18 = vand.u32 2147483647, %v16594_v12 }
 0x294   :  { %16630 = vst [vmem:[#allocation189_spill] sm:$0xff] %v10018_v1  ;;  %vm2949_vm12 = vcmp.lt.f32.partialorder %v2821_v17, 0.0  ;;  %vm2948_vm7 = vcmp.lt.f32.partialorder %v2820_v10, 0.0  ;;  %v16639_v47 = vand.u32 2147483647, %v16633_v3  ;;  %v16643_v17 = vld [vmem:[#allocation14_spill] sm:$0xff]  ;;  %vm16700_vm14 = vnez %v16299_v36 }
 0x295   :  { %16636 = vst [vmem:[#allocation76_spill] sm:$0xff] %v10034_v13  ;;  %16637 = vst [vmem:[#allocation263_spill] sm:$0xff] %v10037_v33  ;;  %v2994_v27 = vsel %vm2866_vm13, %v16638_v18, 0.0  ;;  %v16641_v35 = vand.u32 2147483647, %v8887_v21  ;;  %vm16644_vm8 = vnez %v16643_v17  ;;  %v16646_v10 = vld [vmem:[#allocation318_spill] sm:$0xff]  ;;  %v2823_v59 = vmul.f32 %v10034_v13, %v8919_v6 }
 0x296   :  { %v10044_v9 = vsel %vm2949_vm12, %v16639_v47, 0.0  ;;  %v16647_v26 = vsel %vm16644_vm8, %v16645_v57, %v16646_v10  ;;  %vm2868_vm9 = vcmp.lt.f32.partialorder %v2740_v58, 0.0  ;;  %v2822_v21 = vmul.f32 %v10037_v33, %v8923_v56  ;;  %v16651_v47 = vld [vmem:[#allocation314_spill] sm:$0xff]  ;;  %v10073_v57 = vpop.permute.xlu0 %1294  ;;  %1757 = vbcast.lane.b32.xlu1 %v9785_v42, 344  ;;  %1753 = vbcast.lane.b32.xlu0 %v9785_v42, 336  ;;  %v16679_v1 = vld [vmem:[#allocation328_spill] sm:$0xff] }
 0x297   :  { %16640 = vst [vmem:[#allocation82_spill] sm:$0xff] %v10044_v9  ;;  %v10048_v37 = vsel %vm2948_vm7, %v16641_v35, 0.0  ;;  %v10057_v12 = vadd.f32 %v16647_v26, %v2993_v60  ;;  %v16649_v35 = vld [vmem:[#allocation188_spill] sm:$0xff]  ;;  %v16650_v43 = vand.u32 2147483647, %v16598_v24  ;;  %vm2870_vm10 = vcmp.lt.f32.partialorder %v2742_v41, 0.0  ;;  %v10071_v60 = vpop.permute.xlu1 %1298 }
 0x298   :  { %16642 = vst [vmem:[#allocation86_spill] sm:$0xff] %v10048_v37  ;;  %v3921_v3 = vadd.f32 1.0, %v16649_v35  ;;  %v10069_v17 = vsub.f32 %v16651_v47, %v8989_v30  ;;  %16653 = vst [vmem:[#allocation193_spill] sm:$0xff] %v10071_v60  ;;  %v3915_v10 = vmul.f32 -0.5, %v16603_v53  ;;  %vm2871_vm4 = vcmp.lt.f32.partialorder %v2743_v62, 0.0  ;;  %v16655_v24 = vld [vmem:[#allocation315_spill] sm:$0xff] }
 0x299   :  { %16648 = vst [vmem:[#allocation267_spill] sm:$0xff] %v10057_v12  ;;  %v2997_v18 = vsel %vm2869_vm3, %v16650_v43, 0.0  ;;  %16654 = vst [vmem:[#allocation187_spill] sm:$0xff] %v10073_v57  ;;  %vm2951_vm5 = vcmp.lt.f32.partialorder %v2823_v59, 0.0  ;;  %vm2950_vm11 = vcmp.lt.f32.partialorder %v2822_v21, 0.0  ;;  %v3924_v26 = vmul.f32 -0.5, %v16649_v35 }
 0x29a   :  { %16652 = vst [vmem:[#allocation92_spill] sm:$0xff] %v10069_v17  ;;  %v10079_v54 = vsub.f32 %v16655_v24, %v8989_v30  ;;  %v16657_v43 = vand.u32 2147483647, %v8919_v6  ;;  %v16659_v47 = vand.u32 2147483647, %v8923_v56  ;;  %v16661_v59 = vld [vmem:[#allocation195_spill] sm:$0xff]  ;;  %6539 = vlog2.f32 %v3921_v3 }
 0x29b   :  { %v3930_v21 = vadd.f32 1.0, %v16661_v59  ;;  %v16662_v33 = vand.u32 2147483647, %v16632_v39  ;;  %v16663_v24 = vand.u32 2147483647, %v16635_v11  ;;  %v16664_v56 = vld [vmem:[#allocation15_spill] sm:$0xff]  ;;  %v10106_v19 = vpop.permute.xlu1 %1306  ;;  %v10108_v39 = vpop.permute.xlu0 %1302  ;;  %v10243_v48 = vsub.f32 %v16731_v0, %v8989_v30 }
 0x29c   :  { %16656 = vst [vmem:[#allocation199_spill] sm:$0xff] %v10079_v54  ;;  %v10083_v9 = vsel %vm2951_vm5, %v16657_v43, 0.0  ;;  %v10087_v37 = vsel %vm2950_vm11, %v16659_v47, 0.0  ;;  %v1405_v43 = vcombine.high %v9516_v46, %v9516_v46  ;;  %v2761_v47 = vmul.f32 %v10069_v17, %v16664_v56  ;;  %16667 = vst [vmem:[#allocation214_spill] sm:$0xff] %v10106_v19  ;;  %v16670_v46 = vld [vmem:[#allocation320_spill] sm:$0xff]  ;;  %v16672_v3 = vld [vmem:[#allocation319_spill] sm:$0xff] }
 0x29d   :  { %16658 = vst [vmem:[#allocation200_spill] sm:$0xff] %v10083_v9  ;;  %16660 = vst [vmem:[#allocation194_spill] sm:$0xff] %v10087_v37  ;;  %v2996_v13 = vsel %vm2868_vm9, %v16662_v33, 0.0  ;;  %v2998_v6 = vsel %vm2870_vm10, %v16663_v24, 0.0  ;;  %v16665_v9 = vld [vmem:[#allocation133_spill] sm:$0xff]  ;;  %v3916_v58 = vadd.f32 1.0, %v3915_v10  ;;  %vm16671_vm6 = vnez %v16670_v46 }
 0x29e   :  { %v10104_v37 = vsub.f32 %v16665_v9, %v8989_v30  ;;  %16668 = vst [vmem:[#allocation210_spill] sm:$0xff] %v10108_v39  ;;  %v3918_v11 = vand.u32 2147483647, %v16603_v53  ;;  %v16669_v41 = vand.u32 2147483647, %v16634_v22  ;;  %v16673_v24 = vld [vmem:[#allocation149_spill] sm:$0xff]  ;;  %v2760_v22 = vmul.f32 %v10079_v54, %v16682_v5 }
 0x29f   :  { %v16674_v17 = vsel %vm16671_vm6, %v16672_v3, %v16673_v24  ;;  %v16676_v9 = vld [vmem:[#allocation323_spill] sm:$0xff]  ;;  %v16678_v12 = vld [vmem:[#allocation152_spill] sm:$0xff]  ;;  %v3925_v10 = vadd.f32 1.0, %v3924_v26  ;;  %v16683_v62 = vld [vmem:[#allocation317_spill] sm:$0xff]  ;;  %1765 = vbcast.lane.b32.xlu1 %v9785_v42, 360  ;;  %1761 = vbcast.lane.b32.xlu0 %v9785_v42, 352  ;;  %6541 = vlog2.f32 %v3930_v21  ;;  %v10175_v36 = vmul.f32 %v16603_v53, %v3916_v58 }
 0x2a0   :  { %16666 = vst [vmem:[#allocation206_spill] sm:$0xff] %v10104_v37  ;;  %v2999_v33 = vsel %vm2871_vm4, %v16669_v41, 0.0  ;;  %v10119_v34 = vadd.f32 %v16674_v17, %v2994_v27  ;;  %vm16677_vm0 = vnez %v16676_v9  ;;  %v10132_v41 = vsub.f32 %v16683_v62, %v8989_v30  ;;  %v16685_v27 = vld [vmem:[#allocation335_spill] sm:$0xff]  ;;  %v16688_v46 = vld [vmem:[#allocation142_spill] sm:$0xff]  ;;  %v16696_v24 = vld [vmem:[#allocation345_spill] sm:$0xff] }
 0x2a1   :  { %v16680_v8 = vsel %vm16677_vm0, %v16678_v12, %v16679_v1  ;;  %vm16686_vm2 = vnez %v16685_v27  ;;  %v16687_v17 = vld [vmem:[#allocation331_spill] sm:$0xff]  ;;  %v10148_v12 = vrot.slane %v1405_v43, %v6742_v2  ;;  %v16694_v26 = vld [vmem:[#allocation350_spill] sm:$0xff]  ;;  %vm2889_vm1 = vcmp.lt.f32.partialorder %v2761_v47, 0.0  ;;  %v16705_v43 = vld [vmem:[#allocation144_spill] sm:$0xff]  ;;  %16732 = vst [vmem:[#allocation251_spill] sm:$0xff] %v10243_v48 }
 0x2a2   :  { %16675 = vst [vmem:[#allocation219_spill] sm:$0xff] %v10119_v34  ;;  %v10126_v4 = vadd.f32 %v16680_v8, %v2995_v55  ;;  %16684 = vst [vmem:[#allocation268_spill] sm:$0xff] %v10132_v41  ;;  %v16689_v3 = vsel %vm16686_vm2, %v16687_v17, %v16688_v46  ;;  %v16691_v8 = vld [vmem:[#allocation143_spill] sm:$0xff]  ;;  %vm16695_vm13 = vnez %v16694_v26  ;;  %v16704_v17 = vld [vmem:[#allocation17_spill] sm:$0xff]  ;;  %vm10177_vm3 = vcmp.lt.f32.partialorder %v3918_v11, 0.0004427343 }
 0x2a3   :  { %v10141_v1 = vadd.f32 %v16689_v3, %v2996_v13  ;;  %v10145_v55 = vsub.f32 %v16691_v8, %v8989_v30  ;;  %16693 = vst [vmem:[#allocation222_spill] sm:$0xff] %v10148_v12  ;;  %v16697_v9 = vld [vmem:[#allocation355_spill] sm:$0xff]  ;;  %v16701_v13 = vld [vmem:[#allocation202_spill] sm:$0xff]  ;;  %v2763_v46 = vmul.f32 %v10104_v37, %v16704_v17  ;;  %v10168_v3 = vsub.f32 %v16705_v43, %v8989_v30  ;;  %v10170_v8 = vpop.permute.xlu1 %1314  ;;  %v16793_v60 = vld [vmem:[#allocation29_spill] sm:$0xff] }
 0x2a4   :  { %16681 = vst [vmem:[#allocation89_spill] sm:$0xff] %v10126_v4  ;;  %v16698_v62 = vsel %vm16695_vm13, %v16696_v24, %v16697_v9  ;;  %v16702_v27 = vsel %vm16700_vm14, %v9238_v25, %v16701_v13  ;;  %16707 = vst [vmem:[#allocation230_spill] sm:$0xff] %v10170_v8  ;;  %v16711_v26 = vld [vmem:[#allocation370_spill] sm:$0xff]  ;;  %v3927_v13 = vand.u32 2147483647, %v16649_v35  ;;  %v3933_v53 = vmul.f32 -0.5, %v16661_v59 }
 0x2a5   :  { %16690 = vst [vmem:[#allocation94_spill] sm:$0xff] %v10141_v1  ;;  %16692 = vst [vmem:[#allocation275_spill] sm:$0xff] %v10145_v55  ;;  %v10155_v54 = vadd.f32 %v16698_v62, %v2997_v18  ;;  %v10162_v21 = vadd.f32 %v16702_v27, %v2998_v6  ;;  %v10172_v18 = vpop.permute.xlu0 %1310  ;;  %v6538_v6 = vpop.eup %6537  ;;  %v16712_v24 = vsel %vm9336_vm15, %v9257_v7, %v16711_v26  ;;  %vm2888_vm12 = vcmp.lt.f32.partialorder %v2760_v22, 0.0  ;;  %v16715_v58 = vld [vmem:[#allocation18_spill] sm:$0xff]  ;;  %v16716_v27 = vld [vmem:[#allocation321_spill] sm:$0xff] }
 0x2a6   :  { %16706 = vst [vmem:[#allocation65_spill] sm:$0xff] %v10168_v3  ;;  %16708 = vst [vmem:[#allocation237_spill] sm:$0xff] %v10172_v18  ;;  %v10186_v9 = vadd.f32 %v16712_v24, %v2999_v33  ;;  %v10189_v62 = vmul.f32 %v16649_v35, %v3925_v10  ;;  %v2762_v11 = vmul.f32 %v10132_v41, %v16715_v58  ;;  %1773 = vbcast.lane.b32.xlu1 %v9785_v42, 376  ;;  %v16718_v7 = vld [vmem:[#allocation8_spill] sm:$0xff]  ;;  %v16728_v1 = vld [vmem:[#allocation326_spill] sm:$0xff] }
 0x2a7   :  { %16699 = vst [vmem:[#allocation221_spill] sm:$0xff] %v10155_v54  ;;  %16703 = vst [vmem:[#allocation229_spill] sm:$0xff] %v10162_v21  ;;  %v10197_v43 = vsub.f32 %v16716_v27, %v8989_v30  ;;  %1769 = vbcast.lane.b32.xlu0 %v9785_v42, 368  ;;  %v10206_v33 = vrot.slane %v10202_v50, %v16718_v7  ;;  %v16719_v35 = vand.u32 2147483647, %v16664_v56  ;;  %v16720_v26 = vld [vmem:[#allocation20_spill] sm:$0xff]  ;;  %v10223_v54 = vpop.permute.xlu1 %1322  ;;  %v6540_v0 = vpop.eup %6539 }
 0x2a8   :  { %16713 = vst [vmem:[#allocation238_spill] sm:$0xff] %v10186_v9  ;;  %16714 = vst [vmem:[#allocation233_spill] sm:$0xff] %v10189_v62  ;;  %v2765_v24 = vmul.f32 %v10145_v55, %v16720_v26  ;;  %v3936_v27 = vand.u32 2147483647, %v16661_v59  ;;  %v16721_v41 = vld [vmem:[#allocation192_spill] sm:$0xff]  ;;  %vm2891_vm15 = vcmp.lt.f32.partialorder %v2763_v46, 0.0  ;;  %v10235_v4 = vsub.f32 %v16728_v1, %v8989_v30 }
 0x2a9   :  { %16717 = vst [vmem:[#allocation243_spill] sm:$0xff] %v10197_v43  ;;  %v10211_v10 = vsel %vm2889_vm1, %v16719_v35, 0.0  ;;  %v3939_v37 = vadd.f32 1.0, %v16721_v41  ;;  %v16722_v42 = vld [vmem:[#allocation21_spill] sm:$0xff]  ;;  %v16723_v21 = vld [vmem:[#allocation322_spill] sm:$0xff]  ;;  %16725 = vst [vmem:[#allocation246_spill] sm:$0xff] %v10223_v54  ;;  %v10225_v56 = vpop.permute.xlu0 %1318 }
 0x2aa   :  { %v2764_v9 = vmul.f32 %v10168_v3, %v16722_v42  ;;  %v10221_v7 = vsub.f32 %v16723_v21, %v8989_v30  ;;  %16726 = vst [vmem:[#allocation250_spill] sm:$0xff] %v10225_v56  ;;  %v3942_v47 = vmul.f32 -0.5, %v16721_v41  ;;  %v16727_v35 = vand.u32 2147483647, %v16682_v5  ;;  %16729 = vst [vmem:[#allocation266_spill] sm:$0xff] %v10235_v4  ;;  %v16730_v21 = vld [vmem:[#allocation23_spill] sm:$0xff] }
 0x2ab   :  { %v10237_v3 = vmul.f32 0.6931472, %v6538_v6  ;;  %v3934_v34 = vadd.f32 1.0, %v3933_v53  ;;  %vm2890_vm7 = vcmp.lt.f32.partialorder %v2762_v11, 0.0  ;;  %v2767_v31 = vmul.f32 %v10197_v43, %v16730_v21  ;;  %1784 = vbcast.lane.b32.xlu1 %v10206_v33, 264  ;;  %1780 = vbcast.lane.b32.xlu0 %v10206_v33, 256  ;;  %v10260_v54 = vpop.permute.xlu1 %1330 }
 0x2ac   :  { %16724 = vst [vmem:[#allocation247_spill] sm:$0xff] %v10221_v7  ;;  %v10231_v55 = vsel %vm2888_vm12, %v16727_v35, 0.0  ;;  %vm10247_vm8 = vcmp.lt.f32.partialorder %v3927_v13, 0.0004427343  ;;  %v16733_v5 = vmov 0  ;;  %vm2893_vm9 = vcmp.lt.f32.partialorder %v2765_v24, 0.0 }
 0x2ad   :  { %v16734_v5 = vsel %vm10247_vm8, 4294967295, %v16733_v5  ;;  %v16736_v22 = vand.u32 2147483647, %v16704_v17  ;;  %v16738_v53 = vld [vmem:[#allocation201_spill] sm:$0xff]  ;;  %vm2892_vm10 = vcmp.lt.f32.partialorder %v2764_v9, 0.0  ;;  %v16739_v43 = vld [vmem:[#allocation24_spill] sm:$0xff]  ;;  %v10262_v13 = vpop.permute.xlu0 %1326  ;;  %6543 = vlog2.f32 %v3939_v37 }
 0x2ae   :  { %16735 = vst [vmem:[#allocation265_spill] sm:$0xff] %v16734_v5  ;;  %v3951_v35 = vmul.f32 -0.5, %v16738_v53  ;;  %v2766_v56 = vmul.f32 %v10221_v7, %v16739_v43  ;;  %16740 = vst [vmem:[#allocation276_spill] sm:$0xff] %v10260_v54  ;;  %v3943_v18 = vadd.f32 1.0, %v3942_v47  ;;  %v16742_v17 = vand.u32 2147483647, %v16715_v58 }
 0x2af   :  { %v10254_v1 = vsel %vm2891_vm15, %v16736_v22, 0.0  ;;  %16741 = vst [vmem:[#allocation98_spill] sm:$0xff] %v10262_v13  ;;  %v16744_v24 = vld [vmem:[#allocation25_spill] sm:$0xff]  ;;  %v10276_v7 = vmul.f32 %v16661_v59, %v3934_v34  ;;  %vm10278_vm4 = vcmp.lt.f32.partialorder %v3936_v27, 0.0004427343  ;;  %v16746_v13 = vmov 0  ;;  %v6542_v34 = vpop.eup %6541  ;;  %v10307_v39 = vpop.permute.xlu1 %1338 }
 0x2b0   :  { %16737 = vst [vmem:[#allocation97_spill] sm:$0xff] %v10254_v1  ;;  %v10267_v46 = vsel %vm2890_vm7, %v16742_v17, 0.0  ;;  %v2769_v22 = vmul.f32 %v10235_v4, %v16744_v24  ;;  %v16747_v13 = vsel %vm10278_vm4, 4294967295, %v16746_v13  ;;  %v16749_v37 = vand.u32 2147483647, %v16720_v26  ;;  %v16751_v11 = vld [vmem:[#allocation26_spill] sm:$0xff] }
 0x2b1   :  { %16743 = vst [vmem:[#allocation282_spill] sm:$0xff] %v10267_v46  ;;  %16745 = vst [vmem:[#allocation283_spill] sm:$0xff] %v10276_v7  ;;  %vm2895_vm5 = vcmp.lt.f32.partialorder %v2767_v31, 0.0  ;;  %v2768_v47 = vmul.f32 %v10243_v48, %v16751_v11  ;;  %1792 = vbcast.lane.b32.xlu1 %v10206_v33, 280  ;;  %1788 = vbcast.lane.b32.xlu0 %v10206_v33, 272  ;;  %v3948_v17 = vadd.f32 1.0, %v16738_v53 }
 0x2b2   :  { %16748 = vst [vmem:[#allocation190_spill] sm:$0xff] %v16747_v13  ;;  %v10284_v58 = vsel %vm2893_vm9, %v16749_v37, 0.0  ;;  %v16752_v59 = vand.u32 2147483647, %v16722_v42  ;;  %v10296_v6 = vmul.f32 0.6931472, %v6540_v0  ;;  %v10309_v42 = vpop.permute.xlu0 %1334  ;;  %v10312_v9 = vmul.f32 %v16721_v41, %v3943_v18 }
 0x2b3   :  { %16750 = vst [vmem:[#allocation269_spill] sm:$0xff] %v10284_v58  ;;  %v3952_v26 = vadd.f32 1.0, %v3951_v35  ;;  %v16755_v37 = vld [vmem:[#allocation198_spill] sm:$0xff]  ;;  %vm2894_vm11 = vcmp.lt.f32.partialorder %v2766_v56, 0.0  ;;  %v16756_v48 = vld [vmem:[#allocation332_spill] sm:$0xff]  ;;  %v16758_v58 = vld [vmem:[#allocation333_spill] sm:$0xff]  ;;  %6545 = vlog2.f32 %v3948_v17 }
 0x2b4   :  { %v10294_v27 = vsel %vm2892_vm10, %v16752_v59, 0.0  ;;  %16754 = vst [vmem:[#allocation280_spill] sm:$0xff] %v10296_v6  ;;  %v3957_v4 = vadd.f32 1.0, %v16755_v37  ;;  %v10301_v54 = vsub.f32 %v16756_v48, %v8989_v30  ;;  %v10305_v8 = vsub.f32 %v16758_v58, %v8989_v30  ;;  %16760 = vst [vmem:[#allocation285_spill] sm:$0xff] %v10307_v39  ;;  %v16765_v59 = vld [vmem:[#allocation207_spill] sm:$0xff]  ;;  %v16807_v62 = vld [vmem:[#allocation172_spill] sm:$0xff] }
 0x2b5   :  { %16753 = vst [vmem:[#allocation270_spill] sm:$0xff] %v10294_v27  ;;  %16761 = vst [vmem:[#allocation290_spill] sm:$0xff] %v10309_v42  ;;  %v16763_v35 = vand.u32 2147483647, %v16730_v21  ;;  %vm2897_vm6 = vcmp.lt.f32.partialorder %v2769_v22, 0.0  ;;  %v3966_v27 = vadd.f32 1.0, %v16765_v59 }
 0x2b6   :  { %16757 = vst [vmem:[#allocation278_spill] sm:$0xff] %v10301_v54  ;;  %16759 = vst [vmem:[#allocation277_spill] sm:$0xff] %v10305_v8  ;;  %vm2896_vm0 = vcmp.lt.f32.partialorder %v2768_v47, 0.0  ;;  %1800 = vbcast.lane.b32.xlu1 %v10206_v33, 296  ;;  %1796 = vbcast.lane.b32.xlu0 %v10206_v33, 288  ;;  %v3960_v18 = vmul.f32 -0.5, %v16755_v37  ;;  %6547 = vlog2.f32 %v3957_v4  ;;  %v1343_v39 = vpop.permute.xlu0 %1342 }
 0x2b7   :  { %16762 = vst [vmem:[#allocation287_spill] sm:$0xff] %v10312_v9  ;;  %v10317_v0 = vsel %vm2895_vm5, %v16763_v35, 0.0  ;;  %v10323_v58 = vmul.f32 0.6931472, %v6542_v34  ;;  %v16767_v21 = vand.u32 2147483647, %v16739_v43  ;;  %v10336_v35 = vmul.f32 %v16738_v53, %v3952_v26 }
 0x2b8   :  { %16764 = vst [vmem:[#allocation294_spill] sm:$0xff] %v10317_v0  ;;  %v16770_v34 = vand.u32 2147483647, %v16744_v24  ;;  %v16772_v17 = vld [vmem:[#allocation27_spill] sm:$0xff]  ;;  %v16773_v43 = vld [vmem:[#allocation28_spill] sm:$0xff]  ;;  %v10358_v24 = vsub.f32 %v1343_v39, %v10148_v12  ;;  %6549 = vlog2.f32 %v3966_v27  ;;  %v3961_v39 = vadd.f32 1.0, %v3960_v18 }
 0x2b9   :  { %16766 = vst [vmem:[#allocation137_spill] sm:$0xff] %v10323_v58  ;;  %v10329_v31 = vsel %vm2894_vm11, %v16767_v21, 0.0  ;;  %16769 = vst [vmem:[#allocation311_spill] sm:$0xff] %v10336_v35  ;;  %v2771_v42 = vmul.f32 %v10301_v54, %v16772_v17  ;;  %v10346_v56 = vmul.f32 %v10305_v8, %v16773_v43  ;;  %v1347_v21 = vpop.permute.xlu1 %1346  ;;  %v16774_v22 = vand.u32 2147483647, %v16751_v11  ;;  %v16780_v54 = vld [vmem:[#allocation153_spill] sm:$0xff] }
 0x2ba   :  { %16768 = vst [vmem:[#allocation295_spill] sm:$0xff] %v10329_v31  ;;  %v10340_v48 = vsel %vm2897_vm6, %v16770_v34, 0.0  ;;  %v10355_v4 = vsub.f32 %v1347_v21, %v10148_v12  ;;  %16777 = vst [vmem:[#allocation106_spill] sm:$0xff] %v10358_v24  ;;  %v16778_v34 = vld [vmem:[#allocation162_spill] sm:$0xff]  ;;  %1808 = vbcast.lane.b32.xlu1 %v10206_v33, 312  ;;  %1804 = vbcast.lane.b32.xlu0 %v10206_v33, 304  ;;  %v1351_v19 = vpop.permute.xlu0 %1350 }
 0x2bb   :  { %16771 = vst [vmem:[#allocation100_spill] sm:$0xff] %v10340_v48  ;;  %v10352_v26 = vsel %vm2896_vm0, %v16774_v22, 0.0  ;;  %v10362_v8 = vsub.f32 %v16778_v34, %v8989_v30  ;;  %v10366_v48 = vsub.f32 %v16780_v54, %v8989_v30  ;;  %v16782_v47 = vld [vmem:[#allocation185_spill] sm:$0xff]  ;;  %v16783_v22 = vld [vmem:[#allocation186_spill] sm:$0xff]  ;;  %v16784_v54 = vand.u32 2147483647, %v16721_v41  ;;  %v6544_v41 = vpop.eup %6543 }
 0x2bc   :  { %16775 = vst [vmem:[#allocation140_spill] sm:$0xff] %v10352_v26  ;;  %16776 = vst [vmem:[#allocation101_spill] sm:$0xff] %v10355_v4  ;;  %v2837_v27 = vmul.f32 %v10355_v4, %v16782_v47  ;;  %v2836_v21 = vmul.f32 %v10358_v24, %v16783_v22  ;;  %v16785_v34 = vmov 0  ;;  %v3969_v0 = vmul.f32 -0.5, %v16765_v59  ;;  %v16788_v26 = vld [vmem:[#allocation205_spill] sm:$0xff]  ;;  %v16789_v18 = vld [vmem:[#allocation338_spill] sm:$0xff] }
 0x2bd   :  { %16779 = vst [vmem:[#allocation14_spill] sm:$0xff] %v10362_v8  ;;  %16781 = vst [vmem:[#allocation309_spill] sm:$0xff] %v10366_v48  ;;  %vm10380_vm2 = vcmp.lt.f32.partialorder %v16784_v54, 0.0004427343  ;;  %v3975_v31 = vadd.f32 1.0, %v16788_v26  ;;  %vm2899_vm13 = vcmp.lt.f32.partialorder %v2771_v42, 0.0  ;;  %v10389_v11 = vsub.f32 %v16789_v18, %v8989_v30  ;;  %v1355_v4 = vpop.permute.xlu1 %1354 }
 0x2be   :  { %v16786_v34 = vsel %vm10380_vm2, 4294967295, %v16785_v34  ;;  %vm2898_vm14 = vcmp.lt.f32.partialorder %v10346_v56, 0.0  ;;  %v3972_v24 = vand.u32 2147483647, %v16765_v59  ;;  %vm2965_vm1 = vcmp.lt.f32.partialorder %v2837_v27, 0.0  ;;  %v16794_v18 = vld [vmem:[#allocation30_spill] sm:$0xff] }
 0x2bf   :  { %16787 = vst [vmem:[#allocation318_spill] sm:$0xff] %v16786_v34  ;;  %16790 = vst [vmem:[#allocation188_spill] sm:$0xff] %v10389_v11  ;;  %vm2964_vm12 = vcmp.lt.f32.partialorder %v2836_v21, 0.0  ;;  %v10393_v54 = vsub.f32 %v1355_v4, %v10148_v12  ;;  %v10396_v1 = vsub.f32 %v1351_v19, %v10148_v12  ;;  %v10399_v57 = vld.sshfl [vmem:[%s6904_s5 + $0x10] sm:$0xff pattern:$0x75316420]  ;;  %v2773_v58 = vmul.f32 %v10362_v8, %v16793_v60 }
 0x2c0   :  { %v2772_v7 = vmul.f32 %v10366_v48, %v16794_v18  ;;  %v16795_v13 = vand.u32 2147483647, %v16782_v47  ;;  %v16797_v27 = vand.u32 2147483647, %v16783_v22  ;;  %1816 = vbcast.lane.b32.xlu1 %v10206_v33, 328  ;;  %1812 = vbcast.lane.b32.xlu0 %v10206_v33, 320  ;;  %6551 = vlog2.f32 %v3975_v31 }
 0x2c1   :  { %16791 = vst [vmem:[#allocation314_spill] sm:$0xff] %v10393_v54  ;;  %16792 = vst [vmem:[#allocation315_spill] sm:$0xff] %v10396_v1  ;;  %v16799_v19 = vld [vmem:[#allocation339_spill] sm:$0xff]  ;;  %v16802_v48 = vld [vmem:[#allocation197_spill] sm:$0xff]  ;;  %v3970_v6 = vadd.f32 1.0, %v3969_v0  ;;  %vm2901_vm10 = vcmp.lt.f32.partialorder %v2773_v58, 0.0 }
 0x2c2   :  { %v10407_v46 = vsel %vm2965_vm1, %v16795_v13, 0.0  ;;  %v10411_v21 = vsel %vm2964_vm12, %v16797_v27, 0.0  ;;  %v10417_v4 = vsub.f32 %v16799_v19, %v8989_v30  ;;  %v16801_v8 = vld [vmem:[#allocation35_spill] sm:$0xff]  ;;  %v2838_v47 = vmul.f32 %v10396_v1, %v16802_v48  ;;  %v16803_v13 = vld [vmem:[#allocation32_spill] sm:$0xff]  ;;  %v10425_v27 = vpop.permute.xlu1 %1583 }
 0x2c3   :  { %16796 = vst [vmem:[#allocation195_spill] sm:$0xff] %v10407_v46  ;;  %16798 = vst [vmem:[#allocation15_spill] sm:$0xff] %v10411_v21  ;;  %v2839_v12 = vmul.f32 %v10393_v54, %v16801_v8  ;;  %v2775_v22 = vmul.f32 %v10389_v11, %v16803_v13  ;;  %v10427_v46 = vpop.permute.xlu0 %1579  ;;  %v10429_v21 = vmul.f32 0.6931472, %v6544_v41  ;;  %v16808_v30 = vld [vmem:[#allocation343_spill] sm:$0xff]  ;;  %v16810_v54 = vld [vmem:[#allocation344_spill] sm:$0xff]  ;;  %v10510_v58 = vmul.f32 %v16765_v59, %v3970_v6 }
 0x2c4   :  { %16800 = vst [vmem:[#allocation133_spill] sm:$0xff] %v10417_v4  ;;  %16804 = vst [vmem:[#allocation320_spill] sm:$0xff] %v10425_v27  ;;  %v10433_v19 = vsub.f32 %v16808_v30, %v16807_v62  ;;  %v10437_v5 = vsub.f32 %v16810_v54, %v16807_v62  ;;  %vm2966_vm7 = vcmp.lt.f32.partialorder %v2838_v47, 0.0  ;;  %v16812_v31 = vand.u32 2147483647, %v16738_v53  ;;  %1824 = vbcast.lane.b32.xlu1 %v10206_v33, 344  ;;  %v6546_v53 = vpop.eup %6545 }
 0x2c5   :  { %16805 = vst [vmem:[#allocation319_spill] sm:$0xff] %v10427_v46  ;;  %16806 = vst [vmem:[#allocation149_spill] sm:$0xff] %v10429_v21  ;;  %vm2967_vm15 = vcmp.lt.f32.partialorder %v2839_v12, 0.0  ;;  %v16813_v1 = vmov 0  ;;  %v16816_v41 = vand.u32 2147483647, %v16801_v8  ;;  %v10472_v46 = vrot.slane %v10399_v57, %v15864_v44 }
 0x2c6   :  { %16809 = vst [vmem:[#allocation323_spill] sm:$0xff] %v10433_v19  ;;  %16811 = vst [vmem:[#allocation152_spill] sm:$0xff] %v10437_v5  ;;  %vm10441_vm9 = vcmp.lt.f32.partialorder %v16812_v31, 0.0004427343  ;;  %v16818_v30 = vand.u32 2147483647, %v16802_v48  ;;  %v10474_v42 = vpop.permute.xlu1 %1591 }
 0x2c7   :  { %v16814_v1 = vsel %vm10441_vm9, 4294967295, %v16813_v1  ;;  %v10447_v0 = vsel %vm2967_vm15, %v16816_v41, 0.0  ;;  %1820 = vbcast.lane.b32.xlu0 %v10206_v33, 336  ;;  %v16820_v12 = vld [vmem:[#allocation209_spill] sm:$0xff]  ;;  %v16821_v47 = vand.u32 2147483647, %v16772_v17  ;;  %v10476_v17 = vpop.permute.xlu0 %1587  ;;  %v10530_v6 = vrot.slane %v10472_v46, %v6742_v2 }
 0x2c8   :  { %16815 = vst [vmem:[#allocation328_spill] sm:$0xff] %v16814_v1  ;;  %16817 = vst [vmem:[#allocation16_spill] sm:$0xff] %v10447_v0  ;;  %v10451_v11 = vsel %vm2966_vm7, %v16818_v30, 0.0  ;;  %v3984_v54 = vadd.f32 1.0, %v16820_v12  ;;  %vm2900_vm5 = vcmp.lt.f32.partialorder %v2772_v7, 0.0  ;;  %v16823_v8 = vld [vmem:[#allocation33_spill] sm:$0xff]  ;;  %v6548_v30 = vpop.eup %6547 }
 0x2c9   :  { %16819 = vst [vmem:[#allocation317_spill] sm:$0xff] %v10451_v11  ;;  %v10459_v31 = vsel %vm2899_vm13, %v16821_v47, 0.0  ;;  %v2774_v41 = vmul.f32 %v10417_v4, %v16823_v8  ;;  %v3978_v48 = vmul.f32 -0.5, %v16788_v26  ;;  %v16824_v0 = vand.u32 2147483647, %v16773_v43  ;;  %16826 = vst [vmem:[#allocation142_spill] sm:$0xff] %v10474_v42 }
 0x2ca   :  { %16822 = vst [vmem:[#allocation335_spill] sm:$0xff] %v10459_v31  ;;  %16827 = vst [vmem:[#allocation143_spill] sm:$0xff] %v10476_v17  ;;  %v10483_v4 = vmul.f32 %v16755_v37, %v3961_v39  ;;  %v16829_v43 = vand.u32 2147483647, %v16755_v37  ;;  %v16830_v56 = vmov 0  ;;  %vm2903_vm6 = vcmp.lt.f32.partialorder %v2775_v22, 0.0  ;;  %v6550_v39 = vpop.eup %6549  ;;  %v10532_v59 = vpop.permute.xlu1 %1599 }
 0x2cb   :  { %v10468_v11 = vsel %vm2898_vm14, %v16824_v0, 0.0  ;;  %v16833_v0 = vand.u32 2147483647, %v16793_v60  ;;  %v16836_v42 = vld [vmem:[#allocation36_spill] sm:$0xff]  ;;  %v16837_v27 = vand.u32 2147483647, %v16794_v18  ;;  %6553 = vlog2.f32 %v3984_v54  ;;  %v10534_v54 = vpop.permute.xlu0 %1595 }
 0x2cc   :  { %16825 = vst [vmem:[#allocation331_spill] sm:$0xff] %v10468_v11  ;;  %16828 = vst [vmem:[#allocation350_spill] sm:$0xff] %v10483_v4  ;;  %vm10487_vm11 = vcmp.lt.f32.partialorder %v16829_v43, 0.0004427343  ;;  %v16835_v11 = vld [vmem:[#allocation69_spill] sm:$0xff]  ;;  %v2776_v47 = vmul.f32 %v10437_v5, %v16836_v42  ;;  %1832 = vbcast.lane.b32.xlu1 %v10206_v33, 360 }
 0x2cd   :  { %v16831_v56 = vsel %vm10487_vm11, 4294967295, %v16830_v56  ;;  %v10494_v31 = vsel %vm2901_vm10, %v16833_v0, 0.0  ;;  %v2777_v17 = vmul.f32 %v10433_v19, %v16835_v11  ;;  %v10503_v37 = vsel %vm2900_vm5, %v16837_v27, 0.0  ;;  %1828 = vbcast.lane.b32.xlu0 %v10206_v33, 352  ;;  %16840 = vst [vmem:[#allocation144_spill] sm:$0xff] %v10510_v58  ;;  %v16841_v22 = vld [vmem:[#allocation346_spill] sm:$0xff] }
 0x2ce   :  { %16832 = vst [vmem:[#allocation345_spill] sm:$0xff] %v16831_v56  ;;  %16834 = vst [vmem:[#allocation355_spill] sm:$0xff] %v10494_v31  ;;  %v10507_v60 = vmul.f32 0.6931472, %v6546_v53  ;;  %vm2902_vm0 = vcmp.lt.f32.partialorder %v2774_v41, 0.0  ;;  %v10514_v43 = vsub.f32 %v16841_v22, %v16807_v62  ;;  %v16843_v18 = vld [vmem:[#allocation347_spill] sm:$0xff] }
 0x2cf   :  { %16838 = vst [vmem:[#allocation202_spill] sm:$0xff] %v10503_v37  ;;  %v10518_v7 = vsub.f32 %v16843_v18, %v16807_v62  ;;  %vm10520_vm13 = vcmp.lt.f32.partialorder %v3972_v24, 0.0004427343  ;;  %v16845_v27 = vmov 0  ;;  %v3979_v0 = vadd.f32 1.0, %v3978_v48  ;;  %16850 = vst [vmem:[#allocation20_spill] sm:$0xff] %v10530_v6 }
 0x2d0   :  { %16839 = vst [vmem:[#allocation17_spill] sm:$0xff] %v10507_v60  ;;  %16842 = vst [vmem:[#allocation370_spill] sm:$0xff] %v10514_v43  ;;  %v16846_v27 = vsel %vm10520_vm13, 4294967295, %v16845_v27  ;;  %v16848_v53 = vand.u32 2147483647, %v16803_v13  ;;  %vm2905_vm14 = vcmp.lt.f32.partialorder %v2777_v17, 0.0  ;;  %v10580_v60 = vpop.permute.xlu1 %1607 }
 0x2d1   :  { %16844 = vst [vmem:[#allocation18_spill] sm:$0xff] %v10518_v7  ;;  %16847 = vst [vmem:[#allocation321_spill] sm:$0xff] %v16846_v27  ;;  %v10536_v41 = vmul.f32 0.6931472, %v6548_v30  ;;  %v3981_v24 = vand.u32 2147483647, %v16788_v26 }
 0x2d2   :  { %v10526_v5 = vsel %vm2903_vm6, %v16848_v53, 0.0  ;;  %16851 = vst [vmem:[#allocation192_spill] sm:$0xff] %v10532_v59  ;;  %16852 = vst [vmem:[#allocation21_spill] sm:$0xff] %v10534_v54  ;;  %vm2904_vm1 = vcmp.lt.f32.partialorder %v2776_v47, 0.0  ;;  %v16854_v48 = vld [vmem:[#allocation138_spill] sm:$0xff]  ;;  %v3987_v13 = vmul.f32 -0.5, %v16820_v12 }
 0x2d3   :  { %16849 = vst [vmem:[#allocation8_spill] sm:$0xff] %v10526_v5  ;;  %16853 = vst [vmem:[#allocation322_spill] sm:$0xff] %v10536_v41  ;;  %v10541_v22 = vsub.f32 %v16854_v48, %v16807_v62  ;;  %v16856_v18 = vand.u32 2147483647, %v16823_v8  ;;  %1840 = vbcast.lane.b32.xlu1 %v10206_v33, 376  ;;  %1836 = vbcast.lane.b32.xlu0 %v10206_v33, 368  ;;  %v10566_v33 = vmul.f32 %v16788_v26, %v3979_v0 }
 0x2d4   :  { %v16858_v30 = vld [vmem:[#allocation9_spill] sm:$0xff]  ;;  %v16859_v47 = vld [vmem:[#allocation208_spill] sm:$0xff]  ;;  %v10563_v31 = vmul.f32 0.6931472, %v6550_v39  ;;  %v16864_v37 = vand.u32 2147483647, %v16835_v11  ;;  %v10582_v39 = vpop.permute.xlu0 %1603  ;;  %v10615_v41 = vpop.permute.xlu1 %1615 }
 0x2d5   :  { %16855 = vst [vmem:[#allocation326_spill] sm:$0xff] %v10541_v22  ;;  %v10546_v53 = vsel %vm2902_vm0, %v16856_v18, 0.0  ;;  %v10552_v19 = vrot.slane %v10202_v50, %v16858_v30  ;;  %v3993_v48 = vadd.f32 1.0, %v16859_v47  ;;  %v16860_v5 = vld [vmem:[#allocation37_spill] sm:$0xff]  ;;  %v16861_v18 = vld [vmem:[#allocation38_spill] sm:$0xff]  ;;  %16863 = vst [vmem:[#allocation201_spill] sm:$0xff] %v10566_v33  ;;  %v6552_v30 = vpop.eup %6551 }
 0x2d6   :  { %16857 = vst [vmem:[#allocation23_spill] sm:$0xff] %v10546_v53  ;;  %v2779_v8 = vmul.f32 %v10514_v43, %v16860_v5  ;;  %v2778_v53 = vmul.f32 %v10518_v7, %v16861_v18  ;;  %16862 = vst [vmem:[#allocation327_spill] sm:$0xff] %v10563_v31  ;;  %v10570_v59 = vsel %vm2905_vm14, %v16864_v37, 0.0  ;;  %v16866_v17 = vand.u32 2147483647, %v16836_v42  ;;  %v16868_v6 = vld [vmem:[#allocation160_spill] sm:$0xff] }
 0x2d7   :  { %16865 = vst [vmem:[#allocation24_spill] sm:$0xff] %v10570_v59  ;;  %v10578_v43 = vsub.f32 %v16868_v6, %v16807_v62  ;;  %16870 = vst [vmem:[#allocation198_spill] sm:$0xff] %v10580_v60  ;;  %vm10584_vm12 = vcmp.lt.f32.partialorder %v3981_v24, 0.0004427343  ;;  %v16872_v26 = vmov 0  ;;  %v16875_v0 = vld [vmem:[#allocation40_spill] sm:$0xff]  ;;  %6555 = vlog2.f32 %v3993_v48 }
 0x2d8   :  { %v10574_v54 = vsel %vm2904_vm1, %v16866_v17, 0.0  ;;  %16871 = vst [vmem:[#allocation332_spill] sm:$0xff] %v10582_v39  ;;  %v16873_v26 = vsel %vm10584_vm12, 4294967295, %v16872_v26  ;;  %v2781_v11 = vmul.f32 %v10541_v22, %v16875_v0  ;;  %v16876_v37 = vld [vmem:[#allocation166_spill] sm:$0xff]  ;;  %v3988_v17 = vadd.f32 1.0, %v3987_v13  ;;  %1851 = vbcast.lane.b32.xlu1 %v10552_v19, 264  ;;  %v10617_v4 = vpop.permute.xlu0 %1611 }
 0x2d9   :  { %16867 = vst [vmem:[#allocation25_spill] sm:$0xff] %v10574_v54  ;;  %16869 = vst [vmem:[#allocation26_spill] sm:$0xff] %v10578_v43  ;;  %v10592_v42 = vsub.f32 %v16876_v37, %v16807_v62  ;;  %v16878_v7 = vld [vmem:[#allocation354_spill] sm:$0xff]  ;;  %1847 = vbcast.lane.b32.xlu0 %v10552_v19, 256  ;;  %v3990_v24 = vand.u32 2147483647, %v16820_v12 }
 0x2da   :  { %16874 = vst [vmem:[#allocation333_spill] sm:$0xff] %v16873_v26  ;;  %v10600_v59 = vsub.f32 %v16878_v7, %v16807_v62  ;;  %v16880_v22 = vld [vmem:[#allocation215_spill] sm:$0xff]  ;;  %vm2907_vm15 = vcmp.lt.f32.partialorder %v2779_v8, 0.0  ;;  %vm2906_vm7 = vcmp.lt.f32.partialorder %v2778_v53, 0.0  ;;  %v10606_v54 = vmul.f32 0.6931472, %v6552_v30 }
 0x2db   :  { %16877 = vst [vmem:[#allocation207_spill] sm:$0xff] %v10592_v42  ;;  %v4002_v37 = vadd.f32 1.0, %v16880_v22  ;;  %v3996_v6 = vmul.f32 -0.5, %v16859_v47  ;;  %v16882_v13 = vld [vmem:[#allocation41_spill] sm:$0xff]  ;;  %16885 = vst [vmem:[#allocation153_spill] sm:$0xff] %v10615_v41  ;;  %vm2909_vm10 = vcmp.lt.f32.partialorder %v2781_v11, 0.0 }
 0x2dc   :  { %16879 = vst [vmem:[#allocation27_spill] sm:$0xff] %v10600_v59  ;;  %16881 = vst [vmem:[#allocation28_spill] sm:$0xff] %v10606_v54  ;;  %v2780_v60 = vmul.f32 %v10578_v43, %v16882_v13  ;;  %v16883_v7 = vld [vmem:[#allocation357_spill] sm:$0xff]  ;;  %v3999_v48 = vand.u32 2147483647, %v16859_v47  ;;  %v16887_v8 = vld [vmem:[#allocation44_spill] sm:$0xff]  ;;  %v10662_v26 = vpop.permute.xlu0 %1619 }
 0x2dd   :  { %v10613_v39 = vsub.f32 %v16883_v7, %v16807_v62  ;;  %16886 = vst [vmem:[#allocation185_spill] sm:$0xff] %v10617_v4  ;;  %v2783_v30 = vmul.f32 %v10592_v42, %v16887_v8  ;;  %v16888_v43 = vld [vmem:[#allocation358_spill] sm:$0xff]  ;;  %v16890_v7 = vld [vmem:[#allocation211_spill] sm:$0xff]  ;;  %v16891_v41 = vand.u32 2147483647, %v16860_v5  ;;  %v16895_v53 = vld [vmem:[#allocation45_spill] sm:$0xff]  ;;  %6557 = vlog2.f32 %v4002_v37 }
 0x2de   :  { %v10628_v56 = vsub.f32 %v16888_v43, %v16807_v62  ;;  %v4011_v35 = vadd.f32 1.0, %v16890_v7  ;;  %v16893_v1 = vand.u32 2147483647, %v16861_v18  ;;  %v2782_v11 = vmul.f32 %v10600_v59, %v16895_v53  ;;  %1859 = vbcast.lane.b32.xlu1 %v10552_v19, 280  ;;  %1855 = vbcast.lane.b32.xlu0 %v10552_v19, 272  ;;  %v6554_v43 = vpop.eup %6553  ;;  %v16902_v37 = vld [vmem:[#allocation49_spill] sm:$0xff] }
 0x2df   :  { %16884 = vst [vmem:[#allocation162_spill] sm:$0xff] %v10613_v39  ;;  %v10633_v4 = vsel %vm2907_vm15, %v16891_v41, 0.0  ;;  %v10648_v41 = vmul.f32 %v16820_v12, %v3988_v17  ;;  %vm10650_vm5 = vcmp.lt.f32.partialorder %v3990_v24, 0.0004427343  ;;  %v3997_v18 = vadd.f32 1.0, %v3996_v6  ;;  %16904 = vst [vmem:[#allocation197_spill] sm:$0xff] %v10662_v26 }
 0x2e0   :  { %16889 = vst [vmem:[#allocation186_spill] sm:$0xff] %v10628_v56  ;;  %16892 = vst [vmem:[#allocation205_spill] sm:$0xff] %v10633_v4  ;;  %v10637_v27 = vsel %vm2906_vm7, %v16893_v1, 0.0  ;;  %v16897_v1 = vmov 0  ;;  %v16900_v59 = vand.u32 2147483647, %v16875_v0  ;;  %v2785_v4 = vmul.f32 %v10613_v39, %v16902_v37 }
 0x2e1   :  { %16894 = vst [vmem:[#allocation338_spill] sm:$0xff] %v10637_v27  ;;  %16896 = vst [vmem:[#allocation29_spill] sm:$0xff] %v10648_v41  ;;  %v16898_v1 = vsel %vm10650_vm5, 4294967295, %v16897_v1  ;;  %vm2908_vm6 = vcmp.lt.f32.partialorder %v2780_v60, 0.0  ;;  %v10660_v27 = vpop.permute.xlu1 %1623  ;;  %v4005_v12 = vmul.f32 -0.5, %v16880_v22  ;;  %vm2911_vm0 = vcmp.lt.f32.partialorder %v2783_v30, 0.0 }
 0x2e2   :  { %16899 = vst [vmem:[#allocation30_spill] sm:$0xff] %v16898_v1  ;;  %v10656_v42 = vsel %vm2909_vm10, %v16900_v59, 0.0  ;;  %16903 = vst [vmem:[#allocation35_spill] sm:$0xff] %v10660_v27  ;;  %v16905_v17 = vld [vmem:[#allocation50_spill] sm:$0xff]  ;;  %6559 = vlog2.f32 %v4011_v35  ;;  %v4014_v6 = vmul.f32 -0.5, %v16890_v7  ;;  %vm2910_vm14 = vcmp.lt.f32.partialorder %v2782_v11, 0.0 }
 0x2e3   :  { %16901 = vst [vmem:[#allocation339_spill] sm:$0xff] %v10656_v42  ;;  %v2784_v24 = vmul.f32 %v10628_v56, %v16905_v17  ;;  %v16906_v59 = vld [vmem:[#allocation362_spill] sm:$0xff]  ;;  %v16908_v0 = vld [vmem:[#allocation363_spill] sm:$0xff]  ;;  %1867 = vbcast.lane.b32.xlu1 %v10552_v19, 296  ;;  %1863 = vbcast.lane.b32.xlu0 %v10552_v19, 288  ;;  %v10685_v39 = vmul.f32 %v16859_v47, %v3997_v18  ;;  %v16914_v42 = vld [vmem:[#allocation220_spill] sm:$0xff]  ;;  %v10703_v47 = vpop.permute.xlu0 %1627 }
 0x2e4   :  { %v10670_v60 = vsub.f32 %v16906_v59, %v16807_v62  ;;  %v10674_v5 = vsub.f32 %v16908_v0, %v16807_v62  ;;  %v10678_v30 = vmul.f32 0.6931472, %v6554_v43  ;;  %v16911_v56 = vand.u32 2147483647, %v16882_v13  ;;  %v16917_v54 = vld [vmem:[#allocation191_spill] sm:$0xff]  ;;  %v16919_v13 = vld [vmem:[#allocation364_spill] sm:$0xff]  ;;  %v6556_v11 = vpop.eup %6555 }
 0x2e5   :  { %16913 = vst [vmem:[#allocation209_spill] sm:$0xff] %v10685_v39  ;;  %v4008_v59 = vand.u32 2147483647, %v16880_v22  ;;  %v4020_v27 = vadd.f32 1.0, %v16914_v42  ;;  %v16915_v0 = vand.u32 2147483647, %v16887_v8  ;;  %v10695_v43 = vsub.f32 %v16917_v54, %v16807_v62 }
 0x2e6   :  { %16907 = vst [vmem:[#allocation32_spill] sm:$0xff] %v10670_v60  ;;  %16909 = vst [vmem:[#allocation172_spill] sm:$0xff] %v10674_v5  ;;  %v10682_v35 = vsel %vm2908_vm6, %v16911_v56, 0.0  ;;  %vm2913_vm1 = vcmp.lt.f32.partialorder %v2785_v4, 0.0  ;;  %v10699_v56 = vsub.f32 %v16919_v13, %v16807_v62  ;;  %v16923_v18 = vand.u32 2147483647, %v16895_v53 }
 0x2e7   :  { %16910 = vst [vmem:[#allocation343_spill] sm:$0xff] %v10678_v30  ;;  %16912 = vst [vmem:[#allocation344_spill] sm:$0xff] %v10682_v35  ;;  %v10691_v26 = vsel %vm2911_vm0, %v16915_v0, 0.0  ;;  %v10701_v35 = vpop.permute.xlu1 %1631  ;;  %vm2912_vm15 = vcmp.lt.f32.partialorder %v2784_v24, 0.0  ;;  %vm10710_vm7 = vcmp.lt.f32.partialorder %v3999_v48, 0.0004427343  ;;  %6561 = vlog2.f32 %v4020_v27 }
 0x2e8   :  { %16916 = vst [vmem:[#allocation33_spill] sm:$0xff] %v10691_v26  ;;  %16918 = vst [vmem:[#allocation69_spill] sm:$0xff] %v10695_v43  ;;  %v10708_v33 = vsel %vm2910_vm14, %v16923_v18, 0.0  ;;  %v16925_v8 = vmov 0  ;;  %v4006_v54 = vadd.f32 1.0, %v4005_v12  ;;  %v4015_v0 = vadd.f32 1.0, %v4014_v6 }
 0x2e9   :  { %16920 = vst [vmem:[#allocation36_spill] sm:$0xff] %v10699_v56  ;;  %16921 = vst [vmem:[#allocation346_spill] sm:$0xff] %v10701_v35  ;;  %v16926_v8 = vsel %vm10710_vm7, 4294967295, %v16925_v8  ;;  %v16928_v26 = vld [vmem:[#allocation53_spill] sm:$0xff]  ;;  %v16929_v31 = vld [vmem:[#allocation54_spill] sm:$0xff]  ;;  %1875 = vbcast.lane.b32.xlu1 %v10552_v19, 312 }
 0x2ea   :  { %16922 = vst [vmem:[#allocation347_spill] sm:$0xff] %v10703_v47  ;;  %16924 = vst [vmem:[#allocation138_spill] sm:$0xff] %v10708_v33  ;;  %v2787_v13 = vmul.f32 %v10670_v60, %v16928_v26  ;;  %v2786_v35 = vmul.f32 %v10674_v5, %v16929_v31  ;;  %1871 = vbcast.lane.b32.xlu0 %v10552_v19, 304  ;;  %v4017_v48 = vand.u32 2147483647, %v16890_v7  ;;  %v16932_v6 = vld [vmem:[#allocation31_spill] sm:$0xff] }
 0x2eb   :  { %16927 = vst [vmem:[#allocation9_spill] sm:$0xff] %v16926_v8  ;;  %v16930_v12 = vand.u32 2147483647, %v16902_v37  ;;  %v10732_v18 = vsub.f32 %v16932_v6, %v16807_v62  ;;  %v16934_v5 = vld [vmem:[#allocation216_spill] sm:$0xff]  ;;  %v16935_v33 = vand.u32 2147483647, %v16905_v17  ;;  %v10749_v6 = vpop.permute.xlu0 %1635  ;;  %v10752_v27 = vmul.f32 %v16880_v22, %v4006_v54 }
 0x2ec   :  { %v4029_v60 = vadd.f32 1.0, %v16934_v5  ;;  %v16937_v53 = vld [vmem:[#allocation58_spill] sm:$0xff]  ;;  %v16938_v41 = vld [vmem:[#allocation59_spill] sm:$0xff]  ;;  %v16939_v4 = vld [vmem:[#allocation365_spill] sm:$0xff]  ;;  %16942 = vst [vmem:[#allocation166_spill] sm:$0xff] %v10749_v6  ;;  %v10759_v17 = vmul.f32 %v16890_v7, %v4015_v0  ;;  %vm2915_vm6 = vcmp.lt.f32.partialorder %v2787_v13, 0.0 }
 0x2ed   :  { %v10728_v24 = vsel %vm2913_vm1, %v16930_v12, 0.0  ;;  %16933 = vst [vmem:[#allocation37_spill] sm:$0xff] %v10732_v18  ;;  %v10737_v47 = vsel %vm2912_vm15, %v16935_v33, 0.0  ;;  %v2789_v30 = vmul.f32 %v10695_v43, %v16937_v53  ;;  %v2788_v37 = vmul.f32 %v10699_v56, %v16938_v41  ;;  %16943 = vst [vmem:[#allocation354_spill] sm:$0xff] %v10752_v27  ;;  %1883 = vbcast.lane.b32.xlu1 %v10552_v19, 328  ;;  %v16949_v54 = vld [vmem:[#allocation62_spill] sm:$0xff] }
 0x2ee   :  { %16931 = vst [vmem:[#allocation208_spill] sm:$0xff] %v10728_v24  ;;  %16936 = vst [vmem:[#allocation38_spill] sm:$0xff] %v10737_v47  ;;  %v10745_v12 = vsub.f32 %v16939_v4, %v16807_v62  ;;  %v10747_v24 = vpop.permute.xlu1 %1639  ;;  %vm10754_vm10 = vcmp.lt.f32.partialorder %v4008_v59, 0.0004427343  ;;  %v16944_v33 = vmov 0  ;;  %v4023_v56 = vmul.f32 -0.5, %v16914_v42  ;;  %v6558_v59 = vpop.eup %6557 }
 0x2ef   :  { %16941 = vst [vmem:[#allocation40_spill] sm:$0xff] %v10747_v24  ;;  %v16945_v33 = vsel %vm10754_vm10, 4294967295, %v16944_v33  ;;  %16947 = vst [vmem:[#allocation41_spill] sm:$0xff] %v10759_v17  ;;  %v4032_v43 = vmul.f32 -0.5, %v16934_v5  ;;  %vm2914_vm0 = vcmp.lt.f32.partialorder %v2786_v35, 0.0  ;;  %1879 = vbcast.lane.b32.xlu0 %v10552_v19, 320  ;;  %v2126_v62 = vcombine.high %v10399_v57, %v10399_v57  ;;  %v10784_v58 = vpop.permute.xlu0 %1646  ;;  %v6560_v34 = vpop.eup %6559 }
 0x2f0   :  { %16940 = vst [vmem:[#allocation160_spill] sm:$0xff] %v10745_v12  ;;  %16946 = vst [vmem:[#allocation215_spill] sm:$0xff] %v16945_v33  ;;  %v10767_v22 = vmul.f32 0.6931472, %v6556_v11  ;;  %v2791_v7 = vmul.f32 %v10732_v18, %v16949_v54  ;;  %v16950_v0 = vld [vmem:[#allocation368_spill] sm:$0xff]  ;;  %6563 = vlog2.f32 %v4029_v60  ;;  %vm2917_vm14 = vcmp.lt.f32.partialorder %v2789_v30, 0.0 }
 0x2f1   :  { %v10773_v4 = vsub.f32 %v16950_v0, %v9571_v23  ;;  %v4026_v47 = vand.u32 2147483647, %v16914_v42  ;;  %vm2916_vm1 = vcmp.lt.f32.partialorder %v2788_v37, 0.0  ;;  %v16952_v6 = vld [vmem:[#allocation63_spill] sm:$0xff]  ;;  %v16953_v57 = vld [vmem:[#allocation369_spill] sm:$0xff]  ;;  %16956 = vst [vmem:[#allocation45_spill] sm:$0xff] %v10784_v58 }
 0x2f2   :  { %16948 = vst [vmem:[#allocation357_spill] sm:$0xff] %v10767_v22  ;;  %v2790_v24 = vmul.f32 %v10745_v12, %v16952_v6  ;;  %v10780_v11 = vsub.f32 %v16953_v57, %v9571_v23  ;;  %v10782_v1 = vpop.permute.xlu1 %1650  ;;  %vm10786_vm15 = vcmp.lt.f32.partialorder %v4017_v48, 0.0004427343  ;;  %v16957_v18 = vmov 0  ;;  %1891 = vbcast.lane.b32.xlu1 %v10552_v19, 344 }
 0x2f3   :  { %16951 = vst [vmem:[#allocation44_spill] sm:$0xff] %v10773_v4  ;;  %16955 = vst [vmem:[#allocation211_spill] sm:$0xff] %v10782_v1  ;;  %v16958_v18 = vsel %vm10786_vm15, 4294967295, %v16957_v18  ;;  %v16960_v0 = vand.u32 2147483647, %v16928_v26  ;;  %v4024_v57 = vadd.f32 1.0, %v4023_v56  ;;  %v10801_v1 = vrot.slane %v2126_v62, %v15864_v44 }
 0x2f4   :  { %16954 = vst [vmem:[#allocation358_spill] sm:$0xff] %v10780_v11  ;;  %16959 = vst [vmem:[#allocation49_spill] sm:$0xff] %v16958_v18  ;;  %v16962_v21 = vand.u32 2147483647, %v16929_v31  ;;  %v4033_v9 = vadd.f32 1.0, %v4032_v43  ;;  %1887 = vbcast.lane.b32.xlu0 %v10552_v19, 336 }
 0x2f5   :  { %v10793_v60 = vsel %vm2915_vm6, %v16960_v0, 0.0  ;;  %16964 = vst [vmem:[#allocation363_spill] sm:$0xff] %v10801_v1  ;;  %v10809_v13 = vmul.f32 0.6931472, %v6558_v59  ;;  %v16966_v31 = vld [vmem:[#allocation225_spill] sm:$0xff]  ;;  %vm2919_vm6 = vcmp.lt.f32.partialorder %v2791_v7, 0.0 }
 0x2f6   :  { %16961 = vst [vmem:[#allocation50_spill] sm:$0xff] %v10793_v60  ;;  %v10798_v12 = vsel %vm2914_vm0, %v16962_v21, 0.0  ;;  %v4038_v21 = vadd.f32 1.0, %v16966_v31  ;;  %v16967_v35 = vand.u32 2147483647, %v16937_v53  ;;  %v16971_v62 = vld [vmem:[#allocation77_spill] sm:$0xff]  ;;  %v10830_v30 = vpop.permute.xlu1 %1658  ;;  %v10832_v53 = vpop.permute.xlu0 %1654 }
 0x2f7   :  { %16963 = vst [vmem:[#allocation362_spill] sm:$0xff] %v10798_v12  ;;  %16965 = vst [vmem:[#allocation220_spill] sm:$0xff] %v10809_v13  ;;  %v16969_v56 = vand.u32 2147483647, %v16938_v41  ;;  %v2793_v0 = vmul.f32 %v10773_v4, %v16971_v62  ;;  %vm2918_vm0 = vcmp.lt.f32.partialorder %v2790_v24, 0.0  ;;  %v16972_v26 = vld [vmem:[#allocation66_spill] sm:$0xff]  ;;  %v10842_v4 = vmul.f32 %v16914_v42, %v4024_v57 }
 0x2f8   :  { %v10815_v43 = vsel %vm2917_vm14, %v16967_v35, 0.0  ;;  %v2792_v59 = vmul.f32 %v10780_v11, %v16972_v26  ;;  %v16973_v60 = vld [vmem:[#allocation375_spill] sm:$0xff]  ;;  %16975 = vst [vmem:[#allocation54_spill] sm:$0xff] %v10830_v30  ;;  %16976 = vst [vmem:[#allocation31_spill] sm:$0xff] %v10832_v53  ;;  %v16978_v35 = vld [vmem:[#allocation376_spill] sm:$0xff]  ;;  %v10845_v11 = vmul.f32 %v16934_v5, %v4033_v9  ;;  %1899 = vbcast.lane.b32.xlu1 %v10552_v19, 360  ;;  %6565 = vlog2.f32 %v4038_v21 }
 0x2f9   :  { %16968 = vst [vmem:[#allocation191_spill] sm:$0xff] %v10815_v43  ;;  %v10820_v48 = vsel %vm2916_vm1, %v16969_v56, 0.0  ;;  %v10828_v12 = vsub.f32 %v16973_v60, %v9571_v23  ;;  %v16977_v41 = vld [vmem:[#allocation223_spill] sm:$0xff]  ;;  %v10837_v56 = vsub.f32 %v16978_v35, %v9571_v23  ;;  %v10839_v43 = vmul.f32 0.6931472, %v6560_v34  ;;  %1895 = vbcast.lane.b32.xlu0 %v10552_v19, 352 }
 0x2fa   :  { %16970 = vst [vmem:[#allocation364_spill] sm:$0xff] %v10820_v48  ;;  %v4047_v37 = vadd.f32 1.0, %v16977_v41  ;;  %v10849_v60 = vrot.slane %v10801_v1, %v6742_v2  ;;  %vm10857_vm14 = vcmp.lt.f32.partialorder %v4026_v47, 0.0004427343  ;;  %v16982_v35 = vmov 0  ;;  %v6562_v47 = vpop.eup %6561  ;;  %v16989_v53 = vld [vmem:[#allocation71_spill] sm:$0xff]  ;;  %v10877_v21 = vpop.permute.xlu0 %1662 }
 0x2fb   :  { %16974 = vst [vmem:[#allocation53_spill] sm:$0xff] %v10828_v12  ;;  %16979 = vst [vmem:[#allocation216_spill] sm:$0xff] %v10837_v56  ;;  %v16983_v35 = vsel %vm10857_vm14, 4294967295, %v16982_v35  ;;  %v4035_v9 = vand.u32 2147483647, %v16934_v5  ;;  %vm2921_vm1 = vcmp.lt.f32.partialorder %v2793_v0, 0.0  ;;  %v2795_v58 = vmul.f32 %v10828_v12, %v16989_v53  ;;  %v10875_v5 = vpop.permute.xlu1 %1666 }
 0x2fc   :  { %16980 = vst [vmem:[#allocation58_spill] sm:$0xff] %v10839_v43  ;;  %16981 = vst [vmem:[#allocation59_spill] sm:$0xff] %v10849_v60  ;;  %v16985_v42 = vand.u32 2147483647, %v16949_v54  ;;  %v16987_v48 = vand.u32 2147483647, %v16952_v6  ;;  %6567 = vlog2.f32 %v4047_v37 }
 0x2fd   :  { %16984 = vst [vmem:[#allocation365_spill] sm:$0xff] %v16983_v35  ;;  %v4041_v34 = vmul.f32 -0.5, %v16966_v31  ;;  %vm2920_vm10 = vcmp.lt.f32.partialorder %v2792_v59, 0.0  ;;  %16990 = vst [vmem:[#allocation63_spill] sm:$0xff] %v10875_v5  ;;  %v16992_v54 = vld [vmem:[#allocation231_spill] sm:$0xff]  ;;  %v16998_v37 = vld [vmem:[#allocation46_spill] sm:$0xff]  ;;  %v6564_v18 = vpop.eup %6563 }
 0x2fe   :  { %v10865_v57 = vsel %vm2919_vm6, %v16985_v42, 0.0  ;;  %v10870_v30 = vsel %vm2918_vm0, %v16987_v48, 0.0  ;;  %16991 = vst [vmem:[#allocation369_spill] sm:$0xff] %v10877_v21  ;;  %v4056_v7 = vadd.f32 1.0, %v16992_v54  ;;  %v16993_v42 = vld [vmem:[#allocation72_spill] sm:$0xff]  ;;  %v16994_v6 = vld [vmem:[#allocation99_spill] sm:$0xff]  ;;  %v10896_v5 = vsub.f32 %v16998_v37, %v9571_v23  ;;  %v10927_v13 = vpop.permute.xlu0 %1670 }
 0x2ff   :  { %16986 = vst [vmem:[#allocation62_spill] sm:$0xff] %v10865_v57  ;;  %16988 = vst [vmem:[#allocation368_spill] sm:$0xff] %v10870_v30  ;;  %v2794_v24 = vmul.f32 %v10837_v56, %v16993_v42  ;;  %v10884_v48 = vsub.f32 %v16994_v6, %v9571_v23  ;;  %v16996_v57 = vld [vmem:[#allocation93_spill] sm:$0xff]  ;;  %1907 = vbcast.lane.b32.xlu1 %v10552_v19, 376  ;;  %1903 = vbcast.lane.b32.xlu0 %v10552_v19, 368  ;;  %v17002_v6 = vld [vmem:[#allocation10_spill] sm:$0xff] }
 0x300   :  { %v10888_v30 = vsub.f32 %v16996_v57, %v9571_v23  ;;  %16999 = vst [vmem:[#allocation66_spill] sm:$0xff] %v10896_v5  ;;  %v17000_v21 = vld [vmem:[#allocation213_spill] sm:$0xff]  ;;  %v10906_v57 = vrot.slane %v10202_v50, %v17002_v6  ;;  %vm10908_vm6 = vcmp.lt.f32.partialorder %v4035_v9, 0.0004427343  ;;  %v4044_v12 = vand.u32 2147483647, %v16966_v31  ;;  %v10925_v9 = vpop.permute.xlu1 %1674 }
 0x301   :  { %16995 = vst [vmem:[#allocation225_spill] sm:$0xff] %v10884_v48  ;;  %v10900_v56 = vsub.f32 %v17000_v21, %v9571_v23  ;;  %v17005_v37 = vand.u32 2147483647, %v16971_v62  ;;  %v17007_v21 = vand.u32 2147483647, %v16972_v26  ;;  %v4042_v6 = vadd.f32 1.0, %v4041_v34 }
 0x302   :  { %16997 = vst [vmem:[#allocation77_spill] sm:$0xff] %v10888_v30  ;;  %v10923_v19 = vmul.f32 0.6931472, %v6562_v47  ;;  %vm2923_vm0 = vcmp.lt.f32.partialorder %v2795_v58, 0.0  ;;  %17009 = vst [vmem:[#allocation71_spill] sm:$0xff] %v10925_v9  ;;  %v4050_v27 = vmul.f32 -0.5, %v16977_v41  ;;  %6569 = vlog2.f32 %v4056_v7  ;;  %v10969_v1 = vpop.permute.xlu0 %1678 }
 0x303   :  { %17001 = vst [vmem:[#allocation375_spill] sm:$0xff] %v10900_v56  ;;  %v10916_v43 = vsel %vm2921_vm1, %v17005_v37, 0.0  ;;  %v10921_v17 = vsel %vm2920_vm10, %v17007_v21, 0.0  ;;  %17010 = vst [vmem:[#allocation231_spill] sm:$0xff] %v10927_v13  ;;  %v17011_v62 = vld [vmem:[#allocation226_spill] sm:$0xff]  ;;  %vm2922_vm1 = vcmp.lt.f32.partialorder %v2794_v24, 0.0  ;;  %v10972_v35 = vmul.f32 %v16966_v31, %v4042_v6 }
 0x304   :  { %17006 = vst [vmem:[#allocation223_spill] sm:$0xff] %v10916_v43  ;;  %17008 = vst [vmem:[#allocation376_spill] sm:$0xff] %v10921_v17  ;;  %v4065_v0 = vadd.f32 1.0, %v17011_v62  ;;  %v17012_v37 = vld [vmem:[#allocation79_spill] sm:$0xff]  ;;  %v17013_v59 = vld [vmem:[#allocation80_spill] sm:$0xff]  ;;  %v4059_v34 = vmul.f32 -0.5, %v16992_v54 }
 0x305   :  { %v2797_v26 = vmul.f32 %v10884_v48, %v17012_v37  ;;  %v2796_v47 = vmul.f32 %v10888_v30, %v17013_v59  ;;  %v17014_v21 = vld [vmem:[#allocation83_spill] sm:$0xff]  ;;  %v17015_v17 = vld [vmem:[#allocation84_spill] sm:$0xff]  ;;  %1918 = vbcast.lane.b32.xlu1 %v10906_v57, 264  ;;  %1914 = vbcast.lane.b32.xlu0 %v10906_v57, 256  ;;  %v17018_v24 = vld [vmem:[#allocation234_spill] sm:$0xff]  ;;  %17026 = vst [vmem:[#allocation10_spill] sm:$0xff] %v10969_v1  ;;  %v6566_v31 = vpop.eup %6565 }
 0x306   :  { %v2799_v43 = vmul.f32 %v10896_v5, %v17014_v21  ;;  %v2798_v13 = vmul.f32 %v10900_v56, %v17015_v17  ;;  %v17016_v9 = vld [vmem:[#allocation48_spill] sm:$0xff]  ;;  %v4074_v48 = vadd.f32 1.0, %v17018_v24  ;;  %v17019_v30 = vld [vmem:[#allocation217_spill] sm:$0xff]  ;;  %v10955_v56 = vmul.f32 0.6931472, %v6564_v18 }
 0x307   :  { %v10942_v7 = vsub.f32 %v17016_v9, %v9571_v23  ;;  %v10949_v33 = vsub.f32 %v17019_v30, %v9571_v23  ;;  %v4053_v9 = vand.u32 2147483647, %v16977_v41  ;;  %v17021_v22 = vand.u32 2147483647, %v16989_v53  ;;  %v10967_v30 = vpop.permute.xlu1 %1682 }
 0x308   :  { %v17023_v8 = vand.u32 2147483647, %v16993_v42  ;;  %17025 = vst [vmem:[#allocation213_spill] sm:$0xff] %v10967_v30  ;;  %6571 = vlog2.f32 %v4065_v0  ;;  %vm2925_vm10 = vcmp.lt.f32.partialorder %v2797_v26, 0.0  ;;  %vm2924_vm14 = vcmp.lt.f32.partialorder %v2796_v47, 0.0  ;;  %v17030_v42 = vld [vmem:[#allocation91_spill] sm:$0xff] }
 0x309   :  { %17017 = vst [vmem:[#allocation72_spill] sm:$0xff] %v10942_v7  ;;  %17020 = vst [vmem:[#allocation99_spill] sm:$0xff] %v10949_v33  ;;  %v10961_v39 = vsel %vm2923_vm0, %v17021_v22, 0.0  ;;  %vm10974_vm15 = vcmp.lt.f32.partialorder %v4044_v12, 0.0004427343  ;;  %v17027_v18 = vmov 0  ;;  %6573 = vlog2.f32 %v4074_v48 }
 0x30a   :  { %17022 = vst [vmem:[#allocation93_spill] sm:$0xff] %v10961_v39  ;;  %v10965_v44 = vsel %vm2922_vm1, %v17023_v8, 0.0  ;;  %v17028_v18 = vsel %vm10974_vm15, 4294967295, %v17027_v18  ;;  %v4051_v58 = vadd.f32 1.0, %v4050_v27  ;;  %v4060_v22 = vadd.f32 1.0, %v4059_v34  ;;  %v17029_v8 = vld [vmem:[#allocation90_spill] sm:$0xff] }
 0x30b   :  { %17024 = vst [vmem:[#allocation46_spill] sm:$0xff] %v10965_v44  ;;  %vm2927_vm0 = vcmp.lt.f32.partialorder %v2799_v43, 0.0  ;;  %vm2926_vm7 = vcmp.lt.f32.partialorder %v2798_v13, 0.0  ;;  %v2801_v53 = vmul.f32 %v10942_v7, %v17029_v8  ;;  %1926 = vbcast.lane.b32.xlu1 %v10906_v57, 280  ;;  %1922 = vbcast.lane.b32.xlu0 %v10906_v57, 272  ;;  %v2800_v6 = vmul.f32 %v10949_v33, %v17030_v42  ;;  %v11001_v5 = vpop.permute.xlu1 %1690  ;;  %v11003_v7 = vpop.permute.xlu0 %1686  ;;  %v17046_v43 = vld [vmem:[#allocation232_spill] sm:$0xff] }
 0x30c   :  { %v10986_v12 = vsub.f32 %v9538_v29, %v9571_v23  ;;  %v10990_v27 = vsub.f32 %v9540_v61, %v9571_v23  ;;  %v17033_v34 = vand.u32 2147483647, %v17012_v37  ;;  %17035 = vst [vmem:[#allocation83_spill] sm:$0xff] %v11001_v5  ;;  %17036 = vst [vmem:[#allocation84_spill] sm:$0xff] %v11003_v7  ;;  %vm11005_vm1 = vcmp.lt.f32.partialorder %v4053_v9, 0.0004427343  ;;  %v6568_v33 = vpop.eup %6567 }
 0x30d   :  { %v17037_v29 = vmov 0  ;;  %v4062_v61 = vand.u32 2147483647, %v16992_v54  ;;  %v4068_v23 = vmul.f32 -0.5, %v17011_v62  ;;  %v17039_v0 = vand.u32 2147483647, %v17013_v59 }
 0x30e   :  { %17031 = vst [vmem:[#allocation226_spill] sm:$0xff] %v10986_v12  ;;  %17032 = vst [vmem:[#allocation79_spill] sm:$0xff] %v10990_v27  ;;  %v10999_v48 = vsel %vm2925_vm10, %v17033_v34, 0.0  ;;  %v17038_v29 = vsel %vm11005_vm1, 4294967295, %v17037_v29  ;;  %v17041_v26 = vand.u32 2147483647, %v17014_v21  ;;  %v11027_v39 = vmul.f32 %v16977_v41, %v4051_v58 }
 0x30f   :  { %17034 = vst [vmem:[#allocation80_spill] sm:$0xff] %v10999_v48  ;;  %v11014_v37 = vsel %vm2924_vm14, %v17039_v0, 0.0  ;;  %v17043_v9 = vand.u32 2147483647, %v17015_v17  ;;  %vm2929_vm10 = vcmp.lt.f32.partialorder %v2801_v53, 0.0  ;;  %1934 = vbcast.lane.b32.xlu1 %v10906_v57, 296  ;;  %v11034_v47 = vmul.f32 %v16992_v54, %v4060_v22 }
 0x310   :  { %17040 = vst [vmem:[#allocation48_spill] sm:$0xff] %v11014_v37  ;;  %v11019_v34 = vsel %vm2927_vm0, %v17041_v26, 0.0  ;;  %1930 = vbcast.lane.b32.xlu0 %v10906_v57, 288  ;;  %v11031_v59 = vmul.f32 0.6931472, %v6566_v31  ;;  %v4083_v21 = vadd.f32 1.0, %v17046_v43  ;;  %v11042_v26 = vpop.permute.xlu1 %1698  ;;  %v11071_v44 = vsub.f32 %v9670_v15, %v9968_v14 }
 0x311   :  { %17042 = vst [vmem:[#allocation234_spill] sm:$0xff] %v11019_v34  ;;  %v11024_v48 = vsel %vm2926_vm7, %v17043_v9, 0.0  ;;  %17045 = vst [vmem:[#allocation90_spill] sm:$0xff] %v11034_v47  ;;  %vm2928_vm14 = vcmp.lt.f32.partialorder %v2800_v6, 0.0  ;;  %v17047_v17 = vld [vmem:[#allocation257_spill] sm:$0xff]  ;;  %v17048_v0 = vld [vmem:[#allocation260_spill] sm:$0xff]  ;;  %v11044_v9 = vpop.permute.xlu0 %1694  ;;  %v6570_v34 = vpop.eup %6569 }
 0x312   :  { %17044 = vst [vmem:[#allocation217_spill] sm:$0xff] %v11024_v48  ;;  %v2803_v13 = vmul.f32 %v10986_v12, %v17047_v17  ;;  %v2802_v41 = vmul.f32 %v10990_v27, %v17048_v0  ;;  %v4077_v58 = vmul.f32 -0.5, %v17018_v24  ;;  %17049 = vst [vmem:[#allocation91_spill] sm:$0xff] %v11042_v26  ;;  %v11046_v31 = vmul.f32 0.6931472, %v6568_v33  ;;  %v17073_v15 = vld [vmem:[#allocation274_spill] sm:$0xff] }
 0x313   :  { %17050 = vst [vmem:[#allocation232_spill] sm:$0xff] %v11044_v9  ;;  %vm11048_vm7 = vcmp.lt.f32.partialorder %v4062_v61, 0.0004427343  ;;  %v17051_v54 = vmov 0  ;;  %v4069_v22 = vadd.f32 1.0, %v4068_v23  ;;  %v4086_v6 = vmul.f32 -0.5, %v17046_v43 }
 0x314   :  { %v17052_v54 = vsel %vm11048_vm7, 4294967295, %v17051_v54  ;;  %v17054_v12 = vand.u32 2147483647, %v17029_v8  ;;  %v11060_v48 = vsub.f32 %v9668_v16, %v9968_v14  ;;  %v2156_v33 = vcombine.high %v10472_v46, %v10472_v46  ;;  %17059 = vst [vmem:[#allocation380_spill] sm:$0xff] %v11071_v44  ;;  %1942 = vbcast.lane.b32.xlu1 %v10906_v57, 312  ;;  %1938 = vbcast.lane.b32.xlu0 %v10906_v57, 304  ;;  %v11080_v53 = vpop.permute.xlu1 %1706 }
 0x315   :  { %17053 = vst [vmem:[#allocation257_spill] sm:$0xff] %v17052_v54  ;;  %v4071_v61 = vand.u32 2147483647, %v17011_v62  ;;  %v17057_v37 = vand.u32 2147483647, %v17030_v42  ;;  %6575 = vlog2.f32 %v4083_v21  ;;  %vm2931_vm0 = vcmp.lt.f32.partialorder %v2803_v13, 0.0  ;;  %v11082_v42 = vpop.permute.xlu0 %1702  ;;  %v6572_v13 = vpop.eup %6571 }
 0x316   :  { %v11056_v27 = vsel %vm2929_vm10, %v17054_v12, 0.0  ;;  %17056 = vst [vmem:[#allocation378_spill] sm:$0xff] %v11060_v48  ;;  %vm2930_vm10 = vcmp.lt.f32.partialorder %v2802_v41, 0.0  ;;  %v4078_v46 = vadd.f32 1.0, %v4077_v58  ;;  %v4080_v8 = vand.u32 2147483647, %v17018_v24 }
 0x317   :  { %17055 = vst [vmem:[#allocation260_spill] sm:$0xff] %v11056_v27  ;;  %v11067_v23 = vsel %vm2928_vm14, %v17057_v37, 0.0  ;;  %17060 = vst [vmem:[#allocation381_spill] sm:$0xff] %v11080_v53  ;;  %v11088_v12 = vmul.f32 0.6931472, %v6570_v34  ;;  %v11091_v37 = vmul.f32 %v17011_v62, %v4069_v22  ;;  %v4087_v21 = vadd.f32 1.0, %v4086_v6 }
 0x318   :  { %17058 = vst [vmem:[#allocation379_spill] sm:$0xff] %v11067_v23  ;;  %17061 = vst [vmem:[#allocation382_spill] sm:$0xff] %v11082_v42  ;;  %v17064_v41 = vld [vmem:[#allocation272_spill] sm:$0xff]  ;;  %v11097_v16 = vsub.f32 %v9698_v52, %v9968_v14  ;;  %v11100_v27 = vrot.slane %v2156_v33, %v6742_v2  ;;  %vm11102_vm14 = vcmp.lt.f32.partialorder %v4071_v61, 0.0004427343  ;;  %v17066_v23 = vmov 0  ;;  %v6574_v33 = vpop.eup %6573 }
 0x319   :  { %17062 = vst [vmem:[#allocation383_spill] sm:$0xff] %v11088_v12  ;;  %17063 = vst [vmem:[#allocation384_spill] sm:$0xff] %v11091_v37  ;;  %v2809_v58 = vmul.f32 %v11060_v48, %v17064_v41  ;;  %v17067_v23 = vsel %vm11102_vm14, 4294967295, %v17066_v23  ;;  %v17069_v34 = vand.u32 2147483647, %v17047_v17  ;;  %v2808_v48 = vmul.f32 %v11071_v44, %v17073_v15  ;;  %1950 = vbcast.lane.b32.xlu1 %v10906_v57, 328 }
 0x31a   :  { %17065 = vst [vmem:[#allocation272_spill] sm:$0xff] %v11097_v16  ;;  %17068 = vst [vmem:[#allocation385_spill] sm:$0xff] %v17067_v23  ;;  %v17071_v22 = vand.u32 2147483647, %v17048_v0  ;;  %v11118_v52 = vsub.f32 %v9700_v63, %v9968_v14  ;;  %1946 = vbcast.lane.b32.xlu0 %v10906_v57, 320  ;;  %v11123_v17 = vmul.f32 %v17018_v24, %v4078_v46  ;;  %v17076_v61 = vmov 0 }
 0x31b   :  { %v11108_v62 = vsel %vm2931_vm0, %v17069_v34, 0.0  ;;  %vm11125_vm0 = vcmp.lt.f32.partialorder %v4080_v8, 0.0004427343  ;;  %v4089_v0 = vand.u32 2147483647, %v17046_v43  ;;  %v17079_v34 = vld [vmem:[#allocation241_spill] sm:$0xff]  ;;  %v11138_v24 = vmul.f32 %v17046_v43, %v4087_v21 }
 0x31c   :  { %17070 = vst [vmem:[#allocation386_spill] sm:$0xff] %v11108_v62  ;;  %v11112_v6 = vsel %vm2930_vm10, %v17071_v22, 0.0  ;;  %17074 = vst [vmem:[#allocation274_spill] sm:$0xff] %v11118_v52  ;;  %v17077_v61 = vsel %vm11125_vm0, 4294967295, %v17076_v61  ;;  %v4092_v22 = vadd.f32 1.0, %v17079_v34  ;;  %v1718_v62 = vpop.permute.xlu1 %1717  ;;  %v4095_v46 = vmul.f32 -0.5, %v17079_v34 }
 0x31d   :  { %17072 = vst [vmem:[#allocation387_spill] sm:$0xff] %v11112_v6  ;;  %17075 = vst [vmem:[#allocation388_spill] sm:$0xff] %v11123_v17  ;;  %v1714_v6 = vpop.permute.xlu0 %1713  ;;  %v11135_v44 = vmul.f32 0.6931472, %v6572_v13  ;;  %vm2937_vm10 = vcmp.lt.f32.partialorder %v2809_v58, 0.0  ;;  %v17082_v8 = vld [vmem:[#allocation286_spill] sm:$0xff]  ;;  %v2233_v53 = vsub.f32 %v1718_v62, %v11100_v27  ;;  %v11154_v58 = vsub.f32 %v9765_v28, %v9968_v14 }
 0x31e   :  { %17078 = vst [vmem:[#allocation389_spill] sm:$0xff] %v17077_v61  ;;  %17081 = vst [vmem:[#allocation390_spill] sm:$0xff] %v11138_v24  ;;  %v2811_v42 = vmul.f32 %v11097_v16, %v17082_v8  ;;  %v2232_v9 = vsub.f32 %v1714_v6, %v11100_v27  ;;  %vm2936_vm1 = vcmp.lt.f32.partialorder %v2808_v48, 0.0  ;;  %v17083_v26 = vld [vmem:[#allocation289_spill] sm:$0xff]  ;;  %1958 = vbcast.lane.b32.xlu1 %v10906_v57, 344  ;;  %1954 = vbcast.lane.b32.xlu0 %v10906_v57, 336 }
 0x31f   :  { %17080 = vst [vmem:[#allocation241_spill] sm:$0xff] %v11135_v44  ;;  %v2810_v7 = vmul.f32 %v11118_v52, %v17083_v26  ;;  %v11149_v43 = vmul.f32 0.6931472, %v6574_v33  ;;  %v17085_v21 = vld [vmem:[#allocation239_spill] sm:$0xff]  ;;  %17086 = vst [vmem:[#allocation289_spill] sm:$0xff] %v11154_v58  ;;  %v17088_v6 = vld [vmem:[#allocation292_spill] sm:$0xff]  ;;  %6577 = vlog2.f32 %v4092_v22  ;;  %v11168_v33 = vsub.f32 %v9767_v51, %v9968_v14 }
 0x320   :  { %v4101_v13 = vadd.f32 1.0, %v17085_v21  ;;  %v17087_v63 = vld [vmem:[#allocation291_spill] sm:$0xff]  ;;  %v11160_v16 = vmul.f32 %v2232_v9, %v17088_v6  ;;  %v17089_v52 = vand.u32 2147483647, %v17064_v41  ;;  %v1726_v30 = vpop.permute.xlu1 %1725  ;;  %v17092_v9 = vand.u32 2147483647, %v17073_v15 }
 0x321   :  { %17084 = vst [vmem:[#allocation286_spill] sm:$0xff] %v11149_v43  ;;  %v11157_v62 = vmul.f32 %v2233_v53, %v17087_v63  ;;  %17091 = vst [vmem:[#allocation291_spill] sm:$0xff] %v11168_v33  ;;  %v1722_v1 = vpop.permute.xlu0 %1721  ;;  %v4098_v53 = vand.u32 2147483647, %v17079_v34  ;;  %v2235_v41 = vsub.f32 %v1726_v30, %v11100_v27  ;;  %vm11182_vm7 = vcmp.lt.f32.partialorder %v4089_v0, 0.0004427343 }
 0x322   :  { %v11164_v5 = vsel %vm2937_vm10, %v17089_v52, 0.0  ;;  %v11178_v22 = vsel %vm2936_vm1, %v17092_v9, 0.0  ;;  %vm2939_vm10 = vcmp.lt.f32.partialorder %v2811_v42, 0.0  ;;  %v2234_v51 = vsub.f32 %v1722_v1, %v11100_v27  ;;  %1966 = vbcast.lane.b32.xlu1 %v10906_v57, 360  ;;  %1962 = vbcast.lane.b32.xlu0 %v10906_v57, 352  ;;  %v6576_v42 = vpop.eup %6575  ;;  %v17097_v30 = vld [vmem:[#allocation117_spill] sm:$0xff] }
 0x323   :  { %17090 = vst [vmem:[#allocation239_spill] sm:$0xff] %v11164_v5  ;;  %17093 = vst [vmem:[#allocation292_spill] sm:$0xff] %v11178_v22  ;;  %v17094_v52 = vmov 0  ;;  %vm2938_vm15 = vcmp.lt.f32.partialorder %v2810_v7, 0.0  ;;  %v4096_v15 = vadd.f32 1.0, %v4095_v46  ;;  %6579 = vlog2.f32 %v4101_v13  ;;  %v17098_v0 = vld [vmem:[#allocation297_spill] sm:$0xff] }
 0x324   :  { %v17095_v52 = vsel %vm11182_vm7, 4294967295, %v17094_v52  ;;  %v2813_v1 = vmul.f32 %v11154_v58, %v17097_v30  ;;  %v11195_v63 = vmul.f32 %v2235_v41, %v17098_v0  ;;  %v17099_v6 = vld [vmem:[#allocation298_spill] sm:$0xff]  ;;  %v4104_v28 = vmul.f32 -0.5, %v17085_v21  ;;  %v1734_v48 = vpop.permute.xlu1 %1733 }
 0x325   :  { %17096 = vst [vmem:[#allocation391_spill] sm:$0xff] %v17095_v52  ;;  %v11198_v9 = vmul.f32 %v2234_v51, %v17099_v6  ;;  %v17100_v5 = vand.u32 2147483647, %v17082_v8  ;;  %v17102_v61 = vld [vmem:[#allocation118_spill] sm:$0xff]  ;;  %v11209_v13 = vsub.f32 %v9811_v45, %v9968_v14  ;;  %v1730_v58 = vpop.permute.xlu0 %1729  ;;  %v4107_v41 = vand.u32 2147483647, %v17085_v21 }
 0x326   :  { %v2812_v46 = vmul.f32 %v11168_v33, %v17102_v61  ;;  %v17104_v51 = vand.u32 2147483647, %v17083_v26  ;;  %v2237_v8 = vsub.f32 %v1734_v48, %v11100_v27  ;;  %v2236_v6 = vsub.f32 %v1730_v58, %v11100_v27  ;;  %1974 = vbcast.lane.b32.xlu1 %v10906_v57, 376  ;;  %1970 = vbcast.lane.b32.xlu0 %v10906_v57, 368  ;;  %v17107_v45 = vld [vmem:[#allocation11_spill] sm:$0xff]  ;;  %v17112_v58 = vld [vmem:[#allocation301_spill] sm:$0xff] }
 0x327   :  { %v11203_v22 = vsel %vm2939_vm10, %v17100_v5, 0.0  ;;  %17103 = vst [vmem:[#allocation297_spill] sm:$0xff] %v11209_v13  ;;  %v11219_v5 = vsub.f32 %v9813_v20, %v9968_v14  ;;  %v11227_v33 = vrot.slane %v10202_v50, %v17107_v45  ;;  %v11229_v26 = vmul.f32 0.6931472, %v6576_v42  ;;  %v17113_v57 = vld [vmem:[#allocation120_spill] sm:$0xff]  ;;  %v17251_v54 = vld [vmem:[#allocation170_spill] sm:$0xff] }
 0x328   :  { %17101 = vst [vmem:[#allocation117_spill] sm:$0xff] %v11203_v22  ;;  %v11215_v0 = vsel %vm2938_vm15, %v17104_v51, 0.0  ;;  %v11232_v7 = vmul.f32 %v17079_v34, %v4096_v15  ;;  %v17110_v51 = vld [vmem:[#allocation248_spill] sm:$0xff]  ;;  %vm2941_vm15 = vcmp.lt.f32.partialorder %v2813_v1, 0.0  ;;  %v4105_v43 = vadd.f32 1.0, %v4104_v28  ;;  %v1742_v34 = vpop.permute.xlu1 %1741 }
 0x329   :  { %17105 = vst [vmem:[#allocation298_spill] sm:$0xff] %v11215_v0  ;;  %17106 = vst [vmem:[#allocation118_spill] sm:$0xff] %v11219_v5  ;;  %v4110_v20 = vadd.f32 1.0, %v17110_v51  ;;  %v17111_v22 = vld [vmem:[#allocation300_spill] sm:$0xff]  ;;  %v11239_v0 = vmul.f32 %v2236_v6, %v17112_v58  ;;  %vm2940_vm1 = vcmp.lt.f32.partialorder %v2812_v46, 0.0  ;;  %v2815_v50 = vmul.f32 %v11209_v13, %v17113_v57  ;;  %v1738_v15 = vpop.permute.xlu0 %1737  ;;  %v17118_v58 = vld [vmem:[#allocation242_spill] sm:$0xff] }
 0x32a   :  { %17108 = vst [vmem:[#allocation11_spill] sm:$0xff] %v11229_v26  ;;  %17109 = vst [vmem:[#allocation392_spill] sm:$0xff] %v11232_v7  ;;  %v11236_v48 = vmul.f32 %v2237_v8, %v17111_v22  ;;  %v11245_v42 = vsub.f32 %v9853_v40, %v9968_v14  ;;  %v17115_v22 = vsel %vm10177_vm3, %v10175_v36, %v10237_v3  ;;  %v17117_v8 = vld [vmem:[#allocation121_spill] sm:$0xff]  ;;  %v4119_v40 = vadd.f32 1.0, %v17118_v58  ;;  %v17138_v26 = vld [vmem:[#allocation252_spill] sm:$0xff] }
 0x32b   :  { %v11253_v1 = vadd.f32 %v17115_v22, %v10231_v55  ;;  %v2814_v28 = vmul.f32 %v11219_v5, %v17117_v8  ;;  %v2239_v6 = vsub.f32 %v1742_v34, %v11100_v27  ;;  %v2238_v45 = vsub.f32 %v1738_v15, %v11100_v27  ;;  %1985 = vbcast.lane.b32.xlu1 %v11227_v33, 264  ;;  %v17125_v15 = vld [vmem:[#allocation304_spill] sm:$0xff] }
 0x32c   :  { %17114 = vst [vmem:[#allocation248_spill] sm:$0xff] %v11245_v42  ;;  %v17119_v13 = vand.u32 2147483647, %v17097_v30  ;;  %1981 = vbcast.lane.b32.xlu0 %v11227_v33, 256  ;;  %6581 = vlog2.f32 %v4110_v20  ;;  %v4113_v3 = vmul.f32 -0.5, %v17110_v51  ;;  %v11278_v30 = vsub.f32 %v9855_v32, %v9968_v14  ;;  %v6578_v20 = vpop.eup %6577 }
 0x32d   :  { %17116 = vst [vmem:[#allocation300_spill] sm:$0xff] %v11253_v1  ;;  %v17121_v36 = vand.u32 2147483647, %v17102_v61  ;;  %v11284_v22 = vmul.f32 %v2238_v45, %v17125_v15  ;;  %vm11286_vm3 = vcmp.lt.f32.partialorder %v4098_v53, 0.0004427343  ;;  %v17126_v55 = vmov 0  ;;  %v1746_v5 = vpop.permute.xlu0 %1745 }
 0x32e   :  { %v11262_v17 = vsel %vm2941_vm15, %v17119_v13, 0.0  ;;  %17123 = vst [vmem:[#allocation121_spill] sm:$0xff] %v11278_v30  ;;  %v17124_v13 = vld [vmem:[#allocation116_spill] sm:$0xff]  ;;  %v17127_v55 = vsel %vm11286_vm3, 4294967295, %v17126_v55  ;;  %vm2943_vm10 = vcmp.lt.f32.partialorder %v2815_v50, 0.0  ;;  %v17129_v61 = vld [vmem:[#allocation123_spill] sm:$0xff]  ;;  %v11293_v32 = vmul.f32 %v17085_v21, %v4105_v43 }
 0x32f   :  { %17120 = vst [vmem:[#allocation301_spill] sm:$0xff] %v11262_v17  ;;  %v11274_v25 = vsel %vm2940_vm1, %v17121_v36, 0.0  ;;  %v11281_v34 = vmul.f32 %v2239_v6, %v17124_v13  ;;  %17128 = vst [vmem:[#allocation242_spill] sm:$0xff] %v17127_v55  ;;  %v2817_v46 = vmul.f32 %v11245_v42, %v17129_v61  ;;  %v1750_v36 = vpop.permute.xlu1 %1749  ;;  %v4116_v6 = vand.u32 2147483647, %v17110_v51  ;;  %1993 = vbcast.lane.b32.xlu1 %v11227_v33, 280 }
 0x330   :  { %17122 = vst [vmem:[#allocation120_spill] sm:$0xff] %v11274_v25  ;;  %17130 = vst [vmem:[#allocation116_spill] sm:$0xff] %v11293_v32  ;;  %vm2942_vm15 = vcmp.lt.f32.partialorder %v2814_v28, 0.0  ;;  %v2241_v45 = vsub.f32 %v1750_v36, %v11100_v27  ;;  %v2240_v53 = vsub.f32 %v1746_v5, %v11100_v27  ;;  %6583 = vlog2.f32 %v4119_v40  ;;  %1989 = vbcast.lane.b32.xlu0 %v11227_v33, 272  ;;  %v6580_v42 = vpop.eup %6579  ;;  %v17132_v17 = vld [vmem:[#allocation127_spill] sm:$0xff]  ;;  %v17134_v40 = vld [vmem:[#allocation308_spill] sm:$0xff] }
 0x331   :  { %v11300_v13 = vsub.f32 %v9910_v38, %v9968_v14  ;;  %v4114_v15 = vadd.f32 1.0, %v4113_v3  ;;  %v4122_v43 = vmul.f32 -0.5, %v17118_v58  ;;  %v4125_v21 = vand.u32 2147483647, %v17118_v58  ;;  %v17133_v25 = vld [vmem:[#allocation307_spill] sm:$0xff]  ;;  %v17148_v28 = vld [vmem:[#allocation233_spill] sm:$0xff] }
 0x332   :  { %v2816_v36 = vmul.f32 %v11278_v30, %v17132_v17  ;;  %v11309_v5 = vmul.f32 %v2241_v45, %v17133_v25  ;;  %v11312_v1 = vmul.f32 %v2240_v53, %v17134_v40  ;;  %vm11314_vm1 = vcmp.lt.f32.partialorder %v4107_v41, 0.0004427343  ;;  %v1754_v45 = vpop.permute.xlu0 %1753  ;;  %v17195_v55 = vld [vmem:[#allocation313_spill] sm:$0xff] }
 0x333   :  { %17131 = vst [vmem:[#allocation304_spill] sm:$0xff] %v11300_v13  ;;  %v17135_v38 = vmov 0  ;;  %v4128_v3 = vadd.f32 1.0, %v17138_v26  ;;  %v17139_v24 = vand.u32 2147483647, %v17113_v57  ;;  %vm2945_vm7 = vcmp.lt.f32.partialorder %v2817_v46, 0.0  ;;  %v1758_v25 = vpop.permute.xlu1 %1757 }
 0x334   :  { %v17136_v38 = vsel %vm11314_vm1, 4294967295, %v17135_v38  ;;  %v17141_v44 = vand.u32 2147483647, %v17117_v8  ;;  %v11329_v53 = vmul.f32 0.6931472, %v6578_v20  ;;  %v11333_v41 = vsub.f32 %v9912_v49, %v9968_v14  ;;  %2001 = vbcast.lane.b32.xlu1 %v11227_v33, 296 }
 0x335   :  { %17137 = vst [vmem:[#allocation123_spill] sm:$0xff] %v17136_v38  ;;  %v11322_v52 = vsel %vm2943_vm10, %v17139_v24, 0.0  ;;  %v2243_v40 = vsub.f32 %v1758_v25, %v11100_v27  ;;  %v2242_v57 = vsub.f32 %v1754_v45, %v11100_v27  ;;  %v17145_v24 = vld [vmem:[#allocation249_spill] sm:$0xff]  ;;  %1997 = vbcast.lane.b32.xlu0 %v11227_v33, 288  ;;  %v17149_v20 = vld [vmem:[#allocation280_spill] sm:$0xff]  ;;  %v11351_v25 = vmul.f32 %v17110_v51, %v4114_v15  ;;  %v17174_v51 = vld [vmem:[#allocation187_spill] sm:$0xff] }
 0x336   :  { %17140 = vst [vmem:[#allocation127_spill] sm:$0xff] %v11322_v52  ;;  %v11327_v30 = vsel %vm2942_vm15, %v17141_v44, 0.0  ;;  %17143 = vst [vmem:[#allocation308_spill] sm:$0xff] %v11329_v53  ;;  %v4137_v50 = vadd.f32 1.0, %v17145_v24  ;;  %v17146_v52 = vld [vmem:[#allocation134_spill] sm:$0xff]  ;;  %v17150_v49 = vsel %vm10247_vm8, %v17148_v28, %v17149_v20  ;;  %v4123_v45 = vadd.f32 1.0, %v4122_v43 }
 0x337   :  { %17142 = vst [vmem:[#allocation307_spill] sm:$0xff] %v11327_v30  ;;  %17144 = vst [vmem:[#allocation252_spill] sm:$0xff] %v11333_v41  ;;  %v2819_v8 = vmul.f32 %v11300_v13, %v17146_v52  ;;  %v11348_v14 = vadd.f32 %v17150_v49, %v10211_v10  ;;  %vm2944_vm10 = vcmp.lt.f32.partialorder %v2816_v36, 0.0  ;;  %v17153_v30 = vld [vmem:[#allocation128_spill] sm:$0xff]  ;;  %v17154_v13 = vld [vmem:[#allocation310_spill] sm:$0xff]  ;;  %6585 = vlog2.f32 %v4128_v3  ;;  %v1766_v28 = vpop.permute.xlu1 %1765  ;;  %v1762_v10 = vpop.permute.xlu0 %1761 }
 0x338   :  { %17152 = vst [vmem:[#allocation134_spill] sm:$0xff] %v11351_v25  ;;  %v11354_v37 = vmul.f32 %v2243_v40, %v17153_v30  ;;  %v11357_v23 = vmul.f32 %v2242_v57, %v17154_v13  ;;  %v17155_v12 = vand.u32 2147483647, %v17129_v61  ;;  %v11368_v15 = vmul.f32 0.6931472, %v6580_v42  ;;  %v17158_v43 = vld [vmem:[#allocation135_spill] sm:$0xff] }
 0x339   :  { %17151 = vst [vmem:[#allocation249_spill] sm:$0xff] %v11348_v14  ;;  %v4131_v30 = vmul.f32 -0.5, %v17138_v26  ;;  %v2818_v13 = vmul.f32 %v11333_v41, %v17158_v43  ;;  %v2245_v36 = vsub.f32 %v1766_v28, %v11100_v27  ;;  %v2244_v61 = vsub.f32 %v1762_v10, %v11100_v27  ;;  %2009 = vbcast.lane.b32.xlu1 %v11227_v33, 312  ;;  %v17164_v42 = vld [vmem:[#allocation282_spill] sm:$0xff]  ;;  %v17166_v57 = vld [vmem:[#allocation283_spill] sm:$0xff]  ;;  %v17167_v20 = vld [vmem:[#allocation137_spill] sm:$0xff] }
 0x33a   :  { %v11362_v44 = vsel %vm2945_vm7, %v17155_v12, 0.0  ;;  %17157 = vst [vmem:[#allocation233_spill] sm:$0xff] %v11368_v15  ;;  %vm11375_vm8 = vcmp.lt.f32.partialorder %v4116_v6, 0.0004427343  ;;  %v17159_v12 = vmov 0  ;;  %6587 = vlog2.f32 %v4137_v50  ;;  %2005 = vbcast.lane.b32.xlu0 %v11227_v33, 304  ;;  %v6582_v50 = vpop.eup %6581 }
 0x33b   :  { %17156 = vst [vmem:[#allocation265_spill] sm:$0xff] %v11362_v44  ;;  %v17160_v12 = vsel %vm11375_vm8, 4294967295, %v17159_v12  ;;  %v17162_v46 = vand.u32 2147483647, %v17132_v17  ;;  %vm2947_vm7 = vcmp.lt.f32.partialorder %v2819_v8, 0.0  ;;  %v17168_v49 = vsel %vm10278_vm4, %v17166_v57, %v17167_v20  ;;  %v17171_v17 = vld [vmem:[#allocation222_spill] sm:$0xff]  ;;  %v1770_v57 = vpop.permute.xlu0 %1769 }
 0x33c   :  { %17161 = vst [vmem:[#allocation280_spill] sm:$0xff] %v17160_v12  ;;  %v11391_v6 = vadd.f32 %v17168_v49, %v17164_v42  ;;  %v11394_v28 = vmul.f32 %v17118_v58, %v4123_v45  ;;  %v17172_v10 = vld [vmem:[#allocation193_spill] sm:$0xff]  ;;  %v11402_v41 = vsub.f32 %v17174_v51, %v17171_v17  ;;  %v17177_v40 = vld [vmem:[#allocation131_spill] sm:$0xff]  ;;  %v1774_v42 = vpop.permute.xlu1 %1773  ;;  %vm11414_vm4 = vcmp.lt.f32.partialorder %v4125_v21, 0.0004427343  ;;  %v17194_v53 = vld [vmem:[#allocation312_spill] sm:$0xff] }
 0x33d   :  { %v11381_v3 = vsel %vm2944_vm10, %v17162_v46, 0.0  ;;  %v11398_v46 = vsub.f32 %v17172_v10, %v17171_v17  ;;  %v17176_v44 = vld [vmem:[#allocation129_spill] sm:$0xff]  ;;  %v11408_v14 = vmul.f32 %v2244_v61, %v17177_v40  ;;  %v17178_v45 = vmov 0  ;;  %v17181_v49 = vld [vmem:[#allocation363_spill] sm:$0xff]  ;;  %v6584_v40 = vpop.eup %6583  ;;  %2017 = vbcast.lane.b32.xlu1 %v11227_v33, 328 }
 0x33e   :  { %17163 = vst [vmem:[#allocation128_spill] sm:$0xff] %v11381_v3  ;;  %17169 = vst [vmem:[#allocation310_spill] sm:$0xff] %v11391_v6  ;;  %v11405_v3 = vmul.f32 %v2245_v36, %v17176_v44  ;;  %v17179_v45 = vsel %vm11414_vm4, 4294967295, %v17178_v45  ;;  %v4132_v20 = vadd.f32 1.0, %v4131_v30  ;;  %v4134_v51 = vand.u32 2147483647, %v17138_v26 }
 0x33f   :  { %17170 = vst [vmem:[#allocation135_spill] sm:$0xff] %v11394_v28  ;;  %17173 = vst [vmem:[#allocation282_spill] sm:$0xff] %v11398_v46  ;;  %v4140_v44 = vmul.f32 -0.5, %v17145_v24  ;;  %vm2946_vm15 = vcmp.lt.f32.partialorder %v2818_v13, 0.0  ;;  %v2247_v36 = vsub.f32 %v1774_v42, %v11100_v27  ;;  %v2246_v61 = vsub.f32 %v1770_v57, %v11100_v27  ;;  %2013 = vbcast.lane.b32.xlu0 %v11227_v33, 320  ;;  %v17184_v30 = vld [vmem:[#allocation97_spill] sm:$0xff] }
 0x340   :  { %17175 = vst [vmem:[#allocation190_spill] sm:$0xff] %v11402_v41  ;;  %17180 = vst [vmem:[#allocation283_spill] sm:$0xff] %v17179_v45  ;;  %v2158_v10 = vcombine.high %v17181_v49, %v17181_v49  ;;  %v17182_v58 = vand.u32 2147483647, %v17146_v52  ;;  %v17186_v15 = vld [vmem:[#allocation287_spill] sm:$0xff]  ;;  %v17187_v42 = vld [vmem:[#allocation149_spill] sm:$0xff] }
 0x341   :  { %v17188_v32 = vsel %vm10380_vm2, %v17186_v15, %v17187_v42  ;;  %v11439_v57 = vmul.f32 0.6931472, %v6582_v50  ;;  %v17191_v49 = vld [vmem:[#allocation256_spill] sm:$0xff]  ;;  %v17192_v52 = vld [vmem:[#allocation150_spill] sm:$0xff]  ;;  %v11447_v7 = vmul.f32 %v2247_v36, %v17194_v53  ;;  %v11450_v6 = vmul.f32 %v2246_v61, %v17195_v55  ;;  %v11460_v42 = vpop.permute.xlu1 %1784  ;;  %2025 = vbcast.lane.b32.xlu1 %v11227_v33, 344  ;;  %v17232_v45 = vld [vmem:[#allocation161_spill] sm:$0xff] }
 0x342   :  { %v11427_v21 = vsel %vm2947_vm7, %v17182_v58, 0.0  ;;  %v11437_v27 = vadd.f32 %v17188_v32, %v17184_v30  ;;  %v4146_v38 = vadd.f32 1.0, %v17191_v49  ;;  %v2825_v8 = vmul.f32 %v11398_v46, %v17192_v52  ;;  %v17193_v58 = vld [vmem:[#allocation151_spill] sm:$0xff]  ;;  %v17196_v15 = vld [vmem:[#allocation214_spill] sm:$0xff]  ;;  %17200 = vst [vmem:[#allocation131_spill] sm:$0xff] %v11460_v42  ;;  %v11462_v46 = vpop.permute.xlu0 %1780 }
 0x343   :  { %17183 = vst [vmem:[#allocation137_spill] sm:$0xff] %v11427_v21  ;;  %17190 = vst [vmem:[#allocation193_spill] sm:$0xff] %v11439_v57  ;;  %v2824_v21 = vmul.f32 %v11402_v41, %v17193_v58  ;;  %v11454_v32 = vsub.f32 %v17196_v15, %v17171_v17  ;;  %v17198_v50 = vld [vmem:[#allocation210_spill] sm:$0xff]  ;;  %v11465_v41 = vmul.f32 %v17138_v26, %v4132_v20  ;;  %v4141_v53 = vadd.f32 1.0, %v4140_v44  ;;  %v17210_v44 = vld [vmem:[#allocation311_spill] sm:$0xff] }
 0x344   :  { %17189 = vst [vmem:[#allocation222_spill] sm:$0xff] %v11437_v27  ;;  %v11458_v30 = vsub.f32 %v17198_v50, %v17171_v17  ;;  %17201 = vst [vmem:[#allocation363_spill] sm:$0xff] %v11462_v46  ;;  %v11468_v36 = vrot.slane %v2158_v10, %v6742_v2  ;;  %v11470_v55 = vmul.f32 0.6931472, %v6584_v40  ;;  %v4143_v61 = vand.u32 2147483647, %v17145_v24  ;;  %v6586_v20 = vpop.eup %6585 }
 0x345   :  { %17197 = vst [vmem:[#allocation187_spill] sm:$0xff] %v11454_v32  ;;  %v4149_v15 = vmul.f32 -0.5, %v17191_v49  ;;  %v17204_v50 = vand.u32 2147483647, %v17158_v43  ;;  %v17206_v46 = vld [vmem:[#allocation230_spill] sm:$0xff]  ;;  %2021 = vbcast.lane.b32.xlu0 %v11227_v33, 336  ;;  %6589 = vlog2.f32 %v4146_v38  ;;  %v11510_v43 = vpop.permute.xlu1 %1792  ;;  %v11515_v57 = vmul.f32 %v17145_v24, %v4141_v53 }
 0x346   :  { %17199 = vst [vmem:[#allocation129_spill] sm:$0xff] %v11458_v30  ;;  %17202 = vst [vmem:[#allocation97_spill] sm:$0xff] %v11468_v36  ;;  %v11481_v42 = vsub.f32 %v17206_v46, %v17171_v17  ;;  %v17208_v26 = vld [vmem:[#allocation270_spill] sm:$0xff]  ;;  %v17211_v10 = vld [vmem:[#allocation17_spill] sm:$0xff]  ;;  %vm2953_vm2 = vcmp.lt.f32.partialorder %v2825_v8, 0.0  ;;  %vm2952_vm10 = vcmp.lt.f32.partialorder %v2824_v21, 0.0 }
 0x347   :  { %17203 = vst [vmem:[#allocation318_spill] sm:$0xff] %v11470_v55  ;;  %v11477_v27 = vsel %vm2946_vm15, %v17204_v50, 0.0  ;;  %v17212_v40 = vsel %vm10441_vm9, %v17210_v44, %v17211_v10  ;;  %vm11497_vm7 = vcmp.lt.f32.partialorder %v4134_v51, 0.0004427343  ;;  %v17216_v46 = vld [vmem:[#allocation255_spill] sm:$0xff]  ;;  %17221 = vst [vmem:[#allocation151_spill] sm:$0xff] %v11510_v43  ;;  %v11512_v51 = vpop.permute.xlu0 %1788 }
 0x348   :  { %17205 = vst [vmem:[#allocation287_spill] sm:$0xff] %v11477_v27  ;;  %17207 = vst [vmem:[#allocation149_spill] sm:$0xff] %v11481_v42  ;;  %v11491_v36 = vadd.f32 %v17212_v40, %v17208_v26  ;;  %v4155_v50 = vadd.f32 1.0, %v17216_v46  ;;  %v17217_v27 = vld [vmem:[#allocation156_spill] sm:$0xff]  ;;  %v17218_v26 = vld [vmem:[#allocation157_spill] sm:$0xff]  ;;  %2033 = vbcast.lane.b32.xlu1 %v11227_v33, 360 }
 0x349   :  { %v2827_v44 = vmul.f32 %v11454_v32, %v17217_v27  ;;  %v2826_v10 = vmul.f32 %v11458_v30, %v17218_v26  ;;  %v17219_v40 = vld [vmem:[#allocation237_spill] sm:$0xff]  ;;  %17222 = vst [vmem:[#allocation312_spill] sm:$0xff] %v11512_v51  ;;  %v17223_v38 = vld [vmem:[#allocation246_spill] sm:$0xff]  ;;  %vm11525_vm9 = vcmp.lt.f32.partialorder %v4143_v61, 0.0004427343  ;;  %v6588_v51 = vpop.eup %6587  ;;  %v2829_v61 = vmul.f32 %v11481_v42, %v17232_v45  ;;  %2029 = vbcast.lane.b32.xlu0 %v11227_v33, 352  ;;  %v11562_v55 = vpop.permute.xlu1 %1800 }
 0x34a   :  { %17213 = vst [vmem:[#allocation256_spill] sm:$0xff] %v11491_v36  ;;  %v11508_v36 = vsub.f32 %v17219_v40, %v17171_v17  ;;  %v11519_v25 = vsub.f32 %v17223_v38, %v17171_v17  ;;  %v4150_v40 = vadd.f32 1.0, %v4149_v15  ;;  %v17227_v43 = vld [vmem:[#allocation262_spill] sm:$0xff]  ;;  %v17228_v24 = vand.u32 2147483647, %v17192_v52  ;;  %v17233_v32 = vld [vmem:[#allocation269_spill] sm:$0xff] }
 0x34b   :  { %v4164_v12 = vadd.f32 1.0, %v17227_v43  ;;  %v17230_v38 = vand.u32 2147483647, %v17193_v58  ;;  %v4152_v15 = vand.u32 2147483647, %v17191_v49  ;;  %v17235_v52 = vld [vmem:[#allocation350_spill] sm:$0xff]  ;;  %6591 = vlog2.f32 %v4155_v50 }
 0x34c   :  { %17220 = vst [vmem:[#allocation150_spill] sm:$0xff] %v11508_v36  ;;  %17224 = vst [vmem:[#allocation313_spill] sm:$0xff] %v11519_v25  ;;  %v11533_v53 = vsel %vm2953_vm2, %v17228_v24, 0.0  ;;  %v17236_v8 = vld [vmem:[#allocation322_spill] sm:$0xff]  ;;  %v11553_v21 = vmul.f32 0.6931472, %v6586_v20 }
 0x34d   :  { %17229 = vst [vmem:[#allocation214_spill] sm:$0xff] %v11533_v53  ;;  %v11538_v47 = vsel %vm2952_vm10, %v17230_v38, 0.0  ;;  %v17237_v24 = vsel %vm10487_vm11, %v17235_v52, %v17236_v8  ;;  %v4158_v58 = vmul.f32 -0.5, %v17216_v46  ;;  %vm2955_vm15 = vcmp.lt.f32.partialorder %v2827_v44, 0.0  ;;  %v17239_v38 = vld [vmem:[#allocation130_spill] sm:$0xff]  ;;  %17242 = vst [vmem:[#allocation328_spill] sm:$0xff] %v11562_v55  ;;  %v11564_v52 = vpop.permute.xlu0 %1796 }
 0x34e   :  { %17231 = vst [vmem:[#allocation210_spill] sm:$0xff] %v11538_v47  ;;  %v11551_v53 = vadd.f32 %v17237_v24, %v17233_v32  ;;  %vm2954_vm2 = vcmp.lt.f32.partialorder %v2826_v10, 0.0  ;;  %v2828_v42 = vmul.f32 %v11508_v36, %v17239_v38  ;;  %v17240_v47 = vld [vmem:[#allocation250_spill] sm:$0xff]  ;;  %17243 = vst [vmem:[#allocation311_spill] sm:$0xff] %v11564_v52  ;;  %v17244_v32 = vld [vmem:[#allocation169_spill] sm:$0xff]  ;;  %6593 = vlog2.f32 %v4164_v12  ;;  %2041 = vbcast.lane.b32.xlu1 %v11227_v33, 376 }
 0x34f   :  { %v11560_v28 = vsub.f32 %v17240_v47, %v17171_v17  ;;  %v2831_v20 = vmul.f32 %v11519_v25, %v17244_v32  ;;  %v11568_v50 = vmul.f32 0.6931472, %v6588_v51  ;;  %v4161_v8 = vand.u32 2147483647, %v17216_v46  ;;  %2037 = vbcast.lane.b32.xlu0 %v11227_v33, 368  ;;  %v6701_v47 = vld [vmem:[%s6747_s23 + $0x10] sm:$0xff] }
 0x350   :  { %17238 = vst [vmem:[#allocation230_spill] sm:$0xff] %v11551_v53  ;;  %vm2957_vm11 = vcmp.lt.f32.partialorder %v2829_v61, 0.0  ;;  %v2488_v24 = vand.u32 2147483647, %v11160_v16  ;;  %v17246_v36 = vld [vmem:[#allocation19_spill] sm:$0xff]  ;;  %v11579_v52 = vmul.f32 %v17191_v49, %v4150_v40  ;;  %v4159_v55 = vadd.f32 1.0, %v4158_v58 }
 0x351   :  { %17241 = vst [vmem:[#allocation270_spill] sm:$0xff] %v11560_v28  ;;  %17245 = vst [vmem:[#allocation17_spill] sm:$0xff] %v11568_v50  ;;  %v11576_v53 = vrot.slane %v6701_v47, %v17246_v36  ;;  %v17247_v51 = vand.u32 2147483647, %v17217_v27  ;;  %v17249_v12 = vand.u32 2147483647, %v17218_v26  ;;  %v2830_v36 = vmul.f32 %v11560_v28, %v17251_v54  ;;  %v11598_v27 = vpop.permute.xlu1 %1808  ;;  %v11600_v44 = vpop.permute.xlu0 %1804 }
 0x352   :  { %v4167_v33 = vmul.f32 -0.5, %v17227_v43  ;;  %vm2956_vm10 = vcmp.lt.f32.partialorder %v2828_v42, 0.0  ;;  %v17252_v49 = vld [vmem:[#allocation276_spill] sm:$0xff]  ;;  %17254 = vst [vmem:[#allocation237_spill] sm:$0xff] %v11598_v27  ;;  %17255 = vst [vmem:[#allocation246_spill] sm:$0xff] %v11600_v44  ;;  %v17258_v47 = vld [vmem:[#allocation98_spill] sm:$0xff] }
 0x353   :  { %v11584_v25 = vsel %vm2955_vm15, %v17247_v51, 0.0  ;;  %v11589_v16 = vsel %vm2954_vm2, %v17249_v12, 0.0  ;;  %v11596_v40 = vsub.f32 %v17252_v49, %v17171_v17  ;;  %v17256_v10 = vand.u32 2147483647, %v17232_v45  ;;  %v17260_v12 = vld [vmem:[#allocation295_spill] sm:$0xff]  ;;  %v17262_v28 = vld [vmem:[#allocation144_spill] sm:$0xff] }
 0x354   :  { %17248 = vst [vmem:[#allocation255_spill] sm:$0xff] %v11584_v25  ;;  %17250 = vst [vmem:[#allocation156_spill] sm:$0xff] %v11589_v16  ;;  %vm2959_vm15 = vcmp.lt.f32.partialorder %v2831_v20, 0.0  ;;  %v11613_v51 = vsub.f32 %v17258_v47, %v17171_v17  ;;  %v17263_v25 = vld [vmem:[#allocation327_spill] sm:$0xff]  ;;  %v2489_v26 = vand.u32 2147483647, %v11157_v62 }
 0x355   :  { %17253 = vst [vmem:[#allocation157_spill] sm:$0xff] %v11596_v40  ;;  %v11609_v58 = vsel %vm2957_vm11, %v17256_v10, 0.0  ;;  %v17264_v16 = vsel %vm10520_vm13, %v17262_v28, %v17263_v25  ;;  %v2490_v45 = vand.u32 2147483647, %v11198_v9  ;;  %2052 = vbcast.lane.b32.xlu1 %v11576_v53, 264  ;;  %2048 = vbcast.lane.b32.xlu0 %v11576_v53, 256  ;;  %v11644_v28 = vmul.f32 %v17216_v46, %v4159_v55  ;;  %v11651_v47 = vpop.permute.xlu0 %1812 }
 0x356   :  { %17257 = vst [vmem:[#allocation262_spill] sm:$0xff] %v11609_v58  ;;  %17259 = vst [vmem:[#allocation161_spill] sm:$0xff] %v11613_v51  ;;  %v11621_v44 = vadd.f32 %v17264_v16, %v17260_v12  ;;  %v17266_v61 = vld [vmem:[#allocation325_spill] sm:$0xff]  ;;  %vm11634_vm2 = vcmp.lt.f32.partialorder %v4152_v15, 0.0004427343  ;;  %v4168_v16 = vadd.f32 1.0, %v4167_v33  ;;  %v6590_v12 = vpop.eup %6589  ;;  %v11649_v15 = vpop.permute.xlu1 %1816 }
 0x357   :  { %v11628_v10 = vmul.f32 %v17266_v61, %v2488_v24  ;;  %v17270_v62 = vand.u32 2147483647, %v17239_v38  ;;  %17272 = vst [vmem:[#allocation322_spill] sm:$0xff] %v11644_v28  ;;  %v4170_v24 = vand.u32 2147483647, %v17227_v43  ;;  %vm2958_vm13 = vcmp.lt.f32.partialorder %v2830_v36, 0.0 }
 0x358   :  { %17265 = vst [vmem:[#allocation269_spill] sm:$0xff] %v11621_v44  ;;  %v17273_v49 = vld [vmem:[#allocation173_spill] sm:$0xff]  ;;  %17274 = vst [vmem:[#allocation130_spill] sm:$0xff] %v11649_v15  ;;  %v17279_v55 = vld [vmem:[#allocation174_spill] sm:$0xff]  ;;  %v2491_v50 = vand.u32 2147483647, %v11195_v63 }
 0x359   :  { %17267 = vst [vmem:[#allocation345_spill] sm:$0xff] %v11628_v10  ;;  %v11641_v9 = vsel %vm2956_vm10, %v17270_v62, 0.0  ;;  %v2833_v61 = vmul.f32 %v11596_v40, %v17273_v49  ;;  %17275 = vst [vmem:[#allocation250_spill] sm:$0xff] %v11651_v47  ;;  %v17276_v58 = vld [vmem:[#allocation261_spill] sm:$0xff]  ;;  %v17277_v62 = vand.u32 2147483647, %v17244_v32  ;;  %v2832_v33 = vmul.f32 %v11613_v51, %v17279_v55 }
 0x35a   :  { %17271 = vst [vmem:[#allocation350_spill] sm:$0xff] %v11641_v9  ;;  %v4173_v38 = vadd.f32 1.0, %v17276_v58  ;;  %v4176_v42 = vmul.f32 -0.5, %v17276_v58  ;;  %v17280_v9 = vld [vmem:[#allocation294_spill] sm:$0xff]  ;;  %v17282_v40 = vld [vmem:[#allocation201_spill] sm:$0xff]  ;;  %v17283_v10 = vld [vmem:[#allocation28_spill] sm:$0xff] }
 0x35b   :  { %v11658_v46 = vsel %vm2959_vm15, %v17277_v62, 0.0  ;;  %v17284_v15 = vsel %vm10584_vm12, %v17282_v40, %v17283_v10  ;;  %v2492_v32 = vand.u32 2147483647, %v11239_v0  ;;  %2060 = vbcast.lane.b32.xlu1 %v11576_v53, 280  ;;  %2056 = vbcast.lane.b32.xlu0 %v11576_v53, 272  ;;  %v17286_v20 = vld [vmem:[#allocation334_spill] sm:$0xff] }
 0x35c   :  { %17278 = vst [vmem:[#allocation169_spill] sm:$0xff] %v11658_v46  ;;  %v11668_v27 = vadd.f32 %v17284_v15, %v17280_v9  ;;  %v11676_v62 = vmul.f32 %v17286_v20, %v2489_v26  ;;  %v17288_v44 = vld [vmem:[#allocation340_spill] sm:$0xff]  ;;  %vm11681_vm12 = vcmp.lt.f32.partialorder %v4161_v8, 0.0004427343  ;;  %v17290_v40 = vmov 0  ;;  %v6592_v20 = vpop.eup %6591  ;;  %v11698_v8 = vpop.permute.xlu0 %1820  ;;  %v17747_v25 = vld [vmem:[#allocation97_spill] sm:$0xff] }
 0x35d   :  { %v11679_v51 = vmul.f32 %v17288_v44, %v2490_v45  ;;  %v17291_v40 = vsel %vm11681_vm12, 4294967295, %v17290_v40  ;;  %v17293_v10 = vand.u32 2147483647, %v17251_v54  ;;  %v11690_v0 = vmul.f32 0.6931472, %v6590_v12  ;;  %v17296_v15 = vld [vmem:[#allocation104_spill] sm:$0xff]  ;;  %v11696_v45 = vpop.permute.xlu1 %1824 }
 0x35e   :  { %17285 = vst [vmem:[#allocation19_spill] sm:$0xff] %v11668_v27  ;;  %17287 = vst [vmem:[#allocation170_spill] sm:$0xff] %v11676_v62  ;;  %v11693_v9 = vmul.f32 %v17227_v43, %v4168_v16  ;;  %v4182_v26 = vadd.f32 1.0, %v17296_v15  ;;  %vm2961_vm11 = vcmp.lt.f32.partialorder %v2833_v61, 0.0  ;;  %v6702_v44 = vld [vmem:[%s6904_s5 + $0x10] sm:$0xff]  ;;  %v17299_v54 = vmov 0 }
 0x35f   :  { %17289 = vst [vmem:[#allocation276_spill] sm:$0xff] %v11679_v51  ;;  %17292 = vst [vmem:[#allocation98_spill] sm:$0xff] %v17291_v40  ;;  %v11688_v63 = vsel %vm2958_vm13, %v17293_v10, 0.0  ;;  %v2111_v47 = vcombine.high %v6702_v44, %v6702_v44  ;;  %vm11701_vm10 = vcmp.lt.f32.partialorder %v4170_v24, 0.0004427343  ;;  %6595 = vlog2.f32 %v4173_v38  ;;  %v17302_v43 = vld [vmem:[#allocation285_spill] sm:$0xff] }
 0x360   :  { %17294 = vst [vmem:[#allocation295_spill] sm:$0xff] %v11688_v63  ;;  %17295 = vst [vmem:[#allocation321_spill] sm:$0xff] %v11693_v9  ;;  %v17300_v54 = vsel %vm11701_vm10, 4294967295, %v17299_v54  ;;  %v4177_v36 = vadd.f32 1.0, %v4176_v42  ;;  %vm2960_vm15 = vcmp.lt.f32.partialorder %v2832_v33, 0.0  ;;  %v11707_v16 = vsub.f32 %v17302_v43, %v17171_v17  ;;  %v17304_v12 = vld [vmem:[#allocation290_spill] sm:$0xff]  ;;  %v6594_v63 = vpop.eup %6593 }
 0x361   :  { %17297 = vst [vmem:[#allocation144_spill] sm:$0xff] %v11696_v45  ;;  %17298 = vst [vmem:[#allocation327_spill] sm:$0xff] %v11698_v8  ;;  %v11711_v10 = vsub.f32 %v17304_v12, %v17171_v17  ;;  %v4185_v46 = vmul.f32 -0.5, %v17296_v15  ;;  %v2493_v44 = vand.u32 2147483647, %v11236_v48  ;;  %2068 = vbcast.lane.b32.xlu1 %v11576_v53, 296  ;;  %6597 = vlog2.f32 %v4182_v26 }
 0x362   :  { %17301 = vst [vmem:[#allocation325_spill] sm:$0xff] %v17300_v54  ;;  %17303 = vst [vmem:[#allocation173_spill] sm:$0xff] %v11707_v16  ;;  %v2494_v24 = vand.u32 2147483647, %v11284_v22  ;;  %2064 = vbcast.lane.b32.xlu0 %v11576_v53, 288  ;;  %v17306_v38 = vld [vmem:[#allocation164_spill] sm:$0xff] }
 0x363   :  { %17305 = vst [vmem:[#allocation261_spill] sm:$0xff] %v11711_v10  ;;  %v11719_v42 = vmul.f32 %v17306_v38, %v2491_v50  ;;  %v17308_v33 = vld [vmem:[#allocation352_spill] sm:$0xff]  ;;  %v17310_v17 = vand.u32 2147483647, %v17273_v49  ;;  %v11733_v22 = vmul.f32 0.6931472, %v6592_v20  ;;  %v11739_v38 = vpop.permute.xlu1 %1832 }
 0x364   :  { %v11722_v43 = vmul.f32 %v17308_v33, %v2492_v32  ;;  %v17313_v27 = vand.u32 2147483647, %v17279_v55  ;;  %17315 = vst [vmem:[#allocation334_spill] sm:$0xff] %v11739_v38  ;;  %v11741_v32 = vpop.permute.xlu0 %1828  ;;  %v17317_v49 = vld [vmem:[#allocation22_spill] sm:$0xff]  ;;  %v11747_v33 = vmul.f32 %v17276_v58, %v4177_v36  ;;  %v17320_v48 = vld [vmem:[#allocation179_spill] sm:$0xff]  ;;  %v17322_v26 = vld [vmem:[#allocation180_spill] sm:$0xff] }
 0x365   :  { %17307 = vst [vmem:[#allocation174_spill] sm:$0xff] %v11719_v42  ;;  %v11727_v12 = vsel %vm2961_vm11, %v17310_v17, 0.0  ;;  %17312 = vst [vmem:[#allocation201_spill] sm:$0xff] %v11733_v22  ;;  %v11744_v61 = vrot.slane %v2111_v47, %v17317_v49  ;;  %v17319_v17 = vld [vmem:[#allocation103_spill] sm:$0xff]  ;;  %v11752_v20 = vmul.f32 %v11707_v16, %v17320_v48  ;;  %v11758_v55 = vmul.f32 0.6931472, %v6594_v63 }
 0x366   :  { %17309 = vst [vmem:[#allocation294_spill] sm:$0xff] %v11722_v43  ;;  %17311 = vst [vmem:[#allocation333_spill] sm:$0xff] %v11727_v12  ;;  %v11737_v50 = vsel %vm2960_vm15, %v17313_v27, 0.0  ;;  %v4191_v12 = vadd.f32 1.0, %v17319_v17  ;;  %v11756_v27 = vmul.f32 %v11711_v10, %v17322_v26  ;;  %v2495_v43 = vand.u32 2147483647, %v11281_v34 }
 0x367   :  { %17314 = vst [vmem:[#allocation28_spill] sm:$0xff] %v11737_v50  ;;  %17316 = vst [vmem:[#allocation340_spill] sm:$0xff] %v11741_v32  ;;  %v4186_v50 = vadd.f32 1.0, %v4185_v46  ;;  %v2496_v47 = vand.u32 2147483647, %v11312_v1  ;;  %2076 = vbcast.lane.b32.xlu1 %v11576_v53, 312 }
 0x368   :  { %17318 = vst [vmem:[#allocation104_spill] sm:$0xff] %v11747_v33  ;;  %17321 = vst [vmem:[#allocation285_spill] sm:$0xff] %v11752_v20  ;;  %2072 = vbcast.lane.b32.xlu0 %v11576_v53, 304  ;;  %v17325_v36 = vld [vmem:[#allocation359_spill] sm:$0xff]  ;;  %v17329_v20 = vld [vmem:[#allocation140_spill] sm:$0xff]  ;;  %6599 = vlog2.f32 %v4191_v12 }
 0x369   :  { %17323 = vst [vmem:[#allocation290_spill] sm:$0xff] %v11756_v27  ;;  %17324 = vst [vmem:[#allocation164_spill] sm:$0xff] %v11758_v55  ;;  %v11765_v42 = vmul.f32 %v17325_v36, %v2493_v44  ;;  %v17327_v48 = vld [vmem:[#allocation39_spill] sm:$0xff]  ;;  %v17331_v63 = vld [vmem:[#allocation29_spill] sm:$0xff]  ;;  %v4188_v34 = vand.u32 2147483647, %v17296_v15 }
 0x36a   :  { %v11768_v16 = vmul.f32 %v17327_v48, %v2494_v24  ;;  %v17332_v10 = vld [vmem:[#allocation343_spill] sm:$0xff]  ;;  %v4194_v44 = vmul.f32 -0.5, %v17319_v17  ;;  %v17335_v36 = vld [vmem:[#allocation20_spill] sm:$0xff]  ;;  %v17341_v1 = vld [vmem:[#allocation9_spill] sm:$0xff]  ;;  %v2499_v12 = vand.u32 2147483647, %v11354_v37 }
 0x36b   :  { %17326 = vst [vmem:[#allocation352_spill] sm:$0xff] %v11765_v42  ;;  %v17333_v46 = vsel %vm10650_vm5, %v17331_v63, %v17332_v10  ;;  %v17336_v24 = vld [vmem:[#allocation320_spill] sm:$0xff]  ;;  %v11788_v42 = vpop.permute.xlu1 %1840  ;;  %v11790_v10 = vpop.permute.xlu0 %1836  ;;  %v2497_v63 = vand.u32 2147483647, %v11309_v5  ;;  %vm17342_vm5 = vnez %v17341_v1  ;;  %v17344_v51 = vld [vmem:[#allocation357_spill] sm:$0xff]  ;;  %2084 = vbcast.lane.b32.xlu1 %v11576_v53, 328 }
 0x36c   :  { %17328 = vst [vmem:[#allocation22_spill] sm:$0xff] %v11768_v16  ;;  %v11776_v27 = vadd.f32 %v17333_v46, %v17329_v20  ;;  %v2201_v48 = vsub.f32 %v17336_v24, %v17335_v36  ;;  %v17337_v16 = vld [vmem:[#allocation319_spill] sm:$0xff]  ;;  %17338 = vst [vmem:[#allocation359_spill] sm:$0xff] %v11788_v42  ;;  %v11794_v20 = vrot.slane %v11744_v61, %v17317_v49  ;;  %v17340_v46 = vld [vmem:[#allocation100_spill] sm:$0xff]  ;;  %v2498_v5 = vand.u32 2147483647, %v11357_v23 }
 0x36d   :  { %v2200_v26 = vsub.f32 %v17337_v16, %v17335_v36  ;;  %17339 = vst [vmem:[#allocation39_spill] sm:$0xff] %v11790_v10  ;;  %v11810_v10 = vmul.f32 %v17296_v15, %v4186_v50  ;;  %2080 = vbcast.lane.b32.xlu0 %v11576_v53, 320  ;;  %v17348_v1 = vld [vmem:[#allocation371_spill] sm:$0xff]  ;;  %v2500_v16 = vand.u32 2147483647, %v11408_v14  ;;  %v17353_v37 = vmov 0 }
 0x36e   :  { %17334 = vst [vmem:[#allocation103_spill] sm:$0xff] %v11776_v27  ;;  %v17343_v27 = vld [vmem:[#allocation209_spill] sm:$0xff]  ;;  %v17352_v15 = vand.u32 2147483647, %v17276_v58  ;;  %v4195_v23 = vadd.f32 1.0, %v4194_v44  ;;  %v17357_v42 = vld [vmem:[#allocation175_spill] sm:$0xff] }
 0x36f   :  { %v17345_v24 = vsel %vm17342_vm5, %v17343_v27, %v17344_v51  ;;  %17347 = vst [vmem:[#allocation30_spill] sm:$0xff] %v11810_v10  ;;  %v11817_v51 = vmul.f32 %v17348_v1, %v2495_v43  ;;  %v17350_v27 = vld [vmem:[#allocation377_spill] sm:$0xff]  ;;  %v2329_v32 = vmul.f32 %v2201_v48, %v17357_v42  ;;  %v17358_v43 = vld [vmem:[#allocation196_spill] sm:$0xff]  ;;  %v11839_v14 = vpop.permute.xlu0 %1847  ;;  %v2503_v42 = vand.u32 2147483647, %v11447_v7  ;;  %v17364_v48 = vld [vmem:[#allocation271_spill] sm:$0xff] }
 0x370   :  { %v11803_v62 = vadd.f32 %v17345_v24, %v17340_v46  ;;  %v11820_v46 = vmul.f32 %v17350_v27, %v2496_v47  ;;  %v2501_v24 = vand.u32 2147483647, %v11405_v3  ;;  %vm11826_vm13 = vcmp.lt.f32.partialorder %v17352_v15, 0.0004427343  ;;  %v17356_v50 = vld [vmem:[#allocation273_spill] sm:$0xff]  ;;  %v11837_v3 = vpop.permute.xlu1 %1851  ;;  %17361 = vst [vmem:[#allocation100_spill] sm:$0xff] %v11839_v14  ;;  %v6596_v27 = vpop.eup %6595 }
 0x371   :  { %17349 = vst [vmem:[#allocation29_spill] sm:$0xff] %v11817_v51  ;;  %v17354_v37 = vsel %vm11826_vm13, 4294967295, %v17353_v37  ;;  %v2328_v1 = vmul.f32 %v2200_v26, %v17358_v43  ;;  %v11835_v47 = vrot.slane %v11794_v20, %v6742_v2  ;;  %17360 = vst [vmem:[#allocation319_spill] sm:$0xff] %v11837_v3  ;;  %v4203_v58 = vmul.f32 -0.5, %v17356_v50  ;;  %v17362_v15 = vld [vmem:[#allocation142_spill] sm:$0xff]  ;;  %2092 = vbcast.lane.b32.xlu1 %v11576_v53, 344 }
 0x372   :  { %17346 = vst [vmem:[#allocation140_spill] sm:$0xff] %v11803_v62  ;;  %17351 = vst [vmem:[#allocation343_spill] sm:$0xff] %v11820_v46  ;;  %v4200_v62 = vadd.f32 1.0, %v17356_v50  ;;  %v2203_v44 = vsub.f32 %v17362_v15, %v17335_v36  ;;  %v17363_v46 = vld [vmem:[#allocation143_spill] sm:$0xff]  ;;  %v4209_v26 = vadd.f32 1.0, %v17364_v48  ;;  %2088 = vbcast.lane.b32.xlu0 %v11576_v53, 336 }
 0x373   :  { %17355 = vst [vmem:[#allocation20_spill] sm:$0xff] %v17354_v37  ;;  %17359 = vst [vmem:[#allocation320_spill] sm:$0xff] %v11835_v47  ;;  %v2202_v51 = vsub.f32 %v17363_v46, %v17335_v36  ;;  %v2502_v43 = vand.u32 2147483647, %v11450_v6  ;;  %v17365_v14 = vld [vmem:[#allocation102_spill] sm:$0xff]  ;;  %v17367_v47 = vld [vmem:[#allocation212_spill] sm:$0xff] }
 0x374   :  { %v11852_v3 = vmul.f32 %v17365_v14, %v2497_v63  ;;  %v11855_v38 = vmul.f32 %v17367_v47, %v2498_v5  ;;  %v17369_v15 = vld [vmem:[#allocation52_spill] sm:$0xff]  ;;  %vm11860_vm11 = vcmp.lt.f32.partialorder %v4188_v34, 0.0004427343  ;;  %v17371_v46 = vmov 0  ;;  %v6598_v63 = vpop.eup %6597  ;;  %v11871_v5 = vpop.permute.xlu1 %1859  ;;  %v17381_v34 = vld [vmem:[#allocation215_spill] sm:$0xff] }
 0x375   :  { %v11858_v8 = vmul.f32 %v17369_v15, %v2499_v12  ;;  %v17372_v46 = vsel %vm11860_vm11, 4294967295, %v17371_v46  ;;  %v17374_v7 = vld [vmem:[#allocation96_spill] sm:$0xff]  ;;  %v4197_v9 = vand.u32 2147483647, %v17319_v17  ;;  %6601 = vlog2.f32 %v4200_v62  ;;  %17378 = vst [vmem:[#allocation175_spill] sm:$0xff] %v11871_v5  ;;  %v11873_v47 = vpop.permute.xlu0 %1855  ;;  %v17380_v12 = vld [vmem:[#allocation331_spill] sm:$0xff] }
 0x376   :  { %17366 = vst [vmem:[#allocation9_spill] sm:$0xff] %v11852_v3  ;;  %17368 = vst [vmem:[#allocation209_spill] sm:$0xff] %v11855_v38  ;;  %v11865_v45 = vmul.f32 %v17374_v7, %v2500_v16  ;;  %v17376_v6 = vld [vmem:[#allocation124_spill] sm:$0xff]  ;;  %v2457_v14 = vand.u32 2147483647, %v2329_v32  ;;  %vm17382_vm15 = vnez %v17381_v34  ;;  %v17383_v15 = vld [vmem:[#allocation354_spill] sm:$0xff]  ;;  %6603 = vlog2.f32 %v4209_v26 }
 0x377   :  { %17370 = vst [vmem:[#allocation357_spill] sm:$0xff] %v11858_v8  ;;  %17373 = vst [vmem:[#allocation371_spill] sm:$0xff] %v17372_v46  ;;  %v11868_v55 = vmul.f32 %v17376_v6, %v2501_v24  ;;  %v17384_v8 = vld [vmem:[#allocation220_spill] sm:$0xff]  ;;  %v11883_v7 = vmul.f32 0.6931472, %v6596_v27  ;;  %v4204_v24 = vadd.f32 1.0, %v4203_v58 }
 0x378   :  { %17375 = vst [vmem:[#allocation377_spill] sm:$0xff] %v11865_v45  ;;  %17379 = vst [vmem:[#allocation196_spill] sm:$0xff] %v11873_v47  ;;  %v17385_v38 = vsel %vm17382_vm15, %v17383_v15, %v17384_v8  ;;  %v2456_v6 = vand.u32 2147483647, %v2328_v1  ;;  %v17389_v45 = vld [vmem:[#allocation204_spill] sm:$0xff]  ;;  %v17390_v3 = vld [vmem:[#allocation21_spill] sm:$0xff]  ;;  %v11913_v15 = vpop.permute.xlu1 %1867 }
 0x379   :  { %17377 = vst [vmem:[#allocation273_spill] sm:$0xff] %v11868_v55  ;;  %v11881_v16 = vadd.f32 %v17385_v38, %v17380_v12  ;;  %17387 = vst [vmem:[#allocation143_spill] sm:$0xff] %v11883_v7  ;;  %v17388_v55 = vld [vmem:[#allocation203_spill] sm:$0xff]  ;;  %v2330_v32 = vmul.f32 %v2202_v51, %v17389_v45  ;;  %v2204_v5 = vsub.f32 %v17390_v3, %v17335_v36  ;;  %v17391_v47 = vld [vmem:[#allocation192_spill] sm:$0xff]  ;;  %2100 = vbcast.lane.b32.xlu1 %v11576_v53, 360 }
 0x37a   :  { %v2331_v62 = vmul.f32 %v2203_v44, %v17388_v55  ;;  %v2205_v54 = vsub.f32 %v17391_v47, %v17335_v36  ;;  %2096 = vbcast.lane.b32.xlu0 %v11576_v53, 352  ;;  %v17392_v8 = vld [vmem:[#allocation228_spill] sm:$0xff]  ;;  %v17394_v27 = vld [vmem:[#allocation61_spill] sm:$0xff]  ;;  %v17396_v55 = vld [vmem:[#allocation335_spill] sm:$0xff]  ;;  %v11907_v47 = vmul.f32 0.6931472, %v6598_v63  ;;  %v11910_v12 = vmul.f32 %v17319_v17, %v4195_v23  ;;  %v6600_v23 = vpop.eup %6599 }
 0x37b   :  { %17386 = vst [vmem:[#allocation142_spill] sm:$0xff] %v11881_v16  ;;  %v11894_v38 = vmul.f32 %v17392_v8, %v2502_v43  ;;  %v11897_v58 = vmul.f32 %v17394_v27, %v2503_v42  ;;  %v17397_v1 = vld [vmem:[#allocation49_spill] sm:$0xff]  ;;  %v17400_v51 = vld [vmem:[#allocation58_spill] sm:$0xff]  ;;  %17406 = vst [vmem:[#allocation124_spill] sm:$0xff] %v11913_v15  ;;  %v11915_v42 = vpop.permute.xlu0 %1863  ;;  %vm11921_vm15 = vcmp.lt.f32.partialorder %v4197_v9, 0.0004427343  ;;  %v11926_v63 = vmul.f32 %v17356_v50, %v4204_v24 }
 0x37c   :  { %vm17398_vm5 = vnez %v17397_v1  ;;  %v17399_v45 = vld [vmem:[#allocation41_spill] sm:$0xff]  ;;  %17403 = vst [vmem:[#allocation52_spill] sm:$0xff] %v11907_v47  ;;  %17404 = vst [vmem:[#allocation96_spill] sm:$0xff] %v11910_v12  ;;  %v17408_v8 = vmov 0  ;;  %v4212_v17 = vmul.f32 -0.5, %v17364_v48  ;;  %v17412_v27 = vld [vmem:[#allocation374_spill] sm:$0xff] }
 0x37d   :  { %17393 = vst [vmem:[#allocation271_spill] sm:$0xff] %v11894_v38  ;;  %17395 = vst [vmem:[#allocation102_spill] sm:$0xff] %v11897_v58  ;;  %v17401_v3 = vsel %vm17398_vm5, %v17399_v45, %v17400_v51  ;;  %v17405_v34 = vld [vmem:[#allocation281_spill] sm:$0xff]  ;;  %v17409_v8 = vsel %vm11921_vm15, 4294967295, %v17408_v8  ;;  %v17413_v1 = vld [vmem:[#allocation332_spill] sm:$0xff]  ;;  %2108 = vbcast.lane.b32.xlu1 %v11576_v53, 376 }
 0x37e   :  { %v11905_v44 = vadd.f32 %v17401_v3, %v17396_v55  ;;  %v4218_v43 = vadd.f32 1.0, %v17405_v34  ;;  %17407 = vst [vmem:[#allocation331_spill] sm:$0xff] %v11915_v42  ;;  %17410 = vst [vmem:[#allocation215_spill] sm:$0xff] %v17409_v8  ;;  %v2332_v55 = vmul.f32 %v2204_v5, %v17412_v27  ;;  %v2206_v45 = vsub.f32 %v17413_v1, %v17335_v36  ;;  %v17414_v51 = vld [vmem:[#allocation42_spill] sm:$0xff]  ;;  %v17425_v42 = vld [vmem:[#allocation153_spill] sm:$0xff] }
 0x37f   :  { %17411 = vst [vmem:[#allocation354_spill] sm:$0xff] %v11926_v63  ;;  %v11933_v3 = vmul.f32 %v17414_v51, %v2456_v6  ;;  %v4206_v26 = vand.u32 2147483647, %v17356_v50  ;;  %v2459_v9 = vand.u32 2147483647, %v2331_v62  ;;  %2104 = vbcast.lane.b32.xlu0 %v11576_v53, 368  ;;  %v2209_v6 = vsub.f32 %v17425_v42, %v17335_v36 }
 0x380   :  { %17402 = vst [vmem:[#allocation212_spill] sm:$0xff] %v11905_v44  ;;  %v2458_v58 = vand.u32 2147483647, %v2330_v32  ;;  %v17416_v44 = vld [vmem:[#allocation81_spill] sm:$0xff]  ;;  %v17417_v24 = vld [vmem:[#allocation34_spill] sm:$0xff]  ;;  %6605 = vlog2.f32 %v4218_v43  ;;  %v11949_v32 = vpop.permute.xlu1 %1875  ;;  %v4213_v53 = vadd.f32 1.0, %v4212_v17 }
 0x381   :  { %17415 = vst [vmem:[#allocation220_spill] sm:$0xff] %v11933_v3  ;;  %v2333_v16 = vmul.f32 %v2205_v54, %v17416_v44  ;;  %v11940_v38 = vmul.f32 %v17417_v24, %v2457_v14  ;;  %v17419_v5 = vld [vmem:[#allocation198_spill] sm:$0xff]  ;;  %17421 = vst [vmem:[#allocation204_spill] sm:$0xff] %v11949_v32  ;;  %v11951_v54 = vpop.permute.xlu0 %1871  ;;  %v11953_v44 = vmul.f32 0.6931472, %v6600_v23  ;;  %v4221_v1 = vmul.f32 -0.5, %v17405_v34 }
 0x382   :  { %v2207_v27 = vsub.f32 %v17419_v5, %v17335_v36  ;;  %v17420_v50 = vld [vmem:[#allocation126_spill] sm:$0xff]  ;;  %17422 = vst [vmem:[#allocation21_spill] sm:$0xff] %v11951_v54  ;;  %v4215_v14 = vand.u32 2147483647, %v17364_v48  ;;  %v2460_v51 = vand.u32 2147483647, %v2332_v55 }
 0x383   :  { %17418 = vst [vmem:[#allocation203_spill] sm:$0xff] %v11940_v38  ;;  %v4344_v62 = vadd.f32 1.0, %v17420_v50  ;;  %17423 = vst [vmem:[#allocation192_spill] sm:$0xff] %v11953_v44  ;;  %v17424_v24 = vld [vmem:[#allocation87_spill] sm:$0xff]  ;;  %v17426_v43 = vld [vmem:[#allocation185_spill] sm:$0xff]  ;;  %v17431_v17 = vmov 0 }
 0x384   :  { %v2334_v5 = vmul.f32 %v2206_v45, %v17424_v24  ;;  %v2208_v15 = vsub.f32 %v17426_v43, %v17335_v36  ;;  %v2461_v47 = vand.u32 2147483647, %v2333_v16  ;;  %v17427_v32 = vld [vmem:[#allocation47_spill] sm:$0xff]  ;;  %vm11968_vm5 = vcmp.lt.f32.partialorder %v4206_v26, 0.0004427343  ;;  %v17434_v55 = vld [vmem:[#allocation176_spill] sm:$0xff] }
 0x385   :  { %v11963_v10 = vmul.f32 %v17427_v32, %v2458_v58  ;;  %v17429_v23 = vld [vmem:[#allocation51_spill] sm:$0xff]  ;;  %v17432_v17 = vsel %vm11968_vm5, 4294967295, %v17431_v17  ;;  %v2335_v46 = vmul.f32 %v2207_v27, %v17434_v55  ;;  %v17435_v45 = vld [vmem:[#allocation197_spill] sm:$0xff]  ;;  %v17436_v42 = vld [vmem:[#allocation202_spill] sm:$0xff]  ;;  %6607 = vlog2.f32 %v4344_v62  ;;  %v11983_v32 = vpop.permute.xlu1 %1883  ;;  %v11985_v26 = vpop.permute.xlu0 %1879 }
 0x386   :  { %v11966_v54 = vmul.f32 %v17429_v23, %v2459_v9  ;;  %17433 = vst [vmem:[#allocation335_spill] sm:$0xff] %v17432_v17  ;;  %v2210_v24 = vsub.f32 %v17435_v45, %v17335_v36  ;;  %v17437_v7 = vld [vmem:[#allocation365_spill] sm:$0xff]  ;;  %v6602_v9 = vpop.eup %6601  ;;  %17441 = vst [vmem:[#allocation41_spill] sm:$0xff] %v11983_v32  ;;  %v11992_v43 = vmul.f32 %v17364_v48, %v4213_v53  ;;  %v17444_v23 = vld [vmem:[#allocation122_spill] sm:$0xff] }
 0x387   :  { %17428 = vst [vmem:[#allocation228_spill] sm:$0xff] %v11963_v10  ;;  %vm17438_vm11 = vnez %v17437_v7  ;;  %17442 = vst [vmem:[#allocation58_spill] sm:$0xff] %v11985_v26  ;;  %v4222_v7 = vadd.f32 1.0, %v4221_v1  ;;  %v4353_v55 = vadd.f32 1.0, %v17444_v23  ;;  %v17446_v62 = vld [vmem:[#allocation43_spill] sm:$0xff]  ;;  %v17449_v26 = vmov 0 }
 0x388   :  { %17430 = vst [vmem:[#allocation61_spill] sm:$0xff] %v11966_v54  ;;  %v17439_v16 = vsel %vm17438_vm11, %v10842_v4, %v10923_v19  ;;  %17443 = vst [vmem:[#allocation281_spill] sm:$0xff] %v11992_v43  ;;  %v2462_v4 = vand.u32 2147483647, %v2334_v5  ;;  %v17445_v19 = vld [vmem:[#allocation184_spill] sm:$0xff]  ;;  %v17452_v27 = vld [vmem:[#allocation35_spill] sm:$0xff] }
 0x389   :  { %v11981_v58 = vadd.f32 %v17439_v16, %v17436_v42  ;;  %v2337_v45 = vmul.f32 %v2209_v6, %v17445_v19  ;;  %v2336_v42 = vmul.f32 %v2208_v15, %v17446_v62  ;;  %v17447_v16 = vld [vmem:[#allocation88_spill] sm:$0xff]  ;;  %vm12000_vm11 = vcmp.lt.f32.partialorder %v4215_v14, 0.0004427343  ;;  %v17453_v48 = vld [vmem:[#allocation105_spill] sm:$0xff]  ;;  %v6604_v6 = vpop.eup %6603  ;;  %v17455_v15 = vld [vmem:[#allocation95_spill] sm:$0xff]  ;;  %v12017_v12 = vpop.permute.xlu1 %1891 }
 0x38a   :  { %v11998_v32 = vmul.f32 %v17447_v16, %v2460_v51  ;;  %v17450_v26 = vsel %vm12000_vm11, 4294967295, %v17449_v26  ;;  %v12007_v53 = vmul.f32 %v17453_v48, %v2461_v47  ;;  %v4224_v1 = vand.u32 2147483647, %v17405_v34  ;;  %v17457_v16 = vld [vmem:[#allocation347_spill] sm:$0xff]  ;;  %17458 = vst [vmem:[#allocation34_spill] sm:$0xff] %v12017_v12 }
 0x38b   :  { %17440 = vst [vmem:[#allocation49_spill] sm:$0xff] %v11981_v58  ;;  %17451 = vst [vmem:[#allocation332_spill] sm:$0xff] %v17450_v26  ;;  %v2211_v58 = vsub.f32 %v17452_v27, %v17335_v36  ;;  %v4347_v5 = vmul.f32 -0.5, %v17420_v50  ;;  %v2463_v19 = vand.u32 2147483647, %v2335_v46  ;;  %v2338_v62 = vmul.f32 %v2210_v24, %v17455_v15  ;;  %v12019_v27 = vpop.permute.xlu0 %1887  ;;  %v17460_v47 = vld [vmem:[#allocation355_spill] sm:$0xff] }
 0x38c   :  { %17448 = vst [vmem:[#allocation374_spill] sm:$0xff] %v11998_v32  ;;  %17454 = vst [vmem:[#allocation42_spill] sm:$0xff] %v12007_v53  ;;  %v12012_v51 = vmul.f32 0.6931472, %v6602_v9  ;;  %v4356_v14 = vmul.f32 -0.5, %v17444_v23  ;;  %v2212_v44 = vsub.f32 %v17457_v16, %v17335_v36  ;;  %v17461_v48 = vsel %vm10908_vm6, %v10845_v11, %v10955_v56  ;;  %v17464_v16 = vld [vmem:[#allocation346_spill] sm:$0xff] }
 0x38d   :  { %17459 = vst [vmem:[#allocation198_spill] sm:$0xff] %v12019_v27  ;;  %v12027_v46 = vadd.f32 %v17461_v48, %v17460_v47  ;;  %v12030_v24 = vmul.f32 %v17405_v34, %v4222_v7  ;;  %6609 = vlog2.f32 %v4353_v55  ;;  %v2465_v9 = vand.u32 2147483647, %v2337_v45  ;;  %v17465_v12 = vld [vmem:[#allocation107_spill] sm:$0xff]  ;;  %v17467_v27 = vld [vmem:[#allocation85_spill] sm:$0xff]  ;;  %v17472_v55 = vld [vmem:[#allocation244_spill] sm:$0xff]  ;;  %v12057_v48 = vpop.permute.xlu1 %1899 }
 0x38e   :  { %17456 = vst [vmem:[#allocation81_spill] sm:$0xff] %v12012_v51  ;;  %v2464_v15 = vand.u32 2147483647, %v2336_v42  ;;  %v2213_v8 = vsub.f32 %v17464_v16, %v17335_v36  ;;  %v12035_v33 = vmul.f32 %v17465_v12, %v2462_v4  ;;  %v2339_v37 = vmul.f32 %v2211_v58, %v17467_v27  ;;  %v6606_v58 = vpop.eup %6605  ;;  %v17474_v42 = vld [vmem:[#allocation224_spill] sm:$0xff]  ;;  %17477 = vst [vmem:[#allocation176_spill] sm:$0xff] %v12057_v48  ;;  %v17485_v63 = vld [vmem:[#allocation23_spill] sm:$0xff] }
 0x38f   :  { %17462 = vst [vmem:[#allocation126_spill] sm:$0xff] %v12027_v46  ;;  %17463 = vst [vmem:[#allocation87_spill] sm:$0xff] %v12030_v24  ;;  %v12038_v60 = vmul.f32 0.6931472, %v6604_v6  ;;  %vm12040_vm15 = vcmp.lt.f32.partialorder %v4224_v1, 0.0004427343  ;;  %v12046_v45 = vmul.f32 %v17472_v55, %v2463_v19  ;;  %v2340_v6 = vmul.f32 %v2212_v44, %v17474_v42 }
 0x390   :  { %17466 = vst [vmem:[#allocation153_spill] sm:$0xff] %v12035_v33  ;;  %v17469_v11 = vmov 0  ;;  %v4348_v56 = vadd.f32 1.0, %v4347_v5  ;;  %v4350_v34 = vand.u32 2147483647, %v17420_v50  ;;  %v4357_v4 = vadd.f32 1.0, %v4356_v14 }
 0x391   :  { %17468 = vst [vmem:[#allocation185_spill] sm:$0xff] %v12038_v60  ;;  %v17470_v11 = vsel %vm12040_vm15, 4294967295, %v17469_v11  ;;  %v2466_v7 = vand.u32 2147483647, %v2338_v62  ;;  %17473 = vst [vmem:[#allocation51_spill] sm:$0xff] %v12046_v45  ;;  %v17475_v1 = vld [vmem:[#allocation40_spill] sm:$0xff]  ;;  %v12059_v62 = vpop.permute.xlu0 %1895  ;;  %v2127_v14 = vcombine.high %v11744_v61, %v11744_v61  ;;  %vm17486_vm6 = vnez %v17028_v18 }
 0x392   :  { %17471 = vst [vmem:[#allocation47_spill] sm:$0xff] %v17470_v11  ;;  %v2215_v27 = vsub.f32 %v17475_v1, %v17335_v36  ;;  %v17476_v5 = vld [vmem:[#allocation166_spill] sm:$0xff]  ;;  %17478 = vst [vmem:[#allocation197_spill] sm:$0xff] %v12059_v62  ;;  %v17479_v19 = vld [vmem:[#allocation279_spill] sm:$0xff]  ;;  %v2467_v1 = vand.u32 2147483647, %v2339_v37 }
 0x393   :  { %v2214_v47 = vsub.f32 %v17476_v5, %v17335_v36  ;;  %v4227_v16 = vadd.f32 1.0, %v17479_v19  ;;  %v17480_v55 = vld [vmem:[#allocation113_spill] sm:$0xff]  ;;  %v17481_v12 = vld [vmem:[#allocation64_spill] sm:$0xff]  ;;  %v17487_v36 = vsel %vm17486_vm6, %v10972_v35, %v11031_v59  ;;  %vm12086_vm5 = vcmp.lt.f32.partialorder %v4350_v34, 0.0004427343  ;;  %v12101_v34 = vpop.permute.xlu1 %1907  ;;  %v17596_v40 = vld [vmem:[#allocation11_spill] sm:$0xff] }
 0x394   :  { %v2341_v46 = vmul.f32 %v2213_v8, %v17480_v55  ;;  %v12066_v51 = vmul.f32 %v17481_v12, %v2464_v15  ;;  %v17483_v44 = vld [vmem:[#allocation245_spill] sm:$0xff]  ;;  %v12077_v5 = vadd.f32 %v17487_v36, %v17485_v63  ;;  %v12084_v8 = vmul.f32 %v17420_v50, %v4348_v56  ;;  %v6608_v63 = vpop.eup %6607  ;;  %v17497_v55 = vld [vmem:[#allocation136_spill] sm:$0xff]  ;;  %v17498_v50 = vld [vmem:[#allocation55_spill] sm:$0xff]  ;;  %17499 = vst [vmem:[#allocation95_spill] sm:$0xff] %v12101_v34 }
 0x395   :  { %v12069_v42 = vmul.f32 %v17483_v44, %v2465_v9  ;;  %v17490_v9 = vmov 0  ;;  %v17493_v37 = vld [vmem:[#allocation145_spill] sm:$0xff]  ;;  %v12093_v18 = vmul.f32 0.6931472, %v6606_v58  ;;  %v12096_v35 = vmul.f32 %v17444_v23, %v4357_v4  ;;  %v12103_v36 = vpop.permute.xlu0 %1903  ;;  %v17502_v58 = vld [vmem:[#allocation211_spill] sm:$0xff]  ;;  %v17536_v11 = vld [vmem:[#allocation236_spill] sm:$0xff] }
 0x396   :  { %17482 = vst [vmem:[#allocation202_spill] sm:$0xff] %v12066_v51  ;;  %17488 = vst [vmem:[#allocation122_spill] sm:$0xff] %v12077_v5  ;;  %v17491_v9 = vsel %vm12086_vm5, 4294967295, %v17490_v9  ;;  %v12091_v15 = vmul.f32 %v17493_v37, %v2466_v7  ;;  %v4359_v59 = vand.u32 2147483647, %v17444_v23  ;;  %v2343_v44 = vmul.f32 %v2215_v27, %v17497_v55  ;;  %v17501_v37 = vld [vmem:[#allocation59_spill] sm:$0xff] }
 0x397   :  { %17484 = vst [vmem:[#allocation365_spill] sm:$0xff] %v12069_v42  ;;  %17489 = vst [vmem:[#allocation184_spill] sm:$0xff] %v12084_v8  ;;  %v2468_v12 = vand.u32 2147483647, %v2340_v6  ;;  %v2342_v56 = vmul.f32 %v2214_v47, %v17498_v50  ;;  %6611 = vlog2.f32 %v4227_v16  ;;  %v2469_v7 = vand.u32 2147483647, %v2341_v46 }
 0x398   :  { %17492 = vst [vmem:[#allocation43_spill] sm:$0xff] %v17491_v9  ;;  %17494 = vst [vmem:[#allocation88_spill] sm:$0xff] %v12091_v15  ;;  %v2217_v61 = vsub.f32 %v17502_v58, %v17501_v37  ;;  %v17503_v4 = vld [vmem:[#allocation45_spill] sm:$0xff]  ;;  %v12110_v23 = vrot.slane %v2127_v14, %v17317_v49  ;;  %v17507_v27 = vld [vmem:[#allocation8_spill] sm:$0xff]  ;;  %vm17508_vm6 = vnez %v17038_v29  ;;  %v4230_v46 = vmul.f32 -0.5, %v17479_v19 }
 0x399   :  { %17495 = vst [vmem:[#allocation35_spill] sm:$0xff] %v12093_v18  ;;  %17496 = vst [vmem:[#allocation105_spill] sm:$0xff] %v12096_v35  ;;  %v2216_v62 = vsub.f32 %v17503_v4, %v17501_v37  ;;  %v17505_v6 = vld [vmem:[#allocation13_spill] sm:$0xff]  ;;  %v17509_v47 = vsel %vm17508_vm6, %v11027_v39, %v11046_v31  ;;  %v17511_v55 = vld [vmem:[#allocation147_spill] sm:$0xff]  ;;  %v12131_v14 = vmul.f32 0.6931472, %v6608_v63 }
 0x39a   :  { %17500 = vst [vmem:[#allocation347_spill] sm:$0xff] %v12103_v36  ;;  %17504 = vst [vmem:[#allocation355_spill] sm:$0xff] %v12110_v23  ;;  %v12113_v48 = vmul.f32 %v17505_v6, %v2467_v1  ;;  %v12121_v16 = vadd.f32 %v17509_v47, %v17507_v27  ;;  %v4362_v50 = vadd.f32 1.0, %v17511_v55  ;;  %v17512_v58 = vld [vmem:[#allocation31_spill] sm:$0xff]  ;;  %vm12133_vm11 = vcmp.lt.f32.partialorder %v4359_v59, 0.0004427343  ;;  %v12139_v27 = vpop.permute.xlu1 %1918  ;;  %v12141_v47 = vpop.permute.xlu0 %1914 }
 0x39b   :  { %v2218_v4 = vsub.f32 %v17512_v58, %v17501_v37  ;;  %17513 = vst [vmem:[#allocation85_spill] sm:$0xff] %v12131_v14  ;;  %v17514_v29 = vmov 0  ;;  %v2471_v39 = vand.u32 2147483647, %v2343_v44  ;;  %v2470_v31 = vand.u32 2147483647, %v2342_v56  ;;  %v6610_v34 = vpop.eup %6609 }
 0x39c   :  { %17506 = vst [vmem:[#allocation346_spill] sm:$0xff] %v12113_v48  ;;  %17510 = vst [vmem:[#allocation107_spill] sm:$0xff] %v12121_v16  ;;  %v17515_v29 = vsel %vm12133_vm11, 4294967295, %v17514_v29  ;;  %v17517_v1 = vld [vmem:[#allocation54_spill] sm:$0xff]  ;;  %v17522_v49 = vld [vmem:[#allocation60_spill] sm:$0xff]  ;;  %v12150_v5 = vrot.slane %v12110_v23, %v6742_v2  ;;  %6613 = vlog2.f32 %v4362_v50 }
 0x39d   :  { %17516 = vst [vmem:[#allocation244_spill] sm:$0xff] %v17515_v29  ;;  %v2219_v6 = vsub.f32 %v17517_v1, %v17501_v37  ;;  %17518 = vst [vmem:[#allocation224_spill] sm:$0xff] %v12139_v27  ;;  %v17520_v58 = vld [vmem:[#allocation70_spill] sm:$0xff]  ;;  %v2345_v63 = vmul.f32 %v2217_v61, %v17522_v49  ;;  %v17523_v16 = vld [vmem:[#allocation235_spill] sm:$0xff]  ;;  %v4365_v61 = vmul.f32 -0.5, %v17511_v55 }
 0x39e   :  { %17519 = vst [vmem:[#allocation40_spill] sm:$0xff] %v12141_v47  ;;  %v12144_v36 = vmul.f32 %v17520_v58, %v2468_v12  ;;  %v2344_v59 = vmul.f32 %v2216_v62, %v17523_v16  ;;  %17524 = vst [vmem:[#allocation279_spill] sm:$0xff] %v12150_v5  ;;  %v17525_v44 = vld [vmem:[#allocation163_spill] sm:$0xff]  ;;  %v17527_v1 = vld [vmem:[#allocation25_spill] sm:$0xff]  ;;  %v4231_v58 = vadd.f32 1.0, %v4230_v46  ;;  %4893 = vadd.xlane.f32.xlu0 %v11933_v3 }
 0x39f   :  { %v12153_v56 = vmul.f32 %v17525_v44, %v2469_v7  ;;  %v17528_v18 = vld [vmem:[#allocation257_spill] sm:$0xff]  ;;  %v17530_v27 = vld [vmem:[#allocation90_spill] sm:$0xff]  ;;  %v17531_v47 = vld [vmem:[#allocation383_spill] sm:$0xff]  ;;  %v4233_v49 = vand.u32 2147483647, %v17479_v19  ;;  %v2347_v60 = vmul.f32 %v2219_v6, %v17536_v11 }
 0x3a0   :  { %17521 = vst [vmem:[#allocation166_spill] sm:$0xff] %v12144_v36  ;;  %vm17529_vm6 = vnez %v17528_v18  ;;  %v17534_v62 = vld [vmem:[#allocation57_spill] sm:$0xff]  ;;  %v17539_v46 = vld [vmem:[#allocation67_spill] sm:$0xff]  ;;  %v2472_v7 = vand.u32 2147483647, %v2344_v59  ;;  %v17545_v9 = vld [vmem:[#allocation24_spill] sm:$0xff] }
 0x3a1   :  { %17526 = vst [vmem:[#allocation113_spill] sm:$0xff] %v12153_v56  ;;  %v17532_v24 = vsel %vm17529_vm6, %v17530_v27, %v17531_v47  ;;  %v2346_v16 = vmul.f32 %v2218_v4, %v17534_v62  ;;  %v17535_v44 = vld [vmem:[#allocation353_spill] sm:$0xff]  ;;  %v12172_v27 = vpop.permute.xlu1 %1926  ;;  %v12177_v50 = vmul.f32 %v17539_v46, %v2470_v31  ;;  %v17541_v47 = vld [vmem:[#allocation68_spill] sm:$0xff]  ;;  %v2473_v62 = vand.u32 2147483647, %v2345_v63  ;;  %v17551_v31 = vld [vmem:[#allocation63_spill] sm:$0xff]  ;;  %4895 = vadd.xlane.f32.xlu1 %v11940_v38 }
 0x3a2   :  { %v12161_v12 = vadd.f32 %v17532_v24, %v17527_v1  ;;  %v4488_v18 = vadd.f32 1.0, %v17535_v44  ;;  %17537 = vst [vmem:[#allocation245_spill] sm:$0xff] %v12172_v27  ;;  %v12174_v24 = vpop.permute.xlu0 %1922  ;;  %v12180_v4 = vmul.f32 %v17541_v47, %v2471_v39  ;;  %v12182_v1 = vmul.f32 0.6931472, %v6610_v34  ;;  %v17544_v14 = vld [vmem:[#allocation369_spill] sm:$0xff]  ;;  %v17547_v11 = vld [vmem:[#allocation384_spill] sm:$0xff]  ;;  %4897 = vadd.xlane.f32.xlu0 %v11963_v10 }
 0x3a3   :  { %17538 = vst [vmem:[#allocation23_spill] sm:$0xff] %v12174_v24  ;;  %17540 = vst [vmem:[#allocation145_spill] sm:$0xff] %v12177_v50  ;;  %v2220_v8 = vsub.f32 %v17544_v14, %v17501_v37  ;;  %v17548_v6 = vld [vmem:[#allocation241_spill] sm:$0xff]  ;;  %v2221_v46 = vsub.f32 %v17551_v31, %v17501_v37  ;;  %v12197_v39 = vmul.f32 %v17479_v19, %v4231_v58  ;;  %v4366_v34 = vadd.f32 1.0, %v4365_v61  ;;  %v17553_v14 = vld [vmem:[#allocation71_spill] sm:$0xff] }
 0x3a4   :  { %17533 = vst [vmem:[#allocation64_spill] sm:$0xff] %v12161_v12  ;;  %17542 = vst [vmem:[#allocation136_spill] sm:$0xff] %v12180_v4  ;;  %v17549_v27 = vsel %vm11102_vm14, %v17547_v11, %v17548_v6  ;;  %v4491_v63 = vmul.f32 -0.5, %v17535_v44  ;;  %v2474_v59 = vand.u32 2147483647, %v2346_v16  ;;  %v2223_v47 = vsub.f32 %v17553_v14, %v17501_v37  ;;  %v17554_v12 = vld [vmem:[#allocation231_spill] sm:$0xff]  ;;  %v6612_v16 = vpop.eup %6611 }
 0x3a5   :  { %17543 = vst [vmem:[#allocation55_spill] sm:$0xff] %v12182_v1  ;;  %v12192_v24 = vadd.f32 %v17549_v27, %v17545_v9  ;;  %17552 = vst [vmem:[#allocation211_spill] sm:$0xff] %v12197_v39  ;;  %v2222_v43 = vsub.f32 %v17554_v12, %v17501_v37  ;;  %6615 = vlog2.f32 %v4488_v18  ;;  %v2475_v11 = vand.u32 2147483647, %v2347_v60  ;;  %v12204_v9 = vpop.permute.xlu1 %1934  ;;  %v17560_v6 = vld [vmem:[#allocation240_spill] sm:$0xff]  ;;  %v17561_v60 = vld [vmem:[#allocation7_spill] sm:$0xff]  ;;  %4901 = vadd.xlane.f32.xlu1 %v11998_v32 }
 0x3a6   :  { %17555 = vst [vmem:[#allocation45_spill] sm:$0xff] %v12204_v9  ;;  %v12206_v27 = vpop.permute.xlu0 %1930  ;;  %vm12212_vm14 = vcmp.lt.f32.partialorder %v4233_v49, 0.0004427343  ;;  %v17557_v58 = vmov 0  ;;  %v4368_v61 = vand.u32 2147483647, %v17511_v55  ;;  %v2348_v31 = vmul.f32 %v2220_v8, %v17560_v6  ;;  %4899 = vadd.xlane.f32.xlu0 %v11966_v54 }
 0x3a7   :  { %17550 = vst [vmem:[#allocation59_spill] sm:$0xff] %v12192_v24  ;;  %17556 = vst [vmem:[#allocation13_spill] sm:$0xff] %v12206_v27  ;;  %v17558_v58 = vsel %vm12212_vm14, 4294967295, %v17557_v58  ;;  %v12220_v18 = vmul.f32 %v17561_v60, %v2472_v7  ;;  %v17563_v14 = vld [vmem:[#allocation78_spill] sm:$0xff]  ;;  %v17565_v9 = vld [vmem:[#allocation351_spill] sm:$0xff]  ;;  %v12230_v27 = vmul.f32 %v17511_v55, %v4366_v34  ;;  %v4492_v24 = vadd.f32 1.0, %v4491_v63 }
 0x3a8   :  { %17559 = vst [vmem:[#allocation8_spill] sm:$0xff] %v17558_v58  ;;  %v12223_v12 = vmul.f32 %v17563_v14, %v2473_v62  ;;  %v4497_v29 = vadd.f32 1.0, %v17565_v9  ;;  %v17566_v19 = vld [vmem:[#allocation254_spill] sm:$0xff]  ;;  %v17569_v8 = vld [vmem:[#allocation139_spill] sm:$0xff]  ;;  %v17570_v3 = vld [vmem:[#allocation132_spill] sm:$0xff]  ;;  %v4500_v63 = vmul.f32 -0.5, %v17565_v9 }
 0x3a9   :  { %17562 = vst [vmem:[#allocation147_spill] sm:$0xff] %v12220_v18  ;;  %v2349_v49 = vmul.f32 %v2221_v46, %v17566_v19  ;;  %v17567_v1 = vld [vmem:[#allocation10_spill] sm:$0xff]  ;;  %17568 = vst [vmem:[#allocation54_spill] sm:$0xff] %v12230_v27  ;;  %v2351_v6 = vmul.f32 %v2223_v47, %v17569_v8  ;;  %v2350_v26 = vmul.f32 %v2222_v43, %v17570_v3  ;;  %v4494_v62 = vand.u32 2147483647, %v17535_v44  ;;  %v17573_v14 = vld [vmem:[#allocation213_spill] sm:$0xff]  ;;  %v12240_v46 = vpop.permute.xlu1 %1942 }
 0x3aa   :  { %17564 = vst [vmem:[#allocation31_spill] sm:$0xff] %v12223_v12  ;;  %v2224_v35 = vsub.f32 %v17567_v1, %v17501_v37  ;;  %v17571_v7 = vld [vmem:[#allocation258_spill] sm:$0xff]  ;;  %v2225_v17 = vsub.f32 %v17573_v14, %v17501_v37  ;;  %17574 = vst [vmem:[#allocation60_spill] sm:$0xff] %v12240_v46  ;;  %v12242_v19 = vpop.permute.xlu0 %1938  ;;  %v17576_v1 = vld [vmem:[#allocation259_spill] sm:$0xff]  ;;  %v12247_v34 = vmul.f32 0.6931472, %v6612_v16  ;;  %6617 = vlog2.f32 %v4497_v29  ;;  %v6614_v29 = vpop.eup %6613  ;;  %4903 = vadd.xlane.f32.xlu0 %v12007_v53 }
 0x3ab   :  { %v12235_v60 = vmul.f32 %v17571_v7, %v2474_v59  ;;  %17575 = vst [vmem:[#allocation235_spill] sm:$0xff] %v12242_v19  ;;  %v12245_v55 = vmul.f32 %v17576_v1, %v2475_v11  ;;  %v2476_v3 = vand.u32 2147483647, %v2348_v31  ;;  %vm12251_vm6 = vcmp.lt.f32.partialorder %v4368_v61, 0.0004427343  ;;  %v17582_v59 = vld [vmem:[#allocation288_spill] sm:$0xff]  ;;  %4905 = vadd.xlane.f32.xlu1 %v12035_v33 }
 0x3ac   :  { %17578 = vst [vmem:[#allocation25_spill] sm:$0xff] %v12247_v34  ;;  %v17579_v43 = vmov 0  ;;  %v4236_v47 = vadd.f32 1.0, %v17582_v59  ;;  %v4239_v8 = vmul.f32 -0.5, %v17582_v59  ;;  %v2477_v7 = vand.u32 2147483647, %v2349_v49 }
 0x3ad   :  { %17572 = vst [vmem:[#allocation70_spill] sm:$0xff] %v12235_v60  ;;  %17577 = vst [vmem:[#allocation163_spill] sm:$0xff] %v12245_v55  ;;  %v17580_v43 = vsel %vm12251_vm6, 4294967295, %v17579_v43  ;;  %v17583_v14 = vld [vmem:[#allocation146_spill] sm:$0xff]  ;;  %v17586_v31 = vld [vmem:[#allocation388_spill] sm:$0xff]  ;;  %v12268_v19 = vmul.f32 %v17535_v44, %v4492_v24  ;;  %v12283_v24 = vpop.permute.xlu1 %1950 }
 0x3ae   :  { %17581 = vst [vmem:[#allocation257_spill] sm:$0xff] %v17580_v43  ;;  %v2352_v11 = vmul.f32 %v2224_v35, %v17583_v14  ;;  %v17584_v16 = vld [vmem:[#allocation338_spill] sm:$0xff]  ;;  %v2479_v23 = vand.u32 2147483647, %v2351_v6  ;;  %v2478_v22 = vand.u32 2147483647, %v2350_v26  ;;  %v12285_v6 = vpop.permute.xlu0 %1946  ;;  %6619 = vlog2.f32 %v4236_v47  ;;  %4907 = vadd.xlane.f32.xlu0 %v12046_v45 }
 0x3af   :  { %v17587_v46 = vld [vmem:[#allocation286_spill] sm:$0xff]  ;;  %17590 = vst [vmem:[#allocation383_spill] sm:$0xff] %v12268_v19  ;;  %v17591_v49 = vld [vmem:[#allocation83_spill] sm:$0xff]  ;;  %v17592_v35 = vld [vmem:[#allocation205_spill] sm:$0xff]  ;;  %v4501_v26 = vadd.f32 1.0, %v4500_v63  ;;  %4909 = vadd.xlane.f32.xlu1 %v12066_v51 }
 0x3b0   :  { %v17588_v10 = vsel %vm11125_vm0, %v17586_v31, %v17587_v46  ;;  %v2227_v28 = vsub.f32 %v17591_v49, %v17501_v37  ;;  %v17593_v14 = vld [vmem:[#allocation391_spill] sm:$0xff]  ;;  %v17595_v38 = vld [vmem:[#allocation390_spill] sm:$0xff]  ;;  %17601 = vst [vmem:[#allocation353_spill] sm:$0xff] %v12283_v24  ;;  %17602 = vst [vmem:[#allocation236_spill] sm:$0xff] %v12285_v6  ;;  %v12300_v63 = vmul.f32 0.6931472, %v6614_v29 }
 0x3b1   :  { %v12265_v61 = vadd.f32 %v17588_v10, %v17584_v16  ;;  %vm17594_vm11 = vnez %v17593_v14  ;;  %v17599_v46 = vld [vmem:[#allocation154_spill] sm:$0xff]  ;;  %v17600_v16 = vld [vmem:[#allocation84_spill] sm:$0xff]  ;;  %v17604_v14 = vld [vmem:[#allocation159_spill] sm:$0xff]  ;;  %vm12302_vm0 = vcmp.lt.f32.partialorder %v4494_v62, 0.0004427343  ;;  %v12320_v24 = vpop.permute.xlu1 %1958 }
 0x3b2   :  { %v17597_v1 = vsel %vm17594_vm11, %v17595_v38, %v17596_v40  ;;  %v2353_v10 = vmul.f32 %v2225_v17, %v17599_v46  ;;  %v2226_v44 = vsub.f32 %v17600_v16, %v17501_v37  ;;  %v17603_v31 = vld [vmem:[#allocation12_spill] sm:$0xff]  ;;  %v4240_v38 = vadd.f32 1.0, %v4239_v8  ;;  %17608 = vst [vmem:[#allocation369_spill] sm:$0xff] %v12300_v63  ;;  %v17613_v40 = vld [vmem:[#allocation181_spill] sm:$0xff]  ;;  %v17615_v8 = vld [vmem:[#allocation183_spill] sm:$0xff]  ;;  %v12322_v6 = vpop.permute.xlu0 %1954  ;;  %4911 = vadd.xlane.f32.xlu0 %v12069_v42 }
 0x3b3   :  { %17589 = vst [vmem:[#allocation90_spill] sm:$0xff] %v12265_v61  ;;  %v12278_v55 = vadd.f32 %v17597_v1, %v17592_v35  ;;  %v4371_v49 = vadd.f32 1.0, %v17603_v31  ;;  %v12290_v61 = vmul.f32 %v17604_v14, %v2476_v3  ;;  %v2480_v17 = vand.u32 2147483647, %v2352_v11  ;;  %v17606_v35 = vld [vmem:[#allocation177_spill] sm:$0xff]  ;;  %v17612_v16 = vld [vmem:[#allocation148_spill] sm:$0xff]  ;;  %4913 = vadd.xlane.f32.xlu1 %v12091_v15 }
 0x3b4   :  { %v12298_v1 = vmul.f32 %v17606_v35, %v2477_v7  ;;  %v17609_v46 = vmov 0  ;;  %v4503_v3 = vand.u32 2147483647, %v17565_v9  ;;  %v12308_v14 = vmul.f32 %v2227_v28, %v17612_v16  ;;  %v17617_v32 = vld [vmem:[#allocation360_spill] sm:$0xff]  ;;  %v6616_v35 = vpop.eup %6615  ;;  %v17618_v54 = vld [vmem:[#allocation74_spill] sm:$0xff]  ;;  %17619 = vst [vmem:[#allocation241_spill] sm:$0xff] %v12320_v24 }
 0x3b5   :  { %17598 = vst [vmem:[#allocation57_spill] sm:$0xff] %v12278_v55  ;;  %17605 = vst [vmem:[#allocation67_spill] sm:$0xff] %v12290_v61  ;;  %v17610_v46 = vsel %vm12302_vm0, 4294967295, %v17609_v46  ;;  %v12311_v47 = vmul.f32 %v17613_v40, %v2478_v22  ;;  %v12314_v11 = vmul.f32 %v17615_v8, %v2479_v23  ;;  %v4506_v7 = vadd.f32 1.0, %v17617_v32  ;;  %v17622_v22 = vld [vmem:[#allocation344_spill] sm:$0xff]  ;;  %v17632_v23 = vld [vmem:[#allocation141_spill] sm:$0xff] }
 0x3b6   :  { %17607 = vst [vmem:[#allocation68_spill] sm:$0xff] %v12298_v1  ;;  %17611 = vst [vmem:[#allocation24_spill] sm:$0xff] %v17610_v46  ;;  %v2481_v29 = vand.u32 2147483647, %v2353_v10  ;;  %v12318_v62 = vmul.f32 %v2226_v44, %v17618_v54  ;;  %v12325_v28 = vmul.f32 %v17565_v9, %v4501_v26  ;;  %6621 = vlog2.f32 %v4371_v49  ;;  %v17624_v40 = vld [vmem:[#allocation392_spill] sm:$0xff]  ;;  %v17630_v9 = vld [vmem:[#allocation189_spill] sm:$0xff]  ;;  %v1967_v49 = vpop.permute.xlu1 %1966  ;;  %v1963_v63 = vpop.permute.xlu0 %1962  ;;  %4915 = vadd.xlane.f32.xlu0 %v12113_v48 }
 0x3b7   :  { %17614 = vst [vmem:[#allocation385_spill] sm:$0xff] %v12311_v47  ;;  %17616 = vst [vmem:[#allocation384_spill] sm:$0xff] %v12314_v11  ;;  %v17625_v16 = vld [vmem:[#allocation308_spill] sm:$0xff]  ;;  %v12337_v54 = vmul.f32 %v17582_v59, %v4240_v38  ;;  %v4242_v44 = vand.u32 2147483647, %v17582_v59  ;;  %v12343_v26 = vmul.f32 %v17630_v9, %v2480_v17  ;;  %6623 = vlog2.f32 %v4506_v7  ;;  %v17634_v17 = vld [vmem:[#allocation91_spill] sm:$0xff]  ;;  %4917 = vadd.xlane.f32.xlu1 %v12144_v36 }
 0x3b8   :  { %17620 = vst [vmem:[#allocation63_spill] sm:$0xff] %v12322_v6  ;;  %17621 = vst [vmem:[#allocation71_spill] sm:$0xff] %v12325_v28  ;;  %v17626_v8 = vsel %vm11286_vm3, %v17624_v40, %v17625_v16  ;;  %v17629_v24 = vld [vmem:[#allocation284_spill] sm:$0xff]  ;;  %v4380_v40 = vadd.f32 1.0, %v17632_v23  ;;  %v12352_v16 = vmul.f32 0.6931472, %v6616_v35  ;;  %v2229_v9 = vsub.f32 %v17634_v17, %v17501_v37 }
 0x3b9   :  { %v12334_v10 = vadd.f32 %v17626_v8, %v17622_v22  ;;  %17628 = vst [vmem:[#allocation240_spill] sm:$0xff] %v12337_v54  ;;  %v4245_v6 = vadd.f32 1.0, %v17629_v24  ;;  %17631 = vst [vmem:[#allocation7_spill] sm:$0xff] %v12343_v26  ;;  %v4374_v22 = vmul.f32 -0.5, %v17603_v31  ;;  %v4377_v59 = vand.u32 2147483647, %v17603_v31 }
 0x3ba   :  { %17633 = vst [vmem:[#allocation78_spill] sm:$0xff] %v12352_v16  ;;  %v17635_v33 = vld [vmem:[#allocation232_spill] sm:$0xff]  ;;  %v17636_v27 = vld [vmem:[#allocation267_spill] sm:$0xff]  ;;  %vm12363_vm3 = vcmp.lt.f32.partialorder %v4503_v3, 0.0004427343  ;;  %v17638_v38 = vmov 0  ;;  %v2293_v35 = vsub.f32 %v1967_v49, %v12150_v5  ;;  %v2292_v7 = vsub.f32 %v1963_v63, %v12150_v5  ;;  %v1971_v51 = vpop.permute.xlu0 %1970  ;;  %4919 = vadd.xlane.f32.xlu0 %v12153_v56 }
 0x3bb   :  { %17627 = vst [vmem:[#allocation231_spill] sm:$0xff] %v12334_v10  ;;  %v2228_v53 = vsub.f32 %v17635_v33, %v17501_v37  ;;  %v12361_v43 = vmul.f32 %v17636_v27, %v2481_v29  ;;  %v17639_v38 = vsel %vm12363_vm3, 4294967295, %v17638_v38  ;;  %6625 = vlog2.f32 %v4245_v6  ;;  %v17641_v17 = vld [vmem:[#allocation356_spill] sm:$0xff]  ;;  %v6618_v10 = vpop.eup %6617  ;;  %v17642_v33 = vld [vmem:[#allocation381_spill] sm:$0xff]  ;;  %v17643_v27 = vld [vmem:[#allocation339_spill] sm:$0xff]  ;;  %4921 = vadd.xlane.f32.xlu1 %v12177_v50 }
 0x3bc   :  { %17640 = vst [vmem:[#allocation254_spill] sm:$0xff] %v17639_v38  ;;  %v4515_v8 = vadd.f32 1.0, %v17641_v17  ;;  %v2231_v55 = vsub.f32 %v17642_v33, %v17501_v37  ;;  %v17645_v29 = vld [vmem:[#allocation116_spill] sm:$0xff]  ;;  %v17646_v34 = vld [vmem:[#allocation233_spill] sm:$0xff]  ;;  %v4509_v63 = vmul.f32 -0.5, %v17617_v32  ;;  %6627 = vlog2.f32 %v4380_v40  ;;  %v17649_v6 = vld [vmem:[#allocation382_spill] sm:$0xff]  ;;  %v1975_v40 = vpop.permute.xlu1 %1974 }
 0x3bd   :  { %17637 = vst [vmem:[#allocation351_spill] sm:$0xff] %v12361_v43  ;;  %v17647_v39 = vsel %vm11314_vm1, %v17645_v29, %v17646_v34  ;;  %v2230_v45 = vsub.f32 %v17649_v6, %v17501_v37  ;;  %v17650_v58 = vld [vmem:[#allocation109_spill] sm:$0xff]  ;;  %v17651_v33 = vld [vmem:[#allocation108_spill] sm:$0xff]  ;;  %vm12401_vm1 = vcmp.lt.f32.partialorder %v4242_v44, 0.0004427343  ;;  %v17654_v37 = vmov 0 }
 0x3be   :  { %v12380_v49 = vadd.f32 %v17647_v39, %v17643_v27  ;;  %v12386_v43 = vmul.f32 %v2293_v35, %v17650_v58  ;;  %v12389_v26 = vmul.f32 %v2292_v7, %v17651_v33  ;;  %v17652_v34 = vld [vmem:[#allocation253_spill] sm:$0xff]  ;;  %v17653_v27 = vld [vmem:[#allocation158_spill] sm:$0xff]  ;;  %v17655_v37 = vsel %vm12401_vm1, 4294967295, %v17654_v37  ;;  %v17657_v35 = vld [vmem:[#allocation296_spill] sm:$0xff]  ;;  %4923 = vadd.xlane.f32.xlu0 %v12180_v4 }
 0x3bf   :  { %v12396_v39 = vmul.f32 %v2229_v9, %v17652_v34  ;;  %v12399_v29 = vmul.f32 %v2228_v53, %v17653_v27  ;;  %17656 = vst [vmem:[#allocation139_spill] sm:$0xff] %v17655_v37  ;;  %v4375_v58 = vadd.f32 1.0, %v4374_v22  ;;  %v4254_v7 = vadd.f32 1.0, %v17657_v35  ;;  %v6620_v53 = vpop.eup %6619  ;;  %v17659_v34 = vld [vmem:[#allocation167_spill] sm:$0xff]  ;;  %v17660_v16 = vld [vmem:[#allocation264_spill] sm:$0xff]  ;;  %v17683_v28 = vld [vmem:[#allocation193_spill] sm:$0xff]  ;;  %4925 = vadd.xlane.f32.xlu1 %v12220_v18 }
 0x3c0   :  { %17648 = vst [vmem:[#allocation10_spill] sm:$0xff] %v12380_v49  ;;  %v2295_v6 = vsub.f32 %v1975_v40, %v12150_v5  ;;  %v2294_v33 = vsub.f32 %v1971_v51, %v12150_v5  ;;  %v12409_v9 = vmul.f32 0.6931472, %v6618_v10  ;;  %6629 = vlog2.f32 %v4515_v8  ;;  %v17661_v51 = vld [vmem:[#allocation115_spill] sm:$0xff]  ;;  %v17662_v10 = vld [vmem:[#allocation110_spill] sm:$0xff]  ;;  %v12433_v46 = vpop.permute.xlu1 %1985  ;;  %v17721_v4 = vld [vmem:[#allocation208_spill] sm:$0xff] }
 0x3c1   :  { %v12412_v27 = vmul.f32 %v2231_v55, %v17659_v34  ;;  %v4510_v44 = vadd.f32 1.0, %v4509_v63  ;;  %v4512_v22 = vand.u32 2147483647, %v17617_v32  ;;  %v4248_v3 = vmul.f32 -0.5, %v17629_v24  ;;  %v17666_v55 = vld [vmem:[#allocation316_spill] sm:$0xff]  ;;  %17667 = vst [vmem:[#allocation213_spill] sm:$0xff] %v12433_v46 }
 0x3c2   :  { %17658 = vst [vmem:[#allocation132_spill] sm:$0xff] %v12409_v9  ;;  %v12418_v40 = vmul.f32 %v2230_v45, %v17660_v16  ;;  %v12421_v19 = vmul.f32 %v2295_v6, %v17661_v51  ;;  %v12424_v42 = vmul.f32 %v2294_v33, %v17662_v10  ;;  %vm12426_vm11 = vcmp.lt.f32.partialorder %v4377_v59, 0.0004427343  ;;  %v12435_v45 = vpop.permute.xlu0 %1981  ;;  %v17676_v15 = vld [vmem:[#allocation219_spill] sm:$0xff]  ;;  %v17722_v18 = vld [vmem:[#allocation17_spill] sm:$0xff]  ;;  %4927 = vadd.xlane.f32.xlu0 %v12223_v12  ;;  %v17833_v54 = vld [vmem:[#allocation52_spill] sm:$0xff] }
 0x3c3   :  { %v17663_v8 = vmov 0  ;;  %v4389_v34 = vadd.f32 1.0, %v17666_v55  ;;  %17668 = vst [vmem:[#allocation259_spill] sm:$0xff] %v12435_v45  ;;  %v12438_v16 = vmul.f32 %v17603_v31, %v4375_v58  ;;  %6631 = vlog2.f32 %v4254_v7  ;;  %v6622_v6 = vpop.eup %6621  ;;  %4929 = vadd.xlane.f32.xlu1 %v12235_v60  ;;  %v17753_v60 = vld [vmem:[#allocation201_spill] sm:$0xff] }
 0x3c4   :  { %v17664_v8 = vsel %vm12426_vm11, 4294967295, %v17663_v8  ;;  %v2157_v59 = vcombine.high %v11794_v20, %v11794_v20  ;;  %v12447_v51 = vmul.f32 0.6931472, %v6620_v53  ;;  %v4383_v10 = vmul.f32 -0.5, %v17632_v23  ;;  %v6624_v36 = vpop.eup %6623 }
 0x3c5   :  { %17665 = vst [vmem:[#allocation258_spill] sm:$0xff] %v17664_v8  ;;  %17669 = vst [vmem:[#allocation288_spill] sm:$0xff] %v12438_v16  ;;  %v12453_v31 = vmul.f32 %v17617_v32, %v4510_v44  ;;  %vm12455_vm0 = vcmp.lt.f32.partialorder %v4512_v22, 0.0004427343  ;;  %v17672_v20 = vmov 0  ;;  %v4249_v58 = vadd.f32 1.0, %v4248_v3  ;;  %v12467_v32 = vpop.permute.xlu1 %1993 }
 0x3c6   :  { %17670 = vst [vmem:[#allocation146_spill] sm:$0xff] %v12447_v51  ;;  %v17673_v20 = vsel %vm12455_vm0, 4294967295, %v17672_v20  ;;  %v4251_v7 = vand.u32 2147483647, %v17629_v24  ;;  %v17675_v53 = vand.u32 2147483647, %v12318_v62  ;;  %6633 = vlog2.f32 %v4389_v34  ;;  %v12469_v44 = vpop.permute.xlu0 %1989 }
 0x3c7   :  { %17671 = vst [vmem:[#allocation338_spill] sm:$0xff] %v12453_v31  ;;  %17674 = vst [vmem:[#allocation389_spill] sm:$0xff] %v17673_v20  ;;  %v4518_v63 = vmul.f32 -0.5, %v17641_v17  ;;  %v17680_v22 = vld [vmem:[#allocation138_spill] sm:$0xff]  ;;  %v17686_v62 = vld [vmem:[#allocation33_spill] sm:$0xff]  ;;  %v12491_v49 = vrot.slane %v2157_v59, %v6742_v2  ;;  %v4257_v9 = vmul.f32 -0.5, %v17657_v35  ;;  %v12506_v59 = vmul.f32 %v17629_v24, %v4249_v58  ;;  %4933 = vadd.xlane.f32.xlu1 %v12290_v61 }
 0x3c8   :  { %v12464_v48 = vmul.f32 %v17676_v15, %v17675_v53  ;;  %17678 = vst [vmem:[#allocation286_spill] sm:$0xff] %v12467_v32  ;;  %17679 = vst [vmem:[#allocation83_spill] sm:$0xff] %v12469_v44  ;;  %v17682_v3 = vld [vmem:[#allocation134_spill] sm:$0xff]  ;;  %v17688_v15 = vld [vmem:[#allocation135_spill] sm:$0xff]  ;;  %v12487_v5 = vmul.f32 0.6931472, %v6622_v6  ;;  %v6626_v45 = vpop.eup %6625  ;;  %v17706_v58 = vsel %vm11497_vm7, %v11465_v41, %v11553_v21 }
 0x3c9   :  { %v17684_v38 = vsel %vm11375_vm8, %v17682_v3, %v17683_v28  ;;  %v17689_v53 = vld [vmem:[#allocation318_spill] sm:$0xff]  ;;  %v17693_v32 = vld [vmem:[#allocation361_spill] sm:$0xff]  ;;  %17694 = vst [vmem:[#allocation11_spill] sm:$0xff] %v12491_v49  ;;  %17698 = vst [vmem:[#allocation84_spill] sm:$0xff] %v12506_v59  ;;  %vm12508_vm8 = vcmp.lt.f32.partialorder %v4251_v7, 0.0004427343  ;;  %v12517_v50 = vpop.permute.xlu1 %2001 }
 0x3ca   :  { %17677 = vst [vmem:[#allocation388_spill] sm:$0xff] %v12464_v48  ;;  %v12477_v33 = vadd.f32 %v17684_v38, %v17680_v22  ;;  %v17690_v46 = vsel %vm11414_vm4, %v17688_v15, %v17689_v53  ;;  %17692 = vst [vmem:[#allocation390_spill] sm:$0xff] %v12487_v5  ;;  %v4524_v44 = vadd.f32 1.0, %v17693_v32  ;;  %v4384_v38 = vadd.f32 1.0, %v4383_v10  ;;  %v17696_v6 = vld [vmem:[#allocation89_spill] sm:$0xff]  ;;  %v6628_v10 = vpop.eup %6627  ;;  %v17705_v24 = vld [vmem:[#allocation38_spill] sm:$0xff] }
 0x3cb   :  { %v12485_v34 = vadd.f32 %v17690_v46, %v17686_v62  ;;  %v17695_v46 = vand.u32 2147483647, %v12308_v14  ;;  %v17699_v3 = vmov 0  ;;  %v4386_v62 = vand.u32 2147483647, %v17632_v23  ;;  %17703 = vst [vmem:[#allocation177_spill] sm:$0xff] %v12517_v50  ;;  %4937 = vadd.xlane.f32.xlu1 %v12311_v47 }
 0x3cc   :  { %17685 = vst [vmem:[#allocation205_spill] sm:$0xff] %v12477_v33  ;;  %v17700_v3 = vsel %vm12508_vm8, 4294967295, %v17699_v3  ;;  %v12513_v15 = vmul.f32 0.6931472, %v6624_v36  ;;  %v4519_v53 = vadd.f32 1.0, %v4518_v63  ;;  %v4392_v14 = vmul.f32 -0.5, %v17666_v55 }
 0x3cd   :  { %17691 = vst [vmem:[#allocation391_spill] sm:$0xff] %v12485_v34  ;;  %v12503_v22 = vmul.f32 %v17696_v6, %v17695_v46  ;;  %17701 = vst [vmem:[#allocation12_spill] sm:$0xff] %v17700_v3  ;;  %v4521_v28 = vand.u32 2147483647, %v17641_v17  ;;  %v12519_v46 = vpop.permute.xlu0 %1997  ;;  %v12527_v7 = vadd.f32 %v17706_v58, %v17705_v24  ;;  %v4260_v63 = vand.u32 2147483647, %v17657_v35  ;;  %v6630_v21 = vpop.eup %6629 }
 0x3ce   :  { %17702 = vst [vmem:[#allocation159_spill] sm:$0xff] %v12513_v15  ;;  %17704 = vst [vmem:[#allocation148_spill] sm:$0xff] %v12519_v46  ;;  %6635 = vlog2.f32 %v4524_v44  ;;  %v12535_v6 = vmul.f32 0.6931472, %v6626_v45  ;;  %v12538_v56 = vmul.f32 %v17632_v23, %v4384_v38  ;;  %v4258_v13 = vadd.f32 1.0, %v4257_v9  ;;  %v17710_v50 = vld [vmem:[#allocation293_spill] sm:$0xff] }
 0x3cf   :  { %17697 = vst [vmem:[#allocation154_spill] sm:$0xff] %v12503_v22  ;;  %17707 = vst [vmem:[#allocation181_spill] sm:$0xff] %v12527_v7  ;;  %v4263_v41 = vadd.f32 1.0, %v17710_v50  ;;  %v12542_v24 = vmul.f32 0.6931472, %v6628_v10  ;;  %v17712_v58 = vmov 0  ;;  %v12555_v38 = vmul.f32 %v17641_v17, %v4519_v53  ;;  %v12561_v10 = vpop.permute.xlu1 %2009 }
 0x3d0   :  { %17708 = vst [vmem:[#allocation183_spill] sm:$0xff] %v12535_v6  ;;  %17709 = vst [vmem:[#allocation360_spill] sm:$0xff] %v12538_v56  ;;  %vm12544_vm4 = vcmp.lt.f32.partialorder %v4386_v62, 0.0004427343  ;;  %v4527_v44 = vmul.f32 -0.5, %v17693_v32  ;;  %v4266_v45 = vmul.f32 -0.5, %v17710_v50  ;;  %v17723_v5 = vsel %vm11525_vm9, %v11515_v57, %v17722_v18  ;;  %v6632_v23 = vpop.eup %6631 }
 0x3d1   :  { %17711 = vst [vmem:[#allocation74_spill] sm:$0xff] %v12542_v24  ;;  %v17713_v58 = vsel %vm12544_vm4, 4294967295, %v17712_v58  ;;  %17715 = vst [vmem:[#allocation242_spill] sm:$0xff] %v12555_v38  ;;  %vm12557_vm7 = vcmp.lt.f32.partialorder %v4521_v28, 0.0004427343  ;;  %v17716_v9 = vmov 0  ;;  %v12563_v36 = vpop.permute.xlu0 %2005  ;;  %v12571_v20 = vadd.f32 %v17723_v5, %v17721_v4 }
 0x3d2   :  { %17714 = vst [vmem:[#allocation344_spill] sm:$0xff] %v17713_v58  ;;  %v17717_v9 = vsel %vm12557_vm7, 4294967295, %v17716_v9  ;;  %v4393_v62 = vadd.f32 1.0, %v4392_v14  ;;  %17719 = vst [vmem:[#allocation308_spill] sm:$0xff] %v12561_v10  ;;  %vm12573_vm0 = vcmp.lt.f32.partialorder %v4260_v63, 0.0004427343  ;;  %v12587_v57 = vmul.f32 %v17657_v35, %v4258_v13 }
 0x3d3   :  { %17718 = vst [vmem:[#allocation392_spill] sm:$0xff] %v17717_v9  ;;  %17720 = vst [vmem:[#allocation284_spill] sm:$0xff] %v12563_v36  ;;  %v17725_v17 = vmov 0  ;;  %v4395_v28 = vand.u32 2147483647, %v17666_v55  ;;  %v17728_v53 = vld [vmem:[#allocation329_spill] sm:$0xff]  ;;  %6637 = vlog2.f32 %v4263_v41 }
 0x3d4   :  { %17724 = vst [vmem:[#allocation189_spill] sm:$0xff] %v12571_v20  ;;  %v17726_v17 = vsel %vm12573_vm0, 4294967295, %v17725_v17  ;;  %v4398_v14 = vadd.f32 1.0, %v17728_v53  ;;  %v12584_v10 = vmul.f32 0.6931472, %v6630_v21  ;;  %17730 = vst [vmem:[#allocation232_spill] sm:$0xff] %v12587_v57 }
 0x3d5   :  { %17727 = vst [vmem:[#allocation141_spill] sm:$0xff] %v17726_v17  ;;  %v17731_v5 = vand.u32 2147483647, %v12399_v29  ;;  %v17732_v4 = vld [vmem:[#allocation94_spill] sm:$0xff]  ;;  %v4528_v12 = vadd.f32 1.0, %v4527_v44  ;;  %v4267_v30 = vadd.f32 1.0, %v4266_v45  ;;  %v17738_v29 = vsel %vm11634_vm2, %v11579_v52, %v11690_v0  ;;  %v6634_v44 = vpop.eup %6633  ;;  %v12616_v45 = vpop.permute.xlu1 %2017 }
 0x3d6   :  { %17729 = vst [vmem:[#allocation91_spill] sm:$0xff] %v12584_v10  ;;  %v17734_v21 = vand.u32 2147483647, %v12396_v39  ;;  %v17735_v36 = vld [vmem:[#allocation221_spill] sm:$0xff]  ;;  %v17737_v13 = vld [vmem:[#allocation362_spill] sm:$0xff]  ;;  %17741 = vst [vmem:[#allocation123_spill] sm:$0xff] %v12616_v45  ;;  %v12618_v39 = vpop.permute.xlu0 %2013  ;;  %6639 = vlog2.f32 %v4398_v14 }
 0x3d7   :  { %v12593_v18 = vmul.f32 %v17732_v4, %v17731_v5  ;;  %v12610_v41 = vadd.f32 %v17738_v29, %v17737_v13  ;;  %v12613_v5 = vmul.f32 %v17666_v55, %v4393_v62  ;;  %v4530_v4 = vand.u32 2147483647, %v17693_v32  ;;  %17742 = vst [vmem:[#allocation116_spill] sm:$0xff] %v12618_v39  ;;  %v17748_v0 = vld [vmem:[#allocation131_spill] sm:$0xff]  ;;  %v17750_v13 = vld [vmem:[#allocation50_spill] sm:$0xff]  ;;  %v17756_v14 = vld [vmem:[#allocation165_spill] sm:$0xff] }
 0x3d8   :  { %v12602_v35 = vmul.f32 %v17735_v36, %v17734_v21  ;;  %v12620_v36 = vmul.f32 0.6931472, %v6632_v23  ;;  %vm12622_vm9 = vcmp.lt.f32.partialorder %v4395_v28, 0.0004427343  ;;  %v17744_v21 = vmov 0  ;;  %v17749_v62 = vld [vmem:[#allocation163_spill] sm:$0xff] }
 0x3d9   :  { %17733 = vst [vmem:[#allocation267_spill] sm:$0xff] %v12593_v18  ;;  %17739 = vst [vmem:[#allocation381_spill] sm:$0xff] %v12610_v41  ;;  %v17745_v21 = vsel %vm12622_vm9, 4294967295, %v17744_v21  ;;  %v4401_v52 = vmul.f32 -0.5, %v17728_v53  ;;  %v2249_v55 = vsub.f32 %v17748_v0, %v17747_v25  ;;  %4931 = vadd.xlane.f32.xlu0 %v17749_v62  ;;  %v17752_v63 = vld [vmem:[#allocation322_spill] sm:$0xff]  ;;  %v4533_v39 = vadd.f32 1.0, %v17756_v14 }
 0x3da   :  { %17736 = vst [vmem:[#allocation356_spill] sm:$0xff] %v12602_v35  ;;  %17740 = vst [vmem:[#allocation339_spill] sm:$0xff] %v12613_v5  ;;  %v17754_v45 = vsel %vm11681_vm12, %v17752_v63, %v17753_v60  ;;  %v17757_v24 = vld [vmem:[#allocation363_spill] sm:$0xff]  ;;  %v12647_v62 = vmul.f32 %v17693_v32, %v4528_v12  ;;  %v12650_v29 = vmul.f32 %v17710_v50, %v4267_v30  ;;  %v4269_v60 = vand.u32 2147483647, %v17710_v50  ;;  %v12663_v12 = vpop.permute.xlu1 %2025  ;;  %v12665_v32 = vpop.permute.xlu0 %2021  ;;  %v17768_v50 = vld [vmem:[#allocation229_spill] sm:$0xff] }
 0x3db   :  { %17743 = vst [vmem:[#allocation233_spill] sm:$0xff] %v12620_v36  ;;  %17746 = vst [vmem:[#allocation382_spill] sm:$0xff] %v17745_v21  ;;  %v12636_v23 = vadd.f32 %v17754_v45, %v17750_v13  ;;  %v2248_v0 = vsub.f32 %v17757_v24, %v17747_v25  ;;  %v17760_v63 = vld [vmem:[#allocation355_spill] sm:$0xff]  ;;  %v12655_v13 = vmul.f32 0.6931472, %v6634_v44  ;;  %v17762_v28 = vmov 0  ;;  %v6636_v9 = vpop.eup %6635 }
 0x3dc   :  { %17758 = vst [vmem:[#allocation108_spill] sm:$0xff] %v12647_v62  ;;  %17759 = vst [vmem:[#allocation253_spill] sm:$0xff] %v12650_v29  ;;  %v2159_v45 = vcombine.high %v17760_v63, %v17760_v63  ;;  %vm12657_vm2 = vcmp.lt.f32.partialorder %v4530_v4, 0.0004427343  ;;  %v4404_v24 = vand.u32 2147483647, %v17728_v53  ;;  %6641 = vlog2.f32 %v4533_v39 }
 0x3dd   :  { %17755 = vst [vmem:[#allocation109_spill] sm:$0xff] %v12636_v23  ;;  %17761 = vst [vmem:[#allocation158_spill] sm:$0xff] %v12655_v13  ;;  %v17763_v28 = vsel %vm12657_vm2, 4294967295, %v17762_v28  ;;  %v4536_v61 = vmul.f32 -0.5, %v17756_v14  ;;  %v17767_v30 = vand.u32 2147483647, %v12418_v40  ;;  %4935 = vadd.xlane.f32.xlu0 %v12298_v1 }
 0x3de   :  { %17764 = vst [vmem:[#allocation296_spill] sm:$0xff] %v17763_v28  ;;  %17765 = vst [vmem:[#allocation167_spill] sm:$0xff] %v12663_v12  ;;  %v4402_v44 = vadd.f32 1.0, %v4401_v52  ;;  %v17770_v63 = vld [vmem:[#allocation111_spill] sm:$0xff]  ;;  %v17771_v56 = vld [vmem:[#allocation92_spill] sm:$0xff]  ;;  %v2034_v39 = vpop.permute.xlu1 %2033  ;;  %v2030_v59 = vpop.permute.xlu0 %2029  ;;  %v17803_v5 = vmov 0 }
 0x3df   :  { %17766 = vst [vmem:[#allocation264_spill] sm:$0xff] %v12665_v32  ;;  %v12670_v10 = vmul.f32 %v17768_v50, %v17767_v30  ;;  %v4272_v38 = vadd.f32 1.0, %v17770_v63  ;;  %v12678_v58 = vmul.f32 %v2249_v55, %v17771_v56  ;;  %v17772_v12 = vand.u32 2147483647, %v12412_v27  ;;  %v17773_v40 = vld [vmem:[#allocation238_spill] sm:$0xff]  ;;  %v17775_v50 = vld [vmem:[#allocation199_spill] sm:$0xff] }
 0x3e0   :  { %v4539_v30 = vand.u32 2147483647, %v17756_v14  ;;  %v12688_v17 = vmul.f32 %v2248_v0, %v17775_v50  ;;  %v17776_v52 = vld [vmem:[#allocation151_spill] sm:$0xff]  ;;  %v17777_v56 = vld [vmem:[#allocation364_spill] sm:$0xff]  ;;  %v17779_v1 = vld [vmem:[#allocation321_spill] sm:$0xff]  ;;  %v4537_v47 = vadd.f32 1.0, %v4536_v61  ;;  %v2309_v61 = vsub.f32 %v2034_v39, %v12491_v49 }
 0x3e1   :  { %17769 = vst [vmem:[#allocation115_spill] sm:$0xff] %v12670_v10  ;;  %v12684_v32 = vmul.f32 %v17773_v40, %v17772_v12  ;;  %v2251_v4 = vsub.f32 %v17776_v52, %v17747_v25  ;;  %v17780_v36 = vld [vmem:[#allocation164_spill] sm:$0xff]  ;;  %v17783_v12 = vld [vmem:[#allocation191_spill] sm:$0xff]  ;;  %v12710_v52 = vrot.slane %v2159_v45, %v6742_v2  ;;  %v12719_v3 = vmul.f32 0.6931472, %v6636_v9  ;;  %4939 = vadd.xlane.f32.xlu0 %v12314_v11  ;;  %v6638_v9 = vpop.eup %6637  ;;  %v17827_v8 = vld [vmem:[#allocation250_spill] sm:$0xff] }
 0x3e2   :  { %v17781_v27 = vsel %vm11701_vm10, %v17779_v1, %v17780_v36  ;;  %v17785_v40 = vld [vmem:[#allocation104_spill] sm:$0xff]  ;;  %v17786_v6 = vld [vmem:[#allocation143_spill] sm:$0xff]  ;;  %vm12721_vm12 = vcmp.lt.f32.partialorder %v4269_v60, 0.0004427343  ;;  %v12726_v2 = vmul.f32 %v17728_v53, %v4402_v44  ;;  %6643 = vlog2.f32 %v4272_v38  ;;  %v2038_v60 = vpop.permute.xlu0 %2037  ;;  %v17832_v29 = vld [vmem:[#allocation30_spill] sm:$0xff] }
 0x3e3   :  { %17774 = vst [vmem:[#allocation110_spill] sm:$0xff] %v12684_v32  ;;  %v12699_v57 = vadd.f32 %v17781_v27, %v17777_v56  ;;  %v17787_v0 = vsel %vm11826_vm13, %v17785_v40, %v17786_v6  ;;  %17789 = vst [vmem:[#allocation138_spill] sm:$0xff] %v12710_v52  ;;  %v17790_v1 = vld [vmem:[#allocation324_spill] sm:$0xff]  ;;  %v17793_v6 = vmov 0  ;;  %v4275_v40 = vmul.f32 -0.5, %v17770_v63  ;;  %v17799_v38 = vld [vmem:[#allocation311_spill] sm:$0xff] }
 0x3e4   :  { %v12707_v50 = vadd.f32 %v17787_v0, %v17783_v12  ;;  %v4407_v36 = vadd.f32 1.0, %v17790_v1  ;;  %v17791_v56 = vld [vmem:[#allocation312_spill] sm:$0xff]  ;;  %17792 = vst [vmem:[#allocation280_spill] sm:$0xff] %v12719_v3  ;;  %v17794_v6 = vsel %vm12721_vm12, 4294967295, %v17793_v6  ;;  %17796 = vst [vmem:[#allocation193_spill] sm:$0xff] %v12726_v2  ;;  %v2308_v12 = vsub.f32 %v2030_v59, %v12491_v49  ;;  %v17797_v0 = vld [vmem:[#allocation206_spill] sm:$0xff] }
 0x3e5   :  { %17782 = vst [vmem:[#allocation316_spill] sm:$0xff] %v12699_v57  ;;  %v2250_v27 = vsub.f32 %v17791_v56, %v17747_v25  ;;  %17795 = vst [vmem:[#allocation134_spill] sm:$0xff] %v17794_v6  ;;  %v12735_v56 = vmul.f32 %v2251_v4, %v17797_v0  ;;  %v17798_v53 = vld [vmem:[#allocation328_spill] sm:$0xff]  ;;  %v2252_v55 = vsub.f32 %v17799_v38, %v17747_v25  ;;  %v17800_v45 = vld [vmem:[#allocation7_spill] sm:$0xff]  ;;  %vm12748_vm10 = vcmp.lt.f32.partialorder %v4404_v24, 0.0004427343  ;;  %v2042_v38 = vpop.permute.xlu1 %2041 }
 0x3e6   :  { %17788 = vst [vmem:[#allocation219_spill] sm:$0xff] %v12707_v50  ;;  %v2253_v44 = vsub.f32 %v17798_v53, %v17747_v25  ;;  %4941 = vadd.xlane.f32.xlu1 %v17800_v45  ;;  %v17801_v39 = vld [vmem:[#allocation171_spill] sm:$0xff]  ;;  %v17802_v11 = vld [vmem:[#allocation168_spill] sm:$0xff]  ;;  %v17804_v5 = vsel %vm12748_vm10, 4294967295, %v17803_v5  ;;  %v12753_v4 = vmul.f32 %v17756_v14, %v4537_v47  ;;  %6645 = vlog2.f32 %v4407_v36  ;;  %v17812_v45 = vld [vmem:[#allocation65_spill] sm:$0xff] }
 0x3e7   :  { %v12743_v59 = vmul.f32 %v2309_v61, %v17801_v39  ;;  %v12746_v13 = vmul.f32 %v2308_v12, %v17802_v11  ;;  %17805 = vst [vmem:[#allocation33_spill] sm:$0xff] %v17804_v5  ;;  %v17807_v0 = vld [vmem:[#allocation268_spill] sm:$0xff]  ;;  %v4278_v11 = vand.u32 2147483647, %v17770_v63  ;;  %v17808_v24 = vld [vmem:[#allocation367_spill] sm:$0xff]  ;;  %v6640_v12 = vpop.eup %6639  ;;  %v2311_v39 = vsub.f32 %v2042_v38, %v12491_v49  ;;  %v17813_v38 = vld [vmem:[#allocation237_spill] sm:$0xff] }
 0x3e8   :  { %17806 = vst [vmem:[#allocation283_spill] sm:$0xff] %v12753_v4  ;;  %v12756_v53 = vmul.f32 %v2250_v27, %v17807_v0  ;;  %v4542_v61 = vadd.f32 1.0, %v17808_v24  ;;  %v2310_v47 = vsub.f32 %v2038_v60, %v12491_v49  ;;  %v17809_v14 = vld [vmem:[#allocation351_spill] sm:$0xff]  ;;  %v12767_v36 = vmul.f32 0.6931472, %v6638_v9  ;;  %v17814_v28 = vld [vmem:[#allocation76_spill] sm:$0xff] }
 0x3e9   :  { %4943 = vadd.xlane.f32.xlu0 %v17809_v14  ;;  %v4276_v27 = vadd.f32 1.0, %v4275_v40  ;;  %v17811_v21 = vld [vmem:[#allocation275_spill] sm:$0xff]  ;;  %v12774_v3 = vmul.f32 %v2252_v55, %v17812_v45  ;;  %v4410_v62 = vmul.f32 -0.5, %v17790_v1  ;;  %v2255_v60 = vsub.f32 %v17813_v38, %v17747_v25  ;;  %v12789_v55 = vpop.permute.xlu1 %2052  ;;  %v12791_v45 = vpop.permute.xlu0 %2048  ;;  %v17864_v5 = vld [vmem:[#allocation277_spill] sm:$0xff] }
 0x3ea   :  { %17810 = vst [vmem:[#allocation135_spill] sm:$0xff] %v12767_v36  ;;  %v12771_v15 = vmul.f32 %v2253_v44, %v17811_v21  ;;  %4945 = vadd.xlane.f32.xlu1 %v12464_v48  ;;  %v12781_v14 = vmul.f32 %v2311_v39, %v17814_v28  ;;  %v17815_v9 = vld [vmem:[#allocation263_spill] sm:$0xff]  ;;  %v17817_v21 = vld [vmem:[#allocation246_spill] sm:$0xff]  ;;  %17818 = vst [vmem:[#allocation318_spill] sm:$0xff] %v12789_v55  ;;  %v12793_v48 = vmul.f32 0.6931472, %v6640_v12  ;;  %6647 = vlog2.f32 %v4542_v61  ;;  %v6642_v12 = vpop.eup %6641 }
 0x3eb   :  { %v12784_v40 = vmul.f32 %v2310_v47, %v17815_v9  ;;  %v17816_v0 = vld [vmem:[#allocation299_spill] sm:$0xff]  ;;  %v2254_v44 = vsub.f32 %v17817_v21, %v17747_v25  ;;  %17819 = vst [vmem:[#allocation361_spill] sm:$0xff] %v12791_v45  ;;  %vm12795_vm13 = vcmp.lt.f32.partialorder %v4539_v30, 0.0004427343  ;;  %v17821_v16 = vmov 0  ;;  %v17824_v28 = vld [vmem:[#allocation330_spill] sm:$0xff] }
 0x3ec   :  { %v4281_v31 = vadd.f32 1.0, %v17816_v0  ;;  %17820 = vst [vmem:[#allocation89_spill] sm:$0xff] %v12793_v48  ;;  %v17822_v16 = vsel %vm12795_vm13, 4294967295, %v17821_v16  ;;  %v4416_v39 = vadd.f32 1.0, %v17824_v28  ;;  %v12807_v9 = vmul.f32 %v17770_v63, %v4276_v27  ;;  %v17826_v21 = vld [vmem:[#allocation130_spill] sm:$0xff]  ;;  %v17828_v38 = vld [vmem:[#allocation243_spill] sm:$0xff] }
 0x3ed   :  { %17823 = vst [vmem:[#allocation38_spill] sm:$0xff] %v17822_v16  ;;  %4947 = vadd.xlane.f32.xlu0 %v12503_v22  ;;  %v4545_v30 = vmul.f32 -0.5, %v17808_v24  ;;  %v2257_v61 = vsub.f32 %v17826_v21, %v17747_v25  ;;  %v2256_v51 = vsub.f32 %v17827_v8, %v17747_v25  ;;  %v4411_v47 = vadd.f32 1.0, %v4410_v62  ;;  %v17829_v63 = vld [vmem:[#allocation368_spill] sm:$0xff]  ;;  %v17830_v27 = vld [vmem:[#allocation371_spill] sm:$0xff]  ;;  %v17963_v41 = vld [vmem:[#allocation209_spill] sm:$0xff] }
 0x3ee   :  { %17825 = vst [vmem:[#allocation293_spill] sm:$0xff] %v12807_v9  ;;  %4949 = vadd.xlane.f32.xlu1 %v12593_v18  ;;  %v4413_v22 = vand.u32 2147483647, %v17790_v1  ;;  %v12818_v36 = vmul.f32 %v2255_v60, %v17828_v38  ;;  %vm17831_vm12 = vnez %v17830_v27  ;;  %vm12828_vm2 = vcmp.lt.f32.partialorder %v4278_v11, 0.0004427343  ;;  %v17839_v18 = vld [vmem:[#allocation247_spill] sm:$0xff]  ;;  %v12836_v60 = vpop.permute.xlu1 %2060  ;;  %v12838_v38 = vpop.permute.xlu0 %2056 }
 0x3ef   :  { %v17834_v37 = vsel %vm17831_vm12, %v17832_v29, %v17833_v54  ;;  %v17836_v8 = vmov 0  ;;  %6649 = vlog2.f32 %v4281_v31  ;;  %v12834_v6 = vmul.f32 %v2254_v44, %v17839_v18  ;;  %17840 = vst [vmem:[#allocation329_spill] sm:$0xff] %v12836_v60  ;;  %17841 = vst [vmem:[#allocation94_spill] sm:$0xff] %v12838_v38  ;;  %v17842_v29 = vld [vmem:[#allocation144_spill] sm:$0xff]  ;;  %v17843_v31 = vld [vmem:[#allocation327_spill] sm:$0xff] }
 0x3f0   :  { %v12826_v21 = vadd.f32 %v17834_v37, %v17829_v63  ;;  %v17837_v8 = vsel %vm12828_vm2, 4294967295, %v17836_v8  ;;  %6651 = vlog2.f32 %v4416_v39  ;;  %v6644_v37 = vpop.eup %6643  ;;  %v2259_v11 = vsub.f32 %v17842_v29, %v17747_v25  ;;  %v17845_v27 = vld [vmem:[#allocation266_spill] sm:$0xff]  ;;  %v17846_v60 = vld [vmem:[#allocation251_spill] sm:$0xff]  ;;  %v17850_v29 = vld [vmem:[#allocation96_spill] sm:$0xff] }
 0x3f1   :  { %17838 = vst [vmem:[#allocation17_spill] sm:$0xff] %v17837_v8  ;;  %v2258_v63 = vsub.f32 %v17843_v31, %v17747_v25  ;;  %4951 = vadd.xlane.f32.xlu0 %v12602_v35  ;;  %v12849_v18 = vmul.f32 0.6931472, %v6642_v12  ;;  %v4546_v44 = vadd.f32 1.0, %v4545_v30  ;;  %v12852_v62 = vmul.f32 %v2257_v61, %v17845_v27  ;;  %v17847_v39 = vld [vmem:[#allocation62_spill] sm:$0xff]  ;;  %v17848_v54 = vld [vmem:[#allocation215_spill] sm:$0xff] }
 0x3f2   :  { %17835 = vst [vmem:[#allocation208_spill] sm:$0xff] %v12826_v21  ;;  %v12855_v46 = vmul.f32 %v2256_v51, %v17846_v60  ;;  %4953 = vadd.xlane.f32.xlu1 %v12670_v10  ;;  %vm17849_vm12 = vnez %v17848_v54  ;;  %v17851_v48 = vld [vmem:[#allocation192_spill] sm:$0xff]  ;;  %v12867_v12 = vmul.f32 %v17790_v1, %v4411_v47  ;;  %vm12869_vm10 = vcmp.lt.f32.partialorder %v4413_v22, 0.0004427343  ;;  %v12882_v47 = vpop.permute.xlu1 %2068  ;;  %v17863_v10 = vld [vmem:[#allocation278_spill] sm:$0xff]  ;;  %v17977_v20 = vld [vmem:[#allocation341_spill] sm:$0xff] }
 0x3f3   :  { %17844 = vst [vmem:[#allocation221_spill] sm:$0xff] %v12849_v18  ;;  %v17852_v2 = vsel %vm17849_vm12, %v17850_v29, %v17851_v48  ;;  %v17855_v30 = vmov 0  ;;  %v4548_v61 = vand.u32 2147483647, %v17808_v24  ;;  %v4284_v60 = vmul.f32 -0.5, %v17816_v0  ;;  %v6646_v27 = vpop.eup %6645  ;;  %v17859_v1 = vld [vmem:[#allocation340_spill] sm:$0xff]  ;;  %v12884_v29 = vpop.permute.xlu0 %2064 }
 0x3f4   :  { %v12864_v31 = vadd.f32 %v17852_v2, %v17847_v39  ;;  %17854 = vst [vmem:[#allocation97_spill] sm:$0xff] %v12867_v12  ;;  %v17856_v30 = vsel %vm12869_vm10, 4294967295, %v17855_v30  ;;  %v4419_v54 = vmul.f32 -0.5, %v17824_v28  ;;  %v17858_v2 = vld [vmem:[#allocation334_spill] sm:$0xff]  ;;  %v2260_v22 = vsub.f32 %v17859_v1, %v17747_v25  ;;  %17860 = vst [vmem:[#allocation50_spill] sm:$0xff] %v12882_v47  ;;  %v17866_v47 = vld [vmem:[#allocation345_spill] sm:$0xff] }
 0x3f5   :  { %17857 = vst [vmem:[#allocation131_spill] sm:$0xff] %v17856_v30  ;;  %v2261_v39 = vsub.f32 %v17858_v2, %v17747_v25  ;;  %17861 = vst [vmem:[#allocation98_spill] sm:$0xff] %v12884_v29  ;;  %v12886_v51 = vmul.f32 0.6931472, %v6644_v37  ;;  %v12889_v35 = vmul.f32 %v2259_v11, %v17863_v10  ;;  %v12892_v38 = vmul.f32 %v2258_v63, %v17864_v5  ;;  %v17867_v10 = vld [vmem:[#allocation376_spill] sm:$0xff]  ;;  %v17868_v11 = vld [vmem:[#allocation335_spill] sm:$0xff] }
 0x3f6   :  { %17853 = vst [vmem:[#allocation362_spill] sm:$0xff] %v12864_v31  ;;  %4955 = vadd.xlane.f32.xlu0 %v12684_v32  ;;  %v12900_v1 = vmul.f32 %v17808_v24, %v4546_v44  ;;  %4957 = vadd.xlane.f32.xlu1 %v17866_v47  ;;  %vm17869_vm12 = vnez %v17868_v11  ;;  %v17870_v5 = vld [vmem:[#allocation354_spill] sm:$0xff]  ;;  %v17871_v63 = vld [vmem:[#allocation81_spill] sm:$0xff]  ;;  %v4287_v16 = vand.u32 2147483647, %v17816_v0  ;;  %v17875_v24 = vmov 0 }
 0x3f7   :  { %17862 = vst [vmem:[#allocation322_spill] sm:$0xff] %v12886_v51  ;;  %v17872_v32 = vsel %vm17869_vm12, %v17870_v5, %v17871_v63  ;;  %v12914_v2 = vmul.f32 0.6931472, %v6646_v27  ;;  %vm12916_vm13 = vcmp.lt.f32.partialorder %v4548_v61, 0.0004427343  ;;  %v4285_v44 = vadd.f32 1.0, %v4284_v60  ;;  %v12929_v5 = vpop.permute.xlu1 %2076  ;;  %v12931_v27 = vpop.permute.xlu0 %2072 }
 0x3f8   :  { %17865 = vst [vmem:[#allocation201_spill] sm:$0xff] %v12900_v1  ;;  %v12911_v29 = vadd.f32 %v17872_v32, %v17867_v10  ;;  %v17876_v24 = vsel %vm12916_vm13, 4294967295, %v17875_v24  ;;  %v4420_v48 = vadd.f32 1.0, %v4419_v54  ;;  %v17878_v37 = vld [vmem:[#allocation366_spill] sm:$0xff]  ;;  %v17880_v11 = vld [vmem:[#allocation309_spill] sm:$0xff]  ;;  %v17881_v32 = vld [vmem:[#allocation359_spill] sm:$0xff]  ;;  %v6648_v60 = vpop.eup %6647 }
 0x3f9   :  { %17874 = vst [vmem:[#allocation363_spill] sm:$0xff] %v12914_v2  ;;  %17877 = vst [vmem:[#allocation355_spill] sm:$0xff] %v17876_v24  ;;  %v4551_v47 = vadd.f32 1.0, %v17878_v37  ;;  %v17879_v18 = vld [vmem:[#allocation14_spill] sm:$0xff]  ;;  %v12925_v55 = vmul.f32 %v2260_v22, %v17880_v11  ;;  %v2263_v10 = vsub.f32 %v17881_v32, %v17747_v25  ;;  %v4554_v11 = vmul.f32 -0.5, %v17878_v37  ;;  %v17886_v32 = vld [vmem:[#allocation320_spill] sm:$0xff] }
 0x3fa   :  { %17873 = vst [vmem:[#allocation165_spill] sm:$0xff] %v12911_v29  ;;  %v12922_v4 = vmul.f32 %v2261_v39, %v17879_v18  ;;  %17882 = vst [vmem:[#allocation229_spill] sm:$0xff] %v12929_v5  ;;  %v17884_v39 = vld [vmem:[#allocation39_spill] sm:$0xff]  ;;  %v17885_v63 = vld [vmem:[#allocation170_spill] sm:$0xff]  ;;  %vm12956_vm2 = vcmp.lt.f32.partialorder %v4287_v16, 0.0004427343 }
 0x3fb   :  { %17883 = vst [vmem:[#allocation111_spill] sm:$0xff] %v12931_v27  ;;  %v2262_v22 = vsub.f32 %v17884_v39, %v17747_v25  ;;  %4959 = vadd.xlane.f32.xlu0 %v17885_v63  ;;  %v17887_v5 = vld [vmem:[#allocation319_spill] sm:$0xff]  ;;  %v17888_v45 = vld [vmem:[#allocation100_spill] sm:$0xff]  ;;  %v17893_v54 = vld [vmem:[#allocation281_spill] sm:$0xff]  ;;  %v17897_v25 = vmov 0  ;;  %6653 = vlog2.f32 %v4551_v47  ;;  %v12978_v63 = vpop.permute.xlu0 %2080  ;;  %v4555_v16 = vadd.f32 1.0, %v4554_v11 }
 0x3fc   :  { %v2265_v27 = vsub.f32 %v17887_v5, %v17886_v32  ;;  %v2264_v29 = vsub.f32 %v17888_v45, %v17886_v32  ;;  %v17889_v8 = vld [vmem:[#allocation276_spill] sm:$0xff]  ;;  %v17890_v61 = vld [vmem:[#allocation223_spill] sm:$0xff]  ;;  %v17894_v18 = vld [vmem:[#allocation185_spill] sm:$0xff]  ;;  %v17898_v25 = vsel %vm12956_vm2, 4294967295, %v17897_v25  ;;  %v4422_v39 = vand.u32 2147483647, %v17824_v28 }
 0x3fd   :  { %4961 = vadd.xlane.f32.xlu1 %v17889_v8  ;;  %v17891_v51 = vld [vmem:[#allocation332_spill] sm:$0xff]  ;;  %17899 = vst [vmem:[#allocation238_spill] sm:$0xff] %v17898_v25  ;;  %v12966_v8 = vmul.f32 %v17816_v0, %v4285_v44  ;;  %17904 = vst [vmem:[#allocation325_spill] sm:$0xff] %v12978_v63  ;;  %v12980_v45 = vmul.f32 0.6931472, %v6648_v60  ;;  %v17906_v44 = vld [vmem:[#allocation133_spill] sm:$0xff] }
 0x3fe   :  { %vm17892_vm12 = vnez %v17891_v51  ;;  %v12969_v51 = vmul.f32 %v17824_v28, %v4420_v48  ;;  %v12983_v2 = vmul.f32 %v2262_v22, %v17906_v44  ;;  %v17907_v28 = vld [vmem:[#allocation175_spill] sm:$0xff]  ;;  %v17908_v47 = vld [vmem:[#allocation174_spill] sm:$0xff]  ;;  %v17913_v60 = vld [vmem:[#allocation196_spill] sm:$0xff]  ;;  %v17915_v22 = vmov 0 }
 0x3ff   :  { %v17895_v9 = vsel %vm17892_vm12, %v17893_v54, %v17894_v18  ;;  %17900 = vst [vmem:[#allocation199_spill] sm:$0xff] %v12966_v8  ;;  %v12976_v18 = vpop.permute.xlu1 %2084  ;;  %17905 = vst [vmem:[#allocation321_spill] sm:$0xff] %v12980_v45  ;;  %v2267_v48 = vsub.f32 %v17907_v28, %v17886_v32  ;;  %4963 = vadd.xlane.f32.xlu0 %v17908_v47  ;;  %v17909_v5 = vld [vmem:[#allocation302_spill] sm:$0xff]  ;;  %v2266_v63 = vsub.f32 %v17913_v60, %v17886_v32  ;;  %v17920_v11 = vld [vmem:[#allocation87_spill] sm:$0xff]  ;;  %v13017_v50 = vpop.permute.xlu0 %2088  ;;  %vm5379_vm13 = vcmask 982912  }
 0x400   :  { %v12954_v31 = vadd.f32 %v17895_v9, %v17890_v61  ;;  %17901 = vst [vmem:[#allocation151_spill] sm:$0xff] %v12969_v51  ;;  %v6650_v9 = vpop.eup %6649  ;;  %v17902_v61 = vld [vmem:[#allocation188_spill] sm:$0xff]  ;;  %17903 = vst [vmem:[#allocation364_spill] sm:$0xff] %v12976_v18  ;;  %v4290_v12 = vadd.f32 1.0, %v17909_v5  ;;  %vm12998_vm12 = vcmp.lt.f32.partialorder %v4422_v39, 0.0004427343 }
 0x401   :  { %v12974_v54 = vmul.f32 %v2263_v10, %v17902_v61  ;;  %v6652_v0 = vpop.eup %6651  ;;  %v17910_v10 = vld [vmem:[#allocation323_spill] sm:$0xff]  ;;  %v17912_v18 = vld [vmem:[#allocation152_spill] sm:$0xff]  ;;  %v17916_v22 = vsel %vm12998_vm12, 4294967295, %v17915_v22  ;;  %v17918_v44 = vld [vmem:[#allocation46_spill] sm:$0xff]  ;;  %17927 = vst [vmem:[#allocation324_spill] sm:$0xff] %v13017_v50  ;;  %v4461_v33 = vadd.f32 1.0, %v17977_v20 }
 0x402   :  { %17896 = vst [vmem:[#allocation92_spill] sm:$0xff] %v12954_v31  ;;  %v12990_v61 = vmul.f32 %v2265_v27, %v17910_v10  ;;  %v12993_v30 = vmul.f32 %v2264_v29, %v17912_v18  ;;  %v17914_v31 = vld [vmem:[#allocation294_spill] sm:$0xff]  ;;  %17917 = vst [vmem:[#allocation191_spill] sm:$0xff] %v17916_v22  ;;  %v17921_v47 = vld [vmem:[#allocation35_spill] sm:$0xff]  ;;  %v13010_v10 = vmul.f32 0.6931472, %v6650_v9  ;;  %6655 = vlog2.f32 %v4290_v12 }
 0x403   :  { %4965 = vadd.xlane.f32.xlu1 %v17914_v31  ;;  %v17922_v21 = vsel %vm12040_vm15, %v17920_v11, %v17921_v47  ;;  %v4293_v29 = vmul.f32 -0.5, %v17909_v5  ;;  %v17925_v18 = vld [vmem:[#allocation114_spill] sm:$0xff]  ;;  %v13015_v39 = vpop.permute.xlu1 %2092  ;;  %v13023_v11 = vmul.f32 0.6931472, %v6652_v0  ;;  %v13032_v31 = vmul.f32 %v17878_v37, %v4555_v16  ;;  %v17937_v12 = vld [vmem:[#allocation124_spill] sm:$0xff]  ;;  %v2097_v50 = vpop.permute.xlu0 %2096  ;;  %v17941_v25 = vld [vmem:[#allocation343_spill] sm:$0xff] }
 0x404   :  { %17911 = vst [vmem:[#allocation164_spill] sm:$0xff] %v12990_v61  ;;  %v13008_v27 = vadd.f32 %v17922_v21, %v17918_v44  ;;  %17924 = vst [vmem:[#allocation104_spill] sm:$0xff] %v13010_v10  ;;  %v4308_v60 = vadd.f32 1.0, %v17925_v18  ;;  %v4557_v21 = vand.u32 2147483647, %v17878_v37  ;;  %v17929_v44 = vld [vmem:[#allocation370_spill] sm:$0xff] }
 0x405   :  { %17926 = vst [vmem:[#allocation143_spill] sm:$0xff] %v13015_v39  ;;  %17928 = vst [vmem:[#allocation312_spill] sm:$0xff] %v13023_v11  ;;  %v13028_v47 = vmul.f32 %v2267_v48, %v17929_v44  ;;  %v17933_v28 = vld [vmem:[#allocation18_spill] sm:$0xff]  ;;  %v17936_v37 = vld [vmem:[#allocation155_spill] sm:$0xff]  ;;  %v2269_v44 = vsub.f32 %v17937_v12, %v17886_v32  ;;  %v17942_v1 = vand.u32 2147483647, %v12688_v17 }
 0x406   :  { %17923 = vst [vmem:[#allocation20_spill] sm:$0xff] %v13008_v27  ;;  %v17931_v27 = vld [vmem:[#allocation352_spill] sm:$0xff]  ;;  %17932 = vst [vmem:[#allocation328_spill] sm:$0xff] %v13032_v31  ;;  %v13037_v0 = vmul.f32 %v2266_v63, %v17933_v28  ;;  %v17935_v45 = vld [vmem:[#allocation22_spill] sm:$0xff]  ;;  %v4425_v16 = vadd.f32 1.0, %v17936_v37  ;;  %6657 = vlog2.f32 %v4308_v60  ;;  %v4428_v9 = vmul.f32 -0.5, %v17936_v37 }
 0x407   :  { %17930 = vst [vmem:[#allocation206_spill] sm:$0xff] %v13028_v47  ;;  %4967 = vadd.xlane.f32.xlu0 %v17931_v27  ;;  %4969 = vadd.xlane.f32.xlu1 %v17935_v45  ;;  %v4294_v27 = vadd.f32 1.0, %v4293_v29  ;;  %v17938_v39 = vld [vmem:[#allocation331_spill] sm:$0xff]  ;;  %v2101_v28 = vpop.permute.xlu1 %2100  ;;  %v2324_v60 = vsub.f32 %v2097_v50, %v12710_v52  ;;  %v17939_v10 = vld [vmem:[#allocation29_spill] sm:$0xff]  ;;  %v17943_v22 = vld [vmem:[#allocation300_spill] sm:$0xff]  ;;  %v17948_v50 = vmov 0  ;;  %v2105_v57 = vpop.permute.xlu0 %2104 }
 0x408   :  { %17934 = vst [vmem:[#allocation311_spill] sm:$0xff] %v13037_v0  ;;  %v2268_v63 = vsub.f32 %v17938_v39, %v17886_v32  ;;  %v2325_v48 = vsub.f32 %v2101_v28, %v12710_v52  ;;  %v17940_v12 = vld [vmem:[#allocation303_spill] sm:$0xff]  ;;  %v13065_v45 = vmul.f32 %v17943_v22, %v17942_v1  ;;  %v17945_v11 = vand.u32 2147483647, %v12678_v58  ;;  %v17946_v29 = vld [vmem:[#allocation249_spill] sm:$0xff]  ;;  %v6654_v58 = vpop.eup %6653  ;;  %v17955_v1 = vld [vmem:[#allocation326_spill] sm:$0xff] }
 0x409   :  { %v4317_v8 = vadd.f32 1.0, %v17940_v12  ;;  %vm13072_vm15 = vcmp.lt.f32.partialorder %v4557_v21, 0.0004427343  ;;  %v17952_v24 = vld [vmem:[#allocation101_spill] sm:$0xff]  ;;  %v13084_v17 = vmul.f32 %v17909_v5, %v4294_v27  ;;  %6659 = vlog2.f32 %v4425_v16  ;;  %v17960_v27 = vld [vmem:[#allocation372_spill] sm:$0xff] }
 0x40a   :  { %17944 = vst [vmem:[#allocation171_spill] sm:$0xff] %v13065_v45  ;;  %v13070_v51 = vmul.f32 %v17946_v29, %v17945_v11  ;;  %v17949_v50 = vsel %vm13072_vm15, 4294967295, %v17948_v50  ;;  %v13078_v39 = vmul.f32 %v2325_v48, %v17952_v24  ;;  %v13087_v22 = vmul.f32 %v2269_v44, %v17955_v1  ;;  %v17957_v11 = vld [vmem:[#allocation26_spill] sm:$0xff]  ;;  %v17961_v44 = vld [vmem:[#allocation204_spill] sm:$0xff]  ;;  %v18017_v61 = vld [vmem:[#allocation349_spill] sm:$0xff] }
 0x40b   :  { %4971 = vadd.xlane.f32.xlu0 %v17939_v10  ;;  %4973 = vadd.xlane.f32.xlu1 %v17941_v25  ;;  %17950 = vst [vmem:[#allocation268_spill] sm:$0xff] %v17949_v50  ;;  %v17951_v10 = vld [vmem:[#allocation342_spill] sm:$0xff]  ;;  %17954 = vst [vmem:[#allocation367_spill] sm:$0xff] %v13084_v17  ;;  %v13090_v21 = vmul.f32 %v2268_v63, %v17957_v11  ;;  %v2109_v29 = vpop.permute.xlu1 %2108  ;;  %v4429_v23 = vadd.f32 1.0, %v4428_v9  ;;  %v4560_v16 = vadd.f32 1.0, %v17960_v27  ;;  %6661 = vlog2.f32 %v4317_v8  ;;  %v17962_v63 = vld [vmem:[#allocation21_spill] sm:$0xff] }
 0x40c   :  { %17947 = vst [vmem:[#allocation168_spill] sm:$0xff] %v13070_v51  ;;  %v4452_v28 = vadd.f32 1.0, %v17951_v10  ;;  %v17953_v25 = vld [vmem:[#allocation106_spill] sm:$0xff]  ;;  %17956 = vst [vmem:[#allocation275_spill] sm:$0xff] %v13087_v22  ;;  %v2327_v48 = vsub.f32 %v2109_v29, %v12710_v52  ;;  %v2271_v1 = vsub.f32 %v17961_v44, %v17886_v32  ;;  %v2270_v11 = vsub.f32 %v17962_v63, %v17886_v32  ;;  %v17967_v63 = vld [vmem:[#allocation112_spill] sm:$0xff] }
 0x40d   :  { %v13081_v49 = vmul.f32 %v2324_v60, %v17953_v25  ;;  %17958 = vst [vmem:[#allocation65_spill] sm:$0xff] %v13090_v21  ;;  %v2326_v60 = vsub.f32 %v2105_v57, %v12710_v52  ;;  %v17959_v25 = vld [vmem:[#allocation9_spill] sm:$0xff]  ;;  %v4563_v9 = vmul.f32 -0.5, %v17960_v27  ;;  %v17964_v24 = vld [vmem:[#allocation314_spill] sm:$0xff]  ;;  %v17965_v57 = vld [vmem:[#allocation315_spill] sm:$0xff]  ;;  %v13115_v7 = vadd.f32 1.0, %v17967_v63 }
 0x40e   :  { %6663 = vlog2.f32 %v4452_v28  ;;  %v13104_v29 = vmul.f32 %v2327_v48, %v17964_v24  ;;  %v17970_v28 = vld [vmem:[#allocation357_spill] sm:$0xff]  ;;  %v17971_v24 = vand.u32 2147483647, %v12756_v53  ;;  %v17972_v48 = vld [vmem:[#allocation310_spill] sm:$0xff]  ;;  %v4311_v44 = vmul.f32 -0.5, %v17925_v18  ;;  %v17978_v21 = vld [vmem:[#allocation207_spill] sm:$0xff] }
 0x40f   :  { %4975 = vadd.xlane.f32.xlu0 %v17959_v25  ;;  %4977 = vadd.xlane.f32.xlu1 %v17963_v41  ;;  %v13107_v52 = vmul.f32 %v2326_v60, %v17965_v57  ;;  %v13109_v25 = vmul.f32 0.6931472, %v6654_v58  ;;  %17968 = vst [vmem:[#allocation76_spill] sm:$0xff] %v13115_v7  ;;  %v17969_v41 = vld [vmem:[#allocation306_spill] sm:$0xff]  ;;  %v17974_v58 = vand.u32 2147483647, %v12735_v56  ;;  %v13131_v22 = vpop.eup %6655  ;;  %v13134_v47 = vmul.f32 %v2271_v1, %v17978_v21 }
 0x410   :  { %v4326_v34 = vadd.f32 1.0, %v17969_v41  ;;  %v13122_v60 = vmul.f32 %v17972_v48, %v17971_v24  ;;  %v17975_v57 = vld [vmem:[#allocation222_spill] sm:$0xff]  ;;  %v17980_v53 = vld [vmem:[#allocation377_spill] sm:$0xff]  ;;  %v13141_v24 = vmul.f32 %v17936_v37, %v4429_v23  ;;  %6665 = vlog2.f32 %v4560_v16 }
 0x411   :  { %17966 = vst [vmem:[#allocation237_spill] sm:$0xff] %v13109_v25  ;;  %v13127_v8 = vmul.f32 %v17975_v57, %v17974_v58  ;;  %v17982_v56 = vld [vmem:[#allocation93_spill] sm:$0xff]  ;;  %v17984_v58 = vld [vmem:[#allocation211_spill] sm:$0xff]  ;;  %v13155_v1 = vadd.f32 1.0, %v4563_v9  ;;  %v17989_v16 = vand.u32 2147483647, %v12774_v3 }
 0x412   :  { %17973 = vst [vmem:[#allocation263_spill] sm:$0xff] %v13122_v60  ;;  %17981 = vst [vmem:[#allocation246_spill] sm:$0xff] %v13141_v24  ;;  %v17985_v57 = vld [vmem:[#allocation25_spill] sm:$0xff]  ;;  %v17992_v48 = vand.u32 2147483647, %v12771_v15  ;;  %6667 = vlog2.f32 %v4326_v34  ;;  %v4312_v9 = vadd.f32 1.0, %v4311_v44 }
 0x413   :  { %4979 = vadd.xlane.f32.xlu0 %v17970_v28  ;;  %17976 = vst [vmem:[#allocation299_spill] sm:$0xff] %v13127_v8  ;;  %v17979_v28 = vld [vmem:[#allocation27_spill] sm:$0xff]  ;;  %4981 = vadd.xlane.f32.xlu1 %v17980_v53  ;;  %v17986_v0 = vsel %vm12212_vm14, %v17984_v58, %v17985_v57  ;;  %v6658_v23 = vpop.eup %6657  ;;  %v17990_v53 = vld [vmem:[#allocation256_spill] sm:$0xff]  ;;  %v17993_v58 = vld [vmem:[#allocation230_spill] sm:$0xff]  ;;  %v4455_v21 = vmul.f32 -0.5, %v17951_v10  ;;  %6669 = vlog2.f32 %v4461_v33 }
 0x414   :  { %v13137_v17 = vmul.f32 %v2270_v11, %v17979_v28  ;;  %v13149_v7 = vadd.f32 %v17986_v0, %v17982_v56  ;;  %v17988_v11 = vld [vmem:[#allocation182_spill] sm:$0xff]  ;;  %v13161_v24 = vmul.f32 %v17990_v53, %v17989_v16  ;;  %v13166_v0 = vmul.f32 %v17993_v58, %v17992_v48  ;;  %v17995_v57 = vld [vmem:[#allocation273_spill] sm:$0xff]  ;;  %v17997_v3 = vld [vmem:[#allocation271_spill] sm:$0xff] }
 0x415   :  { %v4596_v28 = vadd.f32 1.0, %v17988_v11  ;;  %v4320_v56 = vmul.f32 -0.5, %v17940_v12  ;;  %v17996_v25 = vld [vmem:[#allocation305_spill] sm:$0xff]  ;;  %v17998_v16 = vand.u32 2147483647, %v12834_v6  ;;  %v18002_v58 = vld [vmem:[#allocation19_spill] sm:$0xff] }
 0x416   :  { %17987 = vst [vmem:[#allocation330_spill] sm:$0xff] %v13149_v7  ;;  %17991 = vst [vmem:[#allocation130_spill] sm:$0xff] %v13161_v24  ;;  %v4335_v31 = vadd.f32 1.0, %v17996_v25  ;;  %v17999_v53 = vld [vmem:[#allocation269_spill] sm:$0xff]  ;;  %v18001_v48 = vand.u32 2147483647, %v12818_v36  ;;  %v13195_v36 = vpop.eup %6659 }
 0x417   :  { %17994 = vst [vmem:[#allocation250_spill] sm:$0xff] %v13166_v0  ;;  %4983 = vadd.xlane.f32.xlu0 %v17995_v57  ;;  %4985 = vadd.xlane.f32.xlu1 %v17997_v3  ;;  %v13176_v15 = vmul.f32 %v17999_v53, %v17998_v16  ;;  %v18004_v34 = vand.u32 2147483647, %v12855_v46  ;;  %v18005_v44 = vld [vmem:[#allocation103_spill] sm:$0xff]  ;;  %v4314_v33 = vand.u32 2147483647, %v17925_v18  ;;  %6671 = vlog2.f32 %v4596_v28 }
 0x418   :  { %v13181_v50 = vmul.f32 %v18002_v58, %v18001_v48  ;;  %v18007_v7 = vand.u32 2147483647, %v12852_v62  ;;  %v18008_v3 = vld [vmem:[#allocation140_spill] sm:$0xff]  ;;  %v4310_v6 = vmul.f32 0.6931472, %v6658_v23  ;;  %18010 = vst [vmem:[#allocation52_spill] sm:$0xff] %v13195_v36  ;;  %v4313_v23 = vmul.f32 %v17925_v18, %v4312_v9 }
 0x419   :  { %18000 = vst [vmem:[#allocation243_spill] sm:$0xff] %v13176_v15  ;;  %v13186_v57 = vmul.f32 %v18005_v44, %v18004_v34  ;;  %v4323_v16 = vand.u32 2147483647, %v17940_v12  ;;  %v18011_v53 = vand.u32 2147483647, %v12892_v38  ;;  %v18012_v48 = vld [vmem:[#allocation142_spill] sm:$0xff]  ;;  %6673 = vlog2.f32 %v4335_v31  ;;  %v6662_v38 = vpop.eup %6661 }
 0x41a   :  { %18003 = vst [vmem:[#allocation368_spill] sm:$0xff] %v13181_v50  ;;  %v13192_v37 = vmul.f32 %v18008_v3, %v18007_v7  ;;  %v18014_v58 = vand.u32 2147483647, %v12889_v35  ;;  %v18015_v34 = vld [vmem:[#allocation212_spill] sm:$0xff]  ;;  %v4321_v62 = vadd.f32 1.0, %v4320_v56  ;;  %v4470_v7 = vadd.f32 1.0, %v18017_v61 }
 0x41b   :  { %18006 = vst [vmem:[#allocation371_spill] sm:$0xff] %v13186_v57  ;;  %v13200_v46 = vmul.f32 %v18012_v48, %v18011_v53  ;;  %v18018_v3 = vld [vmem:[#allocation102_spill] sm:$0xff]  ;;  %v4456_v28 = vadd.f32 1.0, %v4455_v21  ;;  %4989 = vadd.xlane.f32.xlu1 %v13065_v45  ;;  %v18020_v53 = vand.u32 2147483647, %v12925_v55  ;;  %v18021_v35 = vld [vmem:[#allocation49_spill] sm:$0xff]  ;;  %v6664_v31 = vpop.eup %6663 }
 0x41c   :  { %18009 = vst [vmem:[#allocation30_spill] sm:$0xff] %v13192_v37  ;;  %v13205_v44 = vmul.f32 %v18015_v34, %v18014_v58  ;;  %4987 = vadd.xlane.f32.xlu0 %v18018_v3  ;;  %v18019_v36 = vld [vmem:[#allocation6_spill] sm:$0xff]  ;;  %v18023_v56 = vand.u32 2147483647, %v12922_v4  ;;  %vm13222_vm14 = vcmp.lt.f32.partialorder %v4314_v33, 0.0004427343  ;;  %6675 = vlog2.f32 %v4470_v7 }
 0x41d   :  { %18013 = vst [vmem:[#allocation247_spill] sm:$0xff] %v13200_v46  ;;  %v4605_v27 = vadd.f32 1.0, %v18019_v36  ;;  %v13215_v48 = vmul.f32 %v18021_v35, %v18020_v53  ;;  %v18024_v58 = vld [vmem:[#allocation126_spill] sm:$0xff]  ;;  %v4458_v18 = vand.u32 2147483647, %v17951_v10  ;;  %v4316_v55 = vsel %vm13222_vm14, %v4313_v23, %v4310_v6  ;;  %v18034_v6 = vld [vmem:[#allocation75_spill] sm:$0xff] }
 0x41e   :  { %18016 = vst [vmem:[#allocation144_spill] sm:$0xff] %v13205_v44  ;;  %v13220_v34 = vmul.f32 %v18024_v58, %v18023_v56  ;;  %v18028_v21 = vand.u32 2147483647, %v12983_v2  ;;  %v18029_v9 = vld [vmem:[#allocation122_spill] sm:$0xff]  ;;  %vm13234_vm15 = vcmp.lt.f32.partialorder %v4323_v16, 0.0004427343  ;;  %v4322_v35 = vmul.f32 %v17940_v12, %v4321_v62  ;;  %v13252_v62 = vpop.eup %6665 }
 0x41f   :  { %18022 = vst [vmem:[#allocation327_spill] sm:$0xff] %v13215_v48  ;;  %v4329_v33 = vmul.f32 -0.5, %v17969_v41  ;;  %v2548_v53 = vand.u32 2147483647, %v12389_v26  ;;  %v18033_v56 = vld [vmem:[#allocation348_spill] sm:$0xff]  ;;  %6677 = vlog2.f32 %v4605_v27  ;;  %v4614_v16 = vadd.f32 1.0, %v18034_v6  ;;  %4993 = vadd.xlane.f32.xlu1 %v13122_v60 }
 0x420   :  { %18025 = vst [vmem:[#allocation266_spill] sm:$0xff] %v13220_v34  ;;  %v13230_v45 = vmul.f32 %v18029_v9, %v18028_v21  ;;  %v4479_v58 = vadd.f32 1.0, %v18033_v56  ;;  %4991 = vadd.xlane.f32.xlu0 %v13070_v51  ;;  %v4319_v2 = vmul.f32 0.6931472, %v6662_v38  ;;  %v4457_v21 = vmul.f32 %v17951_v10, %v4456_v28  ;;  %v18035_v23 = vld [vmem:[#allocation125_spill] sm:$0xff]  ;;  %v18039_v10 = vld [vmem:[#allocation218_spill] sm:$0xff] }
 0x421   :  { %v4724_v3 = vadd.f32 %v4316_v55, %v18035_v23  ;;  %v4454_v9 = vmul.f32 0.6931472, %v6664_v31  ;;  %vm13247_vm14 = vcmp.lt.f32.partialorder %v4458_v18, 0.0004427343  ;;  %v4332_v12 = vand.u32 2147483647, %v17969_v41  ;;  %v6668_v31 = vpop.eup %6667 }
 0x422   :  { %18030 = vst [vmem:[#allocation251_spill] sm:$0xff] %v13230_v45  ;;  %v2549_v7 = vand.u32 2147483647, %v12386_v43  ;;  %v4330_v27 = vadd.f32 1.0, %v4329_v33  ;;  %v4464_v28 = vmul.f32 -0.5, %v17977_v20  ;;  %v4599_v55 = vmul.f32 -0.5, %v17988_v11  ;;  %v6670_v60 = vpop.eup %6669 }
 0x423   :  { %v13257_v38 = vmul.f32 %v4724_v3, %v2548_v53  ;;  %v4338_v18 = vmul.f32 -0.5, %v17996_v25  ;;  %6679 = vlog2.f32 %v4479_v58  ;;  %v2550_v23 = vand.u32 2147483647, %v12424_v42  ;;  %4997 = vadd.xlane.f32.xlu1 %v13161_v24  ;;  %v18040_v53 = vld [vmem:[#allocation119_spill] sm:$0xff] }
 0x424   :  { %4995 = vadd.xlane.f32.xlu0 %v13127_v8  ;;  %v4325_v43 = vsel %vm13234_vm15, %v4322_v35, %v4319_v2  ;;  %6681 = vlog2.f32 %v4614_v16  ;;  %v4623_v33 = vadd.f32 1.0, %v18039_v10  ;;  %v4460_v51 = vsel %vm13247_vm14, %v4457_v21, %v4454_v9  ;;  %v6672_v8 = vpop.eup %6671 }
 0x425   :  { %18038 = vst [vmem:[#allocation62_spill] sm:$0xff] %v13257_v38  ;;  %v4725_v3 = vadd.f32 %v4325_v43, %v18040_v53  ;;  %vm13270_vm12 = vcmp.lt.f32.partialorder %v4332_v12, 0.0004427343  ;;  %v4467_v42 = vand.u32 2147483647, %v17977_v20  ;;  %v4331_v2 = vmul.f32 %v17969_v41, %v4330_v27 }
 0x426   :  { %v2565_v4 = vand.u32 2147483647, %v12743_v59  ;;  %v2564_v35 = vand.u32 2147483647, %v12746_v13  ;;  %v4465_v16 = vadd.f32 1.0, %v4464_v28  ;;  %v4600_v43 = vadd.f32 1.0, %v4599_v55  ;;  %v6674_v59 = vpop.eup %6673 }
 0x427   :  { %v13278_v24 = vmul.f32 %v4725_v3, %v2549_v7  ;;  %v4602_v26 = vand.u32 2147483647, %v17988_v11  ;;  %v4339_v21 = vadd.f32 1.0, %v4338_v18  ;;  %v4328_v9 = vmul.f32 0.6931472, %v6668_v31  ;;  %5001 = vadd.xlane.f32.xlu1 %v13176_v15  ;;  %v18044_v13 = vld [vmem:[#allocation86_spill] sm:$0xff] }
 0x428   :  { %4999 = vadd.xlane.f32.xlu0 %v13166_v0  ;;  %v4463_v12 = vmul.f32 0.6931472, %v6670_v60  ;;  %v4473_v53 = vmul.f32 -0.5, %v18017_v61  ;;  %6683 = vlog2.f32 %v4623_v33  ;;  %v4740_v41 = vadd.f32 %v4460_v51, %v18044_v13  ;;  %v18059_v51 = vld [vmem:[#allocation56_spill] sm:$0xff] }
 0x429   :  { %18043 = vst [vmem:[#allocation215_spill] sm:$0xff] %v13278_v24  ;;  %vm13285_vm15 = vcmp.lt.f32.partialorder %v4467_v42, 0.0004427343  ;;  %v4341_v7 = vand.u32 2147483647, %v17996_v25  ;;  %v4608_v28 = vmul.f32 -0.5, %v18019_v36  ;;  %v4466_v60 = vmul.f32 %v17977_v20, %v4465_v16  ;;  %v6676_v13 = vpop.eup %6675 }
 0x42a   :  { %v4598_v18 = vmul.f32 0.6931472, %v6672_v8  ;;  %v4476_v31 = vand.u32 2147483647, %v18017_v61  ;;  %v13294_v33 = vmul.f32 %v4740_v41, %v2564_v35  ;;  %v4601_v3 = vmul.f32 %v17988_v11, %v4600_v43  ;;  %v18050_v11 = vld [vmem:[#allocation227_spill] sm:$0xff] }
 0x42b   :  { %vm13297_vm14 = vcmp.lt.f32.partialorder %v4602_v26, 0.0004427343  ;;  %v4340_v42 = vmul.f32 %v17996_v25, %v4339_v21  ;;  %v4334_v55 = vsel %vm13270_vm12, %v4331_v2, %v4328_v9  ;;  %v4469_v20 = vsel %vm13285_vm15, %v4466_v60, %v4463_v12  ;;  %5005 = vadd.xlane.f32.xlu1 %v13186_v57  ;;  %v18051_v26 = vld [vmem:[#allocation82_spill] sm:$0xff] }
 0x42c   :  { %18047 = vst [vmem:[#allocation96_spill] sm:$0xff] %v13294_v33  ;;  %5003 = vadd.xlane.f32.xlu0 %v13181_v50  ;;  %v4337_v8 = vmul.f32 0.6931472, %v6674_v59  ;;  %v4474_v35 = vadd.f32 1.0, %v4473_v53  ;;  %v6678_v16 = vpop.eup %6677  ;;  %v4726_v43 = vadd.f32 %v4334_v55, %v18050_v11  ;;  %v4741_v41 = vadd.f32 %v4469_v20, %v18051_v26 }
 0x42d   :  { %vm13310_vm2 = vcmp.lt.f32.partialorder %v4341_v7, 0.0004427343  ;;  %v4609_v21 = vadd.f32 1.0, %v4608_v28  ;;  %v4604_v58 = vsel %vm13297_vm14, %v4601_v3, %v4598_v18  ;;  %vm13316_vm12 = vcmp.lt.f32.partialorder %v4476_v31, 0.0004427343 }
 0x42e   :  { %v4482_v9 = vmul.f32 -0.5, %v18033_v56  ;;  %v4617_v12 = vmul.f32 -0.5, %v18034_v6  ;;  %v2580_v53 = vand.u32 2147483647, %v13081_v49  ;;  %v13323_v59 = vmul.f32 %v4726_v43, %v2550_v23  ;;  %v18058_v49 = vld [vmem:[#allocation15_spill] sm:$0xff] }
 0x42f   :  { %v13325_v27 = vmul.f32 %v4741_v41, %v2565_v4  ;;  %v4611_v7 = vand.u32 2147483647, %v18019_v36  ;;  %v4343_v55 = vsel %vm13310_vm2, %v4340_v42, %v4337_v8  ;;  %v4472_v60 = vmul.f32 0.6931472, %v6676_v13  ;;  %5009 = vadd.xlane.f32.xlu1 %v13200_v46 }
 0x430   :  { %18056 = vst [vmem:[#allocation192_spill] sm:$0xff] %v13323_v59  ;;  %v6680_v28 = vpop.eup %6679  ;;  %5007 = vadd.xlane.f32.xlu0 %v13192_v37  ;;  %v4475_v18 = vmul.f32 %v18017_v61, %v4474_v35  ;;  %v4607_v31 = vmul.f32 0.6931472, %v6678_v16  ;;  %v4756_v23 = vadd.f32 %v4604_v58, %v18058_v49  ;;  %v4727_v4 = vadd.f32 %v4343_v55, %v18059_v51  ;;  %v18087_v55 = vld [vmem:[#allocation34_spill] sm:$0xff]  ;;  %v4896_v37 = vpop.xlane.xlu1 %4895 }
 0x431   :  { %18057 = vst [vmem:[#allocation334_spill] sm:$0xff] %v13325_v27  ;;  %v6682_v3 = vpop.eup %6681  ;;  %v4610_v20 = vmul.f32 %v18019_v36, %v4609_v21  ;;  %v4485_v11 = vand.u32 2147483647, %v18033_v56  ;;  %v4483_v43 = vadd.f32 1.0, %v4482_v9  ;;  %v4618_v26 = vadd.f32 1.0, %v4617_v12 }
 0x432   :  { %v4620_v41 = vand.u32 2147483647, %v18034_v6  ;;  %v4626_v42 = vmul.f32 -0.5, %v18039_v10  ;;  %v2581_v61 = vand.u32 2147483647, %v13078_v39  ;;  %v13340_v13 = vmul.f32 %v4756_v23, %v2580_v53  ;;  %v18063_v39 = vld [vmem:[#allocation194_spill] sm:$0xff] }
 0x433   :  { %v18061_v8 = vand.u32 2147483647, %v12421_v19  ;;  %vm4612_vm2 = vcmp.lt.f32.partialorder %v4611_v7, 0.0004427343  ;;  %v4478_v36 = vsel %vm13316_vm12, %v4475_v18, %v4472_v60  ;;  %v4481_v25 = vmul.f32 0.6931472, %v6680_v28  ;;  %5013 = vadd.xlane.f32.xlu1 %v13215_v48 }
 0x434   :  { %18060 = vst [vmem:[#allocation340_spill] sm:$0xff] %v13340_v13  ;;  %5011 = vadd.xlane.f32.xlu0 %v13205_v44  ;;  %v4613_v16 = vsel %vm4612_vm2, %v4610_v20, %v4607_v31  ;;  %v4616_v21 = vmul.f32 0.6931472, %v6682_v3  ;;  %v2567_v9 = vand.u32 2147483647, %v12781_v14  ;;  %v4742_v12 = vadd.f32 %v4478_v36, %v18063_v39  ;;  %v18064_v53 = vld [vmem:[#allocation195_spill] sm:$0xff] }
 0x435   :  { %v13344_v35 = vmul.f32 %v4727_v4, %v18061_v8  ;;  %v6684_v58 = vpop.eup %6683  ;;  %v4757_v19 = vadd.f32 %v4613_v16, %v18064_v53  ;;  %vm13353_vm15 = vcmp.lt.f32.partialorder %v4485_v11, 0.0004427343  ;;  %v4484_v7 = vmul.f32 %v18033_v56, %v4483_v43  ;;  %v18076_v11 = vld [vmem:[#allocation200_spill] sm:$0xff]  ;;  %v18080_v36 = vld [vmem:[#allocation107_spill] sm:$0xff]  ;;  %v18088_v28 = vld [vmem:[#allocation162_spill] sm:$0xff] }
 0x436   :  { %v4619_v2 = vmul.f32 %v18034_v6, %v4618_v26  ;;  %vm13359_vm14 = vcmp.lt.f32.partialorder %v4620_v41, 0.0004427343  ;;  %v4627_v60 = vadd.f32 1.0, %v4626_v42  ;;  %v2582_v14 = vand.u32 2147483647, %v13107_v52  ;;  %v18077_v26 = vld [vmem:[#allocation317_spill] sm:$0xff] }
 0x437   :  { %18062 = vst [vmem:[#allocation278_spill] sm:$0xff] %v13344_v35  ;;  %v18069_v18 = vand.u32 2147483647, %v17909_v5  ;;  %v18070_v31 = vmov 0  ;;  %v18072_v3 = vand.u32 2147483647, %v12784_v40  ;;  %v13374_v56 = vmul.f32 %v4757_v19, %v2581_v61  ;;  %5017 = vadd.xlane.f32.xlu1 %v13230_v45 }
 0x438   :  { %v4629_v6 = vand.u32 2147483647, %v18039_v10  ;;  %5015 = vadd.xlane.f32.xlu0 %v13220_v34  ;;  %v4487_v52 = vsel %vm13353_vm15, %v4484_v7, %v4481_v25  ;;  %v4622_v5 = vsel %vm13359_vm14, %v4619_v2, %v4616_v21  ;;  %v4625_v51 = vmul.f32 0.6931472, %v6684_v58  ;;  %v18075_v40 = vld [vmem:[#allocation41_spill] sm:$0xff]  ;;  %v18078_v42 = vld [vmem:[#allocation58_spill] sm:$0xff] }
 0x439   :  { %vm13366_vm12 = vcmp.lt.f32.partialorder %v18069_v18, 0.0004427343  ;;  %v13372_v49 = vmul.f32 %v4742_v12, %v18072_v3  ;;  %18074 = vst [vmem:[#allocation376_spill] sm:$0xff] %v13374_v56  ;;  %v2273_v20 = vsub.f32 %v18075_v40, %v17886_v32  ;;  %v4743_v43 = vadd.f32 %v4487_v52, %v18076_v11  ;;  %v18083_v21 = vld [vmem:[#allocation64_spill] sm:$0xff]  ;;  %v18126_v4 = vld [vmem:[#allocation10_spill] sm:$0xff]  ;;  %v18196_v56 = vld [vmem:[#allocation239_spill] sm:$0xff] }
 0x43a   :  { %v18071_v31 = vsel %vm13366_vm12, 4294967295, %v18070_v31  ;;  %v4758_v41 = vadd.f32 %v4622_v5, %v18077_v26  ;;  %v2272_v61 = vsub.f32 %v18078_v42, %v17886_v32  ;;  %v18079_v8 = vand.u32 2147483647, %v12974_v54  ;;  %v18091_v18 = vld [vmem:[#allocation16_spill] sm:$0xff]  ;;  %v18099_v26 = vld [vmem:[#allocation311_spill] sm:$0xff]  ;;  %v18101_v42 = vld [vmem:[#allocation90_spill] sm:$0xff] }
 0x43b   :  { %18073 = vst [vmem:[#allocation277_spill] sm:$0xff] %v13372_v49  ;;  %v18082_v25 = vand.u32 2147483647, %v12993_v30  ;;  %v4628_v39 = vmul.f32 %v18039_v10, %v4627_v60  ;;  %v2583_v12 = vand.u32 2147483647, %v13104_v29  ;;  %v13403_v53 = vmul.f32 %v4743_v43, %v2567_v9  ;;  %v18089_v29 = vld [vmem:[#allocation198_spill] sm:$0xff] }
 0x43c   :  { %v13394_v16 = vmul.f32 %v18080_v36, %v18079_v8  ;;  %v13405_v19 = vmul.f32 %v4758_v41, %v2582_v14  ;;  %vm4630_vm2 = vcmp.lt.f32.partialorder %v4629_v6, 0.0004427343  ;;  %v2275_v54 = vsub.f32 %v18087_v55, %v17886_v32  ;;  %v18090_v60 = vld [vmem:[#allocation372_spill] sm:$0xff]  ;;  %v18092_v6 = vld [vmem:[#allocation186_spill] sm:$0xff]  ;;  %v18106_v55 = vld [vmem:[#allocation367_spill] sm:$0xff] }
 0x43d   :  { %v13399_v58 = vmul.f32 %v18083_v21, %v18082_v25  ;;  %18085 = vst [vmem:[#allocation81_spill] sm:$0xff] %v13403_v53  ;;  %v13411_v7 = vmul.f32 0.6931472, %v13131_v22  ;;  %v4302_v30 = vmul.f32 -0.5, %v17967_v63  ;;  %v4631_v2 = vsel %vm4630_vm2, %v4628_v39, %v4625_v51  ;;  %v18093_v52 = vld [vmem:[#allocation176_spill] sm:$0xff] }
 0x43e   :  { %18081 = vst [vmem:[#allocation335_spill] sm:$0xff] %v13394_v16  ;;  %18086 = vst [vmem:[#allocation366_spill] sm:$0xff] %v13405_v19  ;;  %5019 = vadd.xlane.f32.xlu0 %v13394_v16  ;;  %v13415_v10 = vmul.f32 %v2273_v20, %v18088_v28  ;;  %v2274_v9 = vsub.f32 %v18089_v29, %v17886_v32  ;;  %v13422_v14 = vmul.f32 %v18090_v60, %v13155_v1  ;;  %v18094_v51 = vld [vmem:[#allocation164_spill] sm:$0xff]  ;;  %v18096_v20 = vld [vmem:[#allocation59_spill] sm:$0xff]  ;;  %vm15469_vm15 = vcmask 195712  }
 0x43f   :  { %18084 = vst [vmem:[#allocation354_spill] sm:$0xff] %v13399_v58  ;;  %5021 = vadd.xlane.f32.xlu1 %v13399_v58  ;;  %v4759_v3 = vadd.f32 %v4631_v2, %v18091_v18  ;;  %v2400_v22 = vmul.f32 %v2272_v61, %v18092_v6  ;;  %v2277_v5 = vsub.f32 %v18093_v52, %v17886_v32  ;;  %v18095_v40 = vand.u32 2147483647, %v18094_v51  ;;  %v18098_v43 = vld [vmem:[#allocation76_spill] sm:$0xff]  ;;  %v18103_v1 = vld [vmem:[#allocation337_spill] sm:$0xff]  ;;  %v18118_v2 = vld [vmem:[#allocation231_spill] sm:$0xff] }
 0x440   :  { %6685 = vlog2.f32 %v18098_v43  ;;  %v18100_v41 = vand.u32 2147483647, %v18099_v26  ;;  %v4434_v36 = vadd.f32 1.0, %v18103_v1  ;;  %v4437_v25 = vmul.f32 -0.5, %v18103_v1  ;;  %v18105_v21 = vld [vmem:[#allocation32_spill] sm:$0xff]  ;;  %v18108_v52 = vld [vmem:[#allocation197_spill] sm:$0xff] }
 0x441   :  { %v13431_v11 = vmul.f32 %v18096_v20, %v18095_v40  ;;  %v13441_v61 = vmul.f32 %v4759_v3, %v2583_v12  ;;  %v13444_v39 = vmul.f32 %v2275_v54, %v18105_v21  ;;  %v4303_v28 = vadd.f32 1.0, %v4302_v30  ;;  %v18107_v18 = vld [vmem:[#allocation172_spill] sm:$0xff]  ;;  %v18109_v3 = vld [vmem:[#allocation95_spill] sm:$0xff]  ;;  %v18111_v30 = vld [vmem:[#allocation69_spill] sm:$0xff] }
 0x442   :  { %v13437_v8 = vmul.f32 %v18101_v42, %v18100_v41  ;;  %v13453_v6 = vmul.f32 %v2274_v9, %v18107_v18  ;;  %v2276_v12 = vsub.f32 %v18108_v52, %v17886_v32  ;;  %v2279_v54 = vsub.f32 %v18109_v3, %v17886_v32  ;;  %v18112_v41 = vld [vmem:[#allocation206_spill] sm:$0xff]  ;;  %v18114_v42 = vld [vmem:[#allocation57_spill] sm:$0xff]  ;;  %v18128_v16 = vld [vmem:[#allocation292_spill] sm:$0xff] }
 0x443   :  { %18097 = vst [vmem:[#allocation14_spill] sm:$0xff] %v13431_v11  ;;  %18104 = vst [vmem:[#allocation359_spill] sm:$0xff] %v13441_v61  ;;  %5023 = vadd.xlane.f32.xlu0 %v13431_v11  ;;  %v18110_v51 = vlaneseq  ;;  %v2529_v20 = vand.u32 2147483647, %v13415_v10  ;;  %v2528_v43 = vand.u32 2147483647, %v2400_v22  ;;  %v13465_v26 = vmul.f32 %v2277_v5, %v18111_v30 }
 0x444   :  { %18102 = vst [vmem:[#allocation309_spill] sm:$0xff] %v13437_v8  ;;  %5025 = vadd.xlane.f32.xlu1 %v13437_v8  ;;  %v18113_v9 = vand.u32 2147483647, %v18112_v41  ;;  %v18116_v18 = vld [vmem:[#allocation65_spill] sm:$0xff]  ;;  %6687 = vlog2.f32 %v4434_v36  ;;  %v18120_v10 = vld [vmem:[#allocation347_spill] sm:$0xff]  ;;  %v18121_v30 = vld [vmem:[#allocation52_spill] sm:$0xff] }
 0x445   :  { %v13461_v40 = vand.u32 127, %v18110_v51  ;;  %v18117_v52 = vand.u32 2147483647, %v18116_v18  ;;  %v13478_v51 = vadd.f32 1.0, %v4437_v25  ;;  %v2278_v22 = vsub.f32 %v18120_v10, %v17886_v32  ;;  %v18122_v36 = vld [vmem:[#allocation36_spill] sm:$0xff]  ;;  %v18123_v18 = vld [vmem:[#allocation37_spill] sm:$0xff]  ;;  %v4894_v32 = vpop.xlane.xlu0 %4893 }
 0x446   :  { %v13470_v21 = vmul.f32 %v18114_v42, %v18113_v9  ;;  %v13485_v41 = vmul.f32 0.6931472, %v18121_v30  ;;  %v13488_v9 = vmul.f32 %v17967_v63, %v4303_v28  ;;  %v2530_v42 = vand.u32 2147483647, %v13453_v6  ;;  %v18124_v30 = vld [vmem:[#allocation275_spill] sm:$0xff]  ;;  %v18137_v6 = vld [vmem:[#allocation160_spill] sm:$0xff] }
 0x447   :  { %v13475_v3 = vmul.f32 %v18118_v2, %v18117_v52  ;;  %v5283_v29 = vadd.s32 4294967288, %v13461_v40  ;;  %v5290_v5 = vadd.s32 4294967280, %v13461_v40  ;;  %v13493_v25 = vmul.f32 %v2276_v12, %v18122_v36  ;;  %v18130_v12 = vld [vmem:[#allocation184_spill] sm:$0xff]  ;;  %v18131_v36 = vld [vmem:[#allocation85_spill] sm:$0xff]  ;;  %v18167_v61 = vld [vmem:[#allocation219_spill] sm:$0xff] }
 0x448   :  { %18115 = vst [vmem:[#allocation39_spill] sm:$0xff] %v13470_v21  ;;  %5027 = vadd.xlane.f32.xlu0 %v13470_v21  ;;  %v13496_v52 = vmul.f32 %v2279_v54, %v18123_v18  ;;  %v18125_v23 = vand.u32 2147483647, %v18124_v30  ;;  %v5297_v2 = vadd.s32 4294967272, %v13461_v40  ;;  %v18132_v45 = vsel %vm12086_vm5, %v18130_v12, %v18131_v36  ;;  %v18133_v18 = vld [vmem:[#allocation5_spill] sm:$0xff]  ;;  %v18138_v12 = vld [vmem:[#allocation279_spill] sm:$0xff] }
 0x449   :  { %18119 = vst [vmem:[#allocation320_spill] sm:$0xff] %v13475_v3  ;;  %5029 = vadd.xlane.f32.xlu1 %v13475_v3  ;;  %v13512_v54 = vadd.f32 %v18132_v45, %v18128_v16  ;;  %v13516_v34 = vsub.s32 %v13461_v40, %v18133_v18  ;;  %v18134_v10 = vand.u32 2147483647, %v13137_v17  ;;  %v18135_v30 = vld [vmem:[#allocation205_spill] sm:$0xff]  ;;  %v13528_v44 = vmul.f32 %v2278_v22, %v18137_v6  ;;  %v18139_v45 = vld [vmem:[#allocation224_spill] sm:$0xff]  ;;  %v18142_v6 = vld [vmem:[#allocation391_spill] sm:$0xff] }
 0x44a   :  { %v13503_v28 = vmul.f32 %v18126_v4, %v18125_v23  ;;  %v13524_v23 = vsub.s32 %v5283_v29, %v18133_v18  ;;  %v5304_v4 = vadd.s32 4294967264, %v13461_v40  ;;  %v2281_v16 = vsub.f32 %v18139_v45, %v18138_v12  ;;  %v18140_v36 = vld [vmem:[#allocation40_spill] sm:$0xff] }
 0x44b   :  { %v13521_v48 = vmul.f32 %v18135_v30, %v18134_v10  ;;  %v2280_v46 = vsub.f32 %v18140_v36, %v18138_v12  ;;  %v13536_v17 = vsub.s32 %v5290_v5, %v18133_v18  ;;  %v2532_v10 = vand.u32 2147483647, %v13493_v25  ;;  %v4898_v30 = vpop.xlane.xlu0 %4897  ;;  %v18144_v36 = vld [vmem:[#allocation181_spill] sm:$0xff]  ;;  %v18197_v49 = vld [vmem:[#allocation244_spill] sm:$0xff] }
 0x44c   :  { %18127 = vst [vmem:[#allocation319_spill] sm:$0xff] %v13503_v28  ;;  %5031 = vadd.xlane.f32.xlu0 %v13503_v28  ;;  %vm15470_vm5 = vcmask 130112   ;;  %v18141_v22 = vand.u32 2147483647, %v13134_v47  ;;  %v13547_v57 = vmul.f32 %v18144_v36, %v2528_v43  ;;  %v13550_v5 = vsub.s32 %v5297_v2, %v18133_v18  ;;  %v18147_v2 = vld [vmem:[#allocation358_spill] sm:$0xff] }
 0x44d   :  { %18136 = vst [vmem:[#allocation100_spill] sm:$0xff] %v13521_v48  ;;  %5033 = vadd.xlane.f32.xlu1 %v13521_v48  ;;  %v5311_v25 = vadd.s32 4294967256, %v13461_v40  ;;  %v13553_v29 = vpop.eup %6685  ;;  %v5282_v50 = vrot.slane %v4894_v32, %v13516_v34  ;;  %v5287_v48 = vrot.slane %v4896_v37, %v13524_v23  ;;  %v13558_v47 = vsub.s32 %v5304_v4, %v18133_v18  ;;  %v18148_v4 = vld [vmem:[#allocation189_spill] sm:$0xff] }
 0x44e   :  { %v13544_v45 = vmul.f32 %v18142_v6, %v18141_v22  ;;  %18145 = vst [vmem:[#allocation332_spill] sm:$0xff] %v13547_v57  ;;  %v5318_v22 = vadd.s32 4294967248, %v13461_v40  ;;  %v2534_v43 = vand.u32 2147483647, %v13528_v44  ;;  %v18146_v6 = vld [vmem:[#allocation44_spill] sm:$0xff]  ;;  %v13566_v15 = vmul.f32 %v2280_v46, %v18147_v2  ;;  %v4902_v46 = vpop.xlane.xlu1 %4901 }
 0x44f   :  { %v13563_v36 = vmul.f32 %v2281_v16, %v18146_v6  ;;  %v5294_v28 = vrot.slane %v4898_v30, %v13536_v17  ;;  %v5289_v32 = vsel %vm15470_vm5, %v5287_v48, %v5282_v50  ;;  %vm15479_vm14 = vcmask 261312   ;;  %v4900_v37 = vpop.xlane.xlu0 %4899  ;;  %v18150_v48 = vld [vmem:[#allocation381_spill] sm:$0xff] }
 0x450   :  { %18143 = vst [vmem:[#allocation223_spill] sm:$0xff] %v13544_v45  ;;  %5035 = vadd.xlane.f32.xlu0 %v13544_v45  ;;  %vm15478_vm2 = vcmask 326912   ;;  %v13573_v0 = vmul.f32 %v18148_v4, %v2529_v20  ;;  %v5301_v16 = vrot.slane %v4900_v37, %v13550_v5  ;;  %v13578_v6 = vsub.s32 %v5311_v25, %v18133_v18  ;;  %v18152_v25 = vld [vmem:[#allocation245_spill] sm:$0xff] }
 0x451   :  { %5037 = vadd.xlane.f32.xlu1 %v13547_v57  ;;  %v5296_v44 = vsel %vm15469_vm15, %v5294_v28, %v5289_v32  ;;  %v5325_v30 = vadd.s32 4294967240, %v13461_v40  ;;  %v5308_v50 = vrot.slane %v4902_v46, %v13558_v47  ;;  %v13583_v2 = vmul.f32 %v18150_v48, %v2530_v42  ;;  %v13589_v4 = vpop.eup %6687  ;;  %v18153_v42 = vld [vmem:[#allocation23_spill] sm:$0xff] }
 0x452   :  { %18149 = vst [vmem:[#allocation281_spill] sm:$0xff] %v13573_v0  ;;  %v13586_v57 = vsub.s32 %v5318_v22, %v18133_v18  ;;  %v5332_v20 = vadd.s32 4294967232, %v13461_v40  ;;  %v2536_v32 = vand.u32 2147483647, %v13566_v15  ;;  %v2283_v37 = vsub.f32 %v18152_v25, %v18138_v12  ;;  %v4906_v15 = vpop.xlane.xlu1 %4905  ;;  %v18155_v25 = vld [vmem:[#allocation109_spill] sm:$0xff] }
 0x453   :  { %18151 = vst [vmem:[#allocation185_spill] sm:$0xff] %v13583_v2  ;;  %v5303_v45 = vsel %vm15479_vm14, %v5301_v16, %v5296_v44  ;;  %v2282_v46 = vsub.f32 %v18153_v42, %v18138_v12  ;;  %vm15483_vm15 = vcmask 392512   ;;  %v4904_v48 = vpop.xlane.xlu0 %4903  ;;  %vm15482_vm5 = vcmask 458112  }
 0x454   :  { %5039 = vadd.xlane.f32.xlu0 %v13573_v0  ;;  %v5310_v22 = vsel %vm15478_vm2, %v5308_v50, %v5303_v45  ;;  %v5315_v28 = vrot.slane %v4904_v48, %v13578_v6  ;;  %v18154_v3 = vand.u32 2147483647, %v13444_v39  ;;  %v13608_v44 = vsub.s32 %v5325_v30, %v18133_v18  ;;  %v18158_v50 = vld [vmem:[#allocation316_spill] sm:$0xff]  ;;  %v18161_v0 = vld [vmem:[#allocation53_spill] sm:$0xff]  ;;  %v18164_v30 = vld [vmem:[#allocation259_spill] sm:$0xff] }
 0x455   :  { %5041 = vadd.xlane.f32.xlu1 %v13583_v2  ;;  %v5339_v16 = vadd.s32 4294967224, %v13461_v40  ;;  %v5322_v45 = vrot.slane %v4906_v15, %v13586_v57  ;;  %v13613_v42 = vmul.f32 %v18158_v50, %v2532_v10  ;;  %v13616_v2 = vsub.s32 %v5332_v20, %v18133_v18  ;;  %v18165_v10 = vld [vmem:[#allocation216_spill] sm:$0xff] }
 0x456   :  { %v13605_v21 = vmul.f32 %v18155_v25, %v18154_v3  ;;  %18157 = vst [vmem:[#allocation133_spill] sm:$0xff] %v13608_v44  ;;  %v5346_v48 = vadd.s32 4294967216, %v13461_v40  ;;  %v13620_v39 = vmul.f32 %v2283_v37, %v18161_v0  ;;  %v18162_v3 = vld [vmem:[#allocation11_spill] sm:$0xff]  ;;  %v18163_v25 = vld [vmem:[#allocation213_spill] sm:$0xff]  ;;  %v5317_v58 = vsel %vm15483_vm15, %v5315_v28, %v5310_v22  ;;  %v4910_v37 = vpop.xlane.xlu1 %4909  ;;  %v18170_v22 = vld [vmem:[#allocation208_spill] sm:$0xff] }
 0x457   :  { %18159 = vst [vmem:[#allocation175_spill] sm:$0xff] %v13613_v42  ;;  %18160 = vst [vmem:[#allocation302_spill] sm:$0xff] %v13616_v2  ;;  %v2297_v8 = vsub.f32 %v18163_v25, %v18162_v3  ;;  %v2296_v11 = vsub.f32 %v18164_v30, %v18162_v3  ;;  %v2410_v15 = vmul.f32 %v2282_v46, %v18165_v10  ;;  %vm15487_vm2 = vcmask 523712   ;;  %v4908_v50 = vpop.xlane.xlu0 %4907 }
 0x458   :  { %18156 = vst [vmem:[#allocation188_spill] sm:$0xff] %v13605_v21  ;;  %5043 = vadd.xlane.f32.xlu0 %v13605_v21  ;;  %v5324_v20 = vsel %vm15482_vm5, %v5322_v45, %v5317_v58  ;;  %vm15486_vm14 = vcmask 589312   ;;  %v5329_v0 = vrot.slane %v4908_v50, %v13608_v44  ;;  %v18166_v25 = vand.u32 2147483647, %v13465_v26  ;;  %v18174_v21 = vld [vmem:[#allocation380_spill] sm:$0xff] }
 0x459   :  { %5045 = vadd.xlane.f32.xlu1 %v13613_v42  ;;  %v13638_v28 = vsub.s32 %v5339_v16, %v18133_v18  ;;  %v5353_v46 = vadd.s32 4294967208, %v13461_v40  ;;  %v5336_v58 = vrot.slane %v4910_v37, %v13616_v2  ;;  %v13643_v45 = vmul.f32 %v18170_v22, %v2534_v43  ;;  %v18173_v42 = vld [vmem:[#allocation378_spill] sm:$0xff] }
 0x45a   :  { %v13635_v30 = vmul.f32 %v18167_v61, %v18166_v25  ;;  %v13646_v10 = vsub.s32 %v5346_v48, %v18133_v18  ;;  %v5360_v50 = vadd.s32 4294967200, %v13461_v40  ;;  %v2425_v26 = vmul.f32 %v2297_v8, %v18173_v42  ;;  %v18175_v25 = vld [vmem:[#allocation83_spill] sm:$0xff]  ;;  %v4914_v8 = vpop.xlane.xlu1 %4913 }
 0x45b   :  { %18169 = vst [vmem:[#allocation152_spill] sm:$0xff] %v13638_v28  ;;  %18171 = vst [vmem:[#allocation196_spill] sm:$0xff] %v13643_v45  ;;  %v2424_v61 = vmul.f32 %v2296_v11, %v18174_v21  ;;  %v2298_v16 = vsub.f32 %v18175_v25, %v18162_v3  ;;  %v5331_v19 = vsel %vm15487_vm2, %v5329_v0, %v5324_v20  ;;  %v2538_v37 = vand.u32 2147483647, %v2410_v15  ;;  %v4912_v48 = vpop.xlane.xlu0 %4911  ;;  %v18177_v21 = vld [vmem:[#allocation362_spill] sm:$0xff]  ;;  %v18179_v0 = vld [vmem:[#allocation165_spill] sm:$0xff] }
 0x45c   :  { %18168 = vst [vmem:[#allocation323_spill] sm:$0xff] %v13635_v30  ;;  %18172 = vst [vmem:[#allocation46_spill] sm:$0xff] %v13646_v10  ;;  %5047 = vadd.xlane.f32.xlu0 %v13635_v30  ;;  %v5338_v43 = vsel %vm15486_vm14, %v5336_v58, %v5331_v19  ;;  %vm15491_vm5 = vcmask 654912   ;;  %vm15488_vm15 = vcmask 720512   ;;  %v5343_v22 = vrot.slane %v4912_v48, %v13638_v28  ;;  %v18181_v30 = vld [vmem:[#allocation274_spill] sm:$0xff] }
 0x45d   :  { %5049 = vadd.xlane.f32.xlu1 %v13643_v45  ;;  %v18176_v11 = vand.u32 2147483647, %v13496_v52  ;;  %v13664_v20 = vsub.s32 %v5353_v46, %v18133_v18  ;;  %v5367_v15 = vadd.s32 4294967192, %v13461_v40  ;;  %v5350_v19 = vrot.slane %v4914_v8, %v13646_v10  ;;  %v18183_v8 = vld [vmem:[#allocation92_spill] sm:$0xff] }
 0x45e   :  { %v13669_v58 = vmul.f32 %v18179_v0, %v2536_v32  ;;  %v13672_v25 = vsub.s32 %v5360_v50, %v18133_v18  ;;  %v5374_v48 = vadd.s32 4294967184, %v13461_v40  ;;  %v2553_v45 = vand.u32 2147483647, %v2425_v26  ;;  %v18185_v26 = vld [vmem:[#allocation138_spill] sm:$0xff] }
 0x45f   :  { %v13661_v42 = vmul.f32 %v18177_v21, %v18176_v11  ;;  %v2552_v52 = vand.u32 2147483647, %v2424_v61  ;;  %v2426_v11 = vmul.f32 %v2298_v16, %v18181_v30  ;;  %v5345_v21 = vsel %vm15491_vm5, %v5343_v22, %v5338_v43  ;;  %v4916_v32 = vpop.xlane.xlu0 %4915  ;;  %v18186_v61 = vld [vmem:[#allocation361_spill] sm:$0xff]  ;;  %v4918_v16 = vpop.xlane.xlu1 %4917 }
 0x460   :  { %18180 = vst [vmem:[#allocation87_spill] sm:$0xff] %v13669_v58  ;;  %v5352_v46 = vsel %vm15488_vm15, %v5350_v19, %v5345_v21  ;;  %vm5358_vm14 = vcmask 786112   ;;  %vm5365_vm2 = vcmask 851712   ;;  %v18182_v50 = vand.u32 2147483647, %v13563_v36  ;;  %v18187_v19 = vld [vmem:[#allocation155_spill] sm:$0xff] }
 0x461   :  { %18178 = vst [vmem:[#allocation47_spill] sm:$0xff] %v13661_v42  ;;  %5051 = vadd.xlane.f32.xlu0 %v13661_v42  ;;  %5053 = vadd.xlane.f32.xlu1 %v13669_v58  ;;  %v2312_v53 = vsub.f32 %v18186_v61, %v18185_v26  ;;  %v5357_v30 = vrot.slane %v4916_v32, %v13664_v20  ;;  %v5381_v22 = vadd.s32 4294967176, %v13461_v40  ;;  %v18188_v21 = vand.u32 2147483647, %v18187_v19  ;;  %v18191_v36 = vld [vmem:[#allocation318_spill] sm:$0xff]  ;;  %v18192_v61 = vld [vmem:[#allocation20_spill] sm:$0xff] }
 0x462   :  { %v13683_v0 = vmul.f32 %v18183_v8, %v18182_v50  ;;  %v13689_v43 = vsub.s32 %v5367_v15, %v18133_v18  ;;  %v2313_v50 = vsub.f32 %v18191_v36, %v18185_v26  ;;  %v5364_v8 = vrot.slane %v4918_v16, %v13672_v25  ;;  %v18195_v40 = vld [vmem:[#allocation13_spill] sm:$0xff]  ;;  %v18200_v16 = vld [vmem:[#allocation55_spill] sm:$0xff] }
 0x463   :  { %vm13694_vm15 = vcmp.lt.f32.partialorder %v18188_v21, 0.0004427343  ;;  %v13702_v58 = vmul.f32 %v18192_v61, %v2538_v37  ;;  %v13705_v32 = vsub.s32 %v5374_v48, %v18133_v18  ;;  %v2539_v15 = vand.u32 2147483647, %v13620_v39  ;;  %v18199_v36 = vld [vmem:[#allocation105_spill] sm:$0xff]  ;;  %v18202_v61 = vld [vmem:[#allocation286_spill] sm:$0xff]  ;;  %v4920_v39 = vpop.xlane.xlu0 %4919 }
 0x464   :  { %18184 = vst [vmem:[#allocation35_spill] sm:$0xff] %v13683_v0  ;;  %v2284_v19 = vsub.f32 %v18195_v40, %v18138_v12  ;;  %v5359_v21 = vsel %vm5358_vm14, %v5357_v30, %v5352_v46  ;;  %vm18198_vm5 = vnez %v18197_v49  ;;  %v2299_v48 = vsub.f32 %v18202_v61, %v18162_v3  ;;  %v18203_v46 = vld [vmem:[#allocation190_spill] sm:$0xff]  ;;  %v18207_v61 = vld [vmem:[#allocation45_spill] sm:$0xff] }
 0x465   :  { %18193 = vst [vmem:[#allocation114_spill] sm:$0xff] %v13702_v58  ;;  %18194 = vst [vmem:[#allocation370_spill] sm:$0xff] %v13705_v32  ;;  %5055 = vadd.xlane.f32.xlu0 %v13683_v0  ;;  %v18201_v35 = vsel %vm18198_vm5, %v18199_v36, %v18200_v16  ;;  %v5366_v13 = vsel %vm5365_vm2, %v5364_v8, %v5359_v21  ;;  %5057 = vadd.xlane.f32.xlu1 %v13702_v58  ;;  %vm5372_vm12 = vcmask 917312   ;;  %v4922_v0 = vpop.xlane.xlu1 %4921  ;;  %v18205_v36 = vld [vmem:[#allocation282_spill] sm:$0xff]  ;;  %vm15500_vm5 = vcmask 1048512   ;;  %v18429_v42 = vld [vmem:[#allocation157_spill] sm:$0xff] }
 0x466   :  { %v4729_v37 = vadd.f32 %v18201_v35, %v18196_v56  ;;  %v2440_v30 = vmul.f32 %v2312_v53, %v18203_v46  ;;  %v5371_v40 = vrot.slane %v4920_v39, %v13689_v43  ;;  %v13725_v49 = vmul.f32 %v13512_v54, %v2552_v52  ;;  %v18208_v52 = vld [vmem:[#allocation178_spill] sm:$0xff]  ;;  %v18213_v46 = vld [vmem:[#allocation369_spill] sm:$0xff] }
 0x467   :  { %v13728_v35 = vsub.s32 %v5381_v22, %v18133_v18  ;;  %v2554_v56 = vand.u32 2147483647, %v2426_v11  ;;  %v2441_v16 = vmul.f32 %v2313_v50, %v18205_v36  ;;  %v5378_v8 = vrot.slane %v4922_v0, %v13705_v32  ;;  %v18209_v18 = vld [vmem:[#allocation77_spill] sm:$0xff]  ;;  %v18210_v0 = vld [vmem:[#allocation298_spill] sm:$0xff] }
 0x468   :  { %18204 = vst [vmem:[#allocation18_spill] sm:$0xff] %v13725_v49  ;;  %v13732_v21 = vmul.f32 %v4729_v37, %v2553_v45  ;;  %v2285_v58 = vsub.f32 %v18207_v61, %v18138_v12  ;;  %v5373_v53 = vsel %vm5372_vm12, %v5371_v40, %v5366_v13  ;;  %v4569_v39 = vadd.f32 1.0, %v18208_v52  ;;  %v4924_v45 = vpop.xlane.xlu0 %4923  ;;  %v18212_v37 = vld [vmem:[#allocation54_spill] sm:$0xff] }
 0x469   :  { %5085 = vadd.xlane.f32.xlu0 %v13725_v49  ;;  %v2412_v22 = vmul.f32 %v2284_v19, %v18209_v18  ;;  %v5380_v11 = vsel %vm5379_vm13, %v5378_v8, %v5373_v53  ;;  %v18214_v13 = vsel %vm12251_vm6, %v18212_v37, %v18213_v46  ;;  %v2568_v36 = vand.u32 2147483647, %v2440_v30  ;;  %v18215_v61 = vld [vmem:[#allocation94_spill] sm:$0xff]  ;;  %v4926_v19 = vpop.xlane.xlu1 %4925  ;;  %v18218_v53 = vld [vmem:[#allocation272_spill] sm:$0xff] }
 0x46a   :  { %18206 = vst [vmem:[#allocation124_spill] sm:$0xff] %v13732_v21  ;;  %5087 = vadd.xlane.f32.xlu1 %v13732_v21  ;;  %v4730_v40 = vadd.f32 %v18214_v13, %v18210_v0  ;;  %v2314_v54 = vsub.f32 %v18215_v61, %v18185_v26  ;;  %v5385_v49 = vrot.slane %v4924_v45, %v13728_v35  ;;  %v18216_v18 = vld [vmem:[#allocation330_spill] sm:$0xff]  ;;  %v2569_v27 = vand.u32 2147483647, %v2441_v16  ;;  %v18222_v37 = vld [vmem:[#allocation24_spill] sm:$0xff]  ;;  %v18227_v16 = vld [vmem:[#allocation225_spill] sm:$0xff] }
 0x46b   :  { %v13753_v8 = vmul.f32 %v18216_v18, %v2539_v15  ;;  %v2427_v21 = vmul.f32 %v2299_v48, %v18218_v53  ;;  %v18220_v50 = vld [vmem:[#allocation246_spill] sm:$0xff]  ;;  %vm18223_vm6 = vnez %v18222_v37  ;;  %v18224_v15 = vld [vmem:[#allocation383_spill] sm:$0xff]  ;;  %6689 = vlog2.f32 %v4569_v39 }
 0x46c   :  { %v13756_v59 = vmul.f32 %v4730_v40, %v2554_v56  ;;  %v13763_v30 = vsel %vm15500_vm5, %v5385_v49, %v5380_v11  ;;  %v18221_v45 = vld [vmem:[#allocation210_spill] sm:$0xff]  ;;  %v13774_v56 = vmul.f32 %v18103_v1, %v13478_v51  ;;  %v2413_v40 = vmul.f32 %v2285_v58, %v18227_v16  ;;  %v18228_v49 = vld [vmem:[#allocation148_spill] sm:$0xff]  ;;  %v4928_v18 = vpop.xlane.xlu0 %4927  ;;  %v18231_v0 = vld [vmem:[#allocation71_spill] sm:$0xff] }
 0x46d   :  { %18217 = vst [vmem:[#allocation331_spill] sm:$0xff] %v13753_v8  ;;  %5059 = vadd.xlane.f32.xlu0 %v13753_v8  ;;  %v18225_v46 = vld [vmem:[#allocation78_spill] sm:$0xff]  ;;  %v2540_v61 = vand.u32 2147483647, %v2412_v22  ;;  %v2300_v11 = vsub.f32 %v18228_v49, %v18162_v3  ;;  %v5391_v39 = vrot.slane %v4926_v19, %v13516_v34  ;;  %v5395_v58 = vrot.slane %v4928_v18, %v13524_v23  ;;  %v4930_v22 = vpop.xlane.xlu1 %4929  ;;  %v18236_v8 = vld [vmem:[#allocation329_spill] sm:$0xff] }
 0x46e   :  { %18219 = vst [vmem:[#allocation303_spill] sm:$0xff] %v13756_v59  ;;  %v18226_v13 = vsel %vm18223_vm6, %v18224_v15, %v18225_v46  ;;  %5089 = vadd.xlane.f32.xlu1 %v13756_v59  ;;  %v18229_v53 = vld [vmem:[#allocation214_spill] sm:$0xff]  ;;  %v18232_v15 = vld [vmem:[#allocation132_spill] sm:$0xff]  ;;  %v2555_v49 = vand.u32 2147483647, %v2427_v21  ;;  %v2315_v59 = vsub.f32 %v18236_v8, %v18185_v26  ;;  %v5400_v33 = vrot.slane %v4930_v22, %v13536_v17 }
 0x46f   :  { %v4744_v48 = vadd.f32 %v18226_v13, %v18221_v45  ;;  %v18233_v45 = vsel %vm12363_vm3, %v18231_v0, %v18232_v15  ;;  %v18234_v13 = vld [vmem:[#allocation129_spill] sm:$0xff]  ;;  %v18238_v0 = vand.u32 2147483647, %v18090_v60  ;;  %vm18241_vm6 = vcmask 130112   ;;  %v18244_v21 = vld [vmem:[#allocation240_spill] sm:$0xff]  ;;  %v18252_v19 = vld [vmem:[#allocation390_spill] sm:$0xff] }
 0x470   :  { %v4745_v46 = vadd.f32 %v18233_v45, %v18229_v53  ;;  %v2442_v51 = vmul.f32 %v2314_v54, %v18234_v13  ;;  %v5396_v54 = vsel %vm18241_vm6, %v5395_v58, %v5391_v39  ;;  %v2541_v60 = vand.u32 2147483647, %v2413_v40  ;;  %v18247_v45 = vld [vmem:[#allocation235_spill] sm:$0xff]  ;;  %v4932_v39 = vpop.xlane.xlu0 %4931  ;;  %v18249_v58 = vld [vmem:[#allocation117_spill] sm:$0xff] }
 0x471   :  { %v13789_v16 = vmul.f32 %v4744_v48, %v2568_v36  ;;  %vm13798_vm3 = vcmp.lt.f32.partialorder %v18238_v0, 0.0004427343  ;;  %v18242_v36 = vld [vmem:[#allocation48_spill] sm:$0xff]  ;;  %v18245_v48 = vld [vmem:[#allocation146_spill] sm:$0xff]  ;;  %vm18248_vm5 = vcmask 195712   ;;  %v5405_v40 = vrot.slane %v4932_v39, %v13550_v5  ;;  %v4934_v15 = vpop.xlane.xlu1 %4933  ;;  %v18267_v39 = vld [vmem:[#allocation159_spill] sm:$0xff] }
 0x472   :  { %v13794_v37 = vmul.f32 %v4745_v46, %v2569_v27  ;;  %v18246_v8 = vsel %vm12401_vm1, %v18244_v21, %v18245_v48  ;;  %v4572_v27 = vmul.f32 -0.5, %v18208_v52  ;;  %v2286_v46 = vsub.f32 %v18247_v45, %v18138_v12  ;;  %v18251_v0 = vld [vmem:[#allocation288_spill] sm:$0xff]  ;;  %v18254_v48 = vld [vmem:[#allocation291_spill] sm:$0xff] }
 0x473   :  { %18235 = vst [vmem:[#allocation300_spill] sm:$0xff] %v13789_v16  ;;  %5117 = vadd.xlane.f32.xlu0 %v13789_v16  ;;  %v4716_v18 = vadd.f32 %v18246_v8, %v18242_v36  ;;  %v5401_v13 = vsel %vm18248_vm5, %v5400_v33, %v5396_v54  ;;  %v18253_v21 = vsel %vm12426_vm11, %v18251_v0, %v18252_v19  ;;  %v2570_v16 = vand.u32 2147483647, %v2442_v51  ;;  %v18256_v33 = vld [vmem:[#allocation177_spill] sm:$0xff]  ;;  %v18257_v45 = vld [vmem:[#allocation187_spill] sm:$0xff] }
 0x474   :  { %18237 = vst [vmem:[#allocation249_spill] sm:$0xff] %v13794_v37  ;;  %5119 = vadd.xlane.f32.xlu1 %v13794_v37  ;;  %v4731_v36 = vadd.f32 %v18253_v21, %v18249_v58  ;;  %v2428_v8 = vmul.f32 %v2300_v11, %v18254_v48  ;;  %v2301_v54 = vsub.f32 %v18256_v33, %v18162_v3  ;;  %v18259_v0 = vand.u32 2147483647, %v17967_v63  ;;  %v18264_v51 = vld [vmem:[#allocation389_spill] sm:$0xff]  ;;  %v18269_v63 = vld [vmem:[#allocation60_spill] sm:$0xff] }
 0x475   :  { %v13824_v24 = vmul.f32 %v4716_v18, %v2540_v61  ;;  %v2443_v37 = vmul.f32 %v2315_v59, %v18257_v45  ;;  %v5410_v38 = vrot.slane %v4934_v15, %v13558_v47  ;;  %vm18262_vm11 = vcmask 261312   ;;  %v18263_v61 = vld [vmem:[#allocation156_spill] sm:$0xff]  ;;  %v18266_v18 = vld [vmem:[#allocation338_spill] sm:$0xff] }
 0x476   :  { %v13830_v22 = vmul.f32 %v4731_v36, %v2555_v49  ;;  %vm13834_vm1 = vcmp.lt.f32.partialorder %v18259_v0, 0.0004427343  ;;  %v5406_v11 = vsel %vm18262_vm11, %v5405_v40, %v5401_v13  ;;  %vm18265_vm5 = vnez %v18264_v51  ;;  %v18270_v36 = vld [vmem:[#allocation375_spill] sm:$0xff]  ;;  %v4936_v40 = vpop.xlane.xlu0 %4935  ;;  %v18272_v33 = vld [vmem:[#allocation80_spill] sm:$0xff] }
 0x477   :  { %18255 = vst [vmem:[#allocation342_spill] sm:$0xff] %v13824_v24  ;;  %5061 = vadd.xlane.f32.xlu0 %v13824_v24  ;;  %v18268_v59 = vsel %vm18265_vm5, %v18266_v18, %v18267_v39  ;;  %v13847_v49 = vmul.f32 0.6931472, %v13252_v62  ;;  %v4573_v15 = vadd.f32 1.0, %v4572_v27  ;;  %v2287_v21 = vsub.f32 %v18269_v63, %v18138_v12  ;;  %v18274_v0 = vld [vmem:[#allocation84_spill] sm:$0xff]  ;;  %v18275_v51 = vld [vmem:[#allocation183_spill] sm:$0xff]  ;;  %v4938_v63 = vpop.xlane.xlu1 %4937 }
 0x478   :  { %18258 = vst [vmem:[#allocation101_spill] sm:$0xff] %v13830_v22  ;;  %v4746_v19 = vadd.f32 %v18268_v59, %v18263_v61  ;;  %v2414_v48 = vmul.f32 %v2286_v46, %v18270_v36  ;;  %vm18271_vm6 = vcmask 326912   ;;  %5091 = vadd.xlane.f32.xlu1 %v13830_v22  ;;  %v18276_v61 = vsel %vm12508_vm8, %v18274_v0, %v18275_v51  ;;  %v18277_v27 = vld [vmem:[#allocation98_spill] sm:$0xff]  ;;  %v18284_v0 = vld [vmem:[#allocation360_spill] sm:$0xff] }
 0x479   :  { %v5411_v13 = vsel %vm18271_vm6, %v5410_v38, %v5406_v11  ;;  %v4717_v18 = vadd.f32 %v18276_v61, %v18272_v33  ;;  %v2556_v62 = vand.u32 2147483647, %v2428_v8  ;;  %v2316_v39 = vsub.f32 %v18277_v27, %v18185_v26  ;;  %v18279_v38 = vld [vmem:[#allocation289_spill] sm:$0xff]  ;;  %v18282_v8 = vld [vmem:[#allocation120_spill] sm:$0xff]  ;;  %v18285_v51 = vld [vmem:[#allocation74_spill] sm:$0xff] }
 0x47a   :  { %v5415_v59 = vrot.slane %v4936_v40, %v13578_v6  ;;  %v13863_v46 = vmul.f32 %v4746_v19, %v2570_v16  ;;  %v2429_v11 = vmul.f32 %v2301_v54, %v18279_v38  ;;  %v2571_v36 = vand.u32 2147483647, %v2443_v37  ;;  %v18287_v54 = vld [vmem:[#allocation66_spill] sm:$0xff]  ;;  %v4940_v27 = vpop.xlane.xlu0 %4939 }
 0x47b   :  { %v5420_v24 = vrot.slane %v4938_v63, %v13586_v57  ;;  %v13867_v22 = vmul.f32 %v4717_v18, %v2541_v60  ;;  %vm18281_vm11 = vcmask 392512   ;;  %v18286_v40 = vsel %vm12544_vm4, %v18284_v0, %v18285_v51  ;;  %v13884_v60 = vpop.eup %6689  ;;  %v18291_v38 = vld [vmem:[#allocation242_spill] sm:$0xff] }
 0x47c   :  { %18278 = vst [vmem:[#allocation106_spill] sm:$0xff] %v13863_v46  ;;  %v5416_v45 = vsel %vm18281_vm11, %v5415_v59, %v5411_v13  ;;  %5121 = vadd.xlane.f32.xlu0 %v13863_v46  ;;  %v4732_v61 = vadd.f32 %v18286_v40, %v18282_v8  ;;  %v13882_v37 = vmul.f32 0.6931472, %v13553_v29  ;;  %v2415_v19 = vmul.f32 %v2287_v21, %v18287_v54  ;;  %v18289_v59 = vld [vmem:[#allocation255_spill] sm:$0xff]  ;;  %v18294_v29 = vld [vmem:[#allocation284_spill] sm:$0xff]  ;;  %v18295_v40 = vld [vmem:[#allocation150_spill] sm:$0xff] }
 0x47d   :  { %18280 = vst [vmem:[#allocation326_spill] sm:$0xff] %v13867_v22  ;;  %v2542_v13 = vand.u32 2147483647, %v2414_v48  ;;  %vm18288_vm8 = vcmask 458112   ;;  %5063 = vadd.xlane.f32.xlu1 %v13867_v22  ;;  %v18292_v8 = vld [vmem:[#allocation91_spill] sm:$0xff]  ;;  %v2302_v51 = vsub.f32 %v18294_v29, %v18162_v3  ;;  %v2444_v16 = vmul.f32 %v2316_v39, %v18295_v40  ;;  %v4942_v48 = vpop.xlane.xlu1 %4941  ;;  %v18302_v39 = vld [vmem:[#allocation232_spill] sm:$0xff] }
 0x47e   :  { %v5421_v18 = vsel %vm18288_vm8, %v5420_v24, %v5416_v45  ;;  %v18293_v33 = vsel %vm12557_vm7, %v18291_v38, %v18292_v8  ;;  %v5425_v21 = vrot.slane %v4940_v27, %v13608_v44  ;;  %v13899_v54 = vmul.f32 %v4732_v61, %v2556_v62  ;;  %v18297_v45 = vld [vmem:[#allocation50_spill] sm:$0xff]  ;;  %v18300_v38 = vld [vmem:[#allocation217_spill] sm:$0xff]  ;;  %v4944_v40 = vpop.xlane.xlu0 %4943 }
 0x47f   :  { %v4747_v0 = vadd.f32 %v18293_v33, %v18289_v59  ;;  %v2557_v24 = vand.u32 2147483647, %v2429_v11  ;;  %v2317_v22 = vsub.f32 %v18297_v45, %v18185_v26  ;;  %v5430_v63 = vrot.slane %v4942_v48, %v13616_v2  ;;  %v18303_v27 = vld [vmem:[#allocation233_spill] sm:$0xff]  ;;  %v18309_v45 = vld [vmem:[#allocation339_spill] sm:$0xff] }
 0x480   :  { %18296 = vst [vmem:[#allocation26_spill] sm:$0xff] %v13899_v54  ;;  %vm18299_vm4 = vcmask 523712   ;;  %5093 = vadd.xlane.f32.xlu0 %v13899_v54  ;;  %v18304_v33 = vsel %vm12573_vm0, %v18302_v39, %v18303_v27  ;;  %v13919_v61 = vmul.f32 %v18208_v52, %v4573_v15  ;;  %vm18306_vm7 = vcmask 589312   ;;  %v18312_v27 = vld [vmem:[#allocation118_spill] sm:$0xff] }
 0x481   :  { %v13904_v46 = vmul.f32 %v4747_v0, %v2571_v36  ;;  %v5426_v59 = vsel %vm18299_vm4, %v5425_v21, %v5421_v18  ;;  %v4718_v62 = vadd.f32 %v18304_v33, %v18300_v38  ;;  %v2543_v36 = vand.u32 2147483647, %v2415_v19  ;;  %v18305_v18 = vld [vmem:[#allocation236_spill] sm:$0xff]  ;;  %v18307_v21 = vld [vmem:[#allocation301_spill] sm:$0xff]  ;;  %v18310_v38 = vld [vmem:[#allocation158_spill] sm:$0xff]  ;;  %v4946_v11 = vpop.xlane.xlu1 %4945 }
 0x482   :  { %v2288_v0 = vsub.f32 %v18305_v18, %v18138_v12  ;;  %v5431_v29 = vsel %vm18306_vm7, %v5430_v63, %v5426_v59  ;;  %v18311_v8 = vsel %vm12622_vm9, %v18309_v45, %v18310_v38  ;;  %v2430_v33 = vmul.f32 %v2302_v51, %v18312_v27  ;;  %v18314_v63 = vld [vmem:[#allocation308_spill] sm:$0xff]  ;;  %v18315_v18 = vld [vmem:[#allocation149_spill] sm:$0xff]  ;;  %v18318_v51 = vld [vmem:[#allocation350_spill] sm:$0xff] }
 0x483   :  { %18298 = vst [vmem:[#allocation204_spill] sm:$0xff] %v13904_v46  ;;  %5123 = vadd.xlane.f32.xlu1 %v13904_v46  ;;  %v4733_v39 = vadd.f32 %v18311_v8, %v18307_v21  ;;  %v2572_v15 = vand.u32 2147483647, %v2444_v16  ;;  %v5435_v19 = vrot.slane %v4944_v40, %v13638_v28  ;;  %v13933_v54 = vmul.f32 %v4718_v62, %v2542_v13  ;;  %v18319_v16 = vld [vmem:[#allocation296_spill] sm:$0xff] }
 0x484   :  { %v2303_v59 = vsub.f32 %v18314_v63, %v18162_v3  ;;  %v2445_v46 = vmul.f32 %v2317_v22, %v18315_v18  ;;  %v5440_v2 = vrot.slane %v4946_v11, %v13646_v10  ;;  %vm18317_vm0 = vcmask 654912   ;;  %v18321_v40 = vld [vmem:[#allocation108_spill] sm:$0xff]  ;;  %v18325_v22 = vld [vmem:[#allocation353_spill] sm:$0xff]  ;;  %v18328_v63 = vld [vmem:[#allocation234_spill] sm:$0xff] }
 0x485   :  { %18313 = vst [vmem:[#allocation21_spill] sm:$0xff] %v13933_v54  ;;  %v13939_v48 = vmul.f32 %v4733_v39, %v2557_v24  ;;  %v5436_v45 = vsel %vm18317_vm0, %v5435_v19, %v5431_v29  ;;  %5065 = vadd.xlane.f32.xlu0 %v13933_v54  ;;  %vm18320_vm9 = vnez %v18319_v16  ;;  %v18322_v21 = vld [vmem:[#allocation280_spill] sm:$0xff]  ;;  %v2289_v11 = vsub.f32 %v18325_v22, %v18138_v12  ;;  %v18326_v24 = vld [vmem:[#allocation99_spill] sm:$0xff]  ;;  %v4948_v19 = vpop.xlane.xlu0 %4947  ;;  %v18329_v18 = vld [vmem:[#allocation134_spill] sm:$0xff]  ;;  %v4950_v28 = vpop.xlane.xlu1 %4949 }
 0x486   :  { %v18323_v13 = vsel %vm18320_vm9, %v18321_v40, %v18322_v21  ;;  %v18324_v38 = vld [vmem:[#allocation336_spill] sm:$0xff]  ;;  %v2416_v39 = vmul.f32 %v2288_v0, %v18326_v24  ;;  %vm18327_vm5 = vcmask 720512   ;;  %vm18330_vm6 = vnez %v18329_v18  ;;  %v18331_v16 = vld [vmem:[#allocation253_spill] sm:$0xff]  ;;  %v18332_v40 = vld [vmem:[#allocation135_spill] sm:$0xff] }
 0x487   :  { %18316 = vst [vmem:[#allocation314_spill] sm:$0xff] %v13939_v48  ;;  %v4748_v62 = vadd.f32 %v18323_v13, %v18318_v51  ;;  %v4443_v8 = vadd.f32 1.0, %v18324_v38  ;;  %v4446_v27 = vmul.f32 -0.5, %v18324_v38  ;;  %v5441_v29 = vsel %vm18327_vm5, %v5440_v2, %v5436_v45  ;;  %5095 = vadd.xlane.f32.xlu1 %v13939_v48  ;;  %v18334_v54 = vld [vmem:[#allocation111_spill] sm:$0xff]  ;;  %v18336_v2 = vld [vmem:[#allocation297_spill] sm:$0xff] }
 0x488   :  { %v18333_v51 = vsel %vm18330_vm6, %v18331_v16, %v18332_v40  ;;  %v2558_v13 = vand.u32 2147483647, %v2430_v33  ;;  %v2318_v10 = vsub.f32 %v18334_v54, %v18185_v26  ;;  %v5445_v22 = vrot.slane %v4948_v19, %v13664_v20  ;;  %v18338_v33 = vld [vmem:[#allocation307_spill] sm:$0xff]  ;;  %v18341_v54 = vld [vmem:[#allocation193_spill] sm:$0xff] }
 0x489   :  { %v4719_v21 = vadd.f32 %v18333_v51, %v18328_v63  ;;  %v13965_v0 = vmul.f32 %v4748_v62, %v2572_v15  ;;  %v2431_v45 = vmul.f32 %v2303_v59, %v18336_v2  ;;  %v2573_v24 = vand.u32 2147483647, %v2445_v46  ;;  %v18339_v63 = vld [vmem:[#allocation33_spill] sm:$0xff]  ;;  %v18344_v46 = vld [vmem:[#allocation72_spill] sm:$0xff]  ;;  %v18346_v51 = vld [vmem:[#allocation262_spill] sm:$0xff] }
 0x48a   :  { %v5450_v48 = vrot.slane %v4950_v28, %v13672_v25  ;;  %v5446_v18 = vsel %vm5358_vm14, %v5445_v22, %v5441_v29  ;;  %vm18340_vm11 = vnez %v18339_v63  ;;  %v18342_v16 = vld [vmem:[#allocation89_spill] sm:$0xff]  ;;  %v13980_v15 = vmul.f32 0.6931472, %v13589_v4  ;;  %v18345_v28 = vld [vmem:[#allocation116_spill] sm:$0xff]  ;;  %v4952_v29 = vpop.xlane.xlu0 %4951  ;;  %v18349_v22 = vld [vmem:[#allocation283_spill] sm:$0xff] }
 0x48b   :  { %18335 = vst [vmem:[#allocation315_spill] sm:$0xff] %v13965_v0  ;;  %v13969_v44 = vmul.f32 %v4719_v21, %v2543_v36  ;;  %5125 = vadd.xlane.f32.xlu0 %v13965_v0  ;;  %v18343_v19 = vsel %vm18340_vm11, %v18341_v54, %v18342_v16  ;;  %6691 = vlog2.f32 %v4443_v8  ;;  %v2417_v59 = vmul.f32 %v2289_v11, %v18344_v46  ;;  %v18347_v21 = vld [vmem:[#allocation38_spill] sm:$0xff]  ;;  %v18350_v2 = vld [vmem:[#allocation221_spill] sm:$0xff]  ;;  %v4954_v16 = vpop.xlane.xlu1 %4953 }
 0x48c   :  { %v4734_v40 = vadd.f32 %v18343_v19, %v18338_v33  ;;  %v2304_v36 = vsub.f32 %v18345_v28, %v18162_v3  ;;  %v5451_v62 = vsel %vm5365_vm2, %v5450_v48, %v5446_v18  ;;  %vm18348_vm8 = vnez %v18347_v21  ;;  %v18352_v54 = vld [vmem:[#allocation270_spill] sm:$0xff]  ;;  %v18354_v48 = vld [vmem:[#allocation229_spill] sm:$0xff] }
 0x48d   :  { %18337 = vst [vmem:[#allocation112_spill] sm:$0xff] %v13969_v44  ;;  %5067 = vadd.xlane.f32.xlu1 %v13969_v44  ;;  %v18351_v33 = vsel %vm18348_vm8, %v18349_v22, %v18350_v2  ;;  %v2544_v4 = vand.u32 2147483647, %v2416_v39  ;;  %v2446_v8 = vmul.f32 %v2318_v10, %v18352_v54  ;;  %v5455_v11 = vrot.slane %v4952_v29, %v13689_v43  ;;  %v18359_v39 = vld [vmem:[#allocation379_spill] sm:$0xff]  ;;  %v18367_v54 = vld [vmem:[#allocation121_spill] sm:$0xff] }
 0x48e   :  { %v4749_v63 = vadd.f32 %v18351_v33, %v18346_v51  ;;  %v13995_v19 = vmul.f32 %v4734_v40, %v2558_v13  ;;  %v2559_v46 = vand.u32 2147483647, %v2431_v45  ;;  %v2319_v18 = vsub.f32 %v18354_v48, %v18185_v26  ;;  %v18360_v13 = vld [vmem:[#allocation17_spill] sm:$0xff]  ;;  %v18363_v40 = vld [vmem:[#allocation322_spill] sm:$0xff]  ;;  %v18368_v48 = vld [vmem:[#allocation127_spill] sm:$0xff] }
 0x48f   :  { %v5460_v28 = vrot.slane %v4954_v16, %v13705_v32  ;;  %v18356_v21 = vand.u32 2147483647, %v18103_v1  ;;  %v5456_v10 = vsel %vm5372_vm12, %v5455_v11, %v5451_v62  ;;  %vm18361_vm7 = vnez %v18360_v13  ;;  %v18362_v45 = vld [vmem:[#allocation293_spill] sm:$0xff]  ;;  %v18366_v1 = vld [vmem:[#allocation63_spill] sm:$0xff]  ;;  %v4956_v11 = vpop.xlane.xlu0 %4955 }
 0x490   :  { %18353 = vst [vmem:[#allocation306_spill] sm:$0xff] %v13995_v19  ;;  %v14000_v44 = vmul.f32 %v4749_v63, %v2573_v24  ;;  %5097 = vadd.xlane.f32.xlu0 %v13995_v19  ;;  %v18364_v29 = vsel %vm18361_vm7, %v18362_v45, %v18363_v40  ;;  %v14016_v2 = vadd.f32 1.0, %v4446_v27  ;;  %v18365_v24 = vld [vmem:[#allocation73_spill] sm:$0xff]  ;;  %v2290_v63 = vsub.f32 %v18366_v1, %v18138_v12  ;;  %v18371_v45 = vld [vmem:[#allocation363_spill] sm:$0xff]  ;;  %v4958_v19 = vpop.xlane.xlu1 %4957 }
 0x491   :  { %vm14004_vm4 = vcmp.lt.f32.partialorder %v18356_v21, 0.0004427343  ;;  %v4720_v22 = vadd.f32 %v18364_v29, %v18359_v39  ;;  %v4578_v33 = vadd.f32 1.0, %v18365_v24  ;;  %v2432_v16 = vmul.f32 %v2304_v36, %v18367_v54  ;;  %v18370_v13 = vld [vmem:[#allocation97_spill] sm:$0xff] }
 0x492   :  { %18355 = vst [vmem:[#allocation310_spill] sm:$0xff] %v14000_v44  ;;  %v5461_v62 = vsel %vm5379_vm13, %v5460_v28, %v5456_v10  ;;  %5127 = vadd.xlane.f32.xlu1 %v14000_v44  ;;  %v18372_v39 = vsel %vm12869_vm10, %v18370_v13, %v18371_v45  ;;  %v2574_v40 = vand.u32 2147483647, %v2446_v8  ;;  %vm5941_vm0 = vcmask 1041409   ;;  %v18374_v28 = vld [vmem:[#allocation123_spill] sm:$0xff]  ;;  %v18375_v54 = vld [vmem:[#allocation313_spill] sm:$0xff] }
 0x493   :  { %v4735_v27 = vadd.f32 %v18372_v39, %v18368_v48  ;;  %v5465_v29 = vrot.slane %v4956_v11, %v13728_v35  ;;  %v14031_v1 = vmul.f32 %v4720_v22, %v2544_v4  ;;  %v2545_v36 = vand.u32 2147483647, %v2417_v59  ;;  %v18377_v21 = vld [vmem:[#allocation241_spill] sm:$0xff]  ;;  %v18379_v8 = vld [vmem:[#allocation295_spill] sm:$0xff] }
 0x494   :  { %v2305_v10 = vsub.f32 %v18374_v28, %v18162_v3  ;;  %v2447_v44 = vmul.f32 %v2319_v18, %v18375_v54  ;;  %v2291_v32 = vsub.f32 %v18377_v21, %v18138_v12  ;;  %vm18378_vm10 = vcmask 1048512   ;;  %v18380_v11 = vld [vmem:[#allocation355_spill] sm:$0xff]  ;;  %v18382_v4 = vld [vmem:[#allocation201_spill] sm:$0xff]  ;;  %v4960_v12 = vpop.xlane.xlu0 %4959  ;;  %v18390_v28 = vld [vmem:[#allocation104_spill] sm:$0xff] }
 0x495   :  { %18373 = vst [vmem:[#allocation222_spill] sm:$0xff] %v14031_v1  ;;  %v14036_v0 = vmul.f32 %v4735_v27, %v2559_v46  ;;  %v5466_v48 = vsel %vm18378_vm10, %v5465_v29, %v5461_v62  ;;  %5069 = vadd.xlane.f32.xlu0 %v14031_v1  ;;  %vm18381_vm9 = vnez %v18380_v11  ;;  %v18383_v22 = vld [vmem:[#allocation321_spill] sm:$0xff]  ;;  %6693 = vlog2.f32 %v4578_v33  ;;  %v18385_v45 = vld [vmem:[#allocation79_spill] sm:$0xff]  ;;  %v18386_v62 = vld [vmem:[#allocation260_spill] sm:$0xff]  ;;  %v4962_v11 = vpop.xlane.xlu1 %4961 }
 0x496   :  { %v18384_v59 = vsel %vm18381_vm9, %v18382_v4, %v18383_v22  ;;  %v2418_v39 = vmul.f32 %v2290_v63, %v18385_v45  ;;  %v2560_v18 = vand.u32 2147483647, %v2432_v16  ;;  %v14051_v46 = vsel %vm5941_vm0, %v5466_v48, %v13763_v30  ;;  %v18387_v27 = vld [vmem:[#allocation238_spill] sm:$0xff]  ;;  %v18389_v29 = vld [vmem:[#allocation199_spill] sm:$0xff]  ;;  %v18394_v48 = vld [vmem:[#allocation248_spill] sm:$0xff] }
 0x497   :  { %18376 = vst [vmem:[#allocation341_spill] sm:$0xff] %v14036_v0  ;;  %v4750_v13 = vadd.f32 %v18384_v59, %v18379_v8  ;;  %5099 = vadd.xlane.f32.xlu1 %v14036_v0  ;;  %vm18388_vm5 = vnez %v18387_v27  ;;  %v18392_v8 = vld [vmem:[#allocation325_spill] sm:$0xff]  ;;  %v5470_v63 = vrot.slane %v4958_v19, %v13516_v34  ;;  %v5474_v16 = vrot.slane %v4960_v12, %v13524_v23  ;;  %v18400_v19 = vld [vmem:[#allocation151_spill] sm:$0xff] }
 0x498   :  { %v18391_v54 = vsel %vm18388_vm5, %v18389_v29, %v18390_v28  ;;  %v2320_v33 = vsub.f32 %v18392_v8, %v18185_v26  ;;  %v2433_v4 = vmul.f32 %v2305_v10, %v18394_v48  ;;  %v2575_v22 = vand.u32 2147483647, %v2447_v44  ;;  %v18398_v29 = vld [vmem:[#allocation191_spill] sm:$0xff]  ;;  %v18401_v28 = vld [vmem:[#allocation312_spill] sm:$0xff]  ;;  %v18406_v10 = vld [vmem:[#allocation373_spill] sm:$0xff]  ;;  %v4964_v48 = vpop.xlane.xlu0 %4963 }
 0x499   :  { %v4721_v21 = vadd.f32 %v18391_v54, %v18386_v62  ;;  %v14064_v30 = vmul.f32 %v4750_v13, %v2574_v40  ;;  %v5479_v59 = vrot.slane %v4962_v11, %v13536_v17  ;;  %vm18396_vm6 = vcmask 130112   ;;  %v18397_v62 = vld [vmem:[#allocation128_spill] sm:$0xff]  ;;  %v18407_v8 = vld [vmem:[#allocation226_spill] sm:$0xff]  ;;  %v18416_v1 = vld [vmem:[#allocation161_spill] sm:$0xff] }
 0x49a   :  { %v5475_v27 = vsel %vm18396_vm6, %v5474_v16, %v5470_v63  ;;  %vm18399_vm11 = vnez %v18398_v29  ;;  %v18403_v40 = vand.u32 2147483647, %v18208_v52  ;;  %v4587_v13 = vadd.f32 1.0, %v18406_v10  ;;  %v18410_v29 = vld [vmem:[#allocation268_spill] sm:$0xff]  ;;  %v18413_v52 = vld [vmem:[#allocation237_spill] sm:$0xff] }
 0x49b   :  { %18393 = vst [vmem:[#allocation207_spill] sm:$0xff] %v14064_v30  ;;  %v14068_v45 = vmul.f32 %v4721_v21, %v2545_v36  ;;  %5129 = vadd.xlane.f32.xlu0 %v14064_v30  ;;  %v18402_v12 = vsel %vm18399_vm11, %v18400_v19, %v18401_v28  ;;  %v6692_v21 = vpop.eup %6691  ;;  %v2419_v63 = vmul.f32 %v2291_v32, %v18407_v8  ;;  %v2546_v16 = vand.u32 2147483647, %v2418_v39  ;;  %v18412_v19 = vld [vmem:[#allocation328_spill] sm:$0xff]  ;;  %v4966_v39 = vpop.xlane.xlu1 %4965 }
 0x49c   :  { %v4736_v54 = vadd.f32 %v18402_v12, %v18397_v62  ;;  %vm14084_vm8 = vcmp.lt.f32.partialorder %v18403_v40, 0.0004427343  ;;  %vm18408_vm7 = vcmask 195712   ;;  %v18409_v62 = vld [vmem:[#allocation169_spill] sm:$0xff]  ;;  %vm18411_vm10 = vnez %v18410_v29  ;;  %v18415_v40 = vld [vmem:[#allocation264_spill] sm:$0xff] }
 0x49d   :  { %18395 = vst [vmem:[#allocation27_spill] sm:$0xff] %v14068_v45  ;;  %v5480_v11 = vsel %vm18408_vm7, %v5479_v59, %v5475_v27  ;;  %5071 = vadd.xlane.f32.xlu1 %v14068_v45  ;;  %v18414_v28 = vsel %vm18411_vm10, %v18412_v19, %v18413_v52  ;;  %v2306_v44 = vsub.f32 %v18415_v40, %v18162_v3  ;;  %v2561_v59 = vand.u32 2147483647, %v2433_v4  ;;  %v18417_v27 = vld [vmem:[#allocation364_spill] sm:$0xff]  ;;  %v18419_v19 = vld [vmem:[#allocation387_spill] sm:$0xff] }
 0x49e   :  { %v4751_v12 = vadd.f32 %v18414_v28, %v18409_v62  ;;  %v2448_v0 = vmul.f32 %v2320_v33, %v18416_v1  ;;  %v5484_v32 = vrot.slane %v4964_v48, %v13550_v5  ;;  %v14102_v8 = vmul.f32 %v4736_v54, %v2560_v18  ;;  %v18423_v48 = vld [vmem:[#allocation265_spill] sm:$0xff] }
 0x49f   :  { %v2321_v45 = vsub.f32 %v18417_v27, %v18185_v26  ;;  %v5489_v29 = vrot.slane %v4966_v39, %v13558_v47  ;;  %vm18418_vm9 = vcmask 261312   ;;  %vm18420_vm5 = vnez %v18071_v31 }
 0x4a0   :  { %v14107_v30 = vmul.f32 %v4751_v12, %v2575_v22  ;;  %v5485_v62 = vsel %vm18418_vm9, %v5484_v32, %v5480_v11  ;;  %5101 = vadd.xlane.f32.xlu0 %v14102_v8  ;;  %v18421_v1 = vsel %vm18420_vm5, %v18106_v55, %v13411_v7  ;;  %v4449_v33 = vand.u32 2147483647, %v18324_v38  ;;  %v4968_v22 = vpop.xlane.xlu0 %4967  ;;  %v18425_v7 = vld [vmem:[#allocation290_spill] sm:$0xff]  ;;  %v18426_v55 = vld [vmem:[#allocation252_spill] sm:$0xff]  ;;  %v4970_v12 = vpop.xlane.xlu1 %4969  ;;  %v18428_v32 = vld [vmem:[#allocation167_spill] sm:$0xff] }
 0x4a1   :  { %v4722_v18 = vadd.f32 %v18421_v1, %v18419_v19  ;;  %6695 = vlog2.f32 %v4587_v13  ;;  %v2547_v4 = vand.u32 2147483647, %v2419_v63  ;;  %vm18422_vm6 = vcmask 326912   ;;  %v18434_v19 = vld [vmem:[#allocation386_spill] sm:$0xff] }
 0x4a2   :  { %v5490_v54 = vsel %vm18422_vm6, %v5489_v29, %v5485_v62  ;;  %5131 = vadd.xlane.f32.xlu1 %v14107_v30  ;;  %v18424_v11 = vsel %vm13694_vm15, %v18220_v50, %v13485_v41  ;;  %v4571_v52 = vmul.f32 0.6931472, %v13884_v60  ;;  %vm2962_vm11 = vcmp.lt.f32.partialorder %v18425_v7, 0.0  ;;  %v6694_v29 = vpop.eup %6693 }
 0x4a3   :  { %v4737_v31 = vadd.f32 %v18424_v11, %v18423_v48  ;;  %v2434_v28 = vmul.f32 %v2306_v44, %v18426_v55  ;;  %v2576_v13 = vand.u32 2147483647, %v2448_v0  ;;  %v5494_v63 = vrot.slane %v4968_v22, %v13578_v6  ;;  %v18431_v44 = vld [vmem:[#allocation28_spill] sm:$0xff] }
 0x4a4   :  { %v14130_v40 = vmul.f32 %v4722_v18, %v2546_v16  ;;  %v2307_v39 = vsub.f32 %v18428_v32, %v18162_v3  ;;  %v2449_v27 = vmul.f32 %v2321_v45, %v18429_v42  ;;  %v5499_v41 = vrot.slane %v4970_v12, %v13586_v57  ;;  %v4972_v62 = vpop.xlane.xlu0 %4971  ;;  %v4974_v48 = vpop.xlane.xlu1 %4973  ;;  %v18440_v11 = vld [vmem:[#allocation304_spill] sm:$0xff] }
 0x4a5   :  { %v14136_v50 = vmul.f32 %v4737_v31, %v2561_v59  ;;  %vm18430_vm15 = vcmask 392512   ;;  %v18432_v0 = vsel %vm13798_vm3, %v13422_v14, %v13847_v49  ;;  %v4448_v3 = vmul.f32 %v18324_v38, %v14016_v2  ;;  %v18438_v2 = vld [vmem:[#allocation324_spill] sm:$0xff]  ;;  %v18441_v31 = vld [vmem:[#allocation302_spill] sm:$0xff] }
 0x4a6   :  { %18427 = vst [vmem:[#allocation93_spill] sm:$0xff] %v14130_v40  ;;  %v5495_v60 = vsel %vm18430_vm15, %v5494_v63, %v5490_v54  ;;  %5073 = vadd.xlane.f32.xlu0 %v14130_v40  ;;  %v4752_v16 = vadd.f32 %v18432_v0, %v18431_v44  ;;  %v4581_v45 = vmul.f32 -0.5, %v18365_v24  ;;  %vm18433_vm7 = vcmask 458112   ;;  %v18439_v54 = vld [vmem:[#allocation133_spill] sm:$0xff]  ;;  %v18449_v44 = vld [vmem:[#allocation152_spill] sm:$0xff] }
 0x4a7   :  { %v5500_v59 = vsel %vm18433_vm7, %v5499_v41, %v5495_v60  ;;  %5103 = vadd.xlane.f32.xlu1 %v14136_v50  ;;  %v18435_v53 = vsel %vm13834_vm1, %v13488_v9, %v13882_v37  ;;  %v4577_v14 = vsel %vm14084_vm8, %v13919_v61, %v4571_v52  ;;  %vm14160_vm3 = vcmp.lt.f32.partialorder %v4449_v33, 0.0004427343  ;;  %v18444_v33 = vld [vmem:[#allocation287_spill] sm:$0xff]  ;;  %v18448_v41 = vld [vmem:[#allocation261_spill] sm:$0xff] }
 0x4a8   :  { %v4723_v1 = vadd.f32 %v18435_v53, %v18434_v19  ;;  %v2562_v38 = vand.u32 2147483647, %v2434_v28  ;;  %v2322_v18 = vsub.f32 %v18438_v2, %v18185_v26  ;;  %v5504_v22 = vrot.slane %v4972_v62, %v18439_v54  ;;  %v4976_v32 = vpop.xlane.xlu0 %4975  ;;  %v4978_v0 = vpop.xlane.xlu1 %4977  ;;  %v18455_v2 = vld [vmem:[#allocation180_spill] sm:$0xff] }
 0x4a9   :  { %v14167_v58 = vmul.f32 %v4752_v16, %v2576_v13  ;;  %v2435_v9 = vmul.f32 %v2307_v39, %v18440_v11  ;;  %v2577_v37 = vand.u32 2147483647, %v2449_v27  ;;  %v5509_v55 = vrot.slane %v4974_v48, %v18441_v31  ;;  %v18458_v11 = vld [vmem:[#allocation137_spill] sm:$0xff] }
 0x4aa   :  { %v14171_v36 = vmul.f32 %v4723_v1, %v2547_v4  ;;  %vm18443_vm1 = vcmask 523712   ;;  %v18445_v52 = vsel %vm14004_vm4, %v13774_v56, %v13980_v15  ;;  %v4445_v13 = vmul.f32 0.6931472, %v6692_v21  ;;  %v18447_v4 = vld [vmem:[#allocation333_spill] sm:$0xff]  ;;  %v18451_v21 = vld [vmem:[#allocation143_spill] sm:$0xff] }
 0x4ab   :  { %v5505_v61 = vsel %vm18443_vm1, %v5504_v22, %v5500_v59  ;;  %5133 = vadd.xlane.f32.xlu0 %v14167_v58  ;;  %v4738_v28 = vadd.f32 %v18445_v52, %v18444_v33  ;;  %v4582_v63 = vadd.f32 1.0, %v4581_v45  ;;  %vm18446_vm8 = vcmask 589312   ;;  %v18452_v59 = vld [vmem:[#allocation46_spill] sm:$0xff] }
 0x4ac   :  { %18442 = vst [vmem:[#allocation8_spill] sm:$0xff] %v14171_v36  ;;  %v5510_v12 = vsel %vm18446_vm8, %v5509_v55, %v5505_v61  ;;  %5075 = vadd.xlane.f32.xlu1 %v14171_v36  ;;  %v4753_v39 = vadd.f32 %v4577_v14, %v18447_v4  ;;  %v4580_v42 = vmul.f32 0.6931472, %v6694_v29  ;;  %v4584_v27 = vand.u32 2147483647, %v18365_v24  ;;  %v18453_v29 = vld [vmem:[#allocation285_spill] sm:$0xff]  ;;  %v4980_v48 = vpop.xlane.xlu0 %4979 }
 0x4ad   :  { %v2450_v60 = vmul.f32 %v2322_v18, %v18448_v41  ;;  %v5514_v51 = vrot.slane %v4976_v32, %v18449_v44  ;;  %v14187_v16 = vmul.f32 %v4738_v28, %v2562_v38  ;;  %v4590_v56 = vmul.f32 -0.5, %v18406_v10  ;;  %v18459_v61 = vld [vmem:[#allocation173_spill] sm:$0xff] }
 0x4ae   :  { %v2563_v15 = vand.u32 2147483647, %v2435_v9  ;;  %v2323_v45 = vsub.f32 %v18451_v21, %v18185_v26  ;;  %v5519_v62 = vrot.slane %v4978_v0, %v18452_v59  ;;  %v14193_v19 = vmul.f32 %v4753_v39, %v2577_v37  ;;  %v6696_v38 = vpop.eup %6695  ;;  %v18465_v21 = vld [vmem:[#allocation370_spill] sm:$0xff] }
 0x4af   :  { %18450 = vst [vmem:[#allocation211_spill] sm:$0xff] %v14187_v16  ;;  %vm2963_vm4 = vcmp.lt.f32.partialorder %v18453_v29, 0.0  ;;  %vm18454_vm10 = vcmask 654912   ;;  %5105 = vadd.xlane.f32.xlu0 %v14187_v16  ;;  %v4451_v1 = vsel %vm14160_vm3, %v4448_v3, %v4445_v13  ;;  %v4583_v14 = vmul.f32 %v18365_v24, %v4582_v63  ;;  %v4982_v3 = vpop.xlane.xlu1 %4981  ;;  %v18461_v63 = vld [vmem:[#allocation62_spill] sm:$0xff]  ;;  %v18466_v29 = vld [vmem:[#allocation215_spill] sm:$0xff] }
 0x4b0   :  { %v5515_v53 = vsel %vm18454_vm10, %v5514_v51, %v5510_v12  ;;  %v18456_v18 = vand.u32 2147483647, %v18455_v2  ;;  %vm18457_vm9 = vcmask 720512   ;;  %5135 = vadd.xlane.f32.xlu1 %v14193_v19  ;;  %v4739_v9 = vadd.f32 %v4451_v1, %v18458_v11  ;;  %v4984_v39 = vpop.xlane.xlu0 %4983 }
 0x4b1   :  { %v5520_v22 = vsel %vm18457_vm9, %v5519_v62, %v5515_v53  ;;  %vm4585_vm5 = vcmp.lt.f32.partialorder %v4584_v27, 0.0004427343  ;;  %v2578_v37 = vand.u32 2147483647, %v2450_v60  ;;  %v5524_v49 = vrot.slane %v4980_v48, %v13664_v20 }
 0x4b2   :  { %v3090_v26 = vsel %vm2962_vm11, %v18456_v18, 0.0  ;;  %v4586_v55 = vsel %vm4585_vm5, %v4583_v14, %v4580_v42  ;;  %v4591_v24 = vadd.f32 1.0, %v4590_v56  ;;  %v2451_v33 = vmul.f32 %v2323_v45, %v18459_v61  ;;  %v18462_v42 = vld [vmem:[#allocation179_spill] sm:$0xff] }
 0x4b3   :  { %v5529_v52 = vrot.slane %v4982_v3, %v13672_v25  ;;  %v14211_v7 = vmul.f32 %v4739_v9, %v2563_v15  ;;  %v4593_v28 = vand.u32 2147483647, %v18406_v10  ;;  %v5525_v13 = vsel %vm5358_vm14, %v5524_v49, %v5520_v22  ;;  %5077 = vadd.xlane.f32.xlu0 %v18461_v63  ;;  %v4986_v51 = vpop.xlane.xlu1 %4985  ;;  %v18469_v22 = vld [vmem:[#allocation96_spill] sm:$0xff] }
 0x4b4   :  { %v4754_v12 = vadd.f32 %v4586_v55, %v3090_v26  ;;  %v4589_v32 = vmul.f32 0.6931472, %v6696_v38  ;;  %v18463_v27 = vand.u32 2147483647, %v18462_v42  ;;  %v5534_v60 = vrot.slane %v4984_v39, %v13689_v43  ;;  %v4988_v14 = vpop.xlane.xlu0 %4987 }
 0x4b5   :  { %18460 = vst [vmem:[#allocation25_spill] sm:$0xff] %v14211_v7  ;;  %v5530_v4 = vsel %vm5365_vm2, %v5529_v52, %v5525_v13  ;;  %5107 = vadd.xlane.f32.xlu1 %v14211_v7  ;;  %v4592_v56 = vmul.f32 %v18406_v10, %v4591_v24  ;;  %v2579_v15 = vand.u32 2147483647, %v2451_v33  ;;  %v5539_v45 = vrot.slane %v4986_v51, %v18465_v21  ;;  %v18471_v24 = vld [vmem:[#allocation192_spill] sm:$0xff]  ;;  %v18473_v33 = vld [vmem:[#allocation334_spill] sm:$0xff]  ;;  %v18479_v51 = vld [vmem:[#allocation277_spill] sm:$0xff] }
 0x4b6   :  { %v3091_v41 = vsel %vm2963_vm4, %v18463_v27, 0.0  ;;  %v14223_v0 = vmul.f32 %v4754_v12, %v2578_v37  ;;  %vm4594_vm6 = vcmp.lt.f32.partialorder %v4593_v28, 0.0004427343  ;;  %v5535_v62 = vsel %vm5372_vm12, %v5534_v60, %v5530_v4  ;;  %v18475_v12 = vld [vmem:[#allocation340_spill] sm:$0xff]  ;;  %v18477_v4 = vld [vmem:[#allocation278_spill] sm:$0xff] }
 0x4b7   :  { %v4595_v53 = vsel %vm4594_vm6, %v4592_v56, %v4589_v32  ;;  %v5540_v1 = vsel %vm5379_vm13, %v5539_v45, %v5535_v62  ;;  %vm5943_vm11 = vcmask 1042434   ;;  %v5544_v2 = vrot.slane %v4988_v14, %v13728_v35  ;;  %v4990_v18 = vpop.xlane.xlu1 %4989  ;;  %v18483_v14 = vld [vmem:[#allocation81_spill] sm:$0xff] }
 0x4b8   :  { %18464 = vst [vmem:[#allocation182_spill] sm:$0xff] %v14223_v0  ;;  %5137 = vadd.xlane.f32.xlu0 %v14223_v0  ;;  %v4755_v38 = vadd.f32 %v4595_v53, %v3091_v41  ;;  %vm18468_vm15 = vcmask 1048512   ;;  %v4992_v11 = vpop.xlane.xlu0 %4991  ;;  %v5549_v9 = vrot.slane %v4990_v18, %v13516_v34  ;;  %vm18470_vm7 = vcmask 130112  }
 0x4b9   :  { %5079 = vadd.xlane.f32.xlu1 %v18466_v29  ;;  %v5545_v26 = vsel %vm18468_vm15, %v5544_v2, %v5540_v1  ;;  %v5553_v37 = vrot.slane %v4992_v11, %v13524_v23  ;;  %vm18472_vm3 = vcmask 195712   ;;  %vm18474_vm1 = vcmask 261312   ;;  %v18485_v2 = vld [vmem:[#allocation366_spill] sm:$0xff] }
 0x4ba   :  { %v14232_v10 = vmul.f32 %v4755_v38, %v2579_v15  ;;  %v14238_v48 = vsel %vm5943_vm11, %v5545_v26, %v14051_v46  ;;  %vm18476_vm8 = vcmask 326912   ;;  %vm18478_vm4 = vcmask 392512   ;;  %v18481_v15 = vld [vmem:[#allocation376_spill] sm:$0xff] }
 0x4bb   :  { %v4994_v49 = vpop.xlane.xlu1 %4993  ;;  %v5554_v55 = vsel %vm18470_vm7, %v5553_v37, %v5549_v9  ;;  %vm18480_vm10 = vcmask 458112   ;;  %vm18482_vm9 = vcmask 523712   ;;  %vm18484_vm5 = vcmask 589312   ;;  %v18487_v37 = vld [vmem:[#allocation359_spill] sm:$0xff] }
 0x4bc   :  { %18467 = vst [vmem:[#allocation256_spill] sm:$0xff] %v14232_v10  ;;  %5109 = vadd.xlane.f32.xlu0 %v18469_v22  ;;  %v5558_v3 = vrot.slane %v4994_v49, %v13536_v17  ;;  %v4996_v46 = vpop.xlane.xlu0 %4995  ;;  %vm18486_vm6 = vcmask 654912   ;;  %vm18488_vm15 = vcmask 720512   ;;  %vm5945_vm7 = vcmask 1043459  }
 0x4bd   :  { %5139 = vadd.xlane.f32.xlu1 %v14232_v10  ;;  %v5563_v52 = vrot.slane %v4996_v46, %v13550_v5 }
 0x4be   :  { %v5559_v61 = vsel %vm18472_vm3, %v5558_v3, %v5554_v55  ;;  %vm18489_vm3 = vcmask 1048512  }
 0x4bf   :  { %v4998_v28 = vpop.xlane.xlu1 %4997  ;;  %v5564_v63 = vsel %vm18474_vm1, %v5563_v52, %v5559_v61  ;;  %vm18490_vm1 = vcmask 130112  }
 0x4c0   :  { %5081 = vadd.xlane.f32.xlu0 %v18471_v24  ;;  %v5568_v13 = vrot.slane %v4998_v28, %v13558_v47  ;;  %v5000_v39 = vpop.xlane.xlu0 %4999 }
 0x4c1   :  { %5111 = vadd.xlane.f32.xlu1 %v18473_v33  ;;  %v5573_v42 = vrot.slane %v5000_v39, %v13578_v6 }
 0x4c2   :  { %v5569_v32 = vsel %vm18476_vm8, %v5568_v13, %v5564_v63  ;;  %vm18491_vm8 = vcmask 195712  }
 0x4c3   :  { %v5002_v27 = vpop.xlane.xlu1 %5001  ;;  %v5574_v60 = vsel %vm18478_vm4, %v5573_v42, %v5569_v32  ;;  %vm18492_vm4 = vcmask 261312  }
 0x4c4   :  { %5141 = vadd.xlane.f32.xlu0 %v18475_v12  ;;  %v5578_v41 = vrot.slane %v5002_v27, %v13586_v57  ;;  %v5004_v45 = vpop.xlane.xlu0 %5003  ;;  %v6706_v27 = vmov 0.0  }
 0x4c5   :  { %5083 = vadd.xlane.f32.xlu1 %v18477_v4  ;;  %v5583_v62 = vrot.slane %v5004_v45, %v18439_v54  ;;  %53 = vst [vmem:[%s14616_s4] sm:$0xff] %v6706_v27 }
 0x4c6   :  { %v5579_v56 = vsel %vm18480_vm10, %v5578_v41, %v5574_v60  ;;  %vm18493_vm10 = vcmask 326912  }
 0x4c7   :  { %v5006_v53 = vpop.xlane.xlu1 %5005  ;;  %v5584_v29 = vsel %vm18482_vm9, %v5583_v62, %v5579_v56  ;;  %vm18494_vm9 = vcmask 392512  }
 0x4c8   :  { %5113 = vadd.xlane.f32.xlu0 %v18479_v51  ;;  %v5588_v1 = vrot.slane %v5006_v53, %v18441_v31  ;;  %v5008_v18 = vpop.xlane.xlu0 %5007 }
 0x4c9   :  { %5143 = vadd.xlane.f32.xlu1 %v18481_v15  ;;  %v5593_v26 = vrot.slane %v5008_v18, %v18449_v44 }
 0x4ca   :  { %v5589_v38 = vsel %vm18484_vm5, %v5588_v1, %v5584_v29  ;;  %vm18495_vm5 = vcmask 458112  }
 0x4cb   :  { %v5010_v22 = vpop.xlane.xlu1 %5009  ;;  %v5594_v9 = vsel %vm18486_vm6, %v5593_v26, %v5589_v38  ;;  %vm18496_vm6 = vcmask 523712  }
 0x4cc   :  { %5115 = vadd.xlane.f32.xlu0 %v18483_v14  ;;  %v5598_v11 = vrot.slane %v5010_v22, %v18452_v59  ;;  %v5012_v3 = vpop.xlane.xlu0 %5011 }
 0x4cd   :  { %5145 = vadd.xlane.f32.xlu1 %v18485_v2  ;;  %v5603_v55 = vrot.slane %v5012_v3, %v13664_v20 }
 0x4ce   :  { %v5599_v49 = vsel %vm18488_vm15, %v5598_v11, %v5594_v9  ;;  %vm18497_vm15 = vcmask 589312  }
 0x4cf   :  { %v5014_v24 = vpop.xlane.xlu1 %5013  ;;  %v5604_v33 = vsel %vm5358_vm14, %v5603_v55, %v5599_v49 }
 0x4d0   :  { %5147 = vadd.xlane.f32.xlu0 %v18487_v37  ;;  %v5608_v61 = vrot.slane %v5014_v24, %v13672_v25  ;;  %v5016_v52 = vpop.xlane.xlu0 %5015 }
 0x4d1   :  { %v5613_v28 = vrot.slane %v5016_v52, %v13689_v43 }
 0x4d2   :  { %v5609_v46 = vsel %vm5365_vm2, %v5608_v61, %v5604_v33 }
 0x4d3   :  { %v5018_v13 = vpop.xlane.xlu1 %5017  ;;  %v5614_v12 = vsel %vm5372_vm12, %v5613_v28, %v5609_v46 }
 0x4d4   :  { %v5618_v63 = vrot.slane %v5018_v13, %v18465_v21  ;;  %v5020_v4 = vpop.xlane.xlu0 %5019 }
 0x4d5   :  { %v5623_v39 = vrot.slane %v5020_v4, %v13728_v35 }
 0x4d6   :  { %v5619_v32 = vsel %vm5379_vm13, %v5618_v63, %v5614_v12 }
 0x4d7   :  { %v5022_v42 = vpop.xlane.xlu1 %5021  ;;  %v5624_v41 = vsel %vm18489_vm3, %v5623_v39, %v5619_v32  ;;  %vm18498_vm3 = vcmask 654912  }
 0x4d8   :  { %v5946_v60 = vsel %vm5945_vm7, %v5624_v41, %v14238_v48  ;;  %v5024_v51 = vpop.xlane.xlu0 %5023  ;;  %v5628_v56 = vrot.slane %v5022_v42, %v13516_v34 }
 0x4d9   :  { %v5632_v15 = vrot.slane %v5024_v51, %v13524_v23 }
 0x4db   :  { %v5026_v45 = vpop.xlane.xlu1 %5025  ;;  %v5633_v53 = vsel %vm18490_vm1, %v5632_v15, %v5628_v56  ;;  %vm18499_vm1 = vcmask 720512  }
 0x4dc   :  { %v5637_v62 = vrot.slane %v5026_v45, %v13536_v17  ;;  %v5028_v29 = vpop.xlane.xlu0 %5027 }
 0x4dd   :  { %v5642_v14 = vrot.slane %v5028_v29, %v13550_v5 }
 0x4de   :  { %v5638_v1 = vsel %vm18491_vm8, %v5637_v62, %v5633_v53  ;;  %vm5947_vm8 = vcmask 1044484  }
 0x4df   :  { %v5030_v38 = vpop.xlane.xlu1 %5029  ;;  %v5643_v48 = vsel %vm18492_vm4, %v5642_v14, %v5638_v1  ;;  %vm18500_vm4 = vcmask 1048512  }
 0x4e0   :  { %v5647_v2 = vrot.slane %v5030_v38, %v13558_v47  ;;  %v5032_v26 = vpop.xlane.xlu0 %5031 }
 0x4e1   :  { %v5652_v22 = vrot.slane %v5032_v26, %v13578_v6 }
 0x4e2   :  { %v5648_v18 = vsel %vm18493_vm10, %v5647_v2, %v5643_v48  ;;  %vm18501_vm10 = vcmask 130112  }
 0x4e3   :  { %v5034_v11 = vpop.xlane.xlu1 %5033  ;;  %v5653_v37 = vsel %vm18494_vm9, %v5652_v22, %v5648_v18  ;;  %vm18502_vm9 = vcmask 195712  }
 0x4e4   :  { %v5657_v9 = vrot.slane %v5034_v11, %v13586_v57  ;;  %v5036_v3 = vpop.xlane.xlu0 %5035 }
 0x4e5   :  { %v5662_v55 = vrot.slane %v5036_v3, %v18439_v54 }
 0x4e6   :  { %v5658_v49 = vsel %vm18495_vm5, %v5657_v9, %v5653_v37  ;;  %vm18503_vm5 = vmmov %vm18501_vm10 }
 0x4e7   :  { %v5038_v24 = vpop.xlane.xlu1 %5037  ;;  %v5663_v33 = vsel %vm18496_vm6, %v5662_v55, %v5658_v49  ;;  %vm18504_vm6 = vcmask 261312  }
 0x4e8   :  { %v5667_v61 = vrot.slane %v5038_v24, %v18441_v31  ;;  %v5040_v52 = vpop.xlane.xlu0 %5039 }
 0x4e9   :  { %v5672_v28 = vrot.slane %v5040_v52, %v18449_v44 }
 0x4ea   :  { %v5668_v46 = vsel %vm18497_vm15, %v5667_v61, %v5663_v33  ;;  %vm18505_vm15 = vmmov %vm18502_vm9 }
 0x4eb   :  { %v5042_v13 = vpop.xlane.xlu1 %5041  ;;  %v5673_v12 = vsel %vm18498_vm3, %v5672_v28, %v5668_v46  ;;  %vm18506_vm3 = vmmov %vm18503_vm5 }
 0x4ec   :  { %v5677_v63 = vrot.slane %v5042_v13, %v18452_v59  ;;  %v5044_v4 = vpop.xlane.xlu0 %5043 }
 0x4ed   :  { %v5682_v39 = vrot.slane %v5044_v4, %v13664_v20 }
 0x4ee   :  { %v5678_v32 = vsel %vm18499_vm1, %v5677_v63, %v5673_v12  ;;  %vm18507_vm1 = vcmask 326912  }
 0x4ef   :  { %v5046_v42 = vpop.xlane.xlu1 %5045  ;;  %v5683_v41 = vsel %vm5358_vm14, %v5682_v39, %v5678_v32 }
 0x4f0   :  { %v5687_v27 = vrot.slane %v5046_v42, %v13672_v25  ;;  %v5048_v56 = vpop.xlane.xlu0 %5047 }
 0x4f1   :  { %v5692_v15 = vrot.slane %v5048_v56, %v13689_v43 }
 0x4f2   :  { %v5688_v51 = vsel %vm5365_vm2, %v5687_v27, %v5683_v41 }
 0x4f3   :  { %v5050_v45 = vpop.xlane.xlu1 %5049  ;;  %v5693_v53 = vsel %vm5372_vm12, %v5692_v15, %v5688_v51 }
 0x4f4   :  { %v5697_v62 = vrot.slane %v5050_v45, %v18465_v21  ;;  %v5052_v29 = vpop.xlane.xlu0 %5051 }
 0x4f5   :  { %v5702_v14 = vrot.slane %v5052_v29, %v13728_v35 }
 0x4f6   :  { %v5698_v1 = vsel %vm5379_vm13, %v5697_v62, %v5693_v53 }
 0x4f7   :  { %v5054_v38 = vpop.xlane.xlu1 %5053  ;;  %v5703_v2 = vsel %vm18500_vm4, %v5702_v14, %v5698_v1  ;;  %vm18508_vm4 = vcmask 392512  }
 0x4f8   :  { %v14318_v48 = vsel %vm5947_vm8, %v5703_v2, %v5946_v60  ;;  %v5056_v18 = vpop.xlane.xlu0 %5055  ;;  %v5707_v26 = vrot.slane %v5054_v38, %v13516_v34 }
 0x4f9   :  { %v5711_v22 = vrot.slane %v5056_v18, %v13524_v23 }
 0x4fb   :  { %v5058_v11 = vpop.xlane.xlu1 %5057  ;;  %v5712_v37 = vsel %vm18501_vm10, %v5711_v22, %v5707_v26  ;;  %vm5949_vm10 = vcmask 1045509  }
 0x4fc   :  { %v5716_v9 = vrot.slane %v5058_v11, %v13536_v17  ;;  %v5086_v3 = vpop.xlane.xlu0 %5085 }
 0x4fd   :  { %v5786_v55 = vrot.slane %v5086_v3, %v13516_v34 }
 0x4fe   :  { %v5717_v49 = vsel %vm18502_vm9, %v5716_v9, %v5712_v37  ;;  %vm18509_vm9 = vmmov %vm18504_vm6 }
 0x4ff   :  { %v5088_v24 = vpop.xlane.xlu1 %5087 }
 0x500   :  { %v5790_v61 = vrot.slane %v5088_v24, %v13524_v23  ;;  %v5060_v33 = vpop.xlane.xlu0 %5059 }
 0x501   :  { %v5721_v46 = vrot.slane %v5060_v33, %v13550_v5 }
 0x502   :  { %v5791_v60 = vsel %vm18503_vm5, %v5790_v61, %v5786_v55  ;;  %vm18510_vm5 = vcmask 458112  }
 0x503   :  { %v5090_v52 = vpop.xlane.xlu1 %5089  ;;  %v5722_v13 = vsel %vm18504_vm6, %v5721_v46, %v5717_v49  ;;  %vm18511_vm6 = vcmask 523712  }
 0x504   :  { %v5795_v28 = vrot.slane %v5090_v52, %v13536_v17  ;;  %v5118_v12 = vpop.xlane.xlu0 %5117 }
 0x506   :  { %v5796_v63 = vsel %vm18505_vm15, %v5795_v28, %v5791_v60  ;;  %v5865_v60 = vrot.slane %v5118_v12, %v13516_v34  ;;  %vm18512_vm15 = vcmask 589312  }
 0x507   :  { %v5120_v32 = vpop.xlane.xlu1 %5119 }
 0x508   :  { %v5062_v4 = vpop.xlane.xlu0 %5061  ;;  %v5869_v33 = vrot.slane %v5120_v32, %v13524_v23 }
 0x509   :  { %v5726_v46 = vrot.slane %v5062_v4, %v13558_v47 }
 0x50a   :  { %v5870_v16 = vsel %vm18506_vm3, %v5869_v33, %v5865_v60  ;;  %vm18513_vm3 = vcmask 195712  }
 0x50b   :  { %v5092_v39 = vpop.xlane.xlu1 %5091  ;;  %v5727_v40 = vsel %vm18507_vm1, %v5726_v46, %v5722_v13 }
 0x50c   :  { %v5122_v42 = vpop.xlane.xlu0 %5121  ;;  %v5800_v10 = vrot.slane %v5092_v39, %v13550_v5 }
 0x50d   :  { %v5874_v12 = vrot.slane %v5122_v42, %v13536_v17 }
 0x50f   :  { %v5064_v27 = vpop.xlane.xlu1 %5063 }
 0x510   :  { %v5094_v41 = vpop.xlane.xlu0 %5093  ;;  %v5731_v28 = vrot.slane %v5064_v27, %v13578_v6  ;;  %v5801_v27 = vsel %vm18509_vm9, %v5800_v10, %v5796_v63 }
 0x511   :  { %v5805_v4 = vrot.slane %v5094_v41, %v13558_v47 }
 0x512   :  { %v5732_v32 = vsel %vm18508_vm4, %v5731_v28, %v5727_v40  ;;  %vm18514_vm4 = vcmask 654912  }
 0x513   :  { %v5124_v51 = vpop.xlane.xlu1 %5123 }
 0x514   :  { %v5066_v56 = vpop.xlane.xlu0 %5065 }
 0x515   :  { %v5736_v7 = vrot.slane %v5066_v56, %v13586_v57  ;;  %v5879_v56 = vrot.slane %v5124_v51, %v13550_v5  ;;  %v5875_v51 = vsel %vm18513_vm3, %v5874_v12, %v5870_v16  ;;  %vm18518_vm3 = vcmask 458112  }
 0x517   :  { %v5096_v15 = vpop.xlane.xlu1 %5095 }
 0x518   :  { %v5126_v45 = vpop.xlane.xlu0 %5125 }
 0x519   :  { %v5884_v60 = vrot.slane %v5126_v45, %v13558_v47  ;;  %v5806_v47 = vsel %vm18507_vm1, %v5805_v4, %v5801_v27  ;;  %v5880_v45 = vsel %vm18509_vm9, %v5879_v56, %v5875_v51  ;;  %vm18521_vm9 = vcmask 589312  }
 0x51b   :  { %v5068_v62 = vpop.xlane.xlu1 %5067 }
 0x51c   :  { %v14332_v53 = vpop.xlane.xlu0 %5097  ;;  %v5741_v36 = vrot.slane %v5068_v62, %v18439_v54  ;;  %v5737_v62 = vsel %vm18510_vm5, %v5736_v7, %v5732_v32  ;;  %vm18515_vm5 = vcmask 720512  }
 0x51d   :  { %v5815_v41 = vrot.slane %v14332_v53, %v13586_v57 }
 0x51e   :  { %v5742_v17 = vsel %vm18511_vm6, %v5741_v36, %v5737_v62  ;;  %vm18516_vm6 = vcmask 392512  }
 0x51f   :  { %v14334_v1 = vpop.xlane.xlu1 %5127 }
 0x520   :  { %v5070_v29 = vpop.xlane.xlu0 %5069  ;;  %v5889_v10 = vrot.slane %v14334_v1, %v13578_v6 }
 0x521   :  { %v5746_v34 = vrot.slane %v5070_v29, %v18441_v31  ;;  %v5810_v29 = vrot.slane %v5096_v15, %v13578_v6 }
 0x523   :  { %v14336_v14 = vpop.xlane.xlu1 %5099  ;;  %v5747_v5 = vsel %vm18512_vm15, %v5746_v34, %v5742_v17  ;;  %vm18517_vm15 = vmmov %vm18507_vm1 }
 0x524   :  { %v14338_v38 = vpop.xlane.xlu0 %5129  ;;  %v5820_v53 = vrot.slane %v14336_v14, %v18439_v54  ;;  %vm18519_vm1 = vmmov %vm18516_vm6 }
 0x525   :  { %v5894_v34 = vrot.slane %v14338_v38, %v13586_v57 }
 0x527   :  { %v5072_v2 = vpop.xlane.xlu1 %5071 }
 0x528   :  { %v5751_v39 = vrot.slane %v5072_v2, %v18449_v44  ;;  %v5811_v2 = vsel %vm18516_vm6, %v5810_v29, %v5806_v47  ;;  %vm18523_vm6 = vcmask 654912  }
 0x529   :  { %v14340_v18 = vpop.xlane.xlu0 %5101  ;;  %v5816_v33 = vsel %vm18518_vm3, %v5815_v41, %v5811_v2 }
 0x52a   :  { %v5752_v36 = vsel %vm18514_vm4, %v5751_v39, %v5747_v5  ;;  %v5825_v16 = vrot.slane %v14340_v18, %v18441_v31  ;;  %vm18520_vm4 = vcmask 523712  }
 0x52b   :  { %v14342_v26 = vpop.xlane.xlu1 %5131  ;;  %v5821_v4 = vsel %vm18520_vm4, %v5820_v53, %v5816_v33  ;;  %v4892_v53 = vld [vmem:[%s4891_s13] sm:$0xff] }
 0x52c   :  { %v5899_v39 = vrot.slane %v14342_v26, %v18439_v54  ;;  %v5826_v56 = vsel %vm18521_vm9, %v5825_v16, %v5821_v4 }
 0x52f   :  { %v5074_v22 = vpop.xlane.xlu0 %5073 }
 0x530   :  { %v14344_v11 = vpop.xlane.xlu1 %5103  ;;  %v5756_v13 = vrot.slane %v5074_v22, %v18452_v59  ;;  %v5885_v22 = vsel %vm18517_vm15, %v5884_v60, %v5880_v45  ;;  %vm18524_vm15 = vmmov %vm18518_vm3  ;;  %vm18525_vm3 = vcmask 720512  }
 0x531   :  { %v5890_v46 = vsel %vm18519_vm1, %v5889_v10, %v5885_v22  ;;  %v5830_v14 = vrot.slane %v14344_v11, %v18449_v44  ;;  %vm18526_vm1 = vmmov %vm18520_vm4 }
 0x532   :  { %v5757_v6 = vsel %vm18515_vm5, %v5756_v13, %v5752_v36  ;;  %vm18522_vm5 = vcmask 1048512   ;;  %vm18527_vm4 = vmmov %vm18521_vm9  ;;  %vm5951_vm9 = vcmask 1046534  }
 0x533   :  { %v5831_v13 = vsel %vm18523_vm6, %v5830_v14, %v5826_v56 }
 0x534   :  { %v14346_v9 = vpop.xlane.xlu0 %5133 }
 0x535   :  { %v5076_v37 = vpop.xlane.xlu1 %5075  ;;  %v5904_v57 = vrot.slane %v14346_v9, %v18441_v31  ;;  %v5895_v31 = vsel %vm18524_vm15, %v5894_v34, %v5890_v46  ;;  %vm18530_vm15 = vcmask 1048512  }
 0x536   :  { %v5761_v40 = vrot.slane %v5076_v37, %v13664_v20 }
 0x538   :  { %v14348_v49 = vpop.xlane.xlu0 %5105  ;;  %v5762_v37 = vsel %vm5358_vm14, %v5761_v40, %v5757_v6 }
 0x539   :  { %v14350_v3 = vpop.xlane.xlu1 %5135  ;;  %v5835_v12 = vrot.slane %v14348_v49, %v18452_v59 }
 0x53a   :  { %v5909_v54 = vrot.slane %v14350_v3, %v18449_v44  ;;  %v5900_v44 = vsel %vm18526_vm1, %v5899_v39, %v5895_v31 }
 0x53b   :  { %v5905_v17 = vsel %vm18527_vm4, %v5904_v57, %v5900_v44 }
 0x53c   :  { %v5078_v55 = vpop.xlane.xlu0 %5077 }
 0x53d   :  { %v5766_v7 = vrot.slane %v5078_v55, %v13672_v25 }
 0x53e   :  { %v14352_v24 = vpop.xlane.xlu1 %5107 }
 0x53f   :  { %v5840_v11 = vrot.slane %v14352_v24, %v13664_v20 }
 0x541   :  { %v14354_v61 = vpop.xlane.xlu0 %5137 }
 0x542   :  { %v5080_v52 = vpop.xlane.xlu1 %5079  ;;  %v5914_v9 = vrot.slane %v14354_v61, %v18452_v59 }
 0x543   :  { %v5771_v15 = vrot.slane %v5080_v52, %v13689_v43  ;;  %v5767_v52 = vsel %vm5365_vm2, %v5766_v7, %v5762_v37 }
 0x545   :  { %v14363_v0 = vpop.xlane.xlu0 %5109  ;;  %v5772_v18 = vsel %vm5372_vm12, %v5771_v15, %v5767_v52 }
 0x546   :  { %v14368_v23 = vpop.xlane.xlu1 %5139  ;;  %v5845_v38 = vrot.slane %v14363_v0, %v13672_v25  ;;  %v5836_v0 = vsel %vm18525_vm3, %v5835_v12, %v5831_v13 }
 0x547   :  { %v5841_v3 = vsel %vm5358_vm14, %v5840_v11, %v5836_v0 }
 0x548   :  { %v5846_v40 = vsel %vm5365_vm2, %v5845_v38, %v5841_v3 }
 0x549   :  { %v5082_v42 = vpop.xlane.xlu0 %5081 }
 0x54a   :  { %v5112_v63 = vpop.xlane.xlu1 %5111  ;;  %v5776_v1 = vrot.slane %v5082_v42, %v18465_v21 }
 0x54b   :  { %v5850_v26 = vrot.slane %v5112_v63, %v13689_v43 }
 0x54c   :  { %v5777_v27 = vsel %vm5379_vm13, %v5776_v1, %v5772_v18 }
 0x54d   :  { %v5142_v55 = vpop.xlane.xlu0 %5141  ;;  %v5851_v61 = vsel %vm5372_vm12, %v5850_v26, %v5846_v40 }
 0x54e   :  { %v5084_v28 = vpop.xlane.xlu1 %5083  ;;  %v5924_v42 = vrot.slane %v5142_v55, %v13672_v25 }
 0x54f   :  { %v5781_v32 = vrot.slane %v5084_v28, %v13728_v35 }
 0x551   :  { %v5782_v49 = vsel %vm18522_vm5, %v5781_v32, %v5777_v27  ;;  %v5114_v62 = vpop.xlane.xlu0 %5113  ;;  %vm18528_vm5 = vmmov %vm18523_vm6 }
 0x552   :  { %v5950_v24 = vsel %vm5949_vm10, %v5782_v49, %v14318_v48  ;;  %v5144_v29 = vpop.xlane.xlu1 %5143  ;;  %v5855_v60 = vrot.slane %v5114_v62, %v18465_v21  ;;  %v5919_v48 = vrot.slane %v14368_v23, %v13664_v20  ;;  %v5910_v59 = vsel %vm18528_vm5, %v5909_v54, %v5905_v17  ;;  %vm18529_vm6 = vmmov %vm18525_vm3 }
 0x553   :  { %v5929_v10 = vrot.slane %v5144_v29, %v13689_v43  ;;  %v5915_v20 = vsel %vm18529_vm6, %v5914_v9, %v5910_v59  ;;  %vm5953_vm3 = vcmask 1047559  }
 0x554   :  { %v5856_v23 = vsel %vm5379_vm13, %v5855_v60, %v5851_v61  ;;  %v5920_v25 = vsel %vm5358_vm14, %v5919_v48, %v5915_v20  ;;  %vm18531_vm14 = vmmov %vm18530_vm15 }
 0x555   :  { %v5116_v41 = vpop.xlane.xlu0 %5115  ;;  %v5925_v47 = vsel %vm5365_vm2, %v5924_v42, %v5920_v25 }
 0x556   :  { %v5860_v5 = vrot.slane %v5116_v41, %v13728_v35  ;;  %v5146_v7 = vpop.xlane.xlu1 %5145  ;;  %v5930_v15 = vsel %vm5372_vm12, %v5929_v10, %v5925_v47 }
 0x557   :  { %v5934_v63 = vrot.slane %v5146_v7, %v18465_v21 }
 0x558   :  { %v5861_v51 = vsel %vm18530_vm15, %v5860_v5, %v5856_v23 }
 0x559   :  { %v5952_v43 = vsel %vm5951_vm9, %v5861_v51, %v5950_v24  ;;  %v5148_v36 = vpop.xlane.xlu0 %5147  ;;  %v5935_v21 = vsel %vm5379_vm13, %v5934_v63, %v5930_v15 }
 0x55a   :  { %v5939_v45 = vrot.slane %v5148_v36, %v13728_v35 }
 0x55c   :  { %v5940_v6 = vsel %vm18531_vm14, %v5939_v45, %v5935_v21  ;;  %5961 = sbr.rel (%p6178_p2) target bundleno = 1441 (0x5a1), region = 17 }
 0x55d   :  { %v5954_v1 = vsel %vm5953_vm3, %v5940_v6, %v5952_v43 }
 0x55e   :  { %v5956_v2 = vadd.f32 %v5954_v1, %v4892_v53 }
 0x560   :  { %5957 = vst [vmem:[%s4891_s13] sm:$0xff] %v5956_v2 }
 0x561   :  { %v18532_v22 = vld [vmem:[#allocation220_spill] sm:$0xff]  ;;  %v18533_v16 = vld [vmem:[#allocation203_spill] sm:$0xff]  ;;  %v18536_v46 = vld [vmem:[#allocation345_spill] sm:$0xff] }
 0x562   :  { %v5967_v35 = vadd.f32 %v18533_v16, %v18532_v22  ;;  %v18534_v37 = vld [vmem:[#allocation147_spill] sm:$0xff]  ;;  %v18537_v14 = vld [vmem:[#allocation170_spill] sm:$0xff]  ;;  %v18539_v34 = vld [vmem:[#allocation168_spill] sm:$0xff] }
 0x563   :  { %v18535_v55 = vld [vmem:[#allocation31_spill] sm:$0xff]  ;;  %v6009_v52 = vadd.f32 %v18537_v14, %v18536_v46  ;;  %v18540_v18 = vld [vmem:[#allocation354_spill] sm:$0xff]  ;;  %v18545_v57 = vld [vmem:[#allocation124_spill] sm:$0xff] }
 0x564   :  { %v5988_v33 = vadd.f32 %v18535_v55, %v18534_v37  ;;  %v18538_v28 = vld [vmem:[#allocation171_spill] sm:$0xff]  ;;  %v18541_v32 = vld [vmem:[#allocation14_spill] sm:$0xff]  ;;  %v18546_v49 = vld [vmem:[#allocation300_spill] sm:$0xff] }
 0x565   :  { %v6030_v12 = vadd.f32 %v18539_v34, %v18538_v28  ;;  %v6051_v4 = vadd.f32 %v18541_v32, %v18540_v18  ;;  %v18542_v39 = vld [vmem:[#allocation87_spill] sm:$0xff]  ;;  %v18544_v56 = vld [vmem:[#allocation18_spill] sm:$0xff]  ;;  %v18547_v62 = vld [vmem:[#allocation249_spill] sm:$0xff] }
 0x566   :  { %v18543_v11 = vld [vmem:[#allocation35_spill] sm:$0xff]  ;;  %v6093_v38 = vadd.f32 %v18545_v57, %v18544_v56  ;;  %v6114_v13 = vadd.f32 %v18547_v62, %v18546_v49  ;;  %v18548_v54 = vld [vmem:[#allocation228_spill] sm:$0xff]  ;;  %v18549_v24 = vld [vmem:[#allocation70_spill] sm:$0xff] }
 0x567   :  { %v6072_v27 = vadd.f32 %v18543_v11, %v18542_v39  ;;  %v5968_v26 = vadd.f32 %v5967_v35, %v18548_v54  ;;  %v5989_v29 = vadd.f32 %v5988_v33, %v18549_v24  ;;  %v18550_v31 = vld [vmem:[#allocation276_spill] sm:$0xff]  ;;  %v18551_v9 = vld [vmem:[#allocation263_spill] sm:$0xff]  ;;  %v18552_v44 = vld [vmem:[#allocation309_spill] sm:$0xff] }
 0x568   :  { %v6010_v0 = vadd.f32 %v6009_v52, %v18550_v31  ;;  %v6031_v60 = vadd.f32 %v6030_v12, %v18551_v9  ;;  %v6052_v3 = vadd.f32 %v6051_v4, %v18552_v44  ;;  %v18553_v48 = vld [vmem:[#allocation114_spill] sm:$0xff]  ;;  %v18554_v40 = vld [vmem:[#allocation303_spill] sm:$0xff]  ;;  %v18556_v61 = vld [vmem:[#allocation61_spill] sm:$0xff] }
 0x569   :  { %v6073_v17 = vadd.f32 %v6072_v27, %v18553_v48  ;;  %v6094_v42 = vadd.f32 %v6093_v38, %v18554_v40  ;;  %v18555_v41 = vld [vmem:[#allocation106_spill] sm:$0xff]  ;;  %v5969_v10 = vadd.f32 %v5968_v26, %v18556_v61  ;;  %v18557_v5 = vld [vmem:[#allocation163_spill] sm:$0xff]  ;;  %v18562_v15 = vld [vmem:[#allocation101_spill] sm:$0xff] }
 0x56a   :  { %v6115_v59 = vadd.f32 %v6114_v13, %v18555_v41  ;;  %v5990_v7 = vadd.f32 %v5989_v29, %v18557_v5  ;;  %v18558_v20 = vld [vmem:[#allocation174_spill] sm:$0xff]  ;;  %v18559_v63 = vld [vmem:[#allocation299_spill] sm:$0xff]  ;;  %v18563_v21 = vld [vmem:[#allocation204_spill] sm:$0xff] }
 0x56b   :  { %v6011_v23 = vadd.f32 %v6010_v0, %v18558_v20  ;;  %v6032_v25 = vadd.f32 %v6031_v60, %v18559_v63  ;;  %v18560_v51 = vld [vmem:[#allocation39_spill] sm:$0xff]  ;;  %v6095_v45 = vadd.f32 %v6094_v42, %v18562_v15  ;;  %v18564_v6 = vld [vmem:[#allocation374_spill] sm:$0xff]  ;;  %v18568_v33 = vld [vmem:[#allocation320_spill] sm:$0xff] }
 0x56c   :  { %v6053_v47 = vadd.f32 %v6052_v3, %v18560_v51  ;;  %v18561_v43 = vld [vmem:[#allocation331_spill] sm:$0xff]  ;;  %v6116_v53 = vadd.f32 %v6115_v59, %v18563_v21  ;;  %v5970_v1 = vadd.f32 %v5969_v10, %v18564_v6  ;;  %v18566_v16 = vld [vmem:[#allocation294_spill] sm:$0xff]  ;;  %v18573_v39 = vld [vmem:[#allocation68_spill] sm:$0xff] }
 0x56d   :  { %v6074_v36 = vadd.f32 %v6073_v17, %v18561_v43  ;;  %v18565_v2 = vld [vmem:[#allocation67_spill] sm:$0xff]  ;;  %v6012_v35 = vadd.f32 %v6011_v23, %v18566_v16  ;;  %v18567_v37 = vld [vmem:[#allocation130_spill] sm:$0xff]  ;;  %v18574_v27 = vld [vmem:[#allocation352_spill] sm:$0xff] }
 0x56e   :  { %v5991_v22 = vadd.f32 %v5990_v7, %v18565_v2  ;;  %v6033_v55 = vadd.f32 %v6032_v25, %v18567_v37  ;;  %v6054_v46 = vadd.f32 %v6053_v47, %v18568_v33  ;;  %v18569_v14 = vld [vmem:[#allocation342_spill] sm:$0xff]  ;;  %v18571_v12 = vld [vmem:[#allocation315_spill] sm:$0xff]  ;;  %v18580_v0 = vld [vmem:[#allocation153_spill] sm:$0xff] }
 0x56f   :  { %v6075_v52 = vadd.f32 %v6074_v36, %v18569_v14  ;;  %v18570_v28 = vld [vmem:[#allocation26_spill] sm:$0xff]  ;;  %v6117_v18 = vadd.f32 %v6116_v53, %v18571_v12  ;;  %v6013_v56 = vadd.f32 %v6012_v35, %v18574_v27  ;;  %v18576_v49 = vld [vmem:[#allocation319_spill] sm:$0xff]  ;;  %v18581_v60 = vld [vmem:[#allocation385_spill] sm:$0xff] }
 0x570   :  { %v6096_v34 = vadd.f32 %v6095_v45, %v18570_v28  ;;  %v18572_v32 = vld [vmem:[#allocation42_spill] sm:$0xff]  ;;  %v5992_v11 = vadd.f32 %v5991_v22, %v18573_v39  ;;  %v6055_v62 = vadd.f32 %v6054_v46, %v18576_v49  ;;  %v18583_v17 = vld [vmem:[#allocation243_spill] sm:$0xff]  ;;  %v18584_v42 = vld [vmem:[#allocation100_spill] sm:$0xff] }
 0x571   :  { %v5971_v4 = vadd.f32 %v5970_v1, %v18572_v32  ;;  %v18575_v57 = vld [vmem:[#allocation250_spill] sm:$0xff]  ;;  %v18585_v59 = vld [vmem:[#allocation21_spill] sm:$0xff]  ;;  %v18587_v7 = vld [vmem:[#allocation207_spill] sm:$0xff] }
 0x572   :  { %v6034_v38 = vadd.f32 %v6033_v55, %v18575_v57  ;;  %v18577_v13 = vld [vmem:[#allocation326_spill] sm:$0xff]  ;;  %v5993_v44 = vadd.f32 %v5992_v11, %v18581_v60  ;;  %v6056_v41 = vadd.f32 %v6055_v62, %v18584_v42  ;;  %v18588_v23 = vld [vmem:[#allocation51_spill] sm:$0xff]  ;;  %v18589_v25 = vld [vmem:[#allocation384_spill] sm:$0xff] }
 0x573   :  { %v6076_v54 = vadd.f32 %v6075_v52, %v18577_v13  ;;  %v18578_v26 = vld [vmem:[#allocation314_spill] sm:$0xff]  ;;  %v5972_v9 = vadd.f32 %v5971_v4, %v18580_v0  ;;  %v18590_v47 = vld [vmem:[#allocation29_spill] sm:$0xff]  ;;  %v18591_v36 = vld [vmem:[#allocation368_spill] sm:$0xff] }
 0x574   :  { %v6097_v24 = vadd.f32 %v6096_v34, %v18578_v26  ;;  %v18579_v29 = vld [vmem:[#allocation310_spill] sm:$0xff]  ;;  %v6035_v40 = vadd.f32 %v6034_v38, %v18583_v17  ;;  %v5994_v51 = vadd.f32 %v5993_v44, %v18589_v25  ;;  %v18592_v45 = vld [vmem:[#allocation223_spill] sm:$0xff]  ;;  %v18593_v53 = vld [vmem:[#allocation112_spill] sm:$0xff] }
 0x575   :  { %v6118_v31 = vadd.f32 %v6117_v18, %v18579_v29  ;;  %v18582_v3 = vld [vmem:[#allocation22_spill] sm:$0xff]  ;;  %v6077_v61 = vadd.f32 %v6076_v54, %v18585_v59  ;;  %v5973_v63 = vadd.f32 %v5972_v9, %v18588_v23  ;;  %v6057_v21 = vadd.f32 %v6056_v41, %v18592_v45  ;;  %v18594_v1 = vld [vmem:[#allocation341_spill] sm:$0xff]  ;;  %v18596_v37 = vld [vmem:[#allocation7_spill] sm:$0xff] }
 0x576   :  { %v6014_v48 = vadd.f32 %v6013_v56, %v18582_v3  ;;  %v18586_v10 = vld [vmem:[#allocation306_spill] sm:$0xff]  ;;  %v6036_v15 = vadd.f32 %v6035_v40, %v18591_v36  ;;  %v5995_v55 = vadd.f32 %v5994_v51, %v18596_v37  ;;  %v18597_v33 = vld [vmem:[#allocation343_spill] sm:$0xff]  ;;  %v18599_v28 = vld [vmem:[#allocation332_spill] sm:$0xff] }
 0x577   :  { %v6098_v5 = vadd.f32 %v6097_v24, %v18586_v10  ;;  %v6119_v20 = vadd.f32 %v6118_v31, %v18587_v7  ;;  %v6078_v6 = vadd.f32 %v6077_v61, %v18593_v53  ;;  %v18595_v16 = vld [vmem:[#allocation202_spill] sm:$0xff]  ;;  %v18598_v14 = vld [vmem:[#allocation371_spill] sm:$0xff]  ;;  %v6058_v34 = vadd.f32 %v6057_v21, %v18599_v28  ;;  %v18601_v39 = vld [vmem:[#allocation365_spill] sm:$0xff] }
 0x578   :  { %v6015_v43 = vadd.f32 %v6014_v48, %v18590_v47  ;;  %v5974_v35 = vadd.f32 %v5973_v63, %v18595_v16  ;;  %v6037_v52 = vadd.f32 %v6036_v15, %v18598_v14  ;;  %v18600_v12 = vld [vmem:[#allocation222_spill] sm:$0xff]  ;;  %v18602_v27 = vld [vmem:[#allocation351_spill] sm:$0xff]  ;;  %v18603_v56 = vld [vmem:[#allocation9_spill] sm:$0xff] }
 0x579   :  { %v6099_v2 = vadd.f32 %v6098_v5, %v18594_v1  ;;  %v6120_v22 = vadd.f32 %v6119_v20, %v14107_v30  ;;  %v6079_v18 = vadd.f32 %v6078_v6, %v18600_v12  ;;  %v5996_v30 = vadd.f32 %v5995_v55, %v18602_v27  ;;  %v18604_v38 = vld [vmem:[#allocation30_spill] sm:$0xff]  ;;  %v18605_v62 = vld [vmem:[#allocation281_spill] sm:$0xff]  ;;  %v18606_v54 = vld [vmem:[#allocation27_spill] sm:$0xff] }
 0x57a   :  { %v6016_v46 = vadd.f32 %v6015_v43, %v18597_v33  ;;  %v5975_v11 = vadd.f32 %v5974_v35, %v18601_v39  ;;  %v6038_v49 = vadd.f32 %v6037_v52, %v18604_v38  ;;  %v6059_v13 = vadd.f32 %v6058_v34, %v18605_v62  ;;  %v18607_v31 = vld [vmem:[#allocation88_spill] sm:$0xff]  ;;  %v18609_v9 = vld [vmem:[#allocation209_spill] sm:$0xff]  ;;  %v18610_v44 = vld [vmem:[#allocation247_spill] sm:$0xff] }
 0x57b   :  { %v6100_v32 = vadd.f32 %v6099_v2, %v14102_v8  ;;  %v6121_v4 = vadd.f32 %v6120_v22, %v14167_v58  ;;  %v6080_v26 = vadd.f32 %v6079_v18, %v18606_v54  ;;  %v18608_v0 = vld [vmem:[#allocation388_spill] sm:$0xff]  ;;  %v18611_v48 = vld [vmem:[#allocation185_spill] sm:$0xff]  ;;  %v18613_v41 = vld [vmem:[#allocation211_spill] sm:$0xff] }
 0x57c   :  { %v6017_v57 = vadd.f32 %v6016_v46, %v18603_v56  ;;  %v5976_v8 = vadd.f32 %v5975_v11, %v18607_v31  ;;  %v5997_v58 = vadd.f32 %v5996_v30, %v18608_v0  ;;  %v6039_v3 = vadd.f32 %v6038_v49, %v18610_v44  ;;  %v18612_v40 = vld [vmem:[#allocation93_spill] sm:$0xff]  ;;  %v18614_v61 = vld [vmem:[#allocation182_spill] sm:$0xff]  ;;  %v18618_v63 = vld [vmem:[#allocation144_spill] sm:$0xff] }
 0x57d   :  { %v6101_v24 = vadd.f32 %v6100_v32, %v14136_v50  ;;  %v6122_v29 = vadd.f32 %v6121_v4, %v14193_v19  ;;  %v6060_v17 = vadd.f32 %v6059_v13, %v18611_v48  ;;  %v6081_v42 = vadd.f32 %v6080_v26, %v18612_v40  ;;  %v18615_v5 = vld [vmem:[#allocation346_spill] sm:$0xff]  ;;  %v18617_v20 = vld [vmem:[#allocation357_spill] sm:$0xff]  ;;  %v18619_v51 = vld [vmem:[#allocation188_spill] sm:$0xff] }
 0x57e   :  { %v6018_v60 = vadd.f32 %v6017_v57, %v18609_v9  ;;  %v5977_v50 = vadd.f32 %v5976_v8, %v18615_v5  ;;  %v18616_v7 = vld [vmem:[#allocation154_spill] sm:$0xff]  ;;  %v6040_v25 = vadd.f32 %v6039_v3, %v18618_v63  ;;  %v18620_v43 = vld [vmem:[#allocation8_spill] sm:$0xff]  ;;  %v18621_v15 = vld [vmem:[#allocation25_spill] sm:$0xff] }
 0x57f   :  { %v6102_v59 = vadd.f32 %v6101_v24, %v18613_v41  ;;  %v6123_v10 = vadd.f32 %v6122_v29, %v18614_v61  ;;  %v5998_v19 = vadd.f32 %v5997_v58, %v18616_v7  ;;  %v6061_v47 = vadd.f32 %v6060_v17, %v18619_v51  ;;  %v18622_v21 = vld [vmem:[#allocation256_spill] sm:$0xff]  ;;  %v18623_v6 = vld [vmem:[#allocation166_spill] sm:$0xff]  ;;  %v18624_v2 = vld [vmem:[#allocation267_spill] sm:$0xff] }
 0x580   :  { %v6019_v23 = vadd.f32 %v6018_v60, %v18617_v20  ;;  %v6082_v36 = vadd.f32 %v6081_v42, %v18620_v43  ;;  %v5978_v1 = vadd.f32 %v5977_v50, %v18623_v6  ;;  %v18625_v16 = vld [vmem:[#allocation377_spill] sm:$0xff]  ;;  %v18626_v37 = vld [vmem:[#allocation327_spill] sm:$0xff]  ;;  %v18628_v14 = vld [vmem:[#allocation62_spill] sm:$0xff] }
 0x581   :  { %v6103_v45 = vadd.f32 %v6102_v59, %v18621_v15  ;;  %v6124_v53 = vadd.f32 %v6123_v10, %v18622_v21  ;;  %v5999_v22 = vadd.f32 %v5998_v19, %v18624_v2  ;;  %v6041_v55 = vadd.f32 %v6040_v25, %v18626_v37  ;;  %v18627_v33 = vld [vmem:[#allocation175_spill] sm:$0xff]  ;;  %v18629_v28 = vld [vmem:[#allocation96_spill] sm:$0xff]  ;;  %v18631_v32 = vld [vmem:[#allocation113_spill] sm:$0xff] }
 0x582   :  { %v6020_v35 = vadd.f32 %v6019_v23, %v18625_v16  ;;  %v6062_v46 = vadd.f32 %v6061_v47, %v18627_v33  ;;  %v6083_v52 = vadd.f32 %v6082_v36, %v18628_v14  ;;  %v18630_v12 = vld [vmem:[#allocation340_spill] sm:$0xff]  ;;  %v5979_v4 = vadd.f32 %v5978_v1, %v18631_v32  ;;  %v18633_v27 = vld [vmem:[#allocation273_spill] sm:$0xff]  ;;  %v18634_v56 = vld [vmem:[#allocation266_spill] sm:$0xff] }
 0x583   :  { %v6104_v34 = vadd.f32 %v6103_v45, %v18629_v28  ;;  %v6125_v18 = vadd.f32 %v6124_v53, %v18630_v12  ;;  %v18632_v39 = vld [vmem:[#allocation356_spill] sm:$0xff]  ;;  %v6042_v57 = vadd.f32 %v6041_v55, %v18634_v56  ;;  %v18635_v38 = vld [vmem:[#allocation323_spill] sm:$0xff]  ;;  %v18637_v54 = vld [vmem:[#allocation334_spill] sm:$0xff] }
 0x584   :  { %v6000_v11 = vadd.f32 %v5999_v22, %v18632_v39  ;;  %v6021_v30 = vadd.f32 %v6020_v35, %v18633_v27  ;;  %v6063_v49 = vadd.f32 %v6062_v46, %v18635_v38  ;;  %v18636_v62 = vld [vmem:[#allocation215_spill] sm:$0xff]  ;;  %v18638_v24 = vld [vmem:[#allocation376_spill] sm:$0xff]  ;;  %v18639_v31 = vld [vmem:[#allocation145_spill] sm:$0xff] }
 0x585   :  { %v6084_v13 = vadd.f32 %v6083_v52, %v18636_v62  ;;  %v6105_v26 = vadd.f32 %v6104_v34, %v18637_v54  ;;  %v6126_v29 = vadd.f32 %v6125_v18, %v18638_v24  ;;  %v5980_v8 = vadd.f32 %v5979_v4, %v18639_v31  ;;  %v18640_v0 = vld [vmem:[#allocation115_spill] sm:$0xff]  ;;  %v18643_v48 = vld [vmem:[#allocation196_spill] sm:$0xff]  ;;  %v18645_v41 = vld [vmem:[#allocation277_spill] sm:$0xff] }
 0x586   :  { %v6001_v58 = vadd.f32 %v6000_v11, %v18640_v0  ;;  %v18641_v9 = vld [vmem:[#allocation271_spill] sm:$0xff]  ;;  %v6064_v17 = vadd.f32 %v6063_v49, %v18643_v48  ;;  %v18644_v40 = vld [vmem:[#allocation192_spill] sm:$0xff]  ;;  %v18646_v61 = vld [vmem:[#allocation366_spill] sm:$0xff] }
 0x587   :  { %v6022_v60 = vadd.f32 %v6021_v30, %v18641_v9  ;;  %v18642_v44 = vld [vmem:[#allocation251_spill] sm:$0xff]  ;;  %v6085_v42 = vadd.f32 %v6084_v13, %v18644_v40  ;;  %v6106_v59 = vadd.f32 %v6105_v26, %v18645_v41  ;;  %v6127_v10 = vadd.f32 %v6126_v29, %v18646_v61  ;;  %v18647_v5 = vld [vmem:[#allocation136_spill] sm:$0xff]  ;;  %v18648_v7 = vld [vmem:[#allocation110_spill] sm:$0xff] }
 0x588   :  { %v6043_v3 = vadd.f32 %v6042_v57, %v18642_v44  ;;  %v5981_v50 = vadd.f32 %v5980_v8, %v18647_v5  ;;  %v6002_v19 = vadd.f32 %v6001_v58, %v18648_v7  ;;  %v18649_v20 = vld [vmem:[#allocation102_spill] sm:$0xff]  ;;  %v18650_v63 = vld [vmem:[#allocation335_spill] sm:$0xff]  ;;  %v18653_v15 = vld [vmem:[#allocation81_spill] sm:$0xff] }
 0x589   :  { %v6023_v23 = vadd.f32 %v6022_v60, %v18649_v20  ;;  %v18651_v51 = vld [vmem:[#allocation47_spill] sm:$0xff]  ;;  %v18652_v43 = vld [vmem:[#allocation278_spill] sm:$0xff]  ;;  %v6107_v45 = vadd.f32 %v6106_v59, %v18653_v15  ;;  %v5966_v20 = vld [vmem:[%s5965_s22] sm:$0xff] }
 0x58a   :  { %v6044_v25 = vadd.f32 %v6043_v3, %v18650_v63  ;;  %v6065_v47 = vadd.f32 %v6064_v17, %v18651_v51  ;;  %v6086_v36 = vadd.f32 %v6085_v42, %v18652_v43  ;;  %v18654_v21 = vld [vmem:[#allocation359_spill] sm:$0xff]  ;;  %v5982_v6 = vrot.slane %v5981_v50, 4 }
 0x58b   :  { %v6128_v53 = vadd.f32 %v6127_v10, %v18654_v21  ;;  %v6003_v1 = vrot.slane %v6002_v19, 4  ;;  %v6024_v2 = vrot.slane %v6023_v23, 4  ;;  %v6108_v37 = vrot.slane %v6107_v45, 4 }
 0x58c   :  { %v6045_v22 = vrot.slane %v6044_v25, 4  ;;  %v6066_v16 = vrot.slane %v6065_v47, 4  ;;  %v6087_v35 = vrot.slane %v6086_v36, 4  ;;  %v5983_v33 = vadd.f32 %v5982_v6, %v5981_v50 }
 0x58d   :  { %v6129_v55 = vrot.slane %v6128_v53, 4  ;;  %v6004_v46 = vadd.f32 %v6003_v1, %v6002_v19  ;;  %v6025_v14 = vadd.f32 %v6024_v2, %v6023_v23  ;;  %v6109_v12 = vadd.f32 %v6108_v37, %v6107_v45 }
 0x58e   :  { %v6046_v52 = vadd.f32 %v6045_v22, %v6044_v25  ;;  %v6067_v28 = vadd.f32 %v6066_v16, %v6065_v47  ;;  %v6088_v34 = vadd.f32 %v6087_v35, %v6086_v36  ;;  %v5984_v32 = vrot.slane %v5983_v33, 2 }
 0x58f   :  { %v6130_v18 = vadd.f32 %v6129_v55, %v6128_v53  ;;  %v6005_v4 = vrot.slane %v6004_v46, 2  ;;  %v6026_v39 = vrot.slane %v6025_v14, 2  ;;  %v6110_v56 = vrot.slane %v6109_v12, 2 }
 0x590   :  { %v6047_v11 = vrot.slane %v6046_v52, 2  ;;  %v6068_v27 = vrot.slane %v6067_v28, 2  ;;  %v6089_v30 = vrot.slane %v6088_v34, 2  ;;  %v5985_v38 = vadd.f32 %v5984_v32, %v5983_v33 }
 0x591   :  { %v6131_v57 = vrot.slane %v6130_v18, 2  ;;  %v6006_v49 = vadd.f32 %v6005_v4, %v6004_v46  ;;  %v6027_v62 = vadd.f32 %v6026_v39, %v6025_v14  ;;  %v6111_v24 = vadd.f32 %v6110_v56, %v6109_v12 }
 0x592   :  { %v6048_v13 = vadd.f32 %v6047_v11, %v6046_v52  ;;  %v6069_v54 = vadd.f32 %v6068_v27, %v6067_v28  ;;  %v6090_v26 = vadd.f32 %v6089_v30, %v6088_v34  ;;  %v5986_v31 = vrot.slane %v5985_v38, 1 }
 0x593   :  { %v6132_v29 = vadd.f32 %v6131_v57, %v6130_v18  ;;  %v6007_v8 = vrot.slane %v6006_v49, 1  ;;  %v6028_v0 = vrot.slane %v6027_v62, 1  ;;  %v6112_v44 = vrot.slane %v6111_v24, 1 }
 0x594   :  { %v6049_v58 = vrot.slane %v6048_v13, 1  ;;  %v6070_v9 = vrot.slane %v6069_v54, 1  ;;  %v6091_v60 = vrot.slane %v6090_v26, 1  ;;  %v5987_v48 = vadd.f32 %v5986_v31, %v5985_v38 }
 0x595   :  { %v6133_v3 = vrot.slane %v6132_v29, 1  ;;  %v6008_v17 = vadd.f32 %v6007_v8, %v6006_v49  ;;  %v6029_v40 = vadd.f32 %v6028_v0, %v6027_v62  ;;  %v6113_v10 = vadd.f32 %v6112_v44, %v6111_v24 }
 0x596   :  { %v6050_v42 = vadd.f32 %v6049_v58, %v6048_v13  ;;  %v6071_v41 = vadd.f32 %v6070_v9, %v6069_v54  ;;  %v6092_v59 = vadd.f32 %v6091_v60, %v6090_v26 }
 0x597   :  { %v6143_v61 = vsel %vm5941_vm0, %v6008_v17, %v5987_v48  ;;  %v6134_v50 = vadd.f32 %v6133_v3, %v6132_v29 }
 0x598   :  { %v6144_v5 = vsel %vm5943_vm11, %v6029_v40, %v6143_v61 }
 0x599   :  { %v6145_v7 = vsel %vm5945_vm7, %v6050_v42, %v6144_v5 }
 0x59a   :  { %v6146_v19 = vsel %vm5947_vm8, %v6071_v41, %v6145_v7 }
 0x59b   :  { %v6147_v23 = vsel %vm5949_vm10, %v6092_v59, %v6146_v19 }
 0x59c   :  { %v6148_v63 = vsel %vm5951_vm9, %v6113_v10, %v6147_v23 }
 0x59d   :  { %v6149_v25 = vsel %vm5953_vm3, %v6134_v50, %v6148_v63 }
 0x59e   :  { %v6151_v51 = vadd.f32 %v6149_v25, %v5966_v20 }
 0x5a0   :  { %6152 = vst [vmem:[%s5965_s22] sm:$0xff] %v6151_v51 }
 0x5a1 PF:  {}

</bundles_post_ra>
